<compile_context>
chip_gen: v7x
topology: tpu7x:2x2x1
jax: 0.10.0
libtpu: 0.0.40
codegen_flags: <defaults>
</compile_context>

<pallas_src>
import functools

import jax
import jax.numpy as jnp
from jax.experimental import pallas as pl
from jax.experimental.pallas import tpu as pltpu


def _h_swish(t):
    return t * (jnp.clip(t + 3.0, 0.0, 6.0) * (1.0 / 6.0))


def _lff_kernel(x_ref, w1_ref, b1_ref, wd_ref, b2_ref, ii_ref, jj_ref,
                sew1_ref, seb1_ref, sew2_ref, seb2_ref, w3_ref, b3_ref,
                o_ref, zp_ref, *, H, W, pad, use_se):
    """One batch element: x (HW, Cin) -> out (HW, Cout)."""
    HW = H * W

    x = x_ref[...].astype(jnp.float32)                          # (HW, Cin)

    # ---- 1x1 expand conv (+ folded BN1) + h_swish : MXU matmul ----
    y = jnp.dot(x, w1_ref[...], preferred_element_type=jnp.float32) + b1_ref[...]
    y = _h_swish(y)                                             # (HW, Hd)

    # ---- 3x3 depthwise conv (stride 1, pad 1) + folded BN2 + h_swish ----
    # Write y once into a zero-padded scratch at a sublane-aligned offset,
    # then read the 9 taps as statically shifted slices, masking out-of-image
    # positions with the precomputed (row, col) index maps.
    zp_ref[...] = jnp.zeros_like(zp_ref)
    zp_ref[pad:pad + HW, :] = y

    ii = ii_ref[...]                                            # (HW, 1) rows
    jj = jj_ref[...]                                            # (HW, 1) cols
    acc = jnp.zeros_like(y)
    for di in (-1, 0, 1):
        for dj in (-1, 0, 1):
            k = (di + 1) * 3 + (dj + 1)                         # tap index
            s = di * W + dj                                     # flat shift
            shifted = zp_ref[pad + s:pad + s + HW, :]           # (HW, Hd)
            valid = ((ii + di >= 0) & (ii + di < H) &
                     (jj + dj >= 0) & (jj + dj < W))
            tap = wd_ref[k:k + 1, :]                            # (1, Hd)
            acc = acc + jnp.where(valid, shifted, 0.0) * tap
    z = _h_swish(acc + b2_ref[...])                             # (HW, Hd)

    # ---- SE: avg-pool -> fc1 + ReLU -> fc2 + h_sigmoid -> channel scale ----
    if use_se:
        pooled = jnp.sum(z, axis=0, keepdims=True) * (1.0 / HW)         # (1, Hd)
        a = jnp.dot(pooled, sew1_ref[...], preferred_element_type=jnp.float32)
        a = jnp.maximum(a + seb1_ref[...], 0.0)                         # (1, Cr)
        g = jnp.dot(a, sew2_ref[...], preferred_element_type=jnp.float32)
        g = jnp.clip(g + seb2_ref[...] + 3.0, 0.0, 6.0) * (1.0 / 6.0)   # (1, Hd)
        z = z * g

    # ---- 1x1 reduce conv (+ folded BN3) + residual ----
    out = jnp.dot(z, w3_ref[...], preferred_element_type=jnp.float32) + b3_ref[...]
    out = out + x
    o_ref[...] = out.astype(o_ref.dtype)


def _fold_bn(w, bn, eps):
    gamma, beta, mean, var = bn
    s = gamma / jnp.sqrt(var + eps)
    return w * s[:, None], beta - mean * s


def locality_feed_forward(x_nchw, p, *, use_se=True, eps=1e-5):
    """x_nchw: (B, C, H, W); p: parameter dict from make_params."""
    B, Cin, H, W = x_nchw.shape
    HW = H * W
    Hd = p['w1'].shape[0]
    Cout = p['w3'].shape[0]
    Cr = p['se_w1'].shape[0]
    assert Cin == Cout, "LocalityFeedForward residual needs in_dim == out_dim"
    assert HW % 8 == 0, "flattened spatial must be a multiple of 8 (sublane)"

    # Fold eval-mode BatchNorms into the conv weights / biases.
    w1s, b1 = _fold_bn(p['w1'], p['bn1'], eps)                   # (Hd,Cin),(Hd,)
    wds, b2 = _fold_bn(p['wd'].reshape(Hd, 9), p['bn2'], eps)    # (Hd,9),(Hd,)
    w3s, b3 = _fold_bn(p['w3'], p['bn3'], eps)                   # (Cout,Hd),(Cout,)

    f32 = jnp.float32
    w1_k = w1s.T.astype(f32)                    # (Cin, Hd)
    wd_k = wds.T.astype(f32)                    # (9, Hd), row k = ki*3 + kj
    w3_k = w3s.T.astype(f32)                    # (Hd, Cout)
    b1_k = b1.reshape(1, Hd).astype(f32)
    b2_k = b2.reshape(1, Hd).astype(f32)
    b3_k = b3.reshape(1, Cout).astype(f32)
    sew1_k = p['se_w1'].T.astype(f32)           # (Hd, Cr)
    seb1_k = p['se_b1'].reshape(1, Cr).astype(f32)
    sew2_k = p['se_w2'].T.astype(f32)           # (Cr, Hd)
    seb2_k = p['se_b2'].reshape(1, Hd).astype(f32)

    # NCHW -> (B, H*W, C): channels on the lane axis (MXU-friendly layout).
    x_flat = jnp.transpose(x_nchw, (0, 2, 3, 1)).reshape(B, HW, Cin)

    # Precomputed (row, col) index maps for the depthwise boundary masks.
    ii = jnp.repeat(jnp.arange(H, dtype=jnp.int32), W).reshape(HW, 1)
    jj = jnp.tile(jnp.arange(W, dtype=jnp.int32), H).reshape(HW, 1)

    pad = ((W + 1 + 7) // 8) * 8                # sublane-aligned halo >= W+1

    # Explicit VMEM budget: double-buffered io blocks + weights + scratch +
    # live intermediates, with headroom; clamped to a v7x-safe 64 MiB.
    blk = 4 * HW * (Cin + Cout) * 2
    wts = 4 * (Cin * Hd + 9 * Hd + Hd * Cr + Cr * Hd + Hd * Cout
               + 3 * Hd + Cr + Cout + 2 * HW)
    scr = 4 * (2 * pad + HW) * Hd
    live = 4 * 6 * HW * Hd
    vmem_limit = int(min(max(int(1.5 * (blk + wts + scr + live)),
                             32 * 1024 * 1024), 64 * 1024 * 1024))

    kernel = functools.partial(_lff_kernel, H=H, W=W, pad=pad, use_se=use_se)
    const = lambda b: (0, 0)

    out_flat = pl.pallas_call(
        kernel,
        out_shape=jax.ShapeDtypeStruct((B, HW, Cout), x_nchw.dtype),
        grid_spec=pltpu.PrefetchScalarGridSpec(
            num_scalar_prefetch=0,
            grid=(B,),
            in_specs=[
                pl.BlockSpec((None, HW, Cin), lambda b: (b, 0, 0)),   # x
                pl.BlockSpec((Cin, Hd), const),                       # w1 (folded)
                pl.BlockSpec((1, Hd), const),                         # b1
                pl.BlockSpec((9, Hd), const),                         # dw taps
                pl.BlockSpec((1, Hd), const),                         # b2
                pl.BlockSpec((HW, 1), const),                         # row idx
                pl.BlockSpec((HW, 1), const),                         # col idx
                pl.BlockSpec((Hd, Cr), const),                        # se fc1 w
                pl.BlockSpec((1, Cr), const),                         # se fc1 b
                pl.BlockSpec((Cr, Hd), const),                        # se fc2 w
                pl.BlockSpec((1, Hd), const),                         # se fc2 b
                pl.BlockSpec((Hd, Cout), const),                      # w3 (folded)
                pl.BlockSpec((1, Cout), const),                       # b3
            ],
            out_specs=pl.BlockSpec((None, HW, Cout), lambda b: (b, 0, 0)),
            scratch_shapes=[pltpu.VMEM((2 * pad + HW, Hd), jnp.float32)],
        ),
        compiler_params=pltpu.CompilerParams(
            dimension_semantics=("parallel",),
            vmem_limit_bytes=vmem_limit,
        ),
    )(x_flat, w1_k, b1_k, wd_k, b2_k, ii, jj,
      sew1_k, seb1_k, sew2_k, seb2_k, w3_k, b3_k)

    return jnp.transpose(out_flat.reshape(B, H, W, Cout), (0, 3, 1, 2))


def locality_feed_forward_ref(x, p, *, use_se=True, eps=1e-5):
    """Pure-JAX (XLA) reference matching the PyTorch eval-mode forward."""
    hp = jax.lax.Precision.HIGHEST

    def bn(t, bnp):
        g, b, m, v = bnp
        s = g / jnp.sqrt(v + eps)
        return ((t - m[None, :, None, None]) * s[None, :, None, None]
                + b[None, :, None, None])

    def hswish(t):
        return t * jnp.clip(t + 3.0, 0.0, 6.0) / 6.0

    res = x
    Hd = p['w1'].shape[0]
    y = jnp.einsum('bchw,oc->bohw', x, p['w1'], precision=hp)
    y = hswish(bn(y, p['bn1']))
    y = jax.lax.conv_general_dilated(
        y, p['wd'], window_strides=(1, 1), padding='SAME',
        dimension_numbers=('NCHW', 'OIHW', 'NCHW'),
        feature_group_count=Hd, precision=hp)
    y = hswish(bn(y, p['bn2']))
    if use_se:
        s = jnp.mean(y, axis=(2, 3))
        s = jnp.maximum(jnp.dot(s, p['se_w1'].T, precision=hp) + p['se_b1'], 0.0)
        s = jnp.dot(s, p['se_w2'].T, precision=hp) + p['se_b2']
        s = jnp.clip(s + 3.0, 0.0, 6.0) / 6.0
        y = y * s[:, :, None, None]
    y = jnp.einsum('bchw,oc->bohw', y, p['w3'], precision=hp)
    y = bn(y, p['bn3'])
    return y + res


def make_params(key, in_dim, out_dim, expand_ratio=4.0, reduction=4):
    """Deterministic synthetic parameters mirroring the PyTorch module."""
    hd = int(in_dim * expand_ratio)
    cr = hd // reduction
    ks = jax.random.split(key, 10)

    def unif(k, shape, bound):
        return jax.random.uniform(k, shape, jnp.float32, -bound, bound)

    def bn_params(k, n):
        kg, kb, km, kv = jax.random.split(k, 4)
        gamma = jax.random.uniform(kg, (n,), jnp.float32, 0.5, 1.5)
        beta = unif(kb, (n,), 0.1)
        mean = unif(km, (n,), 0.1)
        var = jax.random.uniform(kv, (n,), jnp.float32, 0.5, 1.5)
        return (gamma, beta, mean, var)

    return {
        'w1': unif(ks[0], (hd, in_dim), 1.0 / (in_dim ** 0.5)),
        'bn1': bn_params(ks[1], hd),
        'wd': unif(ks[2], (hd, 1, 3, 3), 1.0 / 3.0),
        'bn2': bn_params(ks[3], hd),
        'se_w1': unif(ks[4], (cr, hd), 1.0 / (hd ** 0.5)),
        'se_b1': unif(ks[5], (cr,), 1.0 / (hd ** 0.5)),
        'se_w2': unif(ks[6], (hd, cr), 1.0 / (cr ** 0.5)),
        'se_b2': unif(ks[7], (hd,), 1.0 / (cr ** 0.5)),
        'w3': unif(ks[8], (out_dim, hd), 1.0 / (hd ** 0.5)),
        'bn3': bn_params(ks[9], out_dim),
    }


if __name__ == "__main__":
    # in_dim == out_dim == 16, expand_ratio 4 -> hidden 64, SE reduction 4.
    B, C, H, W = 2, 16, 16, 16
    key = jax.random.PRNGKey(0)
    kx, kp = jax.random.split(key)
    x = jax.random.normal(kx, (B, C, H, W), dtype=jnp.float32)
    params = make_params(kp, C, C, expand_ratio=4.0, reduction=4)

    out = locality_feed_forward(x, params, use_se=True)
    out = jax.block_until_ready(out)

    ref = locality_feed_forward_ref(x, params, use_se=True)
    assert out.shape == x.shape
    # Tolerance covers MXU f32-matmul pass-count differences vs the HIGHEST-
    # precision XLA reference; real bugs (tap order, masks, BN fold) are O(1).
    assert jnp.allclose(out, ref, atol=1e-2, rtol=1e-2), (
        "mismatch vs reference, max abs err = "
        f"{jnp.max(jnp.abs(out - ref))}")
    print("KERNEL_OK")
</pallas_src>

<mosaic_0001>
module attributes {stable_mosaic.version = 11 : i64} {
  func.func @_lff_kernel(%arg0: i32, %arg1: memref<1x256x16xf32, #tpu.memory_space<vmem>>, %arg2: memref<16x64xf32, #tpu.memory_space<vmem>>, %arg3: memref<1x64xf32, #tpu.memory_space<vmem>>, %arg4: memref<9x64xf32, #tpu.memory_space<vmem>>, %arg5: memref<1x64xf32, #tpu.memory_space<vmem>>, %arg6: memref<256x1xi32, #tpu.memory_space<vmem>>, %arg7: memref<256x1xi32, #tpu.memory_space<vmem>>, %arg8: memref<64x16xf32, #tpu.memory_space<vmem>>, %arg9: memref<1x16xf32, #tpu.memory_space<vmem>>, %arg10: memref<16x64xf32, #tpu.memory_space<vmem>>, %arg11: memref<1x64xf32, #tpu.memory_space<vmem>>, %arg12: memref<64x16xf32, #tpu.memory_space<vmem>>, %arg13: memref<1x16xf32, #tpu.memory_space<vmem>>, %arg14: memref<1x256x16xf32, #tpu.memory_space<vmem>>, %arg15: memref<304x64xf32, #tpu.memory_space<vmem>>) attributes {dimension_semantics = [#tpu.dimension_semantics<parallel>], iteration_bounds = array<i64: 2>, scalar_prefetch = 0 : i64, scratch_operands = 1 : i64, tpu.core_type = #tpu.core_type<tc>, window_params = [{transform_indices = @transform_0, window_bounds = array<i64: 1, 256, 16>}, {pipeline_mode = #tpu.pipeline_mode<synchronous>, transform_indices = @transform_1, window_bounds = array<i64: 16, 64>}, {pipeline_mode = #tpu.pipeline_mode<synchronous>, transform_indices = @transform_2, window_bounds = array<i64: 1, 64>}, {pipeline_mode = #tpu.pipeline_mode<synchronous>, transform_indices = @transform_3, window_bounds = array<i64: 9, 64>}, {pipeline_mode = #tpu.pipeline_mode<synchronous>, transform_indices = @transform_4, window_bounds = array<i64: 1, 64>}, {pipeline_mode = #tpu.pipeline_mode<synchronous>, transform_indices = @transform_5, window_bounds = array<i64: 256, 1>}, {pipeline_mode = #tpu.pipeline_mode<synchronous>, transform_indices = @transform_6, window_bounds = array<i64: 256, 1>}, {pipeline_mode = #tpu.pipeline_mode<synchronous>, transform_indices = @transform_7, window_bounds = array<i64: 64, 16>}, {pipeline_mode = #tpu.pipeline_mode<synchronous>, transform_indices = @transform_8, window_bounds = array<i64: 1, 16>}, {pipeline_mode = #tpu.pipeline_mode<synchronous>, transform_indices = @transform_9, window_bounds = array<i64: 16, 64>}, {pipeline_mode = #tpu.pipeline_mode<synchronous>, transform_indices = @transform_10, window_bounds = array<i64: 1, 64>}, {pipeline_mode = #tpu.pipeline_mode<synchronous>, transform_indices = @transform_11, window_bounds = array<i64: 64, 16>}, {pipeline_mode = #tpu.pipeline_mode<synchronous>, transform_indices = @transform_12, window_bounds = array<i64: 1, 16>}, {transform_indices = @transform_13, window_bounds = array<i64: 1, 256, 16>}]} {
    %c0 = arith.constant 0 : index
    %c0_0 = arith.constant 0 : index
    %c0_1 = arith.constant 0 : index
    %0 = vector.load %arg1[%c0, %c0_0, %c0_1] : memref<1x256x16xf32, #tpu.memory_space<vmem>>, vector<1x256x16xf32>
    %1 = vector.shape_cast %0 : vector<1x256x16xf32> to vector<256x16xf32>
    %c0_2 = arith.constant 0 : index
    %c0_3 = arith.constant 0 : index
    %2 = vector.load %arg2[%c0_2, %c0_3] : memref<16x64xf32, #tpu.memory_space<vmem>>, vector<16x64xf32>
    %cst = arith.constant dense<0.000000e+00> : vector<256x64xf32>
    %3 = tpu.matmul %1, %2, %cst {dimension_numbers = #tpu.dot_dimension_numbers<[1], [0], [0], [1], [0, 0, 1, 1], [], []>} : vector<256x16xf32>, vector<16x64xf32>, vector<256x64xf32> -> vector<256x64xf32>
    %c0_4 = arith.constant 0 : index
    %c0_5 = arith.constant 0 : index
    %4 = vector.load %arg3[%c0_4, %c0_5] : memref<1x64xf32, #tpu.memory_space<vmem>>, vector<1x64xf32>
    %5 = vector.broadcast %4 : vector<1x64xf32> to vector<256x64xf32>
    %6 = arith.addf %3, %5 : vector<256x64xf32>
    %cst_6 = arith.constant 3.000000e+00 : f32
    %7 = vector.broadcast %cst_6 : f32 to vector<256x64xf32>
    %8 = arith.addf %6, %7 : vector<256x64xf32>
    %cst_7 = arith.constant 0.000000e+00 : f32
    %cst_8 = arith.constant 6.000000e+00 : f32
    %9 = vector.broadcast %cst_7 : f32 to vector<256x64xf32>
    %10 = arith.maximumf %9, %8 : vector<256x64xf32>
    %11 = vector.broadcast %cst_8 : f32 to vector<256x64xf32>
    %12 = arith.minimumf %11, %10 : vector<256x64xf32>
    %cst_9 = arith.constant 0.166666672 : f32
    %13 = vector.broadcast %cst_9 : f32 to vector<256x64xf32>
    %14 = arith.mulf %12, %13 : vector<256x64xf32>
    %15 = arith.mulf %6, %14 : vector<256x64xf32>
    %cst_10 = arith.constant 0.000000e+00 : f32
    %16 = vector.broadcast %cst_10 : f32 to vector<304x64xf32>
    %c0_11 = arith.constant 0 : index
    %c0_12 = arith.constant 0 : index
    %17 = vector.load %arg15[%c0_11, %c0_12] : memref<304x64xf32, #tpu.memory_space<vmem>>, vector<304x64xf32>
    tpu.vector_store %arg15[%c0_11, %c0_12], %16 {strides = array<i32>} : memref<304x64xf32, #tpu.memory_space<vmem>>, vector<304x64xf32>,
    %c24 = arith.constant 24 : index
    %c0_13 = arith.constant 0 : index
    %18 = vector.load %arg15[%c24, %c0_13] : memref<304x64xf32, #tpu.memory_space<vmem>>, vector<256x64xf32>
    tpu.vector_store %arg15[%c24, %c0_13], %15 {strides = array<i32>} : memref<304x64xf32, #tpu.memory_space<vmem>>, vector<256x64xf32>,
    %c0_14 = arith.constant 0 : index
    %c0_15 = arith.constant 0 : index
    %19 = vector.load %arg6[%c0_14, %c0_15] : memref<256x1xi32, #tpu.memory_space<vmem>>, vector<256x1xi32>
    %c0_16 = arith.constant 0 : index
    %c0_17 = arith.constant 0 : index
    %20 = vector.load %arg7[%c0_16, %c0_17] : memref<256x1xi32, #tpu.memory_space<vmem>>, vector<256x1xi32>
    %cst_18 = arith.constant 0.000000e+00 : f32
    %21 = vector.broadcast %cst_18 : f32 to vector<256x64xf32>
    %c7 = arith.constant 7 : index
    %c0_19 = arith.constant 0 : index
    %22 = vector.load %arg15[%c7, %c0_19] : memref<304x64xf32, #tpu.memory_space<vmem>>, vector<256x64xf32>
    %c-1_i32 = arith.constant -1 : i32
    %23 = vector.broadcast %c-1_i32 : i32 to vector<256x1xi32>
    %24 = arith.addi %19, %23 : vector<256x1xi32>
    %c0_i32 = arith.constant 0 : i32
    %25 = vector.broadcast %c0_i32 : i32 to vector<256x1xi32>
    %26 = arith.cmpi sge, %24, %25 : vector<256x1xi32>
    %c-1_i32_20 = arith.constant -1 : i32
    %27 = vector.broadcast %c-1_i32_20 : i32 to vector<256x1xi32>
    %28 = arith.addi %19, %27 : vector<256x1xi32>
    %c16_i32 = arith.constant 16 : i32
    %29 = vector.broadcast %c16_i32 : i32 to vector<256x1xi32>
    %30 = arith.cmpi slt, %28, %29 : vector<256x1xi32>
    %31 = arith.andi %26, %30 : vector<256x1xi1>
    %c-1_i32_21 = arith.constant -1 : i32
    %32 = vector.broadcast %c-1_i32_21 : i32 to vector<256x1xi32>
    %33 = arith.addi %20, %32 : vector<256x1xi32>
    %c0_i32_22 = arith.constant 0 : i32
    %34 = vector.broadcast %c0_i32_22 : i32 to vector<256x1xi32>
    %35 = arith.cmpi sge, %33, %34 : vector<256x1xi32>
    %36 = arith.andi %31, %35 : vector<256x1xi1>
    %c-1_i32_23 = arith.constant -1 : i32
    %37 = vector.broadcast %c-1_i32_23 : i32 to vector<256x1xi32>
    %38 = arith.addi %20, %37 : vector<256x1xi32>
    %c16_i32_24 = arith.constant 16 : i32
    %39 = vector.broadcast %c16_i32_24 : i32 to vector<256x1xi32>
    %40 = arith.cmpi slt, %38, %39 : vector<256x1xi32>
    %41 = arith.andi %36, %40 : vector<256x1xi1>
    %c0_25 = arith.constant 0 : index
    %c0_26 = arith.constant 0 : index
    %42 = vector.load %arg4[%c0_25, %c0_26] : memref<9x64xf32, #tpu.memory_space<vmem>>, vector<1x64xf32>
    %cst_27 = arith.constant 0.000000e+00 : f32
    %43 = vector.shape_cast %41 : vector<256x1xi1> to vector<256x1xi1>
    %44 = vector.broadcast %43 : vector<256x1xi1> to vector<256x64xi1>
    %45 = vector.broadcast %cst_27 : f32 to vector<256x64xf32>
    %46 = arith.select %44, %22, %45 : vector<256x64xi1>, vector<256x64xf32>
    %47 = vector.broadcast %42 : vector<1x64xf32> to vector<256x64xf32>
    %48 = arith.mulf %46, %47 : vector<256x64xf32>
    %49 = arith.addf %21, %48 : vector<256x64xf32>
    %c8 = arith.constant 8 : index
    %c0_28 = arith.constant 0 : index
    %50 = vector.load %arg15[%c8, %c0_28] : memref<304x64xf32, #tpu.memory_space<vmem>>, vector<256x64xf32>
    %c-1_i32_29 = arith.constant -1 : i32
    %51 = vector.broadcast %c-1_i32_29 : i32 to vector<256x1xi32>
    %52 = arith.addi %19, %51 : vector<256x1xi32>
    %c0_i32_30 = arith.constant 0 : i32
    %53 = vector.broadcast %c0_i32_30 : i32 to vector<256x1xi32>
    %54 = arith.cmpi sge, %52, %53 : vector<256x1xi32>
    %c-1_i32_31 = arith.constant -1 : i32
    %55 = vector.broadcast %c-1_i32_31 : i32 to vector<256x1xi32>
    %56 = arith.addi %19, %55 : vector<256x1xi32>
    %c16_i32_32 = arith.constant 16 : i32
    %57 = vector.broadcast %c16_i32_32 : i32 to vector<256x1xi32>
    %58 = arith.cmpi slt, %56, %57 : vector<256x1xi32>
    %59 = arith.andi %54, %58 : vector<256x1xi1>
    %c0_i32_33 = arith.constant 0 : i32
    %60 = vector.broadcast %c0_i32_33 : i32 to vector<256x1xi32>
    %61 = arith.addi %20, %60 : vector<256x1xi32>
    %c0_i32_34 = arith.constant 0 : i32
    %62 = vector.broadcast %c0_i32_34 : i32 to vector<256x1xi32>
    %63 = arith.cmpi sge, %61, %62 : vector<256x1xi32>
    %64 = arith.andi %59, %63 : vector<256x1xi1>
    %c0_i32_35 = arith.constant 0 : i32
    %65 = vector.broadcast %c0_i32_35 : i32 to vector<256x1xi32>
    %66 = arith.addi %20, %65 : vector<256x1xi32>
    %c16_i32_36 = arith.constant 16 : i32
    %67 = vector.broadcast %c16_i32_36 : i32 to vector<256x1xi32>
    %68 = arith.cmpi slt, %66, %67 : vector<256x1xi32>
    %69 = arith.andi %64, %68 : vector<256x1xi1>
    %c1 = arith.constant 1 : index
    %c0_37 = arith.constant 0 : index
    %70 = vector.load %arg4[%c1, %c0_37] : memref<9x64xf32, #tpu.memory_space<vmem>>, vector<1x64xf32>
    %cst_38 = arith.constant 0.000000e+00 : f32
    %71 = vector.shape_cast %69 : vector<256x1xi1> to vector<256x1xi1>
    %72 = vector.broadcast %71 : vector<256x1xi1> to vector<256x64xi1>
    %73 = vector.broadcast %cst_38 : f32 to vector<256x64xf32>
    %74 = arith.select %72, %50, %73 : vector<256x64xi1>, vector<256x64xf32>
    %75 = vector.broadcast %70 : vector<1x64xf32> to vector<256x64xf32>
    %76 = arith.mulf %74, %75 : vector<256x64xf32>
    %77 = arith.addf %49, %76 : vector<256x64xf32>
    %c9 = arith.constant 9 : index
    %c0_39 = arith.constant 0 : index
    %78 = vector.load %arg15[%c9, %c0_39] : memref<304x64xf32, #tpu.memory_space<vmem>>, vector<256x64xf32>
    %c-1_i32_40 = arith.constant -1 : i32
    %79 = vector.broadcast %c-1_i32_40 : i32 to vector<256x1xi32>
    %80 = arith.addi %19, %79 : vector<256x1xi32>
    %c0_i32_41 = arith.constant 0 : i32
    %81 = vector.broadcast %c0_i32_41 : i32 to vector<256x1xi32>
    %82 = arith.cmpi sge, %80, %81 : vector<256x1xi32>
    %c-1_i32_42 = arith.constant -1 : i32
    %83 = vector.broadcast %c-1_i32_42 : i32 to vector<256x1xi32>
    %84 = arith.addi %19, %83 : vector<256x1xi32>
    %c16_i32_43 = arith.constant 16 : i32
    %85 = vector.broadcast %c16_i32_43 : i32 to vector<256x1xi32>
    %86 = arith.cmpi slt, %84, %85 : vector<256x1xi32>
    %87 = arith.andi %82, %86 : vector<256x1xi1>
    %c1_i32 = arith.constant 1 : i32
    %88 = vector.broadcast %c1_i32 : i32 to vector<256x1xi32>
    %89 = arith.addi %20, %88 : vector<256x1xi32>
    %c0_i32_44 = arith.constant 0 : i32
    %90 = vector.broadcast %c0_i32_44 : i32 to vector<256x1xi32>
    %91 = arith.cmpi sge, %89, %90 : vector<256x1xi32>
    %92 = arith.andi %87, %91 : vector<256x1xi1>
    %c1_i32_45 = arith.constant 1 : i32
    %93 = vector.broadcast %c1_i32_45 : i32 to vector<256x1xi32>
    %94 = arith.addi %20, %93 : vector<256x1xi32>
    %c16_i32_46 = arith.constant 16 : i32
    %95 = vector.broadcast %c16_i32_46 : i32 to vector<256x1xi32>
    %96 = arith.cmpi slt, %94, %95 : vector<256x1xi32>
    %97 = arith.andi %92, %96 : vector<256x1xi1>
    %c2 = arith.constant 2 : index
    %c0_47 = arith.constant 0 : index
    %98 = vector.load %arg4[%c2, %c0_47] : memref<9x64xf32, #tpu.memory_space<vmem>>, vector<1x64xf32>
    %cst_48 = arith.constant 0.000000e+00 : f32
    %99 = vector.shape_cast %97 : vector<256x1xi1> to vector<256x1xi1>
    %100 = vector.broadcast %99 : vector<256x1xi1> to vector<256x64xi1>
    %101 = vector.broadcast %cst_48 : f32 to vector<256x64xf32>
    %102 = arith.select %100, %78, %101 : vector<256x64xi1>, vector<256x64xf32>
    %103 = vector.broadcast %98 : vector<1x64xf32> to vector<256x64xf32>
    %104 = arith.mulf %102, %103 : vector<256x64xf32>
    %105 = arith.addf %77, %104 : vector<256x64xf32>
    %c23 = arith.constant 23 : index
    %c0_49 = arith.constant 0 : index
    %106 = vector.load %arg15[%c23, %c0_49] : memref<304x64xf32, #tpu.memory_space<vmem>>, vector<256x64xf32>
    %c0_i32_50 = arith.constant 0 : i32
    %107 = vector.broadcast %c0_i32_50 : i32 to vector<256x1xi32>
    %108 = arith.addi %19, %107 : vector<256x1xi32>
    %c0_i32_51 = arith.constant 0 : i32
    %109 = vector.broadcast %c0_i32_51 : i32 to vector<256x1xi32>
    %110 = arith.cmpi sge, %108, %109 : vector<256x1xi32>
    %c0_i32_52 = arith.constant 0 : i32
    %111 = vector.broadcast %c0_i32_52 : i32 to vector<256x1xi32>
    %112 = arith.addi %19, %111 : vector<256x1xi32>
    %c16_i32_53 = arith.constant 16 : i32
    %113 = vector.broadcast %c16_i32_53 : i32 to vector<256x1xi32>
    %114 = arith.cmpi slt, %112, %113 : vector<256x1xi32>
    %115 = arith.andi %110, %114 : vector<256x1xi1>
    %c-1_i32_54 = arith.constant -1 : i32
    %116 = vector.broadcast %c-1_i32_54 : i32 to vector<256x1xi32>
    %117 = arith.addi %20, %116 : vector<256x1xi32>
    %c0_i32_55 = arith.constant 0 : i32
    %118 = vector.broadcast %c0_i32_55 : i32 to vector<256x1xi32>
    %119 = arith.cmpi sge, %117, %118 : vector<256x1xi32>
    %120 = arith.andi %115, %119 : vector<256x1xi1>
    %c-1_i32_56 = arith.constant -1 : i32
    %121 = vector.broadcast %c-1_i32_56 : i32 to vector<256x1xi32>
    %122 = arith.addi %20, %121 : vector<256x1xi32>
    %c16_i32_57 = arith.constant 16 : i32
    %123 = vector.broadcast %c16_i32_57 : i32 to vector<256x1xi32>
    %124 = arith.cmpi slt, %122, %123 : vector<256x1xi32>
    %125 = arith.andi %120, %124 : vector<256x1xi1>
    %c3 = arith.constant 3 : index
    %c0_58 = arith.constant 0 : index
    %126 = vector.load %arg4[%c3, %c0_58] : memref<9x64xf32, #tpu.memory_space<vmem>>, vector<1x64xf32>
    %cst_59 = arith.constant 0.000000e+00 : f32
    %127 = vector.shape_cast %125 : vector<256x1xi1> to vector<256x1xi1>
    %128 = vector.broadcast %127 : vector<256x1xi1> to vector<256x64xi1>
    %129 = vector.broadcast %cst_59 : f32 to vector<256x64xf32>
    %130 = arith.select %128, %106, %129 : vector<256x64xi1>, vector<256x64xf32>
    %131 = vector.broadcast %126 : vector<1x64xf32> to vector<256x64xf32>
    %132 = arith.mulf %130, %131 : vector<256x64xf32>
    %133 = arith.addf %105, %132 : vector<256x64xf32>
    %c24_60 = arith.constant 24 : index
    %c0_61 = arith.constant 0 : index
    %134 = vector.load %arg15[%c24_60, %c0_61] : memref<304x64xf32, #tpu.memory_space<vmem>>, vector<256x64xf32>
    %c0_i32_62 = arith.constant 0 : i32
    %135 = vector.broadcast %c0_i32_62 : i32 to vector<256x1xi32>
    %136 = arith.addi %19, %135 : vector<256x1xi32>
    %c0_i32_63 = arith.constant 0 : i32
    %137 = vector.broadcast %c0_i32_63 : i32 to vector<256x1xi32>
    %138 = arith.cmpi sge, %136, %137 : vector<256x1xi32>
    %c0_i32_64 = arith.constant 0 : i32
    %139 = vector.broadcast %c0_i32_64 : i32 to vector<256x1xi32>
    %140 = arith.addi %19, %139 : vector<256x1xi32>
    %c16_i32_65 = arith.constant 16 : i32
    %141 = vector.broadcast %c16_i32_65 : i32 to vector<256x1xi32>
    %142 = arith.cmpi slt, %140, %141 : vector<256x1xi32>
    %143 = arith.andi %138, %142 : vector<256x1xi1>
    %c0_i32_66 = arith.constant 0 : i32
    %144 = vector.broadcast %c0_i32_66 : i32 to vector<256x1xi32>
    %145 = arith.addi %20, %144 : vector<256x1xi32>
    %c0_i32_67 = arith.constant 0 : i32
    %146 = vector.broadcast %c0_i32_67 : i32 to vector<256x1xi32>
    %147 = arith.cmpi sge, %145, %146 : vector<256x1xi32>
    %148 = arith.andi %143, %147 : vector<256x1xi1>
    %c0_i32_68 = arith.constant 0 : i32
    %149 = vector.broadcast %c0_i32_68 : i32 to vector<256x1xi32>
    %150 = arith.addi %20, %149 : vector<256x1xi32>
    %c16_i32_69 = arith.constant 16 : i32
    %151 = vector.broadcast %c16_i32_69 : i32 to vector<256x1xi32>
    %152 = arith.cmpi slt, %150, %151 : vector<256x1xi32>
    %153 = arith.andi %148, %152 : vector<256x1xi1>
    %c4 = arith.constant 4 : index
    %c0_70 = arith.constant 0 : index
    %154 = vector.load %arg4[%c4, %c0_70] : memref<9x64xf32, #tpu.memory_space<vmem>>, vector<1x64xf32>
    %cst_71 = arith.constant 0.000000e+00 : f32
    %155 = vector.shape_cast %153 : vector<256x1xi1> to vector<256x1xi1>
    %156 = vector.broadcast %155 : vector<256x1xi1> to vector<256x64xi1>
    %157 = vector.broadcast %cst_71 : f32 to vector<256x64xf32>
    %158 = arith.select %156, %134, %157 : vector<256x64xi1>, vector<256x64xf32>
    %159 = vector.broadcast %154 : vector<1x64xf32> to vector<256x64xf32>
    %160 = arith.mulf %158, %159 : vector<256x64xf32>
    %161 = arith.addf %133, %160 : vector<256x64xf32>
    %c25 = arith.constant 25 : index
    %c0_72 = arith.constant 0 : index
    %162 = vector.load %arg15[%c25, %c0_72] : memref<304x64xf32, #tpu.memory_space<vmem>>, vector<256x64xf32>
    %c0_i32_73 = arith.constant 0 : i32
    %163 = vector.broadcast %c0_i32_73 : i32 to vector<256x1xi32>
    %164 = arith.addi %19, %163 : vector<256x1xi32>
    %c0_i32_74 = arith.constant 0 : i32
    %165 = vector.broadcast %c0_i32_74 : i32 to vector<256x1xi32>
    %166 = arith.cmpi sge, %164, %165 : vector<256x1xi32>
    %c0_i32_75 = arith.constant 0 : i32
    %167 = vector.broadcast %c0_i32_75 : i32 to vector<256x1xi32>
    %168 = arith.addi %19, %167 : vector<256x1xi32>
    %c16_i32_76 = arith.constant 16 : i32
    %169 = vector.broadcast %c16_i32_76 : i32 to vector<256x1xi32>
    %170 = arith.cmpi slt, %168, %169 : vector<256x1xi32>
    %171 = arith.andi %166, %170 : vector<256x1xi1>
    %c1_i32_77 = arith.constant 1 : i32
    %172 = vector.broadcast %c1_i32_77 : i32 to vector<256x1xi32>
    %173 = arith.addi %20, %172 : vector<256x1xi32>
    %c0_i32_78 = arith.constant 0 : i32
    %174 = vector.broadcast %c0_i32_78 : i32 to vector<256x1xi32>
    %175 = arith.cmpi sge, %173, %174 : vector<256x1xi32>
    %176 = arith.andi %171, %175 : vector<256x1xi1>
    %c1_i32_79 = arith.constant 1 : i32
    %177 = vector.broadcast %c1_i32_79 : i32 to vector<256x1xi32>
    %178 = arith.addi %20, %177 : vector<256x1xi32>
    %c16_i32_80 = arith.constant 16 : i32
    %179 = vector.broadcast %c16_i32_80 : i32 to vector<256x1xi32>
    %180 = arith.cmpi slt, %178, %179 : vector<256x1xi32>
    %181 = arith.andi %176, %180 : vector<256x1xi1>
    %c5 = arith.constant 5 : index
    %c0_81 = arith.constant 0 : index
    %182 = vector.load %arg4[%c5, %c0_81] : memref<9x64xf32, #tpu.memory_space<vmem>>, vector<1x64xf32>
    %cst_82 = arith.constant 0.000000e+00 : f32
    %183 = vector.shape_cast %181 : vector<256x1xi1> to vector<256x1xi1>
    %184 = vector.broadcast %183 : vector<256x1xi1> to vector<256x64xi1>
    %185 = vector.broadcast %cst_82 : f32 to vector<256x64xf32>
    %186 = arith.select %184, %162, %185 : vector<256x64xi1>, vector<256x64xf32>
    %187 = vector.broadcast %182 : vector<1x64xf32> to vector<256x64xf32>
    %188 = arith.mulf %186, %187 : vector<256x64xf32>
    %189 = arith.addf %161, %188 : vector<256x64xf32>
    %c39 = arith.constant 39 : index
    %c0_83 = arith.constant 0 : index
    %190 = vector.load %arg15[%c39, %c0_83] : memref<304x64xf32, #tpu.memory_space<vmem>>, vector<256x64xf32>
    %c1_i32_84 = arith.constant 1 : i32
    %191 = vector.broadcast %c1_i32_84 : i32 to vector<256x1xi32>
    %192 = arith.addi %19, %191 : vector<256x1xi32>
    %c0_i32_85 = arith.constant 0 : i32
    %193 = vector.broadcast %c0_i32_85 : i32 to vector<256x1xi32>
    %194 = arith.cmpi sge, %192, %193 : vector<256x1xi32>
    %c1_i32_86 = arith.constant 1 : i32
    %195 = vector.broadcast %c1_i32_86 : i32 to vector<256x1xi32>
    %196 = arith.addi %19, %195 : vector<256x1xi32>
    %c16_i32_87 = arith.constant 16 : i32
    %197 = vector.broadcast %c16_i32_87 : i32 to vector<256x1xi32>
    %198 = arith.cmpi slt, %196, %197 : vector<256x1xi32>
    %199 = arith.andi %194, %198 : vector<256x1xi1>
    %c-1_i32_88 = arith.constant -1 : i32
    %200 = vector.broadcast %c-1_i32_88 : i32 to vector<256x1xi32>
    %201 = arith.addi %20, %200 : vector<256x1xi32>
    %c0_i32_89 = arith.constant 0 : i32
    %202 = vector.broadcast %c0_i32_89 : i32 to vector<256x1xi32>
    %203 = arith.cmpi sge, %201, %202 : vector<256x1xi32>
    %204 = arith.andi %199, %203 : vector<256x1xi1>
    %c-1_i32_90 = arith.constant -1 : i32
    %205 = vector.broadcast %c-1_i32_90 : i32 to vector<256x1xi32>
    %206 = arith.addi %20, %205 : vector<256x1xi32>
    %c16_i32_91 = arith.constant 16 : i32
    %207 = vector.broadcast %c16_i32_91 : i32 to vector<256x1xi32>
    %208 = arith.cmpi slt, %206, %207 : vector<256x1xi32>
    %209 = arith.andi %204, %208 : vector<256x1xi1>
    %c6 = arith.constant 6 : index
    %c0_92 = arith.constant 0 : index
    %210 = vector.load %arg4[%c6, %c0_92] : memref<9x64xf32, #tpu.memory_space<vmem>>, vector<1x64xf32>
    %cst_93 = arith.constant 0.000000e+00 : f32
    %211 = vector.shape_cast %209 : vector<256x1xi1> to vector<256x1xi1>
    %212 = vector.broadcast %211 : vector<256x1xi1> to vector<256x64xi1>
    %213 = vector.broadcast %cst_93 : f32 to vector<256x64xf32>
    %214 = arith.select %212, %190, %213 : vector<256x64xi1>, vector<256x64xf32>
    %215 = vector.broadcast %210 : vector<1x64xf32> to vector<256x64xf32>
    %216 = arith.mulf %214, %215 : vector<256x64xf32>
    %217 = arith.addf %189, %216 : vector<256x64xf32>
    %c40 = arith.constant 40 : index
    %c0_94 = arith.constant 0 : index
    %218 = vector.load %arg15[%c40, %c0_94] : memref<304x64xf32, #tpu.memory_space<vmem>>, vector<256x64xf32>
    %c1_i32_95 = arith.constant 1 : i32
    %219 = vector.broadcast %c1_i32_95 : i32 to vector<256x1xi32>
    %220 = arith.addi %19, %219 : vector<256x1xi32>
    %c0_i32_96 = arith.constant 0 : i32
    %221 = vector.broadcast %c0_i32_96 : i32 to vector<256x1xi32>
    %222 = arith.cmpi sge, %220, %221 : vector<256x1xi32>
    %c1_i32_97 = arith.constant 1 : i32
    %223 = vector.broadcast %c1_i32_97 : i32 to vector<256x1xi32>
    %224 = arith.addi %19, %223 : vector<256x1xi32>
    %c16_i32_98 = arith.constant 16 : i32
    %225 = vector.broadcast %c16_i32_98 : i32 to vector<256x1xi32>
    %226 = arith.cmpi slt, %224, %225 : vector<256x1xi32>
    %227 = arith.andi %222, %226 : vector<256x1xi1>
    %c0_i32_99 = arith.constant 0 : i32
    %228 = vector.broadcast %c0_i32_99 : i32 to vector<256x1xi32>
    %229 = arith.addi %20, %228 : vector<256x1xi32>
    %c0_i32_100 = arith.constant 0 : i32
    %230 = vector.broadcast %c0_i32_100 : i32 to vector<256x1xi32>
    %231 = arith.cmpi sge, %229, %230 : vector<256x1xi32>
    %232 = arith.andi %227, %231 : vector<256x1xi1>
    %c0_i32_101 = arith.constant 0 : i32
    %233 = vector.broadcast %c0_i32_101 : i32 to vector<256x1xi32>
    %234 = arith.addi %20, %233 : vector<256x1xi32>
    %c16_i32_102 = arith.constant 16 : i32
    %235 = vector.broadcast %c16_i32_102 : i32 to vector<256x1xi32>
    %236 = arith.cmpi slt, %234, %235 : vector<256x1xi32>
    %237 = arith.andi %232, %236 : vector<256x1xi1>
    %c7_103 = arith.constant 7 : index
    %c0_104 = arith.constant 0 : index
    %238 = vector.load %arg4[%c7_103, %c0_104] : memref<9x64xf32, #tpu.memory_space<vmem>>, vector<1x64xf32>
    %cst_105 = arith.constant 0.000000e+00 : f32
    %239 = vector.shape_cast %237 : vector<256x1xi1> to vector<256x1xi1>
    %240 = vector.broadcast %239 : vector<256x1xi1> to vector<256x64xi1>
    %241 = vector.broadcast %cst_105 : f32 to vector<256x64xf32>
    %242 = arith.select %240, %218, %241 : vector<256x64xi1>, vector<256x64xf32>
    %243 = vector.broadcast %238 : vector<1x64xf32> to vector<256x64xf32>
    %244 = arith.mulf %242, %243 : vector<256x64xf32>
    %245 = arith.addf %217, %244 : vector<256x64xf32>
    %c41 = arith.constant 41 : index
    %c0_106 = arith.constant 0 : index
    %246 = vector.load %arg15[%c41, %c0_106] : memref<304x64xf32, #tpu.memory_space<vmem>>, vector<256x64xf32>
    %c1_i32_107 = arith.constant 1 : i32
    %247 = vector.broadcast %c1_i32_107 : i32 to vector<256x1xi32>
    %248 = arith.addi %19, %247 : vector<256x1xi32>
    %c0_i32_108 = arith.constant 0 : i32
    %249 = vector.broadcast %c0_i32_108 : i32 to vector<256x1xi32>
    %250 = arith.cmpi sge, %248, %249 : vector<256x1xi32>
    %c1_i32_109 = arith.constant 1 : i32
    %251 = vector.broadcast %c1_i32_109 : i32 to vector<256x1xi32>
    %252 = arith.addi %19, %251 : vector<256x1xi32>
    %c16_i32_110 = arith.constant 16 : i32
    %253 = vector.broadcast %c16_i32_110 : i32 to vector<256x1xi32>
    %254 = arith.cmpi slt, %252, %253 : vector<256x1xi32>
    %255 = arith.andi %250, %254 : vector<256x1xi1>
    %c1_i32_111 = arith.constant 1 : i32
    %256 = vector.broadcast %c1_i32_111 : i32 to vector<256x1xi32>
    %257 = arith.addi %20, %256 : vector<256x1xi32>
    %c0_i32_112 = arith.constant 0 : i32
    %258 = vector.broadcast %c0_i32_112 : i32 to vector<256x1xi32>
    %259 = arith.cmpi sge, %257, %258 : vector<256x1xi32>
    %260 = arith.andi %255, %259 : vector<256x1xi1>
    %c1_i32_113 = arith.constant 1 : i32
    %261 = vector.broadcast %c1_i32_113 : i32 to vector<256x1xi32>
    %262 = arith.addi %20, %261 : vector<256x1xi32>
    %c16_i32_114 = arith.constant 16 : i32
    %263 = vector.broadcast %c16_i32_114 : i32 to vector<256x1xi32>
    %264 = arith.cmpi slt, %262, %263 : vector<256x1xi32>
    %265 = arith.andi %260, %264 : vector<256x1xi1>
    %c8_115 = arith.constant 8 : index
    %c0_116 = arith.constant 0 : index
    %266 = vector.load %arg4[%c8_115, %c0_116] : memref<9x64xf32, #tpu.memory_space<vmem>>, vector<1x64xf32>
    %cst_117 = arith.constant 0.000000e+00 : f32
    %267 = vector.shape_cast %265 : vector<256x1xi1> to vector<256x1xi1>
    %268 = vector.broadcast %267 : vector<256x1xi1> to vector<256x64xi1>
    %269 = vector.broadcast %cst_117 : f32 to vector<256x64xf32>
    %270 = arith.select %268, %246, %269 : vector<256x64xi1>, vector<256x64xf32>
    %271 = vector.broadcast %266 : vector<1x64xf32> to vector<256x64xf32>
    %272 = arith.mulf %270, %271 : vector<256x64xf32>
    %273 = arith.addf %245, %272 : vector<256x64xf32>
    %c0_118 = arith.constant 0 : index
    %c0_119 = arith.constant 0 : index
    %274 = vector.load %arg5[%c0_118, %c0_119] : memref<1x64xf32, #tpu.memory_space<vmem>>, vector<1x64xf32>
    %275 = vector.broadcast %274 : vector<1x64xf32> to vector<256x64xf32>
    %276 = arith.addf %273, %275 : vector<256x64xf32>
    %cst_120 = arith.constant 3.000000e+00 : f32
    %277 = vector.broadcast %cst_120 : f32 to vector<256x64xf32>
    %278 = arith.addf %276, %277 : vector<256x64xf32>
    %cst_121 = arith.constant 0.000000e+00 : f32
    %cst_122 = arith.constant 6.000000e+00 : f32
    %279 = vector.broadcast %cst_121 : f32 to vector<256x64xf32>
    %280 = arith.maximumf %279, %278 : vector<256x64xf32>
    %281 = vector.broadcast %cst_122 : f32 to vector<256x64xf32>
    %282 = arith.minimumf %281, %280 : vector<256x64xf32>
    %cst_123 = arith.constant 0.166666672 : f32
    %283 = vector.broadcast %cst_123 : f32 to vector<256x64xf32>
    %284 = arith.mulf %282, %283 : vector<256x64xf32>
    %285 = arith.mulf %276, %284 : vector<256x64xf32>
    %cst_124 = arith.constant dense<0.000000e+00> : vector<64xf32>
    %286 = vector.multi_reduction <add>, %285, %cst_124 [0] : vector<256x64xf32> to vector<64xf32>
    %287 = vector.shape_cast %286 : vector<64xf32> to vector<1x64xf32>
    %cst_125 = arith.constant 3.906250e-03 : f32
    %288 = vector.broadcast %cst_125 : f32 to vector<1x64xf32>
    %289 = arith.mulf %287, %288 : vector<1x64xf32>
    %c0_126 = arith.constant 0 : index
    %c0_127 = arith.constant 0 : index
    %290 = vector.load %arg8[%c0_126, %c0_127] : memref<64x16xf32, #tpu.memory_space<vmem>>, vector<64x16xf32>
    %cst_128 = arith.constant dense<0.000000e+00> : vector<1x16xf32>
    %291 = tpu.matmul %289, %290, %cst_128 {dimension_numbers = #tpu.dot_dimension_numbers<[1], [0], [0], [1], [0, 0, 1, 1], [], []>} : vector<1x64xf32>, vector<64x16xf32>, vector<1x16xf32> -> vector<1x16xf32>
    %c0_129 = arith.constant 0 : index
    %c0_130 = arith.constant 0 : index
    %292 = vector.load %arg9[%c0_129, %c0_130] : memref<1x16xf32, #tpu.memory_space<vmem>>, vector<1x16xf32>
    %293 = arith.addf %291, %292 : vector<1x16xf32>
    %cst_131 = arith.constant 0.000000e+00 : f32
    %294 = vector.broadcast %cst_131 : f32 to vector<1x16xf32>
    %295 = arith.maximumf %293, %294 : vector<1x16xf32>
    %c0_132 = arith.constant 0 : index
    %c0_133 = arith.constant 0 : index
    %296 = vector.load %arg10[%c0_132, %c0_133] : memref<16x64xf32, #tpu.memory_space<vmem>>, vector<16x64xf32>
    %cst_134 = arith.constant dense<0.000000e+00> : vector<1x64xf32>
    %297 = tpu.matmul %295, %296, %cst_134 {dimension_numbers = #tpu.dot_dimension_numbers<[1], [0], [0], [1], [0, 0, 1, 1], [], []>} : vector<1x16xf32>, vector<16x64xf32>, vector<1x64xf32> -> vector<1x64xf32>
    %c0_135 = arith.constant 0 : index
    %c0_136 = arith.constant 0 : index
    %298 = vector.load %arg11[%c0_135, %c0_136] : memref<1x64xf32, #tpu.memory_space<vmem>>, vector<1x64xf32>
    %299 = arith.addf %297, %298 : vector<1x64xf32>
    %cst_137 = arith.constant 3.000000e+00 : f32
    %300 = vector.broadcast %cst_137 : f32 to vector<1x64xf32>
    %301 = arith.addf %299, %300 : vector<1x64xf32>
    %cst_138 = arith.constant 0.000000e+00 : f32
    %cst_139 = arith.constant 6.000000e+00 : f32
    %302 = vector.broadcast %cst_138 : f32 to vector<1x64xf32>
    %303 = arith.maximumf %302, %301 : vector<1x64xf32>
    %304 = vector.broadcast %cst_139 : f32 to vector<1x64xf32>
    %305 = arith.minimumf %304, %303 : vector<1x64xf32>
    %cst_140 = arith.constant 0.166666672 : f32
    %306 = vector.broadcast %cst_140 : f32 to vector<1x64xf32>
    %307 = arith.mulf %305, %306 : vector<1x64xf32>
    %308 = vector.broadcast %307 : vector<1x64xf32> to vector<256x64xf32>
    %309 = arith.mulf %285, %308 : vector<256x64xf32>
    %c0_141 = arith.constant 0 : index
    %c0_142 = arith.constant 0 : index
    %310 = vector.load %arg12[%c0_141, %c0_142] : memref<64x16xf32, #tpu.memory_space<vmem>>, vector<64x16xf32>
    %cst_143 = arith.constant dense<0.000000e+00> : vector<256x16xf32>
    %311 = tpu.matmul %309, %310, %cst_143 {dimension_numbers = #tpu.dot_dimension_numbers<[1], [0], [0], [1], [0, 0, 1, 1], [], []>} : vector<256x64xf32>, vector<64x16xf32>, vector<256x16xf32> -> vector<256x16xf32>
    %c0_144 = arith.constant 0 : index
    %c0_145 = arith.constant 0 : index
    %312 = vector.load %arg13[%c0_144, %c0_145] : memref<1x16xf32, #tpu.memory_space<vmem>>, vector<1x16xf32>
    %313 = vector.broadcast %312 : vector<1x16xf32> to vector<256x16xf32>
    %314 = arith.addf %311, %313 : vector<256x16xf32>
    %315 = arith.addf %314, %1 : vector<256x16xf32>
    %c0_146 = arith.constant 0 : index
    %c0_147 = arith.constant 0 : index
    %c0_148 = arith.constant 0 : index
    %316 = vector.load %arg14[%c0_146, %c0_147, %c0_148] : memref<1x256x16xf32, #tpu.memory_space<vmem>>, vector<1x256x16xf32>
    %317 = vector.shape_cast %316 : vector<1x256x16xf32> to vector<256x16xf32>
    %318 = vector.shape_cast %315 : vector<256x16xf32> to vector<1x256x16xf32>
    tpu.vector_store %arg14[%c0_146, %c0_147, %c0_148], %318 {strides = array<i32>} : memref<1x256x16xf32, #tpu.memory_space<vmem>>, vector<1x256x16xf32>,
    return
  }
  func.func @transform_0(%arg0: i32) -> (i32, i32, i32) {
    %c0_i32 = arith.constant 0 : i32
    %c0_i32_0 = arith.constant 0 : i32
    %c0_i32_1 = arith.constant 0 : i32
    return %arg0, %c0_i32, %c0_i32_0 : i32, i32, i32
  }
  func.func @transform_1(%arg0: i32) -> (i32, i32) {
    %c0_i32 = arith.constant 0 : i32
    %c0_i32_0 = arith.constant 0 : i32
    %c0_i32_1 = arith.constant 0 : i32
    return %c0_i32, %c0_i32_0 : i32, i32
  }
  func.func @transform_2(%arg0: i32) -> (i32, i32) {
    %c0_i32 = arith.constant 0 : i32
    %c0_i32_0 = arith.constant 0 : i32
    %c0_i32_1 = arith.constant 0 : i32
    return %c0_i32, %c0_i32_0 : i32, i32
  }
  func.func @transform_3(%arg0: i32) -> (i32, i32) {
    %c0_i32 = arith.constant 0 : i32
    %c0_i32_0 = arith.constant 0 : i32
    %c0_i32_1 = arith.constant 0 : i32
    return %c0_i32, %c0_i32_0 : i32, i32
  }
  func.func @transform_4(%arg0: i32) -> (i32, i32) {
    %c0_i32 = arith.constant 0 : i32
    %c0_i32_0 = arith.constant 0 : i32
    %c0_i32_1 = arith.constant 0 : i32
    return %c0_i32, %c0_i32_0 : i32, i32
  }
  func.func @transform_5(%arg0: i32) -> (i32, i32) {
    %c0_i32 = arith.constant 0 : i32
    %c0_i32_0 = arith.constant 0 : i32
    %c0_i32_1 = arith.constant 0 : i32
    return %c0_i32, %c0_i32_0 : i32, i32
  }
  func.func @transform_6(%arg0: i32) -> (i32, i32) {
    %c0_i32 = arith.constant 0 : i32
    %c0_i32_0 = arith.constant 0 : i32
    %c0_i32_1 = arith.constant 0 : i32
    return %c0_i32, %c0_i32_0 : i32, i32
  }
  func.func @transform_7(%arg0: i32) -> (i32, i32) {
    %c0_i32 = arith.constant 0 : i32
    %c0_i32_0 = arith.constant 0 : i32
    %c0_i32_1 = arith.constant 0 : i32
    return %c0_i32, %c0_i32_0 : i32, i32
  }
  func.func @transform_8(%arg0: i32) -> (i32, i32) {
    %c0_i32 = arith.constant 0 : i32
    %c0_i32_0 = arith.constant 0 : i32
    %c0_i32_1 = arith.constant 0 : i32
    return %c0_i32, %c0_i32_0 : i32, i32
  }
  func.func @transform_9(%arg0: i32) -> (i32, i32) {
    %c0_i32 = arith.constant 0 : i32
    %c0_i32_0 = arith.constant 0 : i32
    %c0_i32_1 = arith.constant 0 : i32
    return %c0_i32, %c0_i32_0 : i32, i32
  }
  func.func @transform_10(%arg0: i32) -> (i32, i32) {
    %c0_i32 = arith.constant 0 : i32
    %c0_i32_0 = arith.constant 0 : i32
    %c0_i32_1 = arith.constant 0 : i32
    return %c0_i32, %c0_i32_0 : i32, i32
  }
  func.func @transform_11(%arg0: i32) -> (i32, i32) {
    %c0_i32 = arith.constant 0 : i32
    %c0_i32_0 = arith.constant 0 : i32
    %c0_i32_1 = arith.constant 0 : i32
    return %c0_i32, %c0_i32_0 : i32, i32
  }
  func.func @transform_12(%arg0: i32) -> (i32, i32) {
    %c0_i32 = arith.constant 0 : i32
    %c0_i32_0 = arith.constant 0 : i32
    %c0_i32_1 = arith.constant 0 : i32
    return %c0_i32, %c0_i32_0 : i32, i32
  }
  func.func @transform_13(%arg0: i32) -> (i32, i32, i32) {
    %c0_i32 = arith.constant 0 : i32
    %c0_i32_0 = arith.constant 0 : i32
    %c0_i32_1 = arith.constant 0 : i32
    return %arg0, %c0_i32, %c0_i32_0 : i32, i32, i32
  }
}

</mosaic_0001>

<bundles_post_ra>
// kernel: tpu_custom_call.1
= control target key start
LH: loop header
LB: loop body
LE: loop exit
PB: predicated region body
PF: predicated region fallthrough
CT: control target
= control target key end

     0   :  { %s6468_s25 = smov 0   ;;  %s13333_s0 = inlined_call_operand.vmem [shape: f32[2,256,16], index: 0, kind: input, shape index: {}]   ;;  %s13334_s1 = inlined_call_operand.vmem [shape: f32[16,64], index: 1, kind: input, shape index: {}]   ;;  %s13335_s2 = inlined_call_operand.vmem [shape: f32[1,64], index: 2, kind: input, shape index: {}]   ;;  %s13336_s3 = inlined_call_operand.vmem [shape: f32[9,64], index: 3, kind: input, shape index: {}]   ;;  %s13337_s4 = inlined_call_operand.vmem [shape: f32[1,64], index: 4, kind: input, shape index: {}]   ;;  %s13338_s5 = inlined_call_operand.vmem [shape: s32[256,1], index: 5, kind: input, shape index: {}]   ;;  %s13339_s6 = inlined_call_operand.vmem [shape: s32[256,1], index: 6, kind: input, shape index: {}]   ;;  %s13340_s7 = inlined_call_operand.vmem [shape: f32[64,16], index: 7, kind: input, shape index: {}]   ;;  %s13341_s8 = inlined_call_operand.vmem [shape: f32[1,16], index: 8, kind: input, shape index: {}]   ;;  %s13342_s9 = inlined_call_operand.vmem [shape: f32[16,64], index: 9, kind: input, shape index: {}]   ;;  %s13343_s10 = inlined_call_operand.vmem [shape: f32[1,64], index: 10, kind: input, shape index: {}]   ;;  %s13344_s11 = inlined_call_operand.vmem [shape: f32[64,16], index: 11, kind: input, shape index: {}]   ;;  %s13345_s12 = inlined_call_operand.vmem [shape: f32[1,16], index: 12, kind: input, shape index: {}]   ;;  %s13346_s13 = inlined_call_operand.vmem [shape: f32[2,256,16], index: 13, kind: output, shape index: {}]  }
   0x1 LB: > { %s5843_s26 = sadd.s32 4294967295, %s6392_s25   ;;  %p5847_p0 = scmp.ge.s32.totalorder %s6392_s25, 1  ;;  %s6392_s25 = sphi %s6468_s25, %s23_s25  }
   0x2   : > { %p387_p1 = scmp.lt.s32.totalorder %s6392_s25, 3 }
   0x4   : > { %p388_p2 = pnand %p5847_p0, %p387_p1 }
   0x6   : > { %391 = sbr.rel (%p388_p2) target bundleno = 1683 (0x693), region = 72 }
   0xd   : > { %v473_v0 = vld [vmem:[%s13334_s1] sm:$0xff]  ;;  %v474_v1 = vld [vmem:[%s13334_s1 + $0x8] sm:$0xff]  ;;  %p431_p3 = scmp.lt.s32.totalorder %s5843_s26, 1  ;;  %v1037_v2 = vld [vmem:[%s13338_s5 + $0x10] sm:$0xff]  ;;  %v13393_v4 = vmov 0   ;;  %vm13362_vm0 = vcmask 130048  }
   0xe   : > { %v6162_v3 = vpack.c.bf16 %v474_v1, %v473_v0  ;;  %6210 = vset.pattern.permute.xlu1 %v13393_v4  ;;  %6209 = vset.pattern.permute.xlu0 %v13393_v4  ;;  %v1069_v5 = vld [vmem:[%s13339_s6 + $0x10] sm:$0xff]  ;;  %v1133_v6 = vadd.s32 4294967295, %v1037_v2  ;;  %v1035_v7 = vld [vmem:[%s13338_s5] sm:$0xff]  ;;  %v1038_v12 = vld [vmem:[%s13338_s5 + $0x18] sm:$0xff]  ;;  %v13944_v32 = vmov 0  ;;  %v13950_v47 = vmov 0 }
   0xf   : > { %v1067_v8 = vld [vmem:[%s13339_s6] sm:$0xff]  ;;  %s15435_s26 = smov (!%p431_p3, %s5843_s26), 1  ;;  %v6498_v9 = vadd.s32 4294967295, %v1069_v5  ;;  %v1131_v10 = vadd.s32 4294967295, %v1035_v7  ;;  %v1070_v13 = vld [vmem:[%s13339_s6 + $0x18] sm:$0xff]  ;;  %v1134_v14 = vadd.s32 4294967295, %v1038_v12 }
  0x10   : > { %v6500_v11 = vadd.s32 4294967295, %v1067_v8  ;;  %6163 = vmatprep.subr.bf16.mxu0 %v6162_v3  ;;  %vm1165_vm1 = vcmp.ge.s32.totalorder %v1133_v6, 0  ;;  %vm1197_vm2 = vcmp.lt.s32.totalorder %v1133_v6, 16  ;;  %v6508_v15 = vadd.s32 4294967295, %v1070_v13  ;;  %v1036_v16 = vld [vmem:[%s13338_s5 + $0x8] sm:$0xff]  ;;  %s5932_s30 = sshll.u32 %s15435_s26, 8 }
  0x11   : > { %13936 = vst [vmem:[#allocation3_spill] sm:$0xff] %v6498_v9  ;;  %6165 = vmatpush3.bf16.msra.mxu0 %v6162_v3  ;;  %vm6514_vm3 = vmand %vm1165_vm1, %vm1197_vm2  ;;  %vm13350_vm4 = vcmp.ge.s32.totalorder %v6498_v9, 0  ;;  %vm13347_vm5 = vcmp.lt.s32.totalorder %v6498_v9, 16  ;;  %vm1163_vm6 = vcmp.ge.s32.totalorder %v1131_v10, 0  ;;  %vm1195_vm7 = vcmp.lt.s32.totalorder %v1131_v10, 16  ;;  %v6523_v18 = vld [vmem:[%s13339_s6 + $0x8] sm:$0xff]  ;;  %s6530_s18 = scalar_lea.vmem %s13333_s0, %s5932_s30  ;;  %s13201_s14 = scalar_lea.vmem %s13346_s13, %s5932_s30 }
  0x12   : > { %13937 = vst [vmem:[#allocation4_spill] sm:$0xff] %v6500_v11  ;;  %13938 = vst [vmem:[#allocation5_spill] sm:$0xff] %v6508_v15  ;;  %vm13355_vm9 = vcmp.ge.s32.totalorder %v6500_v11, 0  ;;  %v1040_v19 = vld [vmem:[%s13338_s5 + $0x28] sm:$0xff]  ;;  %v441_v20 = vld [vmem:[%s6530_s18] sm:$0xff]  ;;  %vm13352_vm11 = vcmp.lt.s32.totalorder %v6500_v11, 16 }
  0x13   : > { %vm1325_vm8 = vmand %vm6514_vm3, %vm13350_vm4  ;;  %v442_v21 = vld [vmem:[%s6530_s18 + $0x8] sm:$0xff]  ;;  %v1132_v22 = vadd.s32 4294967295, %v1036_v16  ;;  %6024 = vmatprep.mubr.msk.f32.mxu0 %vm13362_vm0, %v441_v20  ;;  %v443_v25 = vld [vmem:[%s6530_s18 + $0x10] sm:$0xff]  ;;  %vm1166_vm13 = vcmp.ge.s32.totalorder %v1134_v14, 0  ;;  %vm1198_vm14 = vcmp.lt.s32.totalorder %v1134_v14, 16  ;;  %v6553_v26 = vadd.s32 4294967295, %v6523_v18 }
  0x14   : > { %vm1389_vm10 = vmand %vm1325_vm8, %vm13347_vm5  ;;  %v6558_v27 = vld [vmem:[%s13339_s6 + $0x28] sm:$0xff]  ;;  %6025 = vmatmul.mubr.msk.f32.vlgmr.msra.gmra.mrb[0].mxu0 %vm13362_vm0, %v442_v21  ;;  %vm13348_vm1 = vcmp.ge.s32.totalorder %v6508_v15, 0  ;;  %v444_v28 = vld [vmem:[%s6530_s18 + $0x18] sm:$0xff]  ;;  %v1136_v29 = vadd.s32 4294967295, %v1040_v19  ;;  %v13953_v55 = vmov 0  ;;  %v13956_v62 = vmov 0 }
  0x15   : > { %v1422_v23 = vsel %vm1389_vm10, 1, %v13393_v4  ;;  %vm6547_vm12 = vmand %vm1163_vm6, %vm1195_vm7  ;;  %13943 = vst [vmem:[#allocation6_spill] sm:$0xff] %v6553_v26  ;;  %6027 = vmatprep.mubr.msk.f32.mxu0 %vm13362_vm0, %v443_v25  ;;  %vm13349_vm6 = vcmp.lt.s32.totalorder %v6508_v15, 16  ;;  %v1039_v30 = vld [vmem:[%s13338_s5 + $0x20] sm:$0xff]  ;;  %vm1164_vm8 = vcmp.ge.s32.totalorder %v1132_v22, 0  ;;  %vm1196_vm10 = vcmp.lt.s32.totalorder %v1132_v22, 16 }
  0x16   : > { %1459 = vperm.xlu1 %6210, %v1422_v23   ;;  %vm1323_vm15 = vmand %vm6547_vm12, %vm13355_vm9  ;;  %v445_v33 = vld [vmem:[%s6530_s18 + $0x20] sm:$0xff]  ;;  %v6582_v34 = vadd.s32 4294967295, %v6558_v27  ;;  %v1135_v36 = vadd.s32 4294967295, %v1039_v30  ;;  %v1042_v37 = vld [vmem:[%s13338_s5 + $0x38] sm:$0xff]  ;;  %v13960_v6 = vmov 0  ;;  %v13964_v19 = vmov 0 }
  0x17   : > { %vm1387_vm2 = vmand %vm1323_vm15, %vm13352_vm11  ;;  %v6587_v35 = vld [vmem:[%s13339_s6 + $0x20] sm:$0xff]  ;;  %v446_v41 = vld [vmem:[%s6530_s18 + $0x28] sm:$0xff]  ;;  %v1138_v44 = vadd.s32 4294967295, %v1042_v37  ;;  %v13972_v30 = vmov 0 }
  0x18   : > { %v1420_v31 = vsel %vm1387_vm2, 1, %v13393_v4  ;;  %vm6576_vm7 = vmand %vm1166_vm13, %vm1198_vm14  ;;  %13946 = vst [vmem:[#allocation7_spill] sm:$0xff] %v6582_v34  ;;  %vm13351_vm14 = vcmp.ge.s32.totalorder %v6553_v26, 0  ;;  %vm13354_vm2 = vcmp.lt.s32.totalorder %v6553_v26, 16  ;;  %6028 = vmatmul.mubr.msk.f32.gmra.mrb[2].mxu0 %vm13362_vm0, %v444_v28  ;;  %v6608_v40 = vadd.s32 4294967295, %v6587_v35  ;;  %v6614_v42 = vld [vmem:[%s13339_s6 + $0x38] sm:$0xff] }
  0x19   : > { %v13945_v32 = vsel %vm6576_vm7, 4294967295, %v13944_v32  ;;  %1453 = vperm.xlu0 %6209, %v1420_v31   ;;  %vm1326_vm13 = vmand %vm6576_vm7, %vm13348_vm1  ;;  %6030 = vmatprep.mubr.msk.f32.mxu0 %vm13362_vm0, %v445_v33  ;;  %vm1168_vm1 = vcmp.ge.s32.totalorder %v1136_v29, 0  ;;  %v447_v43 = vld [vmem:[%s6530_s18 + $0x30] sm:$0xff]  ;;  %vm1199_vm11 = vcmp.lt.s32.totalorder %v1135_v36, 16  ;;  %v6635_v48 = vadd.s32 4294967295, %v6614_v42  ;;  %v448_v50 = vld [vmem:[%s6530_s18 + $0x38] sm:$0xff] }
  0x1a   : > { %vm1390_vm15 = vmand %vm1326_vm13, %vm13349_vm6  ;;  %vm1200_vm13 = vcmp.lt.s32.totalorder %v1136_v29, 16  ;;  %13949 = vst [vmem:[#allocation8_spill] sm:$0xff] %v6608_v40  ;;  %vm13356_vm6 = vcmp.lt.s32.totalorder %v6582_v34, 16  ;;  %v1041_v45 = vld [vmem:[%s13338_s5 + $0x30] sm:$0xff]  ;;  %v449_v52 = vld [vmem:[%s6530_s18 + $0x40] sm:$0xff]  ;;  %vm1202_vm9 = vcmp.lt.s32.totalorder %v1138_v44, 16 }
  0x1b   : > { %v1423_v38 = vsel %vm1390_vm15, 1, %v13393_v4  ;;  %vm6602_vm5 = vmand %vm1164_vm8, %vm1196_vm10  ;;  %vm13353_vm10 = vcmp.ge.s32.totalorder %v6582_v34, 0  ;;  %13952 = vst [vmem:[#allocation9_spill] sm:$0xff] %v6635_v48  ;;  %v6640_v49 = vld [vmem:[%s13339_s6 + $0x30] sm:$0xff]  ;;  %v1137_v51 = vadd.s32 4294967295, %v1041_v45  ;;  %v1044_v53 = vld [vmem:[%s13338_s5 + $0x48] sm:$0xff] }
  0x1c   : > { %1462 = vperm.xlu1 %6210, %v1423_v38   ;;  %vm1324_vm8 = vmand %vm6602_vm5, %vm13351_vm14  ;;  %vm1167_vm14 = vcmp.ge.s32.totalorder %v1135_v36, 0  ;;  %6031 = vmatmul.mubr.msk.f32.gmra.mrb[4].mxu0 %vm13362_vm0, %v446_v41  ;;  %v6664_v56 = vadd.s32 4294967295, %v6640_v49  ;;  %v6669_v57 = vld [vmem:[%s13339_s6 + $0x48] sm:$0xff]  ;;  %v1140_v58 = vadd.s32 4294967295, %v1044_v53  ;;  %v1043_v59 = vld [vmem:[%s13338_s5 + $0x40] sm:$0xff]  ;;  %v13984_v53 = vmov 0 }
  0x1d   : > { %vm1388_vm15 = vmand %vm1324_vm8, %vm13354_vm2  ;;  %6033 = vmatprep.mubr.msk.f32.mxu0 %vm13362_vm0, %v447_v43  ;;  %vm1170_vm2 = vcmp.ge.s32.totalorder %v1138_v44, 0  ;;  %v450_v60 = vld [vmem:[%s6530_s18 + $0x48] sm:$0xff]  ;;  %v6692_v63 = vadd.s32 4294967295, %v6669_v57  ;;  %v6697_v0 = vld [vmem:[%s13339_s6 + $0x40] sm:$0xff]  ;;  %v1139_v2 = vadd.s32 4294967295, %v1043_v59  ;;  %v13979_v43 = vmov 0 }
  0x1e   : > { %v1421_v46 = vsel %vm1388_vm15, 1, %v13393_v4  ;;  %vm6629_vm4 = vmand %vm1168_vm1, %vm1200_vm13  ;;  %vm13357_vm13 = vcmp.ge.s32.totalorder %v6608_v40, 0  ;;  %vm13358_vm15 = vcmp.lt.s32.totalorder %v6608_v40, 16  ;;  %13955 = vst [vmem:[#allocation10_spill] sm:$0xff] %v6664_v56  ;;  %v451_v1 = vld [vmem:[%s6530_s18 + $0x50] sm:$0xff]  ;;  %v1046_v3 = vld [vmem:[%s13338_s5 + $0x58] sm:$0xff] }
  0x1f   : > { %v13951_v47 = vsel %vm6629_vm4, 4294967295, %v13950_v47  ;;  %1456 = vperm.xlu0 %6209, %v1421_v46   ;;  %vm1328_vm1 = vmand %vm6629_vm4, %vm13353_vm10  ;;  %13958 = vst [vmem:[#allocation11_spill] sm:$0xff] %v6692_v63  ;;  %v6718_v7 = vadd.s32 4294967295, %v6697_v0  ;;  %v6724_v8 = vld [vmem:[%s13339_s6 + $0x58] sm:$0xff]  ;;  %v453_v12 = vld [vmem:[%s6530_s18 + $0x60] sm:$0xff]  ;;  %v1142_v13 = vadd.s32 4294967295, %v1046_v3 }
  0x20   : > { %vm1392_vm8 = vmand %vm1328_vm1, %vm13356_vm6  ;;  %6034 = vmatmul.mubr.msk.f32.gmra.mrb[6].mxu0 %vm13362_vm0, %v448_v50  ;;  %v452_v10 = vld [vmem:[%s6530_s18 + $0x58] sm:$0xff]  ;;  %v1045_v14 = vld [vmem:[%s13338_s5 + $0x50] sm:$0xff]  ;;  %v6746_v20 = vadd.s32 4294967295, %v6724_v8  ;;  %v13990_v3 = vmov 0 }
  0x21   : > { %v1425_v54 = vsel %vm1392_vm8, 1, %v13393_v4  ;;  %vm6659_vm10 = vmand %vm1167_vm14, %vm1199_vm11  ;;  %vm13361_vm8 = vcmp.lt.s32.totalorder %v6635_v48, 16  ;;  %6036 = vmatprep.mubr.msk.f32.mxu0 %vm13362_vm0, %v449_v52  ;;  %vm1201_vm14 = vcmp.lt.s32.totalorder %v1137_v51, 16  ;;  %13962 = vst [vmem:[#allocation12_spill] sm:$0xff] %v6718_v7  ;;  %v6751_v21 = vld [vmem:[%s13339_s6 + $0x50] sm:$0xff]  ;;  %v454_v22 = vld [vmem:[%s6530_s18 + $0x68] sm:$0xff] }
  0x22   : > { %v13954_v55 = vsel %vm6659_vm10, 4294967295, %v13953_v55  ;;  %1468 = vperm.xlu1 %6210, %v1425_v54   ;;  %vm1327_vm11 = vmand %vm6659_vm10, %vm13357_vm13  ;;  %vm1169_vm13 = vcmp.ge.s32.totalorder %v1137_v51, 0  ;;  %13966 = vst [vmem:[#allocation13_spill] sm:$0xff] %v6746_v20  ;;  %v1141_v23 = vadd.s32 4294967295, %v1045_v14  ;;  %v1048_v25 = vld [vmem:[%s13338_s5 + $0x68] sm:$0xff]  ;;  %v455_v28 = vld [vmem:[%s6530_s18 + $0x70] sm:$0xff] }
  0x23   : > { %vm1391_vm1 = vmand %vm1327_vm11, %vm13358_vm15  ;;  %vm13959_vm11 = vcmp.ge.s32.totalorder %v6635_v48, 0  ;;  %vm13363_vm15 = vcmp.lt.s32.totalorder %v6664_v56, 16  ;;  %v6776_v31 = vadd.s32 4294967295, %v6751_v21  ;;  %v6781_v33 = vld [vmem:[%s13339_s6 + $0x68] sm:$0xff]  ;;  %v1144_v36 = vadd.s32 4294967295, %v1048_v25  ;;  %v1047_v37 = vld [vmem:[%s13338_s5 + $0x60] sm:$0xff] }
  0x24   : > { %v1424_v61 = vsel %vm1391_vm1, 1, %v13393_v4  ;;  %vm6687_vm6 = vmand %vm1170_vm2, %vm1202_vm9  ;;  %6037 = vmatmul.mubr.msk.f32.gmra.mrb[8].mxu0 %vm13362_vm0, %v450_v60  ;;  %vm1204_vm2 = vcmp.lt.s32.totalorder %v1140_v58, 16  ;;  %v456_v38 = vld [vmem:[%s6530_s18 + $0x78] sm:$0xff]  ;;  %v6804_v44 = vadd.s32 4294967295, %v6781_v33  ;;  %v6809_v45 = vld [vmem:[%s13339_s6 + $0x60] sm:$0xff]  ;;  %v1143_v50 = vadd.s32 4294967295, %v1047_v37 }
  0x25   : > { %v13957_v62 = vsel %vm6687_vm6, 4294967295, %v13956_v62  ;;  %1465 = vperm.xlu0 %6209, %v1424_v61   ;;  %vm1330_vm9 = vmand %vm6687_vm6, %vm13959_vm11  ;;  %vm1172_vm11 = vcmp.ge.s32.totalorder %v1140_v58, 0  ;;  %6039 = vmatprep.mubr.msk.f32.mxu0 %vm13362_vm0, %v451_v1  ;;  %13974 = vst [vmem:[#allocation14_spill] sm:$0xff] %v6776_v31  ;;  %v457_v46 = vld [vmem:[%s6530_s18 + $0x80] sm:$0xff]  ;;  %v1050_v51 = vld [vmem:[%s13338_s5 + $0x78] sm:$0xff]  ;;  %v6830_v54 = vadd.s32 4294967295, %v6809_v45 }
  0x26   : > { %vm1394_vm1 = vmand %vm1330_vm9, %vm13361_vm8  ;;  %vm13963_vm9 = vcmp.ge.s32.totalorder %v6664_v56, 0  ;;  %vm13366_vm8 = vcmp.lt.s32.totalorder %v6692_v63, 16  ;;  %13981 = vst [vmem:[#allocation15_spill] sm:$0xff] %v6804_v44  ;;  %v6835_v58 = vld [vmem:[%s13339_s6 + $0x78] sm:$0xff]  ;;  %v458_v59 = vld [vmem:[%s6530_s18 + $0x88] sm:$0xff]  ;;  %v1146_v61 = vadd.s32 4294967295, %v1050_v51 }
  0x27   : > { %v1427_v5 = vsel %vm1394_vm1, 1, %v13393_v4  ;;  %vm6713_vm10 = vmand %vm1169_vm13, %vm1201_vm14  ;;  %vm13371_vm14 = vcmp.lt.s32.totalorder %v6718_v7, 16  ;;  %13986 = vst [vmem:[#allocation16_spill] sm:$0xff] %v6830_v54  ;;  %v459_v60 = vld [vmem:[%s6530_s18 + $0x90] sm:$0xff]  ;;  %v1052_v14 = vld [vmem:[%s13338_s5 + $0x88] sm:$0xff]  ;;  %v13448_v48 = vmov 0.0  }
  0x28   : > { %v13961_v6 = vsel %vm6713_vm10, 4294967295, %v13960_v6  ;;  %1474 = vperm.xlu1 %6210, %v1427_v5   ;;  %vm1329_vm13 = vmand %vm6713_vm10, %vm13963_vm9  ;;  %13987 = vst [vmem:[#allocation17_spill] sm:$0xff] %v6835_v58  ;;  %v1049_v1 = vld [vmem:[%s13338_s5 + $0x70] sm:$0xff]  ;;  %v6858_v5 = vadd.s32 4294967295, %v6835_v58  ;;  %v462_v37 = vld [vmem:[%s6530_s18 + $0xa8] sm:$0xff] }
  0x29   : > { %vm1393_vm1 = vmand %vm1329_vm13, %vm13363_vm15  ;;  %vm13967_vm13 = vcmask 130048   ;;  %v463_v51 = vld [vmem:[%s6530_s18 + $0xb0] sm:$0xff]  ;;  %v1064_v34 = vld [vmem:[%s13338_s5 + $0xe8] sm:$0xff] }
  0x2a   : > { %v1426_v16 = vsel %vm1393_vm1, 1, %v13393_v4  ;;  %vm6741_vm0 = vmand %vm1172_vm11, %vm1204_vm2  ;;  %6040 = vmatmul.mubr.msk.f32.gmra.mrb[10].mxu0 %vm13967_vm13, %v452_v10  ;;  %vm13968_vm1 = vcmp.ge.s32.totalorder %v6692_v63, 0  ;;  %13992 = vst [vmem:[#allocation18_spill] sm:$0xff] %v6858_v5  ;;  %v6863_v10 = vld [vmem:[%s13339_s6 + $0x70] sm:$0xff]  ;;  %v7254_v63 = vld [vmem:[%s13339_s6 + $0xd8] sm:$0xff] }
  0x2b   : > { %v13965_v19 = vsel %vm6741_vm0, 4294967295, %v13964_v19  ;;  %1471 = vperm.xlu0 %6209, %v1426_v16   ;;  %vm1332_vm2 = vmand %vm6741_vm0, %vm13968_vm1  ;;  %vm13971_vm1 = vcmp.ge.s32.totalorder %v1139_v2, 0  ;;  %vm1206_vm0 = vcmp.lt.s32.totalorder %v1142_v13, 16  ;;  %13993 = vst [vmem:[#allocation19_spill] sm:$0xff] %v6863_v10  ;;  %v461_v16 = vld [vmem:[%s6530_s18 + $0xa0] sm:$0xff]  ;;  %v6888_v25 = vadd.s32 4294967295, %v6863_v10 }
  0x2c   : > { %vm13969_vm15 = vmmov %vm13967_vm13  ;;  %vm13970_vm13 = vcmp.lt.s32.totalorder %v1139_v2, 16  ;;  %14077 = vst [vmem:[#allocation49_spill] sm:$0xff] %v7254_v63  ;;  %v14159_v24 = vld [vmem:[#allocation4_spill] sm:$0xff] }
  0x2d   : > { %6042 = vmatprep.mubr.msk.f32.mxu0 %vm13969_vm15, %v453_v12  ;;  %vm1396_vm9 = vmand %vm1332_vm2, %vm13366_vm8  ;;  %vm13975_vm2 = vcmp.ge.s32.totalorder %v6718_v7, 0  ;;  %v460_v12 = vld [vmem:[%s6530_s18 + $0x98] sm:$0xff]  ;;  %14001 = vst [vmem:[#allocation20_spill] sm:$0xff] %v6888_v25 }
  0x2e   : > { %v1429_v29 = vsel %vm1396_vm9, 1, %v13393_v4  ;;  %vm6771_vm11 = vmand %vm13971_vm1, %vm13970_vm13  ;;  %vm1205_vm13 = vcmp.lt.s32.totalorder %v1141_v23, 16 }
  0x2f   : > { %v13973_v30 = vsel %vm6771_vm11, 4294967295, %v13972_v30  ;;  %1480 = vperm.xlu1 %6210, %v1429_v29   ;;  %vm1331_vm9 = vmand %vm6771_vm11, %vm13975_vm2  ;;  %vm13978_vm2 = vcmp.ge.s32.totalorder %v1142_v13, 0  ;;  %v1145_v13 = vadd.s32 4294967295, %v1049_v1  ;;  %v1148_v29 = vadd.s32 4294967295, %v1052_v14 }
  0x30   : > { %vm13976_vm1 = vmmov %vm13969_vm15  ;;  %vm13374_vm15 = vcmp.lt.s32.totalorder %v6746_v20, 16 }
  0x31   : > { %6043 = vmatmul.mubr.msk.f32.gmra.mrb[12].mxu0 %vm13976_vm1, %v454_v22  ;;  %vm1395_vm8 = vmand %vm1331_vm9, %vm13371_vm14  ;;  %vm13983_vm14 = vcmask 130048  }
  0x32   : > { %vm13977_vm10 = vmmov %vm13976_vm1  ;;  %v1428_v41 = vsel %vm1395_vm8, 1, %v13393_v4  ;;  %vm1173_vm1 = vcmp.ge.s32.totalorder %v1141_v23, 0  ;;  %vm1208_vm8 = vcmp.lt.s32.totalorder %v1144_v36, 16  ;;  %v13999_v23 = vmov 0 }
  0x33   : > { %6045 = vmatprep.mubr.msk.f32.mxu0 %vm13977_vm10, %v455_v28  ;;  %vm6799_vm11 = vmand %vm13978_vm2, %vm1206_vm0  ;;  %1477 = vperm.xlu0 %6209, %v1428_v41   ;;  %vm13982_vm10 = vcmp.ge.s32.totalorder %v6746_v20, 0  ;;  %vm13375_vm2 = vcmp.lt.s32.totalorder %v6776_v31, 16  ;;  %v6893_v28 = vld [vmem:[%s13339_s6 + $0x88] sm:$0xff]  ;;  %v14007_v41 = vmov 0 }
  0x34   : > { %v13980_v43 = vsel %vm6799_vm11, 4294967295, %v13979_v43  ;;  %vm1334_vm0 = vmand %vm6799_vm11, %vm13982_vm10  ;;  %vm1176_vm10 = vcmp.ge.s32.totalorder %v1144_v36, 0  ;;  %14002 = vst [vmem:[#allocation21_spill] sm:$0xff] %v6893_v28  ;;  %v1051_v36 = vld [vmem:[%s13338_s5 + $0x80] sm:$0xff] }
  0x35   : > { %vm1398_vm9 = vmand %vm1334_vm0, %vm13374_vm15  ;;  %6046 = vmatmul.mubr.msk.f32.gmra.mrb[14].mxu0 %vm13983_vm14, %v456_v38  ;;  %vm13378_vm15 = vcmp.lt.s32.totalorder %v6804_v44, 16 }
  0x36   : > { %v1431_v52 = vsel %vm1398_vm9, 1, %v13393_v4  ;;  %vm6825_vm6 = vmand %vm1173_vm1, %vm1205_vm13  ;;  %vm13383_vm1 = vcmp.lt.s32.totalorder %v6830_v54, 16 }
  0x37   : > { %v13985_v53 = vsel %vm6825_vm6, 4294967295, %v13984_v53  ;;  %vm13988_vm0 = vmmov %vm13983_vm14  ;;  %1486 = vperm.xlu1 %6210, %v1431_v52   ;;  %vm13989_vm14 = vcmp.ge.s32.totalorder %v6776_v31, 0  ;;  %v1147_v52 = vadd.s32 4294967295, %v1051_v36  ;;  %v14019_v36 = vmov 0 }
  0x38   : > { %6048 = vmatprep.mubr.msk.f32.mxu0 %vm13988_vm0, %v457_v46  ;;  %vm1333_vm13 = vmand %vm6825_vm6, %vm13989_vm14  ;;  %v6916_v46 = vadd.s32 4294967295, %v6893_v28  ;;  %v14064_v31 = vmov 0 }
  0x39   : > { %vm1397_vm9 = vmand %vm1333_vm13, %vm13375_vm2  ;;  %vm13994_vm13 = vcmask 130048  }
  0x3a   : > { %v1430_v2 = vsel %vm1397_vm9, 1, %v13393_v4  ;;  %vm6853_vm0 = vmand %vm1176_vm10, %vm1208_vm8  ;;  %6049 = vmatmul.mubr.msk.f32.gmra.mrb[16].mxu0 %vm13994_vm13, %v458_v59  ;;  %vm13995_vm9 = vcmp.ge.s32.totalorder %v6804_v44, 0  ;;  %14009 = vst [vmem:[#allocation22_spill] sm:$0xff] %v6916_v46  ;;  %v1054_v59 = vld [vmem:[%s13338_s5 + $0x98] sm:$0xff]  ;;  %v470_v44 = vld [vmem:[%s6530_s18 + $0xe8] sm:$0xff] }
  0x3b   : > { %v13991_v3 = vsel %vm6853_vm0, 4294967295, %v13990_v3  ;;  %1483 = vperm.xlu0 %6209, %v1430_v2   ;;  %vm1336_vm8 = vmand %vm6853_vm0, %vm13995_vm9  ;;  %vm13998_vm9 = vcmp.ge.s32.totalorder %v1143_v50, 0  ;;  %vm1210_vm0 = vcmp.lt.s32.totalorder %v1146_v61, 16  ;;  %v6947_v2 = vld [vmem:[%s13339_s6 + $0x98] sm:$0xff]  ;;  %v1150_v14 = vadd.s32 4294967295, %v1054_v59  ;;  %v1056_v59 = vld [vmem:[%s13338_s5 + $0xa8] sm:$0xff] }
  0x3c   : > { %vm13996_vm2 = vmmov %vm13994_vm13  ;;  %vm13997_vm13 = vcmp.lt.s32.totalorder %v1143_v50, 16  ;;  %v6921_v50 = vld [vmem:[%s13339_s6 + $0x80] sm:$0xff]  ;;  %14016 = vst [vmem:[#allocation25_spill] sm:$0xff] %v6947_v2 }
  0x3d   : > { %6051 = vmatprep.mubr.msk.f32.mxu0 %vm13996_vm2, %v459_v60  ;;  %vm1400_vm14 = vmand %vm1336_vm8, %vm13378_vm15  ;;  %vm14003_vm8 = vcmp.ge.s32.totalorder %v6830_v54, 0  ;;  %14010 = vst [vmem:[#allocation23_spill] sm:$0xff] %v6921_v50  ;;  %v6942_v1 = vadd.s32 4294967295, %v6921_v50 }
  0x3e   : > { %v1433_v22 = vsel %vm1400_vm14, 1, %v13393_v4  ;;  %vm6883_vm10 = vmand %vm13998_vm9, %vm13997_vm13  ;;  %vm1209_vm13 = vcmp.lt.s32.totalorder %v1145_v13, 16 }
  0x3f   : > { %v14000_v23 = vsel %vm6883_vm10, 4294967295, %v13999_v23  ;;  %1492 = vperm.xlu1 %6210, %v1433_v22   ;;  %vm1335_vm14 = vmand %vm6883_vm10, %vm14003_vm8  ;;  %vm14006_vm8 = vcmp.ge.s32.totalorder %v1146_v61, 0  ;;  %v14013_v61 = vmov 0  ;;  %14015 = vst [vmem:[#allocation24_spill] sm:$0xff] %v6942_v1 }
  0x40   : > { %vm14004_vm9 = vmmov %vm13996_vm2  ;;  %vm13386_vm2 = vcmp.lt.s32.totalorder %v6858_v5, 16 }
  0x41   : > { %6052 = vmatmul.mubr.msk.f32.gmra.mrb[18].mxu0 %vm14004_vm9, %v460_v12  ;;  %vm1399_vm15 = vmand %vm1335_vm14, %vm13383_vm1  ;;  %vm14012_vm1 = vcmask 130048   ;;  %v464_v12 = vld [vmem:[%s6530_s18 + $0xb8] sm:$0xff] }
  0x42   : > { %vm14005_vm6 = vmmov %vm14004_vm9  ;;  %v1432_v38 = vsel %vm1399_vm15, 1, %v13393_v4  ;;  %vm1177_vm9 = vcmp.ge.s32.totalorder %v1145_v13, 0  ;;  %v465_v13 = vld [vmem:[%s6530_s18 + $0xc0] sm:$0xff] }
  0x43   : > { %6054 = vmatprep.mubr.msk.f32.mxu0 %vm14005_vm6, %v461_v16  ;;  %vm6911_vm10 = vmand %vm14006_vm8, %vm1210_vm0  ;;  %1489 = vperm.xlu0 %6209, %v1432_v38   ;;  %vm14011_vm6 = vcmp.ge.s32.totalorder %v6858_v5, 0  ;;  %vm13387_vm8 = vcmp.lt.s32.totalorder %v6888_v25, 16  ;;  %vm1212_vm0 = vcmp.lt.s32.totalorder %v1148_v29, 16  ;;  %v1053_v16 = vld [vmem:[%s13338_s5 + $0x90] sm:$0xff] }
  0x44   : > { %v14008_v41 = vsel %vm6911_vm10, 4294967295, %v14007_v41  ;;  %vm1338_vm15 = vmand %vm6911_vm10, %vm14011_vm6  ;;  %vm1180_vm6 = vcmp.ge.s32.totalorder %v1148_v29, 0  ;;  %v6975_v38 = vld [vmem:[%s13339_s6 + $0x90] sm:$0xff]  ;;  %v466_v29 = vld [vmem:[%s6530_s18 + $0xc8] sm:$0xff] }
  0x45   : > { %vm1402_vm14 = vmand %vm1338_vm15, %vm13386_vm2  ;;  %6055 = vmatmul.mubr.msk.f32.gmra.mrb[20].mxu0 %vm14012_vm1, %v462_v37  ;;  %vm13390_vm2 = vcmp.lt.s32.totalorder %v6916_v46, 16  ;;  %v6970_v37 = vadd.s32 4294967295, %v6947_v2  ;;  %14023 = vst [vmem:[#allocation28_spill] sm:$0xff] %v6975_v38 }
  0x46   : > { %v1435_v60 = vsel %vm1402_vm14, 1, %v13393_v4  ;;  %vm6937_vm11 = vmand %vm1177_vm9, %vm1209_vm13  ;;  %vm13405_vm9 = vcmp.lt.s32.totalorder %v6942_v1, 16 }
  0x47   : > { %v14014_v61 = vsel %vm6937_vm11, 4294967295, %v14013_v61  ;;  %vm14017_vm15 = vmmov %vm14012_vm1  ;;  %1498 = vperm.xlu1 %6210, %v1435_v60   ;;  %vm14018_vm1 = vcmp.ge.s32.totalorder %v6888_v25, 0  ;;  %14022 = vst [vmem:[#allocation27_spill] sm:$0xff] %v6970_v37  ;;  %v467_v60 = vld [vmem:[%s6530_s18 + $0xd0] sm:$0xff]  ;;  %v14039_v25 = vmov 0 }
  0x48   : > { %6057 = vmatprep.mubr.msk.f32.mxu0 %vm14017_vm15, %v463_v51  ;;  %vm1337_vm13 = vmand %vm6937_vm11, %vm14018_vm1  ;;  %v1149_v51 = vadd.s32 4294967295, %v1053_v16  ;;  %v7005_v16 = vld [vmem:[%s13339_s6 + $0xa8] sm:$0xff] }
  0x49   : > { %vm1401_vm14 = vmand %vm1337_vm13, %vm13387_vm8  ;;  %vm14024_vm13 = vcmask 130048   ;;  %14033 = vst [vmem:[#allocation31_spill] sm:$0xff] %v7005_v16 }
  0x4a   : > { %v1434_v22 = vsel %vm1401_vm14, 1, %v13393_v4  ;;  %vm6965_vm15 = vmand %vm1180_vm6, %vm1212_vm0  ;;  %6058 = vmatmul.mubr.msk.f32.gmra.mrb[22].mxu0 %vm14024_vm13, %v464_v12  ;;  %vm14025_vm14 = vcmp.ge.s32.totalorder %v6916_v46, 0  ;;  %v14037_v46 = vmov 0  }
  0x4b   : > { %v14020_v36 = vsel %vm6965_vm15, 4294967295, %v14019_v36  ;;  %1495 = vperm.xlu0 %6209, %v1434_v22   ;;  %vm1340_vm0 = vmand %vm6965_vm15, %vm14025_vm14  ;;  %vm14028_vm14 = vcmp.ge.s32.totalorder %v1147_v52, 0  ;;  %v14029_v22 = vmov 0  ;;  %vm1214_vm15 = vcmp.lt.s32.totalorder %v1150_v14, 16 }
  0x4c   : > { %14021 = vst [vmem:[#allocation26_spill] sm:$0xff] %v14020_v36  ;;  %vm14026_vm8 = vmmov %vm14024_vm13  ;;  %vm14027_vm13 = vcmp.lt.s32.totalorder %v1147_v52, 16  ;;  %v1152_v52 = vadd.s32 4294967295, %v1056_v59  ;;  %v7033_v59 = vld [vmem:[%s13339_s6 + $0xa0] sm:$0xff] }
  0x4d   : > { %6060 = vmatprep.mubr.msk.f32.mxu0 %vm14026_vm8, %v465_v13  ;;  %vm1404_vm1 = vmand %vm1340_vm0, %vm13390_vm2  ;;  %v7000_v13 = vadd.s32 4294967295, %v6975_v38  ;;  %vm14034_vm0 = vcmp.ge.s32.totalorder %v6942_v1, 0  ;;  %14043 = vst [vmem:[#allocation34_spill] sm:$0xff] %v7033_v59  ;;  %v469_v1 = vld [vmem:[%s6530_s18 + $0xe0] sm:$0xff] }
  0x4e   : > { %v1437_v12 = vsel %vm1404_vm1, 1, %v13393_v4  ;;  %vm6995_vm6 = vmand %vm14028_vm14, %vm14027_vm13  ;;  %v468_v4 = vld [vmem:[%s6530_s18 + $0xd8] sm:$0xff]  ;;  %vm1213_vm13 = vcmp.lt.s32.totalorder %v1149_v51, 16 }
  0x4f   : > { %v14030_v22 = vsel %vm6995_vm6, 4294967295, %v14029_v22  ;;  %14032 = vst [vmem:[#allocation30_spill] sm:$0xff] %v7000_v13  ;;  %1504 = vperm.xlu1 %6210, %v1437_v12   ;;  %vm1339_vm1 = vmand %vm6995_vm6, %vm14034_vm0  ;;  %v1055_v12 = vld [vmem:[%s13338_s5 + $0xa0] sm:$0xff]  ;;  %vm14038_vm0 = vcmp.ge.s32.totalorder %v1150_v14, 0 }
  0x50   : > { %14031 = vst [vmem:[#allocation29_spill] sm:$0xff] %v14030_v22  ;;  %vm14035_vm14 = vmmov %vm14026_vm8  ;;  %vm13412_vm8 = vcmp.lt.s32.totalorder %v6970_v37, 16  ;;  %v1151_v14 = vadd.s32 4294967295, %v1055_v12  ;;  %v7059_v12 = vld [vmem:[%s13339_s6 + $0xb8] sm:$0xff] }
  0x51   : > { %6061 = vmatmul.mubr.msk.f32.gmra.mrb[24].mxu0 %vm14035_vm14, %v466_v29  ;;  %vm1403_vm2 = vmand %vm1339_vm1, %vm13405_vm9  ;;  %v7028_v29 = vadd.s32 4294967295, %v7005_v16  ;;  %vm14045_vm9 = vcmask 130048   ;;  %14050 = vst [vmem:[#allocation37_spill] sm:$0xff] %v7059_v12  ;;  %v7080_v54 = vadd.s32 4294967295, %v7059_v12 }
  0x52   : > { %vm14036_vm11 = vmmov %vm14035_vm14  ;;  %v1436_v5 = vsel %vm1403_vm2, 1, %v14037_v46  ;;  %vm1181_vm14 = vcmp.ge.s32.totalorder %v1149_v51, 0  ;;  %v1058_v51 = vld [vmem:[%s13338_s5 + $0xb8] sm:$0xff] }
  0x53   : > { %6063 = vmatprep.mubr.msk.f32.mxu0 %vm14036_vm11, %v467_v60  ;;  %vm7023_vm6 = vmand %vm14038_vm0, %vm1214_vm15  ;;  %14042 = vst [vmem:[#allocation33_spill] sm:$0xff] %v7028_v29  ;;  %1501 = vperm.xlu0 %6209, %v1436_v5   ;;  %vm14044_vm11 = vcmp.ge.s32.totalorder %v6970_v37, 0  ;;  %vm13419_vm0 = vcmp.lt.s32.totalorder %v7000_v13, 16  ;;  %v14046_v60 = vmov 0  ;;  %vm1216_vm15 = vcmp.lt.s32.totalorder %v1152_v52, 16 }
  0x54   : > { %v14040_v25 = vsel %vm7023_vm6, 4294967295, %v14039_v25  ;;  %vm1342_vm2 = vmand %vm7023_vm6, %vm14044_vm11  ;;  %vm1184_vm11 = vcmp.ge.s32.totalorder %v1152_v52, 0  ;;  %v7054_v37 = vadd.s32 4294967295, %v7033_v59  ;;  %v1057_v52 = vld [vmem:[%s13338_s5 + $0xb0] sm:$0xff]  ;;  %vm1183_vm6 = vcmp.ge.s32.totalorder %v1151_v14, 0  ;;  %14056 = vst [vmem:[#allocation39_spill] sm:$0xff] %v7080_v54 }
  0x55   : > { %14041 = vst [vmem:[#allocation32_spill] sm:$0xff] %v14040_v25  ;;  %vm1406_vm1 = vmand %vm1342_vm2, %vm13412_vm8  ;;  %6064 = vmatmul.mubr.msk.f32.gmra.mrb[26].mxu0 %vm14045_vm9, %v468_v4  ;;  %vm13427_vm8 = vcmp.lt.s32.totalorder %v7028_v29, 16  ;;  %v1154_v4 = vadd.s32 4294967295, %v1058_v51  ;;  %v1060_v51 = vld [vmem:[%s13338_s5 + $0xc8] sm:$0xff] }
  0x56   : > { %v1439_v5 = vsel %vm1406_vm1, 1, %v14037_v46  ;;  %vm7049_vm10 = vmand %vm1181_vm14, %vm1213_vm13  ;;  %14049 = vst [vmem:[#allocation36_spill] sm:$0xff] %v7054_v37  ;;  %vm13420_vm14 = vcmp.ge.s32.totalorder %v7028_v29, 0  ;;  %v1059_v29 = vld [vmem:[%s13338_s5 + $0xc0] sm:$0xff] }
  0x57   : > { %v14047_v60 = vsel %vm7049_vm10, 4294967295, %v14046_v60  ;;  %vm14051_vm2 = vmmov %vm14045_vm9  ;;  %1510 = vperm.xlu1 %6210, %v1439_v5   ;;  %vm14052_vm9 = vcmp.ge.s32.totalorder %v7000_v13, 0  ;;  %v14053_v5 = vmov 0  ;;  %v7085_v13 = vld [vmem:[%s13339_s6 + $0xb0] sm:$0xff]  ;;  %v7154_v7 = vadd.s32 4294967295, %v1059_v29 }
  0x58   : > { %14048 = vst [vmem:[#allocation35_spill] sm:$0xff] %v14047_v60  ;;  %6066 = vmatprep.mubr.msk.f32.mxu0 %vm14051_vm2, %v469_v1  ;;  %vm1341_vm13 = vmand %vm7049_vm10, %vm14052_vm9  ;;  %vm1215_vm9 = vcmp.lt.s32.totalorder %v1151_v14, 16  ;;  %v7096_v14 = vadd.s32 4294967295, %v1057_v52  ;;  %v7107_v20 = vadd.s32 4294967295, %v7085_v13  ;;  %v7112_v52 = vld [vmem:[%s13339_s6 + $0xc8] sm:$0xff] }
  0x59   : > { %vm1405_vm1 = vmand %vm1341_vm13, %vm13419_vm0  ;;  %14057 = vst [vmem:[#allocation40_spill] sm:$0xff] %v7085_v13  ;;  %vm14058_vm13 = vcmask 130048   ;;  %vm13433_vm0 = vcmp.lt.s32.totalorder %v7054_v37, 16 }
  0x5a   : > { %v1438_v1 = vsel %vm1405_vm1, 1, %v14037_v46  ;;  %vm7075_vm2 = vmand %vm1184_vm11, %vm1216_vm15  ;;  %6067 = vmatmul.mubr.msk.f32.gmra.mrb[28].mxu0 %vm14058_vm13, %v470_v44  ;;  %vm13430_vm11 = vcmp.ge.s32.totalorder %v7054_v37, 0  ;;  %14062 = vst [vmem:[#allocation42_spill] sm:$0xff] %v7107_v20  ;;  %v7135_v37 = vadd.s32 4294967295, %v7112_v52 }
  0x5b   : > { %v14054_v5 = vsel %vm7075_vm2, 4294967295, %v14053_v5  ;;  %1507 = vperm.xlu0 %6209, %v1438_v1   ;;  %vm1344_vm15 = vmand %vm7075_vm2, %vm13420_vm14  ;;  %v14059_v1 = vmov 0  ;;  %vm1186_vm14 = vcmp.ge.s32.totalorder %v1154_v4, 0  ;;  %vm1218_vm2 = vcmp.lt.s32.totalorder %v1154_v4, 16  ;;  %14063 = vst [vmem:[#allocation43_spill] sm:$0xff] %v7112_v52 }
  0x5c   : > { %14055 = vst [vmem:[#allocation38_spill] sm:$0xff] %v14054_v5  ;;  %vm1408_vm1 = vmand %vm1344_vm15, %vm13427_vm8  ;;  %v7122_v4 = vadd.s32 4294967295, %v1060_v51  ;;  %v7140_v51 = vld [vmem:[%s13339_s6 + $0xc0] sm:$0xff] }
  0x5d   : > { %v1441_v44 = vsel %vm1408_vm1, 1, %v14037_v46  ;;  %vm7102_vm13 = vmand %vm1183_vm6, %vm1215_vm9  ;;  %vm13442_vm1 = vcmp.lt.s32.totalorder %v7080_v54, 16  ;;  %vm1217_vm6 = vcmp.lt.s32.totalorder %v7096_v14, 16  ;;  %14067 = vst [vmem:[#allocation45_spill] sm:$0xff] %v7135_v37  ;;  %v7249_v56 = vadd.s32 4294967295, %v7140_v51 }
  0x5e   : > { %v14060_v1 = vsel %vm7102_vm13, 4294967295, %v14059_v1  ;;  %1516 = vperm.xlu1 %6210, %v1441_v44   ;;  %vm1343_vm15 = vmand %vm7102_vm13, %vm13430_vm11  ;;  %14068 = vst [vmem:[#allocation46_spill] sm:$0xff] %v7140_v51  ;;  %vm1220_vm11 = vcmp.lt.s32.totalorder %v7122_v4, 16 }
  0x5f   : > { %14061 = vst [vmem:[#allocation41_spill] sm:$0xff] %v14060_v1  ;;  %vm1407_vm9 = vmand %vm1343_vm15, %vm13433_vm0  ;;  %vm14069_vm15 = vcmp.ge.s32.totalorder %v7080_v54, 0  ;;  %v14073_v54 = vmov 0 }
  0x60   : > { %v1440_v44 = vsel %vm1407_vm9, 1, %v14037_v46  ;;  %vm7128_vm8 = vmand %vm1186_vm14, %vm1218_vm2  ;;  %vm13452_vm2 = vcmp.ge.s32.totalorder %v7107_v20, 0  ;;  %vm13445_vm9 = vcmask 523264   ;;  %14076 = vst [vmem:[#allocation48_spill] sm:$0xff] %v7249_v56 }
  0x61   : > { %v14065_v31 = vsel %vm7128_vm8, 4294967295, %v14064_v31  ;;  %1513 = vperm.xlu0 %6209, %v1440_v44   ;;  %vm1346_vm14 = vmand %vm7128_vm8, %vm14069_vm15  ;;  %v1062_v44 = vld [vmem:[%s13338_s5 + $0xd8] sm:$0xff]  ;;  %965 = vst.msk [vmem:[#allocation2] sm:$0xff] %vm13445_vm9, %v13448_v48  ;;  %vm14072_vm15 = vcmp.ge.s32.totalorder %v7096_v14, 0  ;;  %vm13469_vm8 = vcmp.lt.s32.totalorder %v7135_v37, 16 }
  0x62   : > { %14066 = vst [vmem:[#allocation44_spill] sm:$0xff] %v14065_v31  ;;  %vm7149_vm0 = vmand %vm1346_vm14, %vm13442_vm1  ;;  %vm1188_vm1 = vcmp.ge.s32.totalorder %v7122_v4, 0  ;;  %v1158_v14 = vadd.s32 4294967295, %v1062_v44  ;;  %v1061_v4 = vld [vmem:[%s13338_s5 + $0xd0] sm:$0xff] }
  0x63   : > { %966 = vst.msk [vmem:[#allocation2 + $0x8] sm:$0xff] %vm13445_vm9, %v13448_v48  ;;  %967 = vst.msk [vmem:[#allocation2 + $0x10] sm:$0xff] %vm13445_vm9, %v13448_v48  ;;  %v1443_v29 = vsel %vm7149_vm0, 1, %v14037_v46  ;;  %v7280_v44 = vld [vmem:[%s13339_s6 + $0xd0] sm:$0xff] }
  0x64   : > { %968 = vst.msk [vmem:[#allocation2 + $0x18] sm:$0xff] %vm13445_vm9, %v13448_v48  ;;  %969 = vst.msk [vmem:[#allocation2 + $0x20] sm:$0xff] %vm13445_vm9, %v13448_v48  ;;  %1522 = vperm.xlu1 %6210, %v1443_v29   ;;  %v14079_v29 = vmov 0  ;;  %vm1190_vm10 = vcmp.ge.s32.totalorder %v1158_v14, 0  ;;  %v7299_v15 = vadd.s32 4294967295, %v7280_v44 }
  0x65   : > { %970 = vst.msk [vmem:[#allocation2 + $0x28] sm:$0xff] %vm13445_vm9, %v13448_v48  ;;  %971 = vst.msk [vmem:[#allocation2 + $0x30] sm:$0xff] %vm13445_vm9, %v13448_v48 }
  0x66   : > { %972 = vst.msk [vmem:[#allocation2 + $0x38] sm:$0xff] %vm13445_vm9, %v13448_v48  ;;  %973 = vst.msk [vmem:[#allocation2 + $0x40] sm:$0xff] %vm13445_vm9, %v13448_v48 }
  0x67   : > { %974 = vst.msk [vmem:[#allocation2 + $0x48] sm:$0xff] %vm13445_vm9, %v13448_v48  ;;  %975 = vst.msk [vmem:[#allocation2 + $0x50] sm:$0xff] %vm13445_vm9, %v13448_v48 }
  0x68   : > { %976 = vst.msk [vmem:[#allocation2 + $0x58] sm:$0xff] %vm13445_vm9, %v13448_v48  ;;  %977 = vst.msk [vmem:[#allocation2 + $0x60] sm:$0xff] %vm13445_vm9, %v13448_v48 }
  0x69   : > { %978 = vst.msk [vmem:[#allocation2 + $0x68] sm:$0xff] %vm13445_vm9, %v13448_v48  ;;  %979 = vst.msk [vmem:[#allocation2 + $0x70] sm:$0xff] %vm13445_vm9, %v13448_v48 }
  0x6a   : > { %980 = vst.msk [vmem:[#allocation2 + $0x78] sm:$0xff] %vm13445_vm9, %v13448_v48  ;;  %981 = vst.msk [vmem:[#allocation2 + $0x80] sm:$0xff] %vm13445_vm9, %v13448_v48 }
  0x6b   : > { %982 = vst.msk [vmem:[#allocation2 + $0x88] sm:$0xff] %vm13445_vm9, %v13448_v48  ;;  %983 = vst.msk [vmem:[#allocation2 + $0x90] sm:$0xff] %vm13445_vm9, %v13448_v48 }
  0x6c   : > { %984 = vst.msk [vmem:[#allocation2 + $0x98] sm:$0xff] %vm13445_vm9, %v13448_v48  ;;  %985 = vst.msk [vmem:[#allocation2 + $0xa0] sm:$0xff] %vm13445_vm9, %v13448_v48 }
  0x6d   : > { %986 = vst.msk [vmem:[#allocation2 + $0xa8] sm:$0xff] %vm13445_vm9, %v13448_v48  ;;  %987 = vst.msk [vmem:[#allocation2 + $0xb0] sm:$0xff] %vm13445_vm9, %v13448_v48 }
  0x6e   : > { %988 = vst.msk [vmem:[#allocation2 + $0xb8] sm:$0xff] %vm13445_vm9, %v13448_v48  ;;  %989 = vst.msk [vmem:[#allocation2 + $0xc0] sm:$0xff] %vm13445_vm9, %v13448_v48 }
  0x6f   : > { %990 = vst.msk [vmem:[#allocation2 + $0xc8] sm:$0xff] %vm13445_vm9, %v13448_v48  ;;  %991 = vst.msk [vmem:[#allocation2 + $0xd0] sm:$0xff] %vm13445_vm9, %v13448_v48 }
  0x70   : > { %992 = vst.msk [vmem:[#allocation2 + $0xd8] sm:$0xff] %vm13445_vm9, %v13448_v48  ;;  %993 = vst.msk [vmem:[#allocation2 + $0xe0] sm:$0xff] %vm13445_vm9, %v13448_v48 }
  0x71   : > { %994 = vst.msk [vmem:[#allocation2 + $0xe8] sm:$0xff] %vm13445_vm9, %v13448_v48  ;;  %995 = vst.msk [vmem:[#allocation2 + $0xf0] sm:$0xff] %vm13445_vm9, %v13448_v48 }
  0x72   : > { %996 = vst.msk [vmem:[#allocation2 + $0xf8] sm:$0xff] %vm13445_vm9, %v13448_v48  ;;  %997 = vst.msk [vmem:[#allocation2 + $0x100] sm:$0xff] %vm13445_vm9, %v13448_v48 }
  0x73   : > { %998 = vst.msk [vmem:[#allocation2 + $0x108] sm:$0xff] %vm13445_vm9, %v13448_v48  ;;  %999 = vst.msk [vmem:[#allocation2 + $0x110] sm:$0xff] %vm13445_vm9, %v13448_v48 }
  0x74   : > { %1000 = vst.msk [vmem:[#allocation2 + $0x118] sm:$0xff] %vm13445_vm9, %v13448_v48  ;;  %1001 = vst.msk [vmem:[#allocation2 + $0x120] sm:$0xff] %vm13445_vm9, %v13448_v48 }
  0x75   : > { %1002 = vst.msk [vmem:[#allocation2 + $0x128] sm:$0xff] %vm13445_vm9, %v13448_v48  ;;  %vm7242_vm14 = vmand %vm14072_vm15, %vm1217_vm6  ;;  %vm14078_vm15 = vcmp.lt.s32.totalorder %v7107_v20, 16  ;;  %vm1219_vm6 = vcmp.lt.s32.totalorder %v7154_v7, 16  ;;  %v7275_v20 = vadd.s32 4294967295, %v7254_v63 }
  0x76   : > { %v14074_v54 = vsel %vm7242_vm14, 4294967295, %v14073_v54  ;;  %vm1345_vm0 = vmand %vm7242_vm14, %vm13452_vm2  ;;  %vm1187_vm2 = vcmp.ge.s32.totalorder %v7154_v7, 0  ;;  %14083 = vst [vmem:[#allocation52_spill] sm:$0xff] %v7280_v44  ;;  %v1157_v7 = vadd.s32 4294967295, %v1061_v4  ;;  %v1063_v4 = vld [vmem:[%s13338_s5 + $0xe0] sm:$0xff] }
  0x77   : > { %14075 = vst [vmem:[#allocation47_spill] sm:$0xff] %v14074_v54  ;;  %vm1409_vm9 = vmand %vm1345_vm0, %vm14078_vm15  ;;  %vm14084_vm0 = vcmp.ge.s32.totalorder %v7135_v37, 0  ;;  %vm13479_vm15 = vcmp.lt.s32.totalorder %v7249_v56, 16  ;;  %v7304_v37 = vld [vmem:[%s13339_s6 + $0xe8] sm:$0xff] }
  0x78   : > { %v1442_v48 = vsel %vm1409_vm9, 1, %v14037_v46  ;;  %vm7268_vm13 = vmand %vm1188_vm1, %vm1220_vm11  ;;  %14082 = vst [vmem:[#allocation51_spill] sm:$0xff] %v7275_v20  ;;  %vm13472_vm1 = vcmp.ge.s32.totalorder %v7249_v56, 0  ;;  %v7323_v26 = vadd.s32 4294967295, %v7304_v37  ;;  %v7328_v56 = vld [vmem:[%s13339_s6 + $0xe0] sm:$0xff] }
  0x79   : > { %v14080_v29 = vsel %vm7268_vm13, 4294967295, %v14079_v29  ;;  %1519 = vperm.xlu0 %6209, %v1442_v48   ;;  %vm1348_vm11 = vmand %vm7268_vm13, %vm14084_vm0  ;;  %v14085_v48 = vmov 0  ;;  %vm1222_vm0 = vcmp.lt.s32.totalorder %v1158_v14, 16  ;;  %14088 = vst [vmem:[#allocation54_spill] sm:$0xff] %v7299_v15  ;;  %v1160_v14 = vadd.s32 4294967295, %v1064_v34 }
  0x7a   : > { %14081 = vst [vmem:[#allocation50_spill] sm:$0xff] %v14080_v29  ;;  %vm1412_vm9 = vmand %vm1348_vm11, %vm13469_vm8  ;;  %vm1189_vm13 = vcmp.ge.s32.totalorder %v1157_v7, 0  ;;  %v1159_v34 = vadd.s32 4294967295, %v1063_v4  ;;  %v1065_v4 = vld [vmem:[%s13338_s5 + $0xf0] sm:$0xff] }
  0x7b   : > { %v1445_v40 = vsel %vm1412_vm9, 1, %v14037_v46  ;;  %vm7294_vm14 = vmand %vm1187_vm2, %vm1219_vm6  ;;  %14089 = vst [vmem:[#allocation55_spill] sm:$0xff] %v7304_v37  ;;  %vm13482_vm2 = vcmp.ge.s32.totalorder %v7275_v20, 0  ;;  %vm13489_vm9 = vcmp.lt.s32.totalorder %v7275_v20, 16  ;;  %v7347_v37 = vadd.s32 4294967295, %v7328_v56  ;;  %v7352_v20 = vld [vmem:[%s13339_s6 + $0xf8] sm:$0xff] }
  0x7c   : > { %v14086_v48 = vsel %vm7294_vm14, 4294967295, %v14085_v48  ;;  %1528 = vperm.xlu1 %6210, %v1445_v40   ;;  %vm1347_vm11 = vmand %vm7294_vm14, %vm13472_vm1  ;;  %v14090_v40 = vmov 0  ;;  %vm1221_vm1 = vcmp.lt.s32.totalorder %v1157_v7, 16  ;;  %14093 = vst [vmem:[#allocation57_spill] sm:$0xff] %v7323_v26  ;;  %v1066_v7 = vld [vmem:[%s13338_s5 + $0xf8] sm:$0xff]  ;;  %vm1192_vm14 = vcmp.ge.s32.totalorder %v1160_v14, 0 }
  0x7d   : > { %14087 = vst [vmem:[#allocation53_spill] sm:$0xff] %v14086_v48  ;;  %vm1411_vm6 = vmand %vm1347_vm11, %vm13479_vm15 }
  0x7e   : > { %v1444_v9 = vsel %vm1411_vm6, 1, %v14037_v46  ;;  %vm7318_vm8 = vmand %vm1190_vm10, %vm1222_vm0  ;;  %14094 = vst [vmem:[#allocation58_spill] sm:$0xff] %v7328_v56  ;;  %vm13492_vm10 = vcmp.ge.s32.totalorder %v7299_v15, 0  ;;  %vm13497_vm6 = vcmp.lt.s32.totalorder %v7299_v15, 16  ;;  %v7376_v15 = vld [vmem:[%s13339_s6 + $0xf0] sm:$0xff] }
  0x7f   : > { %v14091_v40 = vsel %vm7318_vm8, 4294967295, %v14090_v40  ;;  %1525 = vperm.xlu0 %6209, %v1444_v9   ;;  %vm1350_vm11 = vmand %vm7318_vm8, %vm13482_vm2  ;;  %v14095_v9 = vmov 0  ;;  %vm1224_vm2 = vcmp.lt.s32.totalorder %v1160_v14, 16  ;;  %14098 = vst [vmem:[#allocation60_spill] sm:$0xff] %v7347_v37  ;;  %v1162_v14 = vadd.s32 4294967295, %v1066_v7 }
  0x80   : > { %14092 = vst [vmem:[#allocation56_spill] sm:$0xff] %v14091_v40  ;;  %vm1414_vm0 = vmand %vm1350_vm11, %vm13489_vm9  ;;  %vm1191_vm8 = vcmp.ge.s32.totalorder %v1159_v34, 0 }
  0x81   : > { %v1447_v11 = vsel %vm1414_vm0, 1, %v14037_v46  ;;  %vm7342_vm15 = vmand %vm1189_vm13, %vm1221_vm1  ;;  %14099 = vst [vmem:[#allocation61_spill] sm:$0xff] %v7352_v20  ;;  %vm13505_vm13 = vcmp.ge.s32.totalorder %v7323_v26, 0  ;;  %vm13504_vm0 = vcmp.lt.s32.totalorder %v7323_v26, 16  ;;  %vm1226_vm4 = vcmp.lt.s32.totalorder %v1162_v14, 16 }
  0x82   : > { %v14096_v9 = vsel %vm7342_vm15, 4294967295, %v14095_v9  ;;  %1534 = vperm.xlu1 %6210, %v1447_v11   ;;  %vm1349_vm11 = vmand %vm7342_vm15, %vm13492_vm10  ;;  %v14100_v11 = vmov 0  ;;  %vm1223_vm10 = vcmp.lt.s32.totalorder %v1159_v34, 16  ;;  %14104 = vst [vmem:[#allocation64_spill] sm:$0xff] %v7376_v15  ;;  %v1161_v34 = vadd.s32 4294967295, %v1065_v4 }
  0x83   : > { %14097 = vst [vmem:[#allocation59_spill] sm:$0xff] %v14096_v9  ;;  %vm1413_vm1 = vmand %vm1349_vm11, %vm13497_vm6  ;;  %v7371_v9 = vadd.s32 4294967295, %v7352_v20  ;;  %v14105_v20 = vmov 0  ;;  %vm1194_vm15 = vcmp.ge.s32.totalorder %v1162_v14, 0  ;;  %v14109_v14 = vmov 0 }
  0x84   : > { %v1446_v56 = vsel %vm1413_vm1, 1, %v14037_v46  ;;  %vm7366_vm9 = vmand %vm1192_vm14, %vm1224_vm2  ;;  %vm13508_vm14 = vcmp.ge.s32.totalorder %v7347_v37, 0  ;;  %vm13511_vm1 = vcmp.lt.s32.totalorder %v7347_v37, 16  ;;  %v14112_v26 = vmov 0 }
  0x85   : > { %v14101_v11 = vsel %vm7366_vm9, 4294967295, %v14100_v11  ;;  %14103 = vst [vmem:[#allocation63_spill] sm:$0xff] %v7371_v9  ;;  %1531 = vperm.xlu0 %6209, %v1446_v56   ;;  %vm1352_vm11 = vmand %vm7366_vm9, %vm13505_vm13  ;;  %v7392_v56 = vadd.s32 4294967295, %v7376_v15  ;;  %vm1193_vm13 = vcmp.ge.s32.totalorder %v1161_v34, 0  ;;  %vm1225_vm9 = vcmp.lt.s32.totalorder %v1161_v34, 16  ;;  %v7431_v34 = vld [vmem:[%s13339_s6] sm:$0xff] }
  0x86   : > { %14102 = vst [vmem:[#allocation62_spill] sm:$0xff] %v14101_v11  ;;  %vm1416_vm2 = vmand %vm1352_vm11, %vm13504_vm0  ;;  %vm13514_vm0 = vcmp.ge.s32.totalorder %v7371_v9, 0 }
  0x87   : > { %v1449_v7 = vsel %vm1416_vm2, 1, %v14037_v46  ;;  %vm7387_vm6 = vmand %vm1191_vm8, %vm1223_vm10  ;;  %14108 = vst [vmem:[#allocation66_spill] sm:$0xff] %v7392_v56  ;;  %vm13515_vm8 = vcmp.lt.s32.totalorder %v7371_v9, 16 }
  0x88   : > { %v14106_v20 = vsel %vm7387_vm6, 4294967295, %v14105_v20  ;;  %1540 = vperm.xlu1 %6210, %v1449_v7   ;;  %vm1351_vm11 = vmand %vm7387_vm6, %vm13508_vm14  ;;  %vm13519_vm6 = vcmp.ge.s32.totalorder %v7392_v56, 0 }
  0x89   : > { %14107 = vst [vmem:[#allocation65_spill] sm:$0xff] %v14106_v20  ;;  %vm1415_vm2 = vmand %vm1351_vm11, %vm13511_vm1  ;;  %vm13518_vm1 = vcmp.lt.s32.totalorder %v7392_v56, 16 }
  0x8a   : > { %v1448_v4 = vsel %vm1415_vm2, 1, %v14037_v46  ;;  %vm7403_vm10 = vmand %vm1194_vm15, %vm1226_vm4  ;;  %vm13523_vm15 = vcmp.ge.s32.totalorder %v6523_v18, 0 }
  0x8b   : > { %v14110_v14 = vsel %vm7403_vm10, 4294967295, %v14109_v14  ;;  %1537 = vperm.xlu0 %6209, %v1448_v4   ;;  %vm1354_vm14 = vmand %vm7403_vm10, %vm13514_vm0  ;;  %vm13522_vm0 = vcmp.lt.s32.totalorder %v6523_v18, 16 }
  0x8c   : > { %14111 = vst [vmem:[#allocation67_spill] sm:$0xff] %v14110_v14  ;;  %vm1418_vm11 = vmand %vm1354_vm14, %vm13515_vm8 }
  0x8d   : > { %v1451_v7 = vsel %vm1418_vm11, 1, %v14037_v46  ;;  %vm7416_vm4 = vmand %vm1193_vm13, %vm1225_vm9  ;;  %vm13526_vm9 = vcmp.ge.s32.totalorder %v7431_v34, 0  ;;  %vm13524_vm11 = vcmp.lt.s32.totalorder %v7431_v34, 16 }
  0x8e   : > { %v14113_v26 = vsel %vm7416_vm4, 4294967295, %v14112_v26  ;;  %1546 = vperm.xlu1 %6210, %v1451_v7   ;;  %vm1353_vm2 = vmand %vm7416_vm4, %vm13519_vm6  ;;  %v7445_v7 = vld [vmem:[%s13339_s6 + $0x18] sm:$0xff] }
  0x8f   : > { %14114 = vst [vmem:[#allocation68_spill] sm:$0xff] %v14113_v26  ;;  %vm1417_vm14 = vmand %vm1353_vm2, %vm13518_vm1  ;;  %vm13525_vm8 = vcmp.ge.s32.totalorder %v7445_v7, 0  ;;  %vm13527_vm1 = vcmp.lt.s32.totalorder %v7445_v7, 16 }
  0x90   : > { %v1450_v4 = vsel %vm1417_vm14, 1, %v14037_v46  ;;  %vm1745_vm13 = vmand %vm6602_vm5, %vm13523_vm15  ;;  %vm13531_vm15 = vcmp.ge.s32.totalorder %v6558_v27, 0 }
  0x91   : > { %1543 = vperm.xlu0 %6209, %v1450_v4   ;;  %vm1809_vm2 = vmand %vm1745_vm13, %vm13522_vm0  ;;  %v7459_v4 = vld [vmem:[%s13339_s6 + $0x10] sm:$0xff] }
  0x92   : > { %v1842_v9 = vsel %vm1809_vm2, 1, %v14037_v46  ;;  %vm1744_vm14 = vmand %vm6547_vm12, %vm13526_vm9  ;;  %vm13528_vm6 = vcmp.ge.s32.totalorder %v7459_v4, 0  ;;  %vm13530_vm0 = vcmp.lt.s32.totalorder %v7459_v4, 16  ;;  %vm13533_vm9 = vcmp.ge.s32.totalorder %v6587_v35, 0 }
  0x93   : > { %1877 = vperm.xlu1 %6210, %v1842_v9   ;;  %vm1808_vm13 = vmand %vm1744_vm14, %vm13524_vm11  ;;  %vm13532_vm11 = vcmp.lt.s32.totalorder %v6558_v27, 16 }
  0x94   : > { %v1841_v56 = vsel %vm1808_vm13, 1, %v14037_v46  ;;  %vm1747_vm2 = vmand %vm6576_vm7, %vm13525_vm8  ;;  %vm13535_vm7 = vcmp.ge.s32.totalorder %v6614_v42, 0 }
  0x95   : > { %1874 = vperm.xlu0 %6209, %v1841_v56   ;;  %vm1811_vm14 = vmand %vm1747_vm2, %vm13527_vm1  ;;  %vm14115_vm2 = vnez %v13951_v47  ;;  %vm13534_vm1 = vcmp.lt.s32.totalorder %v6587_v35, 16 }
  0x96   : > { %v1844_v9 = vsel %vm1811_vm14, 1, %v14037_v46  ;;  %vm1746_vm13 = vmand %vm6514_vm3, %vm13528_vm6 }
  0x97   : > { %1883 = vperm.xlu1 %6210, %v1844_v9   ;;  %vm1810_vm8 = vmand %vm1746_vm13, %vm13530_vm0  ;;  %vm14116_vm13 = vnez %v13954_v55  ;;  %vm13536_vm0 = vcmp.lt.s32.totalorder %v6614_v42, 16 }
  0x98   : > { %v1843_v56 = vsel %vm1810_vm8, 1, %v14037_v46  ;;  %vm1749_vm14 = vmand %vm14115_vm2, %vm13531_vm15  ;;  %vm13537_vm2 = vcmp.ge.s32.totalorder %v6640_v49, 0 }
  0x99   : > { %1880 = vperm.xlu0 %6209, %v1843_v56   ;;  %vm1813_vm6 = vmand %vm1749_vm14, %vm13532_vm11  ;;  %vm14117_vm14 = vnez %v13957_v62  ;;  %vm13538_vm11 = vcmp.lt.s32.totalorder %v6640_v49, 16 }
  0x9a   : > { %v1846_v9 = vsel %vm1813_vm6, 1, %v14037_v46  ;;  %vm1748_vm8 = vmand %vm14116_vm13, %vm13533_vm9  ;;  %vm13539_vm13 = vcmp.ge.s32.totalorder %v6669_v57, 0 }
  0x9b   : > { %1889 = vperm.xlu1 %6210, %v1846_v9   ;;  %vm1812_vm15 = vmand %vm1748_vm8, %vm13534_vm1  ;;  %vm14118_vm8 = vnez %v13961_v6  ;;  %vm13540_vm1 = vcmp.lt.s32.totalorder %v6669_v57, 16 }
  0x9c   : > { %v1845_v56 = vsel %vm1812_vm15, 1, %v14037_v46  ;;  %vm1751_vm6 = vmand %vm14117_vm14, %vm13535_vm7  ;;  %vm13541_vm14 = vcmp.ge.s32.totalorder %v6697_v0, 0 }
  0x9d   : > { %1886 = vperm.xlu0 %6209, %v1845_v56   ;;  %vm1815_vm9 = vmand %vm1751_vm6, %vm13536_vm0  ;;  %vm14119_vm6 = vnez %v13965_v19  ;;  %vm13542_vm0 = vcmp.lt.s32.totalorder %v6697_v0, 16 }
  0x9e   : > { %v1848_v9 = vsel %vm1815_vm9, 1, %v14037_v46  ;;  %vm1750_vm15 = vmand %vm14118_vm8, %vm13537_vm2  ;;  %vm13543_vm8 = vcmp.ge.s32.totalorder %v6724_v8, 0 }
  0x9f   : > { %1895 = vperm.xlu1 %6210, %v1848_v9   ;;  %vm1814_vm7 = vmand %vm1750_vm15, %vm13538_vm11  ;;  %vm14120_vm15 = vnez %v13973_v30  ;;  %vm13544_vm11 = vcmp.lt.s32.totalorder %v6724_v8, 16 }
  0xa0   : > { %v1847_v56 = vsel %vm1814_vm7, 1, %v14037_v46  ;;  %vm1753_vm9 = vmand %vm14119_vm6, %vm13539_vm13  ;;  %vm13545_vm6 = vcmp.ge.s32.totalorder %v6751_v21, 0 }
  0xa1   : > { %1892 = vperm.xlu0 %6209, %v1847_v56   ;;  %vm1817_vm2 = vmand %vm1753_vm9, %vm13540_vm1  ;;  %vm14121_vm9 = vnez %v13980_v43  ;;  %vm13546_vm1 = vcmp.lt.s32.totalorder %v6751_v21, 16 }
  0xa2   : > { %v1850_v9 = vsel %vm1817_vm2, 1, %v14037_v46  ;;  %vm1752_vm7 = vmand %vm14120_vm15, %vm13541_vm14  ;;  %vm13547_vm15 = vcmp.ge.s32.totalorder %v6781_v33, 0 }
  0xa3   : > { %1901 = vperm.xlu1 %6210, %v1850_v9   ;;  %vm1816_vm13 = vmand %vm1752_vm7, %vm13542_vm0  ;;  %vm14122_vm7 = vnez %v13985_v53  ;;  %vm13548_vm0 = vcmp.lt.s32.totalorder %v6781_v33, 16 }
  0xa4   : > { %v1849_v56 = vsel %vm1816_vm13, 1, %v14037_v46  ;;  %vm1755_vm2 = vmand %vm14121_vm9, %vm13543_vm8  ;;  %vm13549_vm9 = vcmp.ge.s32.totalorder %v6809_v45, 0 }
  0xa5   : > { %1898 = vperm.xlu0 %6209, %v1849_v56   ;;  %vm1819_vm14 = vmand %vm1755_vm2, %vm13544_vm11  ;;  %vm14123_vm2 = vnez %v13991_v3  ;;  %vm13550_vm11 = vcmp.lt.s32.totalorder %v6809_v45, 16 }
  0xa6   : > { %v1852_v9 = vsel %vm1819_vm14, 1, %v14037_v46  ;;  %vm1754_vm13 = vmand %vm14122_vm7, %vm13545_vm6  ;;  %vm13551_vm7 = vcmp.ge.s32.totalorder %v6835_v58, 0 }
  0xa7   : > { %1907 = vperm.xlu1 %6210, %v1852_v9   ;;  %vm1818_vm8 = vmand %vm1754_vm13, %vm13546_vm1  ;;  %vm14124_vm13 = vnez %v14000_v23  ;;  %vm13552_vm1 = vcmp.lt.s32.totalorder %v6835_v58, 16 }
  0xa8   : > { %v1851_v56 = vsel %vm1818_vm8, 1, %v14037_v46  ;;  %vm1757_vm14 = vmand %vm14123_vm2, %vm13547_vm15  ;;  %vm13553_vm2 = vcmp.ge.s32.totalorder %v6863_v10, 0 }
  0xa9   : > { %1904 = vperm.xlu0 %6209, %v1851_v56   ;;  %vm1821_vm6 = vmand %vm1757_vm14, %vm13548_vm0  ;;  %vm14125_vm14 = vnez %v14008_v41  ;;  %vm13554_vm0 = vcmp.lt.s32.totalorder %v6863_v10, 16 }
  0xaa   : > { %v1854_v9 = vsel %vm1821_vm6, 1, %v14037_v46  ;;  %vm1756_vm8 = vmand %vm14124_vm13, %vm13549_vm9  ;;  %vm13555_vm13 = vcmp.ge.s32.totalorder %v6893_v28, 0 }
  0xab   : > { %1913 = vperm.xlu1 %6210, %v1854_v9   ;;  %vm1820_vm15 = vmand %vm1756_vm8, %vm13550_vm11  ;;  %vm14126_vm8 = vnez %v14014_v61  ;;  %vm13558_vm11 = vcmp.lt.s32.totalorder %v6893_v28, 16 }
  0xac   : > { %v1853_v56 = vsel %vm1820_vm15, 1, %v14037_v46  ;;  %vm1759_vm6 = vmand %vm14125_vm14, %vm13551_vm7  ;;  %vm13559_vm14 = vcmp.ge.s32.totalorder %v6921_v50, 0 }
  0xad   : > { %1910 = vperm.xlu0 %6209, %v1853_v56   ;;  %vm1823_vm9 = vmand %vm1759_vm6, %vm13552_vm1  ;;  %vm14127_vm6 = vnez %v14020_v36  ;;  %vm13560_vm1 = vcmp.lt.s32.totalorder %v6921_v50, 16 }
  0xae   : > { %v1856_v9 = vsel %vm1823_vm9, 1, %v14037_v46  ;;  %vm1758_vm15 = vmand %vm14126_vm8, %vm13553_vm2  ;;  %vm13562_vm8 = vcmp.ge.s32.totalorder %v6947_v2, 0 }
  0xaf   : > { %1919 = vperm.xlu1 %6210, %v1856_v9   ;;  %vm1822_vm7 = vmand %vm1758_vm15, %vm13554_vm0  ;;  %vm14128_vm15 = vnez %v14030_v22  ;;  %vm13563_vm0 = vcmp.lt.s32.totalorder %v6947_v2, 16 }
  0xb0   : > { %v1855_v56 = vsel %vm1822_vm7, 1, %v14037_v46  ;;  %vm1761_vm9 = vmand %vm14127_vm6, %vm13555_vm13  ;;  %vm13564_vm6 = vcmp.ge.s32.totalorder %v6975_v38, 0 }
  0xb1   : > { %1916 = vperm.xlu0 %6209, %v1855_v56   ;;  %vm1825_vm2 = vmand %vm1761_vm9, %vm13558_vm11  ;;  %v7606_v56 = vpop.permute.xlu1 %1459  ;;  %vm13567_vm11 = vcmp.lt.s32.totalorder %v6975_v38, 16 }
  0xb2   : > { %v1858_v9 = vsel %vm1825_vm2, 1, %v14037_v46  ;;  %vm1760_vm7 = vmand %vm14128_vm15, %vm13559_vm14  ;;  %14129 = vst [vmem:[#allocation69_spill] sm:$0xff] %v7606_v56  ;;  %vm14130_vm2 = vnez %v14040_v25  ;;  %vm13568_vm15 = vcmp.ge.s32.totalorder %v7005_v16, 0  ;;  %v7623_v56 = vpop.permute.xlu0 %1453 }
  0xb3   : > { %1925 = vperm.xlu1 %6210, %v1858_v9   ;;  %vm1824_vm13 = vmand %vm1760_vm7, %vm13560_vm1  ;;  %vm14131_vm7 = vnez %v14047_v60  ;;  %vm13569_vm1 = vcmp.lt.s32.totalorder %v7005_v16, 16  ;;  %14132 = vst [vmem:[#allocation70_spill] sm:$0xff] %v7623_v56 }
  0xb4   : > { %v1857_v37 = vsel %vm1824_vm13, 1, %v14037_v46  ;;  %vm1763_vm9 = vmand %vm14130_vm2, %vm13562_vm8  ;;  %vm13572_vm2 = vcmp.ge.s32.totalorder %v7033_v59, 0 }
  0xb5   : > { %1922 = vperm.xlu0 %6209, %v1857_v37   ;;  %vm1827_vm14 = vmand %vm1763_vm9, %vm13563_vm0  ;;  %vm13573_vm0 = vcmp.lt.s32.totalorder %v7033_v59, 16 }
  0xb6   : > { %v1860_v9 = vsel %vm1827_vm14, 1, %v14037_v46  ;;  %vm1762_vm13 = vmand %vm14131_vm7, %vm13564_vm6  ;;  %vm14133_vm14 = vnez %v14054_v5  ;;  %vm13574_vm7 = vcmp.ge.s32.totalorder %v7059_v12, 0  ;;  %v7654_v16 = vpop.permute.xlu0 %1456  ;;  %v14176_v5 = vld [vmem:[#allocation3_spill] sm:$0xff] }
  0xb7   : > { %1931 = vperm.xlu1 %6210, %v1860_v9   ;;  %vm1826_vm8 = vmand %vm1762_vm13, %vm13567_vm11  ;;  %v7637_v9 = vpop.permute.xlu1 %1462  ;;  %vm13577_vm11 = vcmp.lt.s32.totalorder %v7059_v12, 16  ;;  %14137 = vst [vmem:[#allocation72_spill] sm:$0xff] %v7654_v16 }
  0xb8   : > { %v1859_v37 = vsel %vm1826_vm8, 1, %v14037_v46  ;;  %vm1765_vm9 = vmand %vm14133_vm14, %vm13568_vm15  ;;  %14134 = vst [vmem:[#allocation71_spill] sm:$0xff] %v7637_v9  ;;  %vm14135_vm8 = vnez %v14060_v1  ;;  %vm13578_vm14 = vcmp.ge.s32.totalorder %v7085_v13, 0  ;;  %v14200_v1 = vld [vmem:[#allocation8_spill] sm:$0xff] }
  0xb9   : > { %1928 = vperm.xlu0 %6209, %v1859_v37   ;;  %vm1829_vm6 = vmand %vm1765_vm9, %vm13569_vm1  ;;  %vm14136_vm9 = vnez %v14065_v31  ;;  %vm13579_vm1 = vcmp.lt.s32.totalorder %v7085_v13, 16 }
  0xba   : > { %v1862_v2 = vsel %vm1829_vm6, 1, %v14037_v46  ;;  %vm1764_vm13 = vmand %vm14135_vm8, %vm13572_vm2  ;;  %vm13582_vm8 = vcmp.ge.s32.totalorder %v7112_v52, 0  ;;  %v7685_v13 = vpop.permute.xlu0 %1465 }
  0xbb   : > { %1937 = vperm.xlu1 %6210, %v1862_v2   ;;  %vm1828_vm15 = vmand %vm1764_vm13, %vm13573_vm0  ;;  %vm13583_vm0 = vcmp.lt.s32.totalorder %v7112_v52, 16  ;;  %14142 = vst [vmem:[#allocation74_spill] sm:$0xff] %v7685_v13  ;;  %v14144_v52 = vld [vmem:[#allocation55_spill] sm:$0xff] }
  0xbc   : > { %v1861_v37 = vsel %vm1828_vm15, 1, %v14037_v46  ;;  %vm1767_vm6 = vmand %vm14136_vm9, %vm13574_vm7  ;;  %vm14138_vm15 = vnez %v14074_v54  ;;  %vm13584_vm9 = vcmp.ge.s32.totalorder %v7140_v51, 0  ;;  %v14167_v54 = vld [vmem:[#allocation6_spill] sm:$0xff] }
  0xbd   : > { %1934 = vperm.xlu0 %6209, %v1861_v37   ;;  %vm1831_vm2 = vmand %vm1767_vm6, %vm13577_vm11  ;;  %v7668_v37 = vpop.permute.xlu1 %1468  ;;  %vm13590_vm11 = vcmp.lt.s32.totalorder %v7140_v51, 16 }
  0xbe   : > { %v1864_v2 = vsel %vm1831_vm2, 1, %v14037_v46  ;;  %vm1766_vm13 = vmand %vm14138_vm15, %vm13578_vm14  ;;  %14139 = vst [vmem:[#allocation73_spill] sm:$0xff] %v7668_v37  ;;  %vm14140_vm2 = vnez %v14080_v29  ;;  %vm13591_vm15 = vcmp.ge.s32.totalorder %v7254_v63, 0  ;;  %v14146_v29 = vld [vmem:[#allocation59_spill] sm:$0xff] }
  0xbf   : > { %1943 = vperm.xlu1 %6210, %v1864_v2   ;;  %vm1830_vm7 = vmand %vm1766_vm13, %vm13579_vm1  ;;  %vm14141_vm13 = vnez %v14086_v48  ;;  %vm13594_vm1 = vcmp.lt.s32.totalorder %v7254_v63, 16 }
  0xc0   : > { %v1863_v12 = vsel %vm1830_vm7, 1, %v14037_v46  ;;  %vm1769_vm6 = vmand %vm14140_vm2, %vm13582_vm8  ;;  %vm13596_vm2 = vcmp.ge.s32.totalorder %v7280_v44, 0 }
  0xc1   : > { %1940 = vperm.xlu0 %6209, %v1863_v12   ;;  %vm1833_vm14 = vmand %vm1769_vm6, %vm13583_vm0  ;;  %vm13605_vm0 = vcmp.lt.s32.totalorder %v7280_v44, 16  ;;  %v6214_v44 = vld [vmem:[%s13339_s6 + $0x8] sm:$0xff] }
  0xc2   : > { %v1866_v2 = vsel %vm1833_vm14, 1, %v14037_v46  ;;  %vm1768_vm7 = vmand %vm14141_vm13, %vm13584_vm9  ;;  %vm14143_vm14 = vnez %v14091_v40  ;;  %vm13600_vm13 = vcmp.ge.s32.totalorder %v14144_v52, 0  ;;  %v7716_v40 = vpop.permute.xlu0 %1471 }
  0xc3   : > { %1949 = vperm.xlu1 %6210, %v1866_v2   ;;  %vm1832_vm8 = vmand %vm1768_vm7, %vm13590_vm11  ;;  %v7699_v2 = vpop.permute.xlu1 %1474  ;;  %vm13601_vm11 = vcmp.lt.s32.totalorder %v14144_v52, 16  ;;  %14150 = vst [vmem:[#allocation76_spill] sm:$0xff] %v7716_v40 }
  0xc4   : > { %v1865_v12 = vsel %vm1832_vm8, 1, %v14037_v46  ;;  %vm1771_vm6 = vmand %vm14143_vm14, %vm13591_vm15  ;;  %14145 = vst [vmem:[#allocation75_spill] sm:$0xff] %v7699_v2  ;;  %vm14147_vm8 = vnez %v14146_v29  ;;  %v7724_v29 = vadd.s32 1, %v6214_v44 }
  0xc5   : > { %1946 = vperm.xlu0 %6209, %v1865_v12   ;;  %vm1835_vm9 = vmand %vm1771_vm6, %vm13594_vm1  ;;  %v14148_v12 = vld [vmem:[#allocation58_spill] sm:$0xff]  ;;  %vm14149_vm6 = vnez %v14101_v11 }
  0xc6   : > { %v1868_v51 = vsel %vm1835_vm9, 1, %v14037_v46  ;;  %vm1770_vm7 = vmand %vm14147_vm8, %vm13596_vm2  ;;  %vm13603_vm14 = vcmp.ge.s32.totalorder %v14148_v12, 0  ;;  %vm13604_vm1 = vcmp.lt.s32.totalorder %v14148_v12, 16  ;;  %v7755_v12 = vpop.permute.xlu0 %1477 }
  0xc7   : > { %1955 = vperm.xlu1 %6210, %v1868_v51   ;;  %vm1834_vm15 = vmand %vm1770_vm7, %vm13605_vm0  ;;  %v14151_v51 = vld [vmem:[#allocation61_spill] sm:$0xff]  ;;  %v7738_v44 = vpop.permute.xlu1 %1480  ;;  %vm13634_vm0 = vcmp.lt.s32.totalorder %v7724_v29, 16  ;;  %14154 = vst [vmem:[#allocation78_spill] sm:$0xff] %v7755_v12 }
  0xc8   : > { %v1867_v63 = vsel %vm1834_vm15, 1, %v14037_v46  ;;  %vm1773_vm9 = vmand %vm14149_vm6, %vm13600_vm13  ;;  %vm13607_vm8 = vcmp.ge.s32.totalorder %v14151_v51, 0  ;;  %vm14152_vm15 = vnez %v14106_v20  ;;  %vm13610_vm13 = vcmp.lt.s32.totalorder %v14151_v51, 16  ;;  %14153 = vst [vmem:[#allocation77_spill] sm:$0xff] %v7738_v44  ;;  %v7819_v20 = vld [vmem:[%s13338_s5 + $0x8] sm:$0xff]  ;;  %v7941_v12 = vld [vmem:[%s13338_s5 + $0x20] sm:$0xff] }
  0xc9   : > { %1952 = vperm.xlu0 %6209, %v1867_v63   ;;  %vm1837_vm2 = vmand %vm1773_vm9, %vm13601_vm11  ;;  %vm13617_vm11 = vcmp.ge.s32.totalorder %v7376_v15, 0  ;;  %v7736_v63 = vadd.s32 1, %v7431_v34  ;;  %v7767_v51 = vadd.s32 1, %v7459_v4  ;;  %v3754_v26 = vadd.s32 1, %v7819_v20 }
  0xca   : > { %v1870_v48 = vsel %vm1837_vm2, 1, %v14037_v46  ;;  %vm1772_vm7 = vmand %vm14152_vm15, %vm13603_vm14  ;;  %vm13614_vm14 = vcmp.lt.s32.totalorder %v7376_v15, 16  ;;  %v7796_v11 = vpop.permute.xlu0 %1483 }
  0xcb   : > { %1961 = vperm.xlu1 %6210, %v1870_v48   ;;  %vm1836_vm9 = vmand %vm1772_vm7, %vm13604_vm1  ;;  %vm13642_vm1 = vcmp.ge.s32.totalorder %v7724_v29, 0  ;;  %v7778_v39 = vpop.permute.xlu1 %1486  ;;  %14158 = vst [vmem:[#allocation80_spill] sm:$0xff] %v7796_v11 }
  0xcc   : > { %v1869_v52 = vsel %vm1836_vm9, 1, %v14037_v46  ;;  %vm1775_vm2 = vmand %vm7403_vm10, %vm13607_vm8  ;;  %vm13618_vm10 = vcmp.ge.s32.totalorder %v7736_v63, 0  ;;  %14155 = vst [vmem:[#allocation79_spill] sm:$0xff] %v7778_v39 }
  0xcd   : > { %1958 = vperm.xlu0 %6209, %v1869_v52   ;;  %vm1839_vm7 = vmand %vm1775_vm2, %vm13610_vm13 }
  0xce   : > { %v1872_v48 = vsel %vm1839_vm7, 1, %v14037_v46  ;;  %vm1774_vm9 = vmand %vm7416_vm4, %vm13617_vm11  ;;  %vm13619_vm7 = vcmp.lt.s32.totalorder %v7736_v63, 16 }
  0xcf   : > { %1967 = vperm.xlu1 %6210, %v1872_v48   ;;  %vm1838_vm8 = vmand %vm1774_vm9, %vm13614_vm14  ;;  %v7774_v48 = vld [vmem:[%s13338_s5] sm:$0xff] }
  0xd0   : > { %v1871_v52 = vsel %vm1838_vm8, 1, %v14037_v46  ;;  %vm2198_vm2 = vmand %vm6602_vm5, %vm13642_vm1  ;;  %vm2586_vm8 = vcmp.ge.s32.totalorder %v7774_v48, 0  ;;  %vm2618_vm9 = vcmp.lt.s32.totalorder %v7774_v48, 16 }
  0xd1   : > { %1964 = vperm.xlu0 %6209, %v1871_v52   ;;  %vm2262_vm13 = vmand %vm2198_vm2, %vm13634_vm0  ;;  %v7786_v52 = vadd.s32 1, %v7445_v7 }
  0xd2   : > { %v2295_v15 = vsel %vm2262_vm13, 1, %v14037_v46  ;;  %vm2197_vm5 = vmand %vm6547_vm12, %vm13618_vm10  ;;  %vm13626_vm13 = vcmp.ge.s32.totalorder %v7767_v51, 0  ;;  %vm14160_vm12 = vcmp.ge.s32.totalorder %v14159_v24, 0  ;;  %vm13622_vm10 = vcmp.lt.s32.totalorder %v7767_v51, 16 }
  0xd3   : > { %2330 = vperm.xlu1 %6210, %v2295_v15   ;;  %vm2261_vm2 = vmand %vm2197_vm5, %vm13619_vm7  ;;  %vm14161_vm5 = vcmp.lt.s32.totalorder %v14159_v24, 16 }
  0xd4   : > { %v2294_v14 = vsel %vm2261_vm2, 1, %v14037_v46  ;;  %vm7791_vm14 = vmand %vm2586_vm8, %vm2618_vm9  ;;  %vm13631_vm8 = vcmp.ge.s32.totalorder %v7786_v52, 0  ;;  %vm13629_vm2 = vcmp.lt.s32.totalorder %v7786_v52, 16 }
  0xd5   : > { %2327 = vperm.xlu0 %6209, %v2294_v14   ;;  %vm2682_vm11 = vmand %vm7791_vm14, %vm14160_vm12  ;;  %v7812_v14 = vpop.permute.xlu1 %1492 }
  0xd6   : > { %vm2714_vm7 = vmand %vm2682_vm11, %vm14161_vm5  ;;  %14162 = vst [vmem:[#allocation4_spill] sm:$0xff] %v7812_v14  ;;  %vm2587_vm11 = vcmp.ge.s32.totalorder %v7819_v20, 0  ;;  %v7851_v14 = vld [vmem:[%s13338_s5 + $0x10] sm:$0xff] }
  0xd7   : > { %v2747_v15 = vsel %vm2714_vm7, 1, %v14037_v46  ;;  %vm2199_vm9 = vmand %vm6514_vm3, %vm13626_vm13  ;;  %vm2619_vm7 = vcmp.lt.s32.totalorder %v7819_v20, 16  ;;  %vm14163_vm3 = vnez %v13945_v32  ;;  %v6217_v32 = vld [vmem:[%s13339_s6 + $0x20] sm:$0xff]  ;;  %v3753_v20 = vadd.s32 1, %v7774_v48 }
  0xd8   : > { %2780 = vperm.xlu1 %6210, %v2747_v15   ;;  %vm2263_vm12 = vmand %vm2199_vm9, %vm13622_vm10  ;;  %v7830_v15 = vpop.permute.xlu0 %1489 }
  0xd9   : > { %v2296_v17 = vsel %vm2263_vm12, 1, %v14037_v46  ;;  %vm2200_vm5 = vmand %vm14163_vm3, %vm13631_vm8  ;;  %14164 = vst [vmem:[#allocation81_spill] sm:$0xff] %v7830_v15  ;;  %vm14168_vm12 = vcmp.ge.s32.totalorder %v14167_v54, 0  ;;  %vm14169_vm3 = vcmp.lt.s32.totalorder %v14167_v54, 16 }
  0xda   : > { %2333 = vperm.xlu0 %6209, %v2296_v17   ;;  %vm2264_vm9 = vmand %vm2200_vm5, %vm13629_vm2  ;;  %v7844_v17 = vadd.s32 1, %v6217_v32 }
  0xdb   : > { %v2297_v31 = vsel %vm2264_vm9, 1, %v14037_v46  ;;  %vm7833_vm10 = vmand %vm2587_vm11, %vm2619_vm7  ;;  %vm2588_vm11 = vcmp.ge.s32.totalorder %v7851_v14, 0  ;;  %vm2620_vm7 = vcmp.lt.s32.totalorder %v7851_v14, 16  ;;  %vm14171_vm9 = vcmp.ge.s32.totalorder %v7431_v34, 0 }
  0xdc   : > { %2336 = vperm.xlu1 %6210, %v2297_v31   ;;  %vm2683_vm13 = vmand %vm7833_vm10, %vm14168_vm12  ;;  %v7855_v31 = vpop.permute.xlu1 %1498  ;;  %vm13641_vm8 = vcmp.ge.s32.totalorder %v7844_v17, 0  ;;  %vm13637_vm0 = vcmp.lt.s32.totalorder %v7844_v17, 16 }
  0xdd   : > { %vm2715_vm5 = vmand %vm2683_vm13, %vm14169_vm3  ;;  %14170 = vst [vmem:[#allocation6_spill] sm:$0xff] %v7855_v31  ;;  %vm14172_vm13 = vcmp.lt.s32.totalorder %v7431_v34, 16  ;;  %v7870_v31 = vpop.permute.xlu0 %1495 }
  0xde   : > { %v2748_v15 = vsel %vm2715_vm5, 1, %v14037_v46  ;;  %vm3039_vm12 = vmand %vm7791_vm14, %vm14171_vm9  ;;  %14175 = vst [vmem:[#allocation82_spill] sm:$0xff] %v7870_v31  ;;  %vm14177_vm5 = vcmp.ge.s32.totalorder %v14176_v5, 0  ;;  %v6224_v31 = vld [vmem:[%s13339_s6 + $0x38] sm:$0xff] }
  0xdf   : > { %2783 = vperm.xlu0 %6209, %v2748_v15   ;;  %vm3071_vm3 = vmand %vm3039_vm12, %vm14172_vm13  ;;  %vm14178_vm12 = vcmp.lt.s32.totalorder %v14176_v5, 16 }
  0xe0   : > { %v3104_v32 = vsel %vm3071_vm3, 1, %v14037_v46  ;;  %vm7865_vm2 = vmand %vm2588_vm11, %vm2620_vm7  ;;  %vm14179_vm11 = vnez %v13954_v55  ;;  %v7884_v11 = vpop.permute.xlu1 %1504  ;;  %v7898_v55 = vld [vmem:[%s13338_s5 + $0x18] sm:$0xff] }
  0xe1   : > { %3137 = vperm.xlu1 %6210, %v3104_v32   ;;  %vm2684_vm9 = vmand %vm7865_vm2, %vm14177_vm5  ;;  %14180 = vst [vmem:[#allocation3_spill] sm:$0xff] %v7884_v11  ;;  %vm14181_vm5 = vcmp.ge.s32.totalorder %v6523_v18, 0  ;;  %v3756_v28 = vadd.s32 1, %v7898_v55 }
  0xe2   : > { %vm2716_vm13 = vmand %vm2684_vm9, %vm14178_vm12  ;;  %vm14182_vm12 = vcmp.lt.s32.totalorder %v6523_v18, 16 }
  0xe3   : > { %v2749_v15 = vsel %vm2716_vm13, 1, %v14037_v46  ;;  %vm2201_vm7 = vmand %vm14179_vm11, %vm13641_vm8  ;;  %vm2589_vm11 = vcmp.ge.s32.totalorder %v7898_v55, 0 }
  0xe4   : > { %2786 = vperm.xlu0 %6209, %v2749_v15   ;;  %vm2265_vm3 = vmand %vm2201_vm7, %vm13637_vm0  ;;  %vm2621_vm7 = vcmp.lt.s32.totalorder %v7898_v55, 16  ;;  %v7902_v15 = vpop.permute.xlu0 %1501  ;;  %v7916_v44 = vpop.permute.xlu1 %1510 }
  0xe5   : > { %v2298_v32 = vsel %vm2265_vm3, 1, %v14037_v46  ;;  %vm3040_vm9 = vmand %vm7833_vm10, %vm14181_vm5  ;;  %14183 = vst [vmem:[#allocation83_spill] sm:$0xff] %v7902_v15  ;;  %vm14184_vm3 = vcmp.ge.s32.totalorder %v7459_v4, 0  ;;  %v14189_v15 = vld [vmem:[#allocation5_spill] sm:$0xff] }
  0xe6   : > { %2339 = vperm.xlu1 %6210, %v2298_v32   ;;  %vm3072_vm13 = vmand %vm3040_vm9, %vm14182_vm12  ;;  %vm14185_vm9 = vcmp.lt.s32.totalorder %v7459_v4, 16  ;;  %14188 = vst [vmem:[#allocation84_spill] sm:$0xff] %v7916_v44  ;;  %v6220_v44 = vld [vmem:[%s13339_s6 + $0x28] sm:$0xff] }
  0xe7   : > { %v3105_v11 = vsel %vm3072_vm13, 1, %v14037_v46  ;;  %vm3041_vm5 = vmand %vm7865_vm2, %vm14184_vm3  ;;  %vm14190_vm13 = vcmp.ge.s32.totalorder %v14189_v15, 0  ;;  %vm14191_vm3 = vcmp.lt.s32.totalorder %v14189_v15, 16 }
  0xe8   : > { %3140 = vperm.xlu0 %6209, %v3105_v11   ;;  %vm3073_vm12 = vmand %vm3041_vm5, %vm14185_vm9  ;;  %vm14192_vm5 = vcmp.ge.s32.totalorder %v7724_v29, 0  ;;  %v7934_v38 = vpop.permute.xlu0 %1507 }
  0xe9   : > { %v3106_v32 = vsel %vm3073_vm12, 1, %v14037_v46  ;;  %vm7912_vm0 = vmand %vm2589_vm11, %vm2621_vm7  ;;  %14193 = vst [vmem:[#allocation5_spill] sm:$0xff] %v7934_v38  ;;  %vm14194_vm7 = vcmp.lt.s32.totalorder %v7724_v29, 16 }
  0xea   : > { %3143 = vperm.xlu1 %6210, %v3106_v32   ;;  %vm2685_vm8 = vmand %vm7912_vm0, %vm14190_vm13  ;;  %v7932_v32 = vadd.s32 1, %v6220_v44  ;;  %vm14196_vm13 = vcmp.lt.s32.totalorder %v7736_v63, 16  ;;  %v7952_v44 = vpop.permute.xlu1 %1516 }
  0xeb   : > { %vm2717_vm1 = vmand %vm2685_vm8, %vm14191_vm3  ;;  %vm14195_vm8 = vcmp.ge.s32.totalorder %v7736_v63, 0  ;;  %14197 = vst [vmem:[#allocation85_spill] sm:$0xff] %v7952_v44 }
  0xec   : > { %v2750_v11 = vsel %vm2717_vm1, 1, %v14037_v46  ;;  %vm3397_vm11 = vmand %vm7833_vm10, %vm14192_vm5  ;;  %vm2590_vm1 = vcmp.ge.s32.totalorder %v7941_v12, 0  ;;  %vm2622_vm10 = vcmp.lt.s32.totalorder %v7941_v12, 16 }
  0xed   : > { %2789 = vperm.xlu0 %6209, %v2750_v11   ;;  %vm3429_vm9 = vmand %vm3397_vm11, %vm14194_vm7  ;;  %vm13652_vm11 = vcmp.ge.s32.totalorder %v7932_v32, 0  ;;  %vm14201_vm7 = vcmp.ge.s32.totalorder %v14200_v1, 0 }
  0xee   : > { %v3462_v59 = vsel %vm3429_vm9, 1, %v14037_v46  ;;  %vm3396_vm12 = vmand %vm7791_vm14, %vm14195_vm8  ;;  %vm13651_vm9 = vcmp.lt.s32.totalorder %v7932_v32, 16  ;;  %vm14202_vm8 = vcmp.lt.s32.totalorder %v14200_v1, 16 }
  0xef   : > { %3497 = vperm.xlu1 %6210, %v3462_v59   ;;  %vm3428_vm3 = vmand %vm3396_vm12, %vm14196_vm13  ;;  %v7968_v59 = vpop.permute.xlu0 %1513 }
  0xf0   : > { %v3461_v11 = vsel %vm3428_vm3, 1, %v14037_v46  ;;  %vm7955_vm5 = vmand %vm2590_vm1, %vm2622_vm10  ;;  %14203 = vst [vmem:[#allocation8_spill] sm:$0xff] %v7968_v59  ;;  %vm14204_vm1 = vnez %v13951_v47  ;;  %vm14205_vm3 = vcmp.ge.s32.totalorder %v7767_v51, 0  ;;  %v7983_v59 = vpop.permute.xlu1 %1522 }
  0xf1   : > { %3494 = vperm.xlu0 %6209, %v3461_v11   ;;  %vm2686_vm14 = vmand %vm7955_vm5, %vm14201_vm7  ;;  %14206 = vst [vmem:[#allocation86_spill] sm:$0xff] %v7983_v59 }
  0xf2   : > { %vm2718_vm12 = vmand %vm2686_vm14, %vm14202_vm8  ;;  %vm14207_vm14 = vcmp.lt.s32.totalorder %v7767_v51, 16 }
  0xf3   : > { %v2751_v44 = vsel %vm2718_vm12, 1, %v14037_v46  ;;  %vm2202_vm10 = vmand %vm14204_vm1, %vm13652_vm11  ;;  %vm3786_vm12 = vcmp.ge.s32.totalorder %v3754_v26, 0  ;;  %vm3818_vm1 = vcmp.lt.s32.totalorder %v3754_v26, 16  ;;  %vm14214_vm11 = vcmp.lt.s32.totalorder %v14167_v54, 16  ;;  %v6222_v26 = vld [vmem:[%s13339_s6 + $0x30] sm:$0xff] }
  0xf4   : > { %2792 = vperm.xlu1 %6210, %v2751_v44   ;;  %vm2266_vm13 = vmand %vm2202_vm10, %vm13651_vm9  ;;  %vm14208_vm10 = vcmp.ge.s32.totalorder %v7445_v7, 0 }
  0xf5   : > { %v2299_v11 = vsel %vm2266_vm13, 1, %v14037_v46  ;;  %vm3398_vm7 = vmand %vm7865_vm2, %vm14205_vm3  ;;  %vm14209_vm2 = vcmp.lt.s32.totalorder %v7445_v7, 16 }
  0xf6   : > { %2342 = vperm.xlu0 %6209, %v2299_v11   ;;  %vm3430_vm8 = vmand %vm3398_vm7, %vm14207_vm14  ;;  %vm3785_vm7 = vcmp.ge.s32.totalorder %v3753_v20, 0  ;;  %vm3817_vm14 = vcmp.lt.s32.totalorder %v3753_v20, 16  ;;  %v8010_v11 = vadd.s32 1, %v6222_v26 }
  0xf7   : > { %v3463_v47 = vsel %vm3430_vm8, 1, %v14037_v46  ;;  %vm3042_vm13 = vmand %vm7912_vm0, %vm14208_vm10  ;;  %vm14213_vm8 = vcmp.ge.s32.totalorder %v14167_v54, 0 }
  0xf8   : > { %3500 = vperm.xlu1 %6210, %v3463_v47   ;;  %vm3074_vm3 = vmand %vm3042_vm13, %vm14209_vm2  ;;  %v7994_v48 = vpop.permute.xlu0 %1519  ;;  %vm14218_vm13 = vcmp.ge.s32.totalorder %v14159_v24, 0 }
  0xf9   : > { %14210 = vst [vmem:[#allocation87_spill] sm:$0xff] %v7994_v48  ;;  %v3107_v39 = vsel %vm3074_vm3, 1, %v14037_v46  ;;  %vm7997_vm9 = vmand %vm3786_vm12, %vm3818_vm1 }
  0xfa   : > { %3146 = vperm.xlu0 %6209, %v3107_v39   ;;  %vm3882_vm10 = vmand %vm7997_vm9, %vm14213_vm8  ;;  %v8022_v39 = vld [vmem:[%s13338_s5 + $0x28] sm:$0xff] }
  0xfb   : > { %vm3914_vm4 = vmand %vm3882_vm10, %vm14214_vm11  ;;  %v8012_v47 = vpop.permute.xlu1 %1528  ;;  %vm2591_vm11 = vcmp.ge.s32.totalorder %v8022_v39, 0  ;;  %vm2623_vm1 = vcmp.lt.s32.totalorder %v8022_v39, 16 }
  0xfc   : > { %14215 = vst [vmem:[#allocation88_spill] sm:$0xff] %v8012_v47  ;;  %v3947_v59 = vsel %vm3914_vm4, 1, %v14037_v46  ;;  %vm8015_vm12 = vmand %vm3785_vm7, %vm3817_vm14  ;;  %vm14219_vm4 = vcmp.lt.s32.totalorder %v14159_v24, 16  ;;  %vm13683_vm14 = vcmp.ge.s32.totalorder %v8010_v11, 0 }
  0xfd   : > { %3982 = vperm.xlu1 %6210, %v3947_v59   ;;  %vm3881_vm2 = vmand %vm8015_vm12, %vm14218_vm13  ;;  %v14223_v59 = vld [vmem:[#allocation7_spill] sm:$0xff]  ;;  %vm13662_vm13 = vcmp.lt.s32.totalorder %v8010_v11, 16 }
  0xfe   : > { %vm3913_vm3 = vmand %vm3881_vm2, %vm14219_vm4  ;;  %v8032_v54 = vpop.permute.xlu0 %1525  ;;  %vm14224_vm8 = vcmp.ge.s32.totalorder %v14223_v59, 0  ;;  %vm14225_vm2 = vcmp.lt.s32.totalorder %v14223_v59, 16 }
  0xff   : > { %14220 = vst [vmem:[#allocation89_spill] sm:$0xff] %v8032_v54  ;;  %v3946_v26 = vsel %vm3913_vm3, 1, %v14037_v46  ;;  %vm8035_vm7 = vmand %vm2591_vm11, %vm2623_vm1  ;;  %vm14227_vm11 = vnez %v13961_v6  ;;  %v8069_v6 = vld [vmem:[%s13335_s2] ss:$0 sm:$0xff] }
 0x100   : > { %3979 = vperm.xlu0 %6209, %v3946_v26   ;;  %vm2687_vm10 = vmand %vm8035_vm7, %vm14224_vm8  ;;  %v3755_v26 = vadd.s32 1, %v7851_v14  ;;  %vm14228_vm8 = vcmp.ge.s32.totalorder %v7786_v52, 0 }
 0x101   : > { %vm2719_vm4 = vmand %vm2687_vm10, %vm14225_vm2  ;;  %v8047_v24 = vpop.permute.xlu1 %1534  ;;  %vm14230_vm2 = vcmp.lt.s32.totalorder %v7786_v52, 16 }
 0x102   : > { %14226 = vst [vmem:[#allocation7_spill] sm:$0xff] %v8047_v24  ;;  %v2752_v54 = vsel %vm2719_vm4, 1, %v14037_v46  ;;  %vm2203_vm1 = vmand %vm14227_vm11, %vm13683_vm14  ;;  %vm14231_vm11 = vcmp.ge.s32.totalorder %v6587_v35, 0 }
 0x103   : > { %2795 = vperm.xlu1 %6210, %v2752_v54   ;;  %vm2267_vm3 = vmand %vm2203_vm1, %vm13662_vm13 }
 0x104   : > { %v2300_v48 = vsel %vm2267_vm3, 1, %v14037_v46  ;;  %vm3399_vm10 = vmand %vm7912_vm0, %vm14228_vm8  ;;  %v8062_v24 = vpop.permute.xlu0 %1531  ;;  %vm14232_vm0 = vcmp.lt.s32.totalorder %v6587_v35, 16  ;;  %vm3787_vm8 = vcmp.ge.s32.totalorder %v3755_v26, 0 }
 0x105   : > { %14229 = vst [vmem:[#allocation90_spill] sm:$0xff] %v8062_v24  ;;  %2345 = vperm.xlu0 %6209, %v2300_v48   ;;  %vm3431_vm4 = vmand %vm3399_vm10, %vm14230_vm2  ;;  %v8079_v48 = vadd.s32 1, %v6224_v31  ;;  %vm3819_vm10 = vcmp.lt.s32.totalorder %v3755_v26, 16  ;;  %v6026_v24 = vpop.f32.mrb[0].mxu0  ;;  %vm14234_vm2 = vcmp.ge.s32.totalorder %v7431_v34, 0 }
 0x106   : > { %v3464_v14 = vsel %vm3431_vm4, 1, %v14037_v46  ;;  %vm3043_vm1 = vmand %vm7955_vm5, %vm14231_vm11  ;;  %v651_v40 = vadd.f32 %v6026_v24, %v8069_v6  ;;  %v645_v31 = vpop.f32.mrb[1].mxu0  ;;  %vm14235_vm11 = vcmp.lt.s32.totalorder %v7431_v34, 16 }
 0x107   : > { %3503 = vperm.xlu1 %6210, %v3464_v14   ;;  %vm3075_vm3 = vmand %vm3043_vm1, %vm14232_vm0  ;;  %v8083_v54 = vpop.permute.xlu1 %1540  ;;  %v646_v14 = vadd.f32 %v8069_v6, %v645_v31  ;;  %vm13676_vm0 = vcmp.ge.s32.totalorder %v8079_v48, 0 }
 0x108   : > { %14233 = vst [vmem:[#allocation91_spill] sm:$0xff] %v8083_v54  ;;  %v3108_v2 = vsel %vm3075_vm3, 1, %v14037_v46  ;;  %vm4238_vm4 = vmand %vm8015_vm12, %vm14234_vm2  ;;  %v805_v37 = vadd.f32 3.0, %v651_v40  ;;  %vm14239_vm3 = vcmp.ge.s32.totalorder %v14176_v5, 0 }
 0x109   : > { %3149 = vperm.xlu0 %6209, %v3108_v2   ;;  %vm4270_vm13 = vmand %vm4238_vm4, %vm14235_vm11  ;;  %vm13675_vm4 = vcmp.lt.s32.totalorder %v8079_v48, 16  ;;  %v804_v34 = vadd.f32 3.0, %v646_v14  ;;  %v6029_v2 = vpop.f32.mrb[2].mxu0 }
 0x10a   : > { %v4303_v26 = vsel %vm4270_vm13, 1, %v14037_v46  ;;  %vm8095_vm1 = vmand %vm3787_vm8, %vm3819_vm10  ;;  %v8100_v13 = vpop.permute.xlu0 %1537  ;;  %vm14240_vm13 = vcmp.lt.s32.totalorder %v14176_v5, 16  ;;  %v837_v24 = vmax.f32 %v805_v37, 0.0  ;;  %v661_v31 = vadd.f32 %v6029_v2, %v8069_v6  ;;  %v655_v9 = vpop.f32.mrb[3].mxu0 }
 0x10b   : > { %14238 = vst [vmem:[#allocation92_spill] sm:$0xff] %v8100_v13  ;;  %4336 = vperm.xlu1 %6210, %v4303_v26   ;;  %vm3883_vm2 = vmand %vm8095_vm1, %vm14239_vm3  ;;  %vm14241_vm10 = vnez %v13957_v62  ;;  %v836_v25 = vmax.f32 %v804_v34, 0.0  ;;  %v656_v16 = vadd.f32 %v8069_v6, %v655_v9  ;;  %v8129_v62 = vld [vmem:[%s13338_s5 + $0x30] sm:$0xff]  ;;  %v6032_v55 = vpop.f32.mrb[4].mxu0 }
 0x10c   : > { %vm3915_vm8 = vmand %vm3883_vm2, %vm14240_vm13  ;;  %v869_v5 = vmin.f32 %v837_v24, 6.0  ;;  %v807_v37 = vadd.f32 3.0, %v661_v31  ;;  %vm14243_vm2 = vcmp.ge.s32.totalorder %v6523_v18, 0  ;;  %v671_v56 = vadd.f32 %v6032_v55, %v8069_v6  ;;  %v665_v50 = vpop.f32.mrb[5].mxu0 }
 0x10d   : > { %v3948_v13 = vsel %vm3915_vm8, 1, %v14037_v46  ;;  %vm2204_vm11 = vmand %vm14241_vm10, %vm13676_vm0  ;;  %v8115_v26 = vpop.permute.xlu1 %1546  ;;  %vm2592_vm8 = vcmp.ge.s32.totalorder %v8129_v62, 0  ;;  %v806_v9 = vadd.f32 3.0, %v656_v16  ;;  %vm14244_vm10 = vcmp.lt.s32.totalorder %v6523_v18, 16 }
 0x10e   : > { %14242 = vst [vmem:[#allocation93_spill] sm:$0xff] %v8115_v26  ;;  %3985 = vperm.xlu0 %6209, %v3948_v13   ;;  %vm2268_vm3 = vmand %vm2204_vm11, %vm13675_vm4  ;;  %v868_v13 = vmin.f32 %v836_v25, 6.0  ;;  %v901_v24 = vmul.f32 0.16666667, %v869_v5  ;;  %v839_v26 = vmax.f32 %v807_v37, 0.0  ;;  %vm3788_vm0 = vcmp.ge.s32.totalorder %v3756_v28, 0 }
 0x10f   : > { %v2301_v2 = vsel %vm2268_vm3, 1, %v14037_v46  ;;  %vm4239_vm13 = vmand %vm7997_vm9, %vm14243_vm2  ;;  %vm2624_vm3 = vcmp.lt.s32.totalorder %v8129_v62, 16  ;;  %vm14246_vm2 = vcmp.ge.s32.totalorder %v6558_v27, 0  ;;  %v838_v18 = vmax.f32 %v806_v9, 0.0 }
 0x110   : > { %2348 = vperm.xlu1 %6210, %v2301_v2   ;;  %vm4271_vm11 = vmand %vm4239_vm13, %vm14244_vm10  ;;  %v8135_v34 = vpop.permute.xlu0 %1543  ;;  %v900_v25 = vmul.f32 0.16666667, %v868_v13  ;;  %vm14247_vm13 = vcmp.lt.s32.totalorder %v6558_v27, 16  ;;  %v933_v5 = vmul.f32 %v901_v24, %v651_v40  ;;  %v871_v37 = vmin.f32 %v839_v26, 6.0  ;;  %v14251_v40 = vld [vmem:[#allocation10_spill] sm:$0xff]  ;;  %v6230_v13 = vld [vmem:[%s13339_s6 + $0x50] sm:$0xff] }
 0x111   : > { %14245 = vst [vmem:[#allocation94_spill] sm:$0xff] %v8135_v34  ;;  %v4304_v60 = vsel %vm4271_vm11, 1, %v14037_v46  ;;  %vm3044_vm4 = vmand %vm8035_vm7, %vm14246_vm2  ;;  %v809_v55 = vadd.f32 3.0, %v671_v56  ;;  %v8148_v34 = vadd.f32 %v8069_v6, %v665_v50  ;;  %vm3820_vm2 = vcmp.lt.s32.totalorder %v3756_v28, 16 }
 0x112   : > { %4339 = vperm.xlu0 %6209, %v4304_v60   ;;  %vm3076_vm10 = vmand %vm3044_vm4, %vm14247_vm13  ;;  %v8145_v2 = vpop.permute.xlu1 %1877  ;;  %v932_v60 = vmul.f32 %v900_v25, %v646_v14  ;;  %v870_v9 = vmin.f32 %v838_v18, 6.0  ;;  %vm14252_vm4 = vcmp.ge.s32.totalorder %v14251_v40, 0  ;;  %v903_v26 = vmul.f32 0.16666667, %v871_v37 }
 0x113   : > { %14248 = vst [vmem:[#allocation95_spill] sm:$0xff] %v8145_v2  ;;  %v3109_v58 = vsel %vm3076_vm10, 1, %v14037_v46  ;;  %vm8155_vm11 = vmand %vm2592_vm8, %vm2624_vm3  ;;  %v6035_v2 = vpop.f32.mrb[6].mxu0  ;;  %vm14254_vm10 = vcmask 523264   ;;  %v841_v24 = vmax.f32 %v809_v55, 0.0  ;;  %v808_v36 = vadd.f32 3.0, %v8148_v34 }
 0x114   : > { %3152 = vperm.xlu1 %6210, %v3109_v58   ;;  %vm2688_vm13 = vmand %vm8155_vm11, %vm14252_vm4  ;;  %v8163_v50 = vpop.permute.xlu0 %1874  ;;  %1004 = vst.msk [vmem:[#allocation2 + $0x20] sm:$0xff] %vm14254_vm10, %v933_v5  ;;  %v675_v10 = vpop.f32.mrb[7].mxu0  ;;  %vm14255_vm8 = vcmp.lt.s32.totalorder %v14251_v40, 16  ;;  %v6226_v58 = vld [vmem:[%s13339_s6 + $0x40] sm:$0xff]  ;;  %v902_v25 = vmul.f32 0.16666667, %v870_v9  ;;  %v8176_v18 = vadd.f32 %v6035_v2, %v8069_v6 }
 0x115   : > { %14253 = vst [vmem:[#allocation10_spill] sm:$0xff] %v8163_v50  ;;  %vm2720_vm3 = vmand %vm2688_vm13, %vm14255_vm8  ;;  %v8172_v14 = vadd.s32 1, %v6226_v58  ;;  %v935_v50 = vmul.f32 %v903_v26, %v661_v31  ;;  %v873_v22 = vmin.f32 %v841_v24, 6.0  ;;  %vm14260_vm13 = vcmp.ge.s32.totalorder %v14189_v15, 0 }
 0x116   : > { %vm14256_vm14 = vmmov %vm14254_vm10  ;;  %v2753_v5 = vsel %vm2720_vm3, 1, %v14037_v46  ;;  %v8185_v55 = vpop.permute.xlu1 %1883  ;;  %v934_v2 = vmul.f32 %v902_v25, %v656_v16  ;;  %vm14261_vm10 = vcmp.lt.s32.totalorder %v14189_v15, 16  ;;  %v840_v58 = vmax.f32 %v808_v36, 0.0 }
 0x117   : > { %1003 = vst.msk [vmem:[#allocation2 + $0x18] sm:$0xff] %vm14256_vm14, %v932_v60  ;;  %vm8181_vm4 = vmand %vm3788_vm0, %vm3820_vm2  ;;  %2798 = vperm.xlu0 %6209, %v2753_v5   ;;  %v6038_v60 = vpop.f32.mrb[8].mxu0  ;;  %vm14262_vm0 = vcmask 523264   ;;  %v905_v9 = vmul.f32 0.16666667, %v873_v22  ;;  %v811_v31 = vadd.f32 3.0, %v8176_v18  ;;  %v8198_v26 = vadd.f32 %v8069_v6, %v675_v10 }
 0x118   : > { %14259 = vst [vmem:[#allocation96_spill] sm:$0xff] %v8185_v55  ;;  %vm3884_vm14 = vmand %vm8181_vm4, %vm14260_vm13  ;;  %v8193_v28 = vpop.permute.xlu0 %1880  ;;  %v685_v24 = vpop.f32.mrb[9].mxu0  ;;  %vm14263_vm2 = vcmp.ge.s32.totalorder %v7844_v17, 0  ;;  %vm13692_vm13 = vcmp.ge.s32.totalorder %v8172_v14, 0  ;;  %v8208_v22 = vadd.f32 %v6038_v60, %v8069_v6  ;;  %v872_v16 = vmin.f32 %v840_v58, 6.0 }
 0x119   : > { %vm3916_vm8 = vmand %vm3884_vm14, %vm14261_vm10  ;;  %1006 = vst.msk [vmem:[#allocation2 + $0x30] sm:$0xff] %vm14262_vm0, %v935_v50  ;;  %vm14265_vm10 = vcmp.lt.s32.totalorder %v7844_v17, 16  ;;  %v937_v36 = vmul.f32 %v905_v9, %v671_v56  ;;  %v843_v15 = vmax.f32 %v811_v31, 0.0  ;;  %v810_v50 = vadd.f32 3.0, %v8198_v26  ;;  %v6041_v60 = vpop.f32.mrb[10].mxu0 }
 0x11a   : > { %v3949_v5 = vsel %vm3916_vm8, 1, %v14037_v46  ;;  %vm3400_vm3 = vmand %vm7955_vm5, %vm14263_vm2  ;;  %v8212_v10 = vpop.permute.xlu1 %1889  ;;  %vm14267_vm5 = vcmp.ge.s32.totalorder %v7736_v63, 0  ;;  %vm13687_vm2 = vcmp.lt.s32.totalorder %v8172_v14, 16  ;;  %v813_v25 = vadd.f32 3.0, %v8208_v22 }
 0x11b   : > { %vm14264_vm14 = vmmov %vm14262_vm0  ;;  %3988 = vperm.xlu1 %6210, %v3949_v5   ;;  %14266 = vst [vmem:[#allocation97_spill] sm:$0xff] %v8212_v10  ;;  %v904_v9 = vmul.f32 0.16666667, %v872_v16  ;;  %v875_v58 = vmin.f32 %v843_v15, 6.0  ;;  %v842_v20 = vmax.f32 %v810_v50, 0.0  ;;  %v8231_v31 = vadd.f32 %v6041_v60, %v8069_v6  ;;  %v695_v5 = vpop.f32.mrb[11].mxu0 }
 0x11c   : > { %1005 = vst.msk [vmem:[#allocation2 + $0x28] sm:$0xff] %vm14264_vm14, %v934_v2  ;;  %vm3432_vm0 = vmand %vm3400_vm3, %vm14265_vm10  ;;  %v8223_v2 = vadd.f32 %v8069_v6, %v685_v24  ;;  %vm14268_vm3 = vcmp.lt.s32.totalorder %v7736_v63, 16  ;;  %v8227_v56 = vpop.permute.xlu0 %1886  ;;  %vm14270_vm10 = vcmask 523264   ;;  %v8241_v63 = vld [vmem:[%s13338_s5 + $0x38] sm:$0xff]  ;;  %v845_v24 = vmax.f32 %v813_v25, 0.0  ;;  %v6044_v55 = vpop.f32.mrb[12].mxu0 }
 0x11d   : > { %v3465_v38 = vsel %vm3432_vm0, 1, %v14037_v46  ;;  %vm4595_vm8 = vmand %vm8015_vm12, %vm14267_vm5  ;;  %14269 = vst [vmem:[#allocation98_spill] sm:$0xff] %v8227_v56  ;;  %vm14271_vm12 = vcmp.ge.s32.totalorder %v7459_v4, 0  ;;  %vm2593_vm5 = vcmp.ge.s32.totalorder %v8241_v63, 0  ;;  %v936_v15 = vmul.f32 %v904_v9, %v8148_v34 }
 0x11e   : > { %3506 = vperm.xlu0 %6209, %v3465_v38   ;;  %vm4627_vm14 = vmand %vm4595_vm8, %vm14268_vm3  ;;  %1008 = vst.msk [vmem:[#allocation2 + $0x40] sm:$0xff] %vm14270_vm10, %v937_v36  ;;  %v812_v36 = vadd.f32 3.0, %v8223_v2  ;;  %vm14272_vm8 = vcmp.lt.s32.totalorder %v7459_v4, 16  ;;  %v8247_v16 = vpop.permute.xlu1 %1895  ;;  %v907_v50 = vmul.f32 0.16666667, %v875_v58  ;;  %v874_v38 = vmin.f32 %v842_v20, 6.0 }
 0x11f   : > { %v4660_v10 = vsel %vm4627_vm14, 1, %v14037_v46  ;;  %vm4240_vm0 = vmand %vm8095_vm1, %vm14271_vm12  ;;  %14273 = vst [vmem:[#allocation99_spill] sm:$0xff] %v8247_v16  ;;  %v815_v60 = vadd.f32 3.0, %v8231_v31  ;;  %vm14274_vm14 = vnez %v13973_v30  ;;  %v877_v25 = vmin.f32 %v845_v24, 6.0  ;;  %v705_v16 = vpop.f32.mrb[13].mxu0 }
 0x120   : > { %4693 = vperm.xlu1 %6210, %v4660_v10   ;;  %vm4272_vm3 = vmand %vm4240_vm0, %vm14272_vm8  ;;  %v3757_v10 = vadd.s32 1, %v7941_v12  ;;  %v844_v4 = vmax.f32 %v812_v36, 0.0  ;;  %v8259_v34 = vpop.permute.xlu0 %1892  ;;  %vm14275_vm0 = vcmask 523264   ;;  %v939_v9 = vmul.f32 %v907_v50, %v8176_v18 }
 0x121   : > { %v4305_v56 = vsel %vm4272_vm3, 1, %v14037_v46  ;;  %vm2205_vm10 = vmand %vm14274_vm14, %vm13692_vm13  ;;  %1007 = vst.msk [vmem:[#allocation2 + $0x38] sm:$0xff] %vm14275_vm0, %v936_v15  ;;  %v906_v58 = vmul.f32 0.16666667, %v874_v38  ;;  %v847_v20 = vmax.f32 %v815_v60, 0.0  ;;  %v8264_v30 = vadd.f32 %v8069_v6, %v695_v5  ;;  %v6047_v60 = vpop.f32.mrb[14].mxu0 }
 0x122   : > { %4342 = vperm.xlu0 %6209, %v4305_v56   ;;  %vm2269_vm12 = vmand %vm2205_vm10, %vm13687_vm2  ;;  %vm14276_vm8 = vcmp.ge.s32.totalorder %v7724_v29, 0  ;;  %vm2625_vm14 = vcmp.lt.s32.totalorder %v8241_v63, 16  ;;  %v909_v56 = vmul.f32 0.16666667, %v877_v25  ;;  %v876_v24 = vmin.f32 %v844_v4, 6.0  ;;  %v8274_v18 = vpop.permute.xlu1 %1901 }
 0x123   : > { %v2302_v12 = vsel %vm2269_vm12, 1, %v14037_v46  ;;  %vm4596_vm3 = vmand %vm7997_vm9, %vm14276_vm8  ;;  %vm14277_vm10 = vcmp.lt.s32.totalorder %v7724_v29, 16  ;;  %14278 = vst [vmem:[#allocation100_spill] sm:$0xff] %v8274_v18  ;;  %vm14279_vm2 = vcmask 523264   ;;  %v938_v5 = vmul.f32 %v906_v58, %v8198_v26  ;;  %v715_v58 = vpop.f32.mrb[15].mxu0 }
 0x124   : > { %2351 = vperm.xlu1 %6210, %v2302_v12   ;;  %vm4628_vm0 = vmand %vm4596_vm3, %vm14277_vm10  ;;  %1010 = vst.msk [vmem:[#allocation2 + $0x50] sm:$0xff] %vm14279_vm2, %v939_v9  ;;  %v879_v36 = vmin.f32 %v847_v20, 6.0  ;;  %v814_v15 = vadd.f32 3.0, %v8264_v30  ;;  %v8280_v44 = vadd.f32 %v6044_v55, %v8069_v6  ;;  %vm14280_vm9 = vcmp.ge.s32.totalorder %v6640_v49, 0  ;;  %v8290_v26 = vpop.permute.xlu0 %1898  ;;  %v6232_v20 = vld [vmem:[%s13339_s6 + $0x58] sm:$0xff] }
 0x125   : > { %v4661_v50 = vsel %vm4628_vm0, 1, %v14037_v46  ;;  %vm3045_vm12 = vmand %vm8155_vm11, %vm14280_vm9  ;;  %vm3789_vm8 = vcmp.ge.s32.totalorder %v3757_v10, 0  ;;  %v941_v29 = vmul.f32 %v909_v56, %v8208_v22  ;;  %v908_v38 = vmul.f32 0.16666667, %v876_v24  ;;  %14282 = vst [vmem:[#allocation101_spill] sm:$0xff] %v8290_v26 }
 0x126   : > { %4696 = vperm.xlu0 %6209, %v4661_v50   ;;  %vm14281_vm2 = vcmp.lt.s32.totalorder %v6640_v49, 16  ;;  %vm14283_vm10 = vcmask 523264   ;;  %v911_v55 = vmul.f32 0.16666667, %v879_v36  ;;  %v846_v25 = vmax.f32 %v814_v15, 0.0  ;;  %vm8302_vm0 = vmand %vm2593_vm5, %vm2625_vm14  ;;  %v8315_v24 = vpop.permute.xlu1 %1907 }
 0x127   : > { %vm3077_vm3 = vmand %vm3045_vm12, %vm14281_vm2  ;;  %1009 = vst.msk [vmem:[#allocation2 + $0x48] sm:$0xff] %vm14283_vm10, %v938_v5  ;;  %v817_v4 = vadd.f32 3.0, %v8280_v44  ;;  %v8295_v9 = vadd.f32 %v8069_v6, %v705_v16  ;;  %vm3821_vm9 = vcmp.lt.s32.totalorder %v3757_v10, 16  ;;  %v940_v12 = vmul.f32 %v908_v38, %v8223_v2  ;;  %v14287_v16 = vld [vmem:[#allocation9_spill] sm:$0xff]  ;;  %v6228_v2 = vld [vmem:[%s13339_s6 + $0x48] sm:$0xff] }
 0x128   : > { %v3110_v22 = vsel %vm3077_vm3, 1, %v14037_v46  ;;  %vm14286_vm12 = vmmov %vm14283_vm10  ;;  %v8309_v56 = vadd.f32 %v6047_v60, %v8069_v6  ;;  %vm14288_vm2 = vcmp.ge.s32.totalorder %v14287_v16, 0  ;;  %14289 = vst [vmem:[#allocation9_spill] sm:$0xff] %v8315_v24  ;;  %v943_v5 = vmul.f32 %v911_v55, %v8231_v31  ;;  %v6050_v31 = vpop.f32.mrb[16].mxu0  ;;  %v8348_v10 = vld [vmem:[%s13338_s5 + $0x40] sm:$0xff] }
 0x129   : > { %1012 = vst.msk [vmem:[#allocation2 + $0x60] sm:$0xff] %vm14286_vm12, %v941_v29  ;;  %3155 = vperm.xlu1 %6210, %v3110_v22   ;;  %vm2689_vm3 = vmand %vm8302_vm0, %vm14288_vm2  ;;  %v878_v36 = vmin.f32 %v846_v25, 6.0  ;;  %v849_v15 = vmax.f32 %v817_v4, 0.0  ;;  %v816_v50 = vadd.f32 3.0, %v8295_v9  ;;  %vm14290_vm5 = vcmp.lt.s32.totalorder %v14287_v16, 16  ;;  %v8338_v4 = vpop.permute.xlu0 %1904  ;;  %v725_v24 = vpop.f32.mrb[17].mxu0 }
 0x12a   : > { %vm2721_vm14 = vmand %vm2689_vm3, %vm14290_vm5  ;;  %v8324_v29 = vadd.s32 1, %v6228_v2  ;;  %1011 = vst.msk [vmem:[#allocation2 + $0x58] sm:$0xff] %vm14283_vm10, %v940_v12  ;;  %v819_v38 = vadd.f32 3.0, %v8309_v56  ;;  %v8329_v60 = vadd.f32 %v8069_v6, %v715_v58  ;;  %vm14295_vm3 = vcmp.ge.s32.totalorder %v14200_v1, 0 }
 0x12b   : > { %v2754_v55 = vsel %vm2721_vm14, 1, %v14037_v46  ;;  %vm8334_vm12 = vmand %vm3789_vm8, %vm3821_vm9  ;;  %14293 = vst [vmem:[#allocation102_spill] sm:$0xff] %v8338_v4  ;;  %v910_v22 = vmul.f32 0.16666667, %v878_v36  ;;  %v881_v12 = vmin.f32 %v849_v15, 6.0  ;;  %v848_v2 = vmax.f32 %v816_v50, 0.0  ;;  %v8357_v15 = vpop.permute.xlu1 %1913 }
 0x12c   : > { %vm14294_vm2 = vmmov %vm14283_vm10  ;;  %2801 = vperm.xlu0 %6209, %v2754_v55   ;;  %vm2594_vm8 = vcmp.ge.s32.totalorder %v8348_v10, 0  ;;  %v851_v58 = vmax.f32 %v819_v38, 0.0  ;;  %v8353_v36 = vadd.f32 %v6050_v31, %v8069_v6  ;;  %vm14296_vm9 = vcmp.lt.s32.totalorder %v14200_v1, 16  ;;  %14297 = vst [vmem:[#allocation103_spill] sm:$0xff] %v8357_v15  ;;  %v6053_v31 = vpop.f32.mrb[18].mxu0 }
 0x12d   : > { %1014 = vst.msk [vmem:[#allocation2 + $0x70] sm:$0xff] %vm14294_vm2, %v943_v5  ;;  %vm3885_vm5 = vmand %vm8334_vm12, %vm14295_vm3  ;;  %v818_v5 = vadd.f32 3.0, %v8329_v60  ;;  %v942_v50 = vmul.f32 %v910_v22, %v8264_v30  ;;  %v913_v55 = vmul.f32 0.16666667, %v881_v12  ;;  %v880_v4 = vmin.f32 %v848_v2, 6.0  ;;  %v8371_v30 = vpop.permute.xlu0 %1910  ;;  %v735_v2 = vpop.f32.mrb[19].mxu0 }
 0x12e   : > { %vm3917_vm14 = vmand %vm3885_vm5, %vm14296_vm9  ;;  %v8361_v18 = vadd.f32 %v8069_v6, %v725_v24  ;;  %vm14298_vm10 = vcmp.ge.s32.totalorder %v7932_v32, 0  ;;  %vm2626_vm3 = vcmp.lt.s32.totalorder %v8348_v10, 16  ;;  %v883_v1 = vmin.f32 %v851_v58, 6.0 }
 0x12f   : > { %v3950_v26 = vsel %vm3917_vm14, 1, %v14037_v46  ;;  %vm3401_vm2 = vmand %vm8035_vm7, %vm14298_vm10  ;;  %v850_v38 = vmax.f32 %v818_v5, 0.0  ;;  %vm14299_vm5 = vcmp.lt.s32.totalorder %v7932_v32, 16  ;;  %vm14300_vm13 = vcmask 523264  }
 0x130   : > { %3991 = vperm.xlu1 %6210, %v3950_v26   ;;  %vm3433_vm9 = vmand %vm3401_vm2, %vm14299_vm5  ;;  %1013 = vst.msk [vmem:[#allocation2 + $0x68] sm:$0xff] %vm14300_vm13, %v942_v50  ;;  %v945_v24 = vmul.f32 %v913_v55, %v8280_v44  ;;  %v912_v22 = vmul.f32 0.16666667, %v880_v4  ;;  %v821_v12 = vadd.f32 3.0, %v8353_v36  ;;  %v820_v47 = vadd.f32 3.0, %v8361_v18  ;;  %v8385_v44 = vpop.permute.xlu1 %1919 }
 0x131   : > { %v3466_v58 = vsel %vm3433_vm9, 1, %v14037_v46  ;;  %vm14301_vm7 = vcmp.ge.s32.totalorder %v7767_v51, 0  ;;  %vm13706_vm10 = vcmp.ge.s32.totalorder %v8324_v29, 0  ;;  %v915_v26 = vmul.f32 0.16666667, %v883_v1  ;;  %14303 = vst [vmem:[#allocation104_spill] sm:$0xff] %v8385_v44 }
 0x132   : > { %vm4597_vm14 = vmand %vm8095_vm1, %vm14301_vm7  ;;  %v882_v5 = vmin.f32 %v850_v38, 6.0  ;;  %3509 = vperm.xlu0 %6209, %v3466_v58   ;;  %vm14302_vm13 = vcmp.lt.s32.totalorder %v7767_v51, 16  ;;  %vm14304_vm5 = vcmask 523264   ;;  %v944_v4 = vmul.f32 %v912_v22, %v8295_v9  ;;  %v6056_v38 = vpop.f32.mrb[20].mxu0  ;;  %v8401_v9 = vpop.permute.xlu0 %1916 }
 0x133   : > { %vm4629_vm2 = vmand %vm4597_vm14, %vm14302_vm13  ;;  %1016 = vst.msk [vmem:[#allocation2 + $0x80] sm:$0xff] %vm14304_vm5, %v945_v24  ;;  %v853_v50 = vmax.f32 %v821_v12, 0.0  ;;  %v852_v55 = vmax.f32 %v820_v47, 0.0  ;;  %v8390_v15 = vadd.f32 %v6053_v31, %v8069_v6  ;;  %vm14305_vm1 = vcmp.ge.s32.totalorder %v7445_v7, 0  ;;  %v745_v47 = vpop.f32.mrb[21].mxu0 }
 0x134   : > { %v4662_v54 = vsel %vm4629_vm2, 1, %v14037_v46  ;;  %vm4241_vm9 = vmand %vm8181_vm4, %vm14305_vm1  ;;  %vm13699_vm7 = vcmp.lt.s32.totalorder %v8324_v29, 16  ;;  %v947_v51 = vmul.f32 %v915_v26, %v8309_v56  ;;  %v914_v1 = vmul.f32 0.16666667, %v882_v5  ;;  %14307 = vst [vmem:[#allocation105_spill] sm:$0xff] %v8401_v9  ;;  %v14311_v5 = vld [vmem:[#allocation12_spill] sm:$0xff] }
 0x135   : > { %4699 = vperm.xlu1 %6210, %v4662_v54   ;;  %vm14306_vm14 = vcmp.lt.s32.totalorder %v7445_v7, 16  ;;  %1015 = vst.msk [vmem:[#allocation2 + $0x78] sm:$0xff] %vm14304_vm5, %v944_v4  ;;  %v885_v31 = vmin.f32 %v853_v50, 6.0  ;;  %v884_v24 = vmin.f32 %v852_v55, 6.0  ;;  %v823_v22 = vadd.f32 3.0, %v8390_v15  ;;  %vm8413_vm2 = vmand %vm2594_vm8, %vm2626_vm3  ;;  %v8429_v4 = vpop.permute.xlu1 %1925 }
 0x136   : > { %vm4273_vm13 = vmand %vm4241_vm9, %vm14306_vm14  ;;  %v8406_v12 = vadd.f32 %v8069_v6, %v735_v2  ;;  %v8418_v58 = vadd.s32 1, %v8022_v39  ;;  %v946_v26 = vmul.f32 %v914_v1, %v8329_v60  ;;  %v8423_v2 = vadd.f32 %v6056_v38, %v8069_v6  ;;  %14313 = vst [vmem:[#allocation12_spill] sm:$0xff] %v8429_v4  ;;  %v6059_v1 = vpop.f32.mrb[22].mxu0 }
 0x137   : > { %v4306_v56 = vsel %vm4273_vm13, 1, %v14037_v46  ;;  %vm14310_vm1 = vmmov %vm14304_vm5  ;;  %vm14312_vm9 = vcmp.ge.s32.totalorder %v14311_v5, 0  ;;  %v917_v50 = vmul.f32 0.16666667, %v885_v31  ;;  %v916_v55 = vmul.f32 0.16666667, %v884_v24  ;;  %v8444_v31 = vpop.permute.xlu0 %1922 }
 0x138   : > { %1018 = vst.msk [vmem:[#allocation2 + $0x90] sm:$0xff] %vm14310_vm1, %v947_v51  ;;  %4345 = vperm.xlu0 %6209, %v4306_v56   ;;  %vm2690_vm14 = vmand %vm8413_vm2, %vm14312_vm9  ;;  %v855_v54 = vmax.f32 %v823_v22, 0.0  ;;  %v822_v39 = vadd.f32 3.0, %v8406_v12  ;;  %vm14314_vm8 = vcmp.lt.s32.totalorder %v14311_v5, 16  ;;  %v825_v60 = vadd.f32 3.0, %v8423_v2 }
 0x139   : > { %vm2722_vm3 = vmand %vm2690_vm14, %vm14314_vm8  ;;  %v8437_v51 = vadd.f32 %v8069_v6, %v745_v47  ;;  %vm14316_vm5 = vnez %v13965_v19  ;;  %14317 = vst [vmem:[#allocation106_spill] sm:$0xff] %v8444_v31  ;;  %v949_v24 = vmul.f32 %v917_v50, %v8353_v36  ;;  %v948_v22 = vmul.f32 %v916_v55, %v8361_v18  ;;  %v8457_v18 = vpop.permute.xlu1 %1931 }
 0x13a   : > { %vm14315_vm13 = vmmov %vm14310_vm1  ;;  %v2755_v38 = vsel %vm2722_vm3, 1, %v14037_v46  ;;  %v887_v56 = vmin.f32 %v855_v54, 6.0  ;;  %vm3790_vm14 = vcmp.ge.s32.totalorder %v8418_v58, 0  ;;  %v854_v47 = vmax.f32 %v822_v39, 0.0  ;;  %14319 = vst [vmem:[#allocation107_spill] sm:$0xff] %v8457_v18 }
 0x13b   : > { %1017 = vst.msk [vmem:[#allocation2 + $0x88] sm:$0xff] %vm14315_vm13, %v946_v26  ;;  %vm2206_vm1 = vmand %vm14316_vm5, %vm13706_vm10  ;;  %v755_v26 = vpop.f32.mrb[23].mxu0  ;;  %2804 = vperm.xlu1 %6210, %v2755_v38   ;;  %v857_v4 = vmax.f32 %v825_v60, 0.0  ;;  %v824_v44 = vadd.f32 3.0, %v8437_v51  ;;  %vm14318_vm8 = vcmp.ge.s32.totalorder %v8010_v11, 0  ;;  %v8462_v50 = vadd.f32 %v6059_v1, %v8069_v6 }
 0x13c   : > { %vm2270_vm9 = vmand %vm2206_vm1, %vm13699_vm7  ;;  %1020 = vst.msk [vmem:[#allocation2 + $0xa0] sm:$0xff] %vm14315_vm13, %v949_v24  ;;  %v919_v36 = vmul.f32 0.16666667, %v887_v56  ;;  %v8465_v55 = vadd.f32 %v8069_v6, %v755_v26  ;;  %vm14321_vm1 = vcmp.lt.s32.totalorder %v8010_v11, 16  ;;  %v8472_v54 = vadd.s32 1, %v6230_v13  ;;  %v6062_v24 = vpop.f32.mrb[24].mxu0 }
 0x13d   : > { %v2303_v19 = vsel %vm2270_vm9, 1, %v14037_v46  ;;  %vm3402_vm3 = vmand %vm8155_vm11, %vm14318_vm8  ;;  %v886_v39 = vmin.f32 %v854_v47, 6.0  ;;  %v889_v60 = vmin.f32 %v857_v4, 6.0  ;;  %v856_v38 = vmax.f32 %v824_v44, 0.0  ;;  %v765_v13 = vpop.f32.mrb[25].mxu0 }
 0x13e   : > { %vm14320_vm5 = vmmov %vm14315_vm13  ;;  %2354 = vperm.xlu0 %6209, %v2303_v19   ;;  %vm14322_vm11 = vcmp.ge.s32.totalorder %v6614_v42, 0  ;;  %v951_v56 = vmul.f32 %v919_v36, %v8390_v15  ;;  %v827_v26 = vadd.f32 3.0, %v8462_v50  ;;  %v826_v19 = vadd.f32 3.0, %v8465_v55  ;;  %v8492_v15 = vpop.permute.xlu1 %1937 }
 0x13f   : > { %1019 = vst.msk [vmem:[#allocation2 + $0x98] sm:$0xff] %vm14320_vm5, %v948_v22  ;;  %vm3434_vm9 = vmand %vm3402_vm3, %vm14321_vm1  ;;  %v8479_v22 = vpop.permute.xlu0 %1928  ;;  %vm14324_vm3 = vcmp.lt.s32.totalorder %v6614_v42, 16  ;;  %vm3822_vm5 = vcmp.lt.s32.totalorder %v8418_v58, 16  ;;  %v918_v44 = vmul.f32 0.16666667, %v886_v39  ;;  %v888_v47 = vmin.f32 %v856_v38, 6.0 }
 0x140   : > { %v3467_v1 = vsel %vm3434_vm9, 1, %v14037_v46  ;;  %vm3046_vm8 = vmand %vm8302_vm0, %vm14322_vm11  ;;  %14323 = vst [vmem:[#allocation108_spill] sm:$0xff] %v8479_v22  ;;  %v921_v4 = vmul.f32 0.16666667, %v889_v60  ;;  %vm14325_vm1 = vcmp.ge.s32.totalorder %v6587_v35, 0  ;;  %vm14327_vm11 = vcmask 523264  }
 0x141   : > { %3512 = vperm.xlu1 %6210, %v3467_v1   ;;  %vm3078_vm13 = vmand %vm3046_vm8, %vm14324_vm3  ;;  %14326 = vst [vmem:[#allocation109_spill] sm:$0xff] %v8492_v15  ;;  %v859_v36 = vmax.f32 %v827_v26, 0.0  ;;  %v858_v1 = vmax.f32 %v826_v19, 0.0  ;;  %vm14328_vm8 = vcmp.lt.s32.totalorder %v6587_v35, 16  ;;  %v950_v39 = vmul.f32 %v918_v44, %v8406_v12  ;;  %v6065_v22 = vpop.f32.mrb[26].mxu0  ;;  %v1100_v15 = vld [vmem:[#allocation2 + $0xf] sm:$0xff] }
 0x142   : > { %v3111_v18 = vsel %vm3078_vm13, 1, %v14037_v46  ;;  %vm4242_vm9 = vmand %vm8334_vm12, %vm14325_vm1  ;;  %1022 = vst.msk [vmem:[#allocation2 + $0xb0] sm:$0xff] %vm14327_vm11, %v951_v56  ;;  %v953_v60 = vmul.f32 %v921_v4, %v8423_v2  ;;  %v920_v38 = vmul.f32 0.16666667, %v888_v47  ;;  %vm13705_vm1 = vcmp.ge.s32.totalorder %v8472_v54, 0  ;;  %v775_v26 = vpop.f32.mrb[27].mxu0 }
 0x143   : > { %3158 = vperm.xlu0 %6209, %v3111_v18   ;;  %vm4274_vm3 = vmand %vm4242_vm9, %vm14328_vm8  ;;  %v8509_v35 = vpop.permute.xlu0 %1934  ;;  %v891_v18 = vmin.f32 %v859_v36, 6.0  ;;  %v890_v12 = vmin.f32 %v858_v1, 6.0  ;;  %vm14332_vm9 = vcmp.ge.s32.totalorder %v14223_v59, 0  ;;  %vm13700_vm8 = vcmp.lt.s32.totalorder %v8472_v54, 16  ;;  %v6068_v36 = vpop.f32.mrb[28].mxu0  ;;  %v8976_v56 = vld [vmem:[%s13338_s5 + $0x70] sm:$0xff] }
 0x144   : > { %v4307_v31 = vsel %vm4274_vm3, 1, %v14037_v46  ;;  %vm8504_vm13 = vmand %vm3790_vm14, %vm3822_vm5  ;;  %14331 = vst [vmem:[#allocation110_spill] sm:$0xff] %v8509_v35  ;;  %vm14333_vm3 = vcmask 523264   ;;  %v952_v58 = vmul.f32 %v920_v38, %v8437_v51  ;;  %v771_v2 = vadd.f32 %v6062_v24, %v8069_v6  ;;  %v8546_v38 = vld [vmem:[%s13338_s5 + $0x48] sm:$0xff] }
 0x145   : > { %4348 = vperm.xlu1 %6210, %v4307_v31   ;;  %vm3886_vm11 = vmand %vm8504_vm13, %vm14332_vm9  ;;  %1021 = vst.msk [vmem:[#allocation2 + $0xa8] sm:$0xff] %vm14333_vm3, %v950_v39  ;;  %v766_v19 = vadd.f32 %v8069_v6, %v765_v13  ;;  %vm14335_vm5 = vcmp.lt.s32.totalorder %v14223_v59, 16  ;;  %v8523_v31 = vpop.permute.xlu1 %1943  ;;  %v923_v44 = vmul.f32 0.16666667, %v891_v18  ;;  %v922_v4 = vmul.f32 0.16666667, %v890_v12 }
 0x146   : > { %vm14334_vm14 = vmmov %vm14333_vm3  ;;  %14336 = vst [vmem:[#allocation111_spill] sm:$0xff] %v8523_v31  ;;  %vm14337_vm9 = vnez %v13985_v53  ;;  %v829_v51 = vadd.f32 3.0, %v771_v2  ;;  %v3759_v59 = vadd.s32 1, %v8129_v62  ;;  %v781_v37 = vadd.f32 %v6065_v22, %v8069_v6 }
 0x147   : > { %1024 = vst.msk [vmem:[#allocation2 + $0xc0] sm:$0xff] %vm14334_vm14, %v953_v60  ;;  %vm3918_vm7 = vmand %vm3886_vm11, %vm14335_vm5  ;;  %v828_v24 = vadd.f32 3.0, %v766_v19  ;;  %v8534_v13 = vpop.permute.xlu0 %1940  ;;  %v955_v1 = vmul.f32 %v923_v44, %v8462_v50  ;;  %v954_v39 = vmul.f32 %v922_v4, %v8465_v55  ;;  %v785_v60 = vpop.f32.mrb[29].mxu0  ;;  %v776_v55 = vadd.f32 %v8069_v6, %v775_v26 }
 0x148   : > { %v3951_v47 = vsel %vm3918_vm7, 1, %v14037_v46  ;;  %vm2207_vm3 = vmand %vm14337_vm9, %vm13705_vm1  ;;  %1023 = vst.msk [vmem:[#allocation2 + $0xb8] sm:$0xff] %vm14334_vm14, %v952_v58  ;;  %vm14339_vm7 = vcmp.ge.s32.totalorder %v7786_v52, 0  ;;  %vm2595_vm9 = vcmp.ge.s32.totalorder %v8546_v38, 0  ;;  %v861_v62 = vmax.f32 %v829_v51, 0.0 }
 0x149   : > { %3994 = vperm.xlu0 %6209, %v3951_v47   ;;  %vm2271_vm11 = vmand %vm2207_vm3, %vm13700_vm8  ;;  %14338 = vst [vmem:[#allocation112_spill] sm:$0xff] %v8534_v13  ;;  %v860_v18 = vmax.f32 %v828_v24, 0.0  ;;  %vm14340_vm3 = vcmp.lt.s32.totalorder %v7786_v52, 16  ;;  %v8552_v50 = vpop.permute.xlu1 %1949  ;;  %vm14342_vm8 = vcmask 523264   ;;  %v791_v12 = vadd.f32 %v6068_v36, %v8069_v6  ;;  %v8804_v24 = vld [vmem:[%s13338_s5 + $0x60] sm:$0xff] }
 0x14a   : > { %v2304_v53 = vsel %vm2271_vm11, 1, %v14037_v46  ;;  %vm4598_vm5 = vmand %vm8181_vm4, %vm14339_vm7  ;;  %vm2627_vm11 = vcmp.lt.s32.totalorder %v8546_v38, 16  ;;  %14341 = vst [vmem:[#allocation113_spill] sm:$0xff] %v8552_v50  ;;  %vm14344_vm7 = vcmp.ge.s32.totalorder %v6697_v0, 0  ;;  %v893_v52 = vmin.f32 %v861_v62, 6.0 }
 0x14b   : > { %2357 = vperm.xlu1 %6210, %v2304_v53   ;;  %vm4630_vm14 = vmand %vm4598_vm5, %vm14340_vm3  ;;  %1026 = vst.msk [vmem:[#allocation2 + $0xd0] sm:$0xff] %vm14342_vm8, %v955_v1  ;;  %v892_v44 = vmin.f32 %v860_v18, 6.0  ;;  %v8566_v4 = vpop.permute.xlu0 %1946  ;;  %v831_v22 = vadd.f32 3.0, %v781_v37  ;;  %v830_v26 = vadd.f32 3.0, %v776_v55  ;;  %v833_v47 = vadd.f32 3.0, %v791_v12 }
 0x14c   : > { %vm14343_vm4 = vmmov %vm14342_vm8  ;;  %v4663_v58 = vsel %vm4630_vm14, 1, %v14037_v46  ;;  %vm14345_vm8 = vcmp.lt.s32.totalorder %v6697_v0, 16  ;;  %14346 = vst [vmem:[#allocation114_spill] sm:$0xff] %v8566_v4  ;;  %v925_v36 = vmul.f32 0.16666667, %v893_v52  ;;  %v786_v50 = vadd.f32 %v8069_v6, %v785_v60 }
 0x14d   : > { %1025 = vst.msk [vmem:[#allocation2 + $0xc8] sm:$0xff] %vm14343_vm4, %v954_v39  ;;  %vm3047_vm5 = vmand %vm8413_vm2, %vm14344_vm7  ;;  %4702 = vperm.xlu0 %6209, %v4663_v58   ;;  %vm3791_vm4 = vcmp.ge.s32.totalorder %v3759_v59, 0  ;;  %vm3823_vm7 = vcmp.lt.s32.totalorder %v3759_v59, 16  ;;  %v924_v1 = vmul.f32 0.16666667, %v892_v44  ;;  %v14349_v39 = vld [vmem:[#allocation11_spill] sm:$0xff]  ;;  %v8581_v53 = vpop.permute.xlu1 %1955 }
 0x14e   : > { %vm3079_vm3 = vmand %vm3047_vm5, %vm14345_vm8  ;;  %vm14350_vm5 = vcmp.ge.s32.totalorder %v14349_v39, 0  ;;  %14351 = vst [vmem:[#allocation11_spill] sm:$0xff] %v8581_v53  ;;  %v863_v62 = vmax.f32 %v831_v22, 0.0  ;;  %v862_v18 = vmax.f32 %v830_v26, 0.0  ;;  %v865_v58 = vmax.f32 %v833_v47, 0.0 }
 0x14f   : > { %v3112_v51 = vsel %vm3079_vm3, 1, %v14037_v46  ;;  %vm8573_vm14 = vmand %vm2595_vm9, %vm2627_vm11  ;;  %vm14352_vm9 = vcmp.lt.s32.totalorder %v14349_v39, 16  ;;  %v957_v4 = vmul.f32 %v925_v36, %v771_v2  ;;  %v956_v31 = vmul.f32 %v924_v1, %v766_v19 }
 0x150   : > { %3161 = vperm.xlu1 %6210, %v3112_v51   ;;  %vm2691_vm8 = vmand %vm8573_vm14, %vm14350_vm5  ;;  %v8592_v51 = vpop.permute.xlu0 %1952  ;;  %v895_v53 = vmin.f32 %v863_v62, 6.0  ;;  %v894_v22 = vmin.f32 %v862_v18, 6.0  ;;  %v897_v26 = vmin.f32 %v865_v58, 6.0  ;;  %vm14356_vm5 = vcmp.ge.s32.totalorder %v14251_v40, 0 }
 0x151   : > { %vm2723_vm11 = vmand %vm2691_vm8, %vm14352_vm9  ;;  %14355 = vst [vmem:[#allocation115_spill] sm:$0xff] %v8592_v51  ;;  %vm14357_vm9 = vcmask 523264   ;;  %v832_v6 = vadd.f32 3.0, %v786_v50  ;;  %v8602_v2 = vpop.permute.xlu1 %1961  ;;  %v8621_v62 = vadd.s32 1, %v6232_v20  ;;  %v14464_v51 = vld [vmem:[#allocation20_spill] sm:$0xff] }
 0x152   : > { %v2756_v52 = vsel %vm2723_vm11, 1, %v14037_v46  ;;  %vm8588_vm3 = vmand %vm3791_vm4, %vm3823_vm7  ;;  %1028 = vst.msk [vmem:[#allocation2 + $0xe0] sm:$0xff] %vm14357_vm9, %v957_v4  ;;  %vm14359_vm4 = vcmp.lt.s32.totalorder %v14251_v40, 16  ;;  %v927_v19 = vmul.f32 0.16666667, %v895_v53  ;;  %vm14361_vm11 = vcmp.ge.s32.totalorder %v8079_v48, 0 }
 0x153   : > { %2807 = vperm.xlu0 %6209, %v2756_v52   ;;  %vm3887_vm8 = vmand %vm8588_vm3, %vm14356_vm5  ;;  %14360 = vst [vmem:[#allocation116_spill] sm:$0xff] %v8602_v2  ;;  %v926_v59 = vmul.f32 0.16666667, %v894_v22  ;;  %v929_v60 = vmul.f32 0.16666667, %v897_v26  ;;  %v864_v36 = vmax.f32 %v832_v6, 0.0 }
 0x154   : > { %vm14358_vm1 = vmmov %vm14357_vm9  ;;  %v959_v40 = vmul.f32 %v927_v19, %v781_v37  ;;  %v8628_v37 = vld [vmem:[%s13338_s5 + $0x50] sm:$0xff]  ;;  %v14375_v26 = vld [vmem:[#allocation14_spill] sm:$0xff]  ;;  %v3760_v19 = vadd.s32 1, %v8241_v63 }
 0x155   : > { %1027 = vst.msk [vmem:[#allocation2 + $0xd8] sm:$0xff] %vm14358_vm1, %v956_v31  ;;  %vm3919_vm7 = vmand %vm3887_vm8, %vm14359_vm4  ;;  %vm14362_vm1 = vcmp.lt.s32.totalorder %v8079_v48, 16  ;;  %v8611_v31 = vpop.permute.xlu0 %1958  ;;  %v958_v4 = vmul.f32 %v926_v59, %v776_v55  ;;  %v961_v1 = vmul.f32 %v929_v60, %v791_v12  ;;  %vm14364_vm8 = vcmp.ge.s32.totalorder %v7844_v17, 0  ;;  %v8632_v25 = vpop.permute.xlu1 %1967  ;;  %v6234_v63 = vld [vmem:[%s13339_s6 + $0x60] sm:$0xff] }
 0x156   : > { %v3952_v47 = vsel %vm3919_vm7, 1, %v14037_v46  ;;  %vm3403_vm5 = vmand %vm8302_vm0, %vm14361_vm11  ;;  %14363 = vst [vmem:[#allocation117_spill] sm:$0xff] %v8611_v31  ;;  %v896_v18 = vmin.f32 %v864_v36, 6.0  ;;  %vm14365_vm0 = vcmp.lt.s32.totalorder %v7844_v17, 16  ;;  %vm2596_vm11 = vcmp.ge.s32.totalorder %v8628_v37, 0 }
 0x157   : > { %3997 = vperm.xlu1 %6210, %v3952_v47   ;;  %vm3435_vm9 = vmand %vm3403_vm5, %vm14362_vm1  ;;  %14366 = vst [vmem:[#allocation118_spill] sm:$0xff] %v8632_v25  ;;  %vm14367_vm5 = vcmask 523264   ;;  %v8689_v47 = vadd.s32 1, %v6234_v63 }
 0x158   : > { %v3468_v53 = vsel %vm3435_vm9, 1, %v14037_v46  ;;  %vm4599_vm4 = vmand %vm8334_vm12, %vm14364_vm8  ;;  %vm2628_vm12 = vcmp.lt.s32.totalorder %v8628_v37, 16  ;;  %1030 = vst.msk [vmem:[#allocation2 + $0xf0] sm:$0xff] %vm14367_vm5, %v959_v40  ;;  %vm14370_vm8 = vcmp.ge.s32.totalorder %v6558_v27, 0  ;;  %v928_v55 = vmul.f32 0.16666667, %v896_v18 }
 0x159   : > { %3515 = vperm.xlu0 %6209, %v3468_v53   ;;  %vm4631_vm7 = vmand %vm4599_vm4, %vm14365_vm0  ;;  %vm14371_vm0 = vcmp.lt.s32.totalorder %v6558_v27, 16  ;;  %v8644_v12 = vpop.permute.xlu0 %1964  ;;  %v8657_v27 = vpop.permute.xlu1 %2330 }
 0x15a   : > { %vm14368_vm1 = vmmov %vm14367_vm5  ;;  %v4664_v17 = vsel %vm4631_vm7, 1, %v14037_v46  ;;  %14372 = vst [vmem:[#allocation119_spill] sm:$0xff] %v8644_v12  ;;  %vm13708_vm7 = vcmp.ge.s32.totalorder %v8621_v62, 0  ;;  %v960_v22 = vmul.f32 %v928_v55, %v786_v50 }
 0x15b   : > { %1029 = vst.msk [vmem:[#allocation2 + $0xe8] sm:$0xff] %vm14368_vm1, %v958_v4  ;;  %vm14369_vm9 = vmmov %vm14368_vm1  ;;  %4705 = vperm.xlu1 %6210, %v4664_v17   ;;  %vm14376_vm1 = vcmp.ge.s32.totalorder %v14375_v26, 0 }
 0x15c   : > { %1032 = vst.msk [vmem:[#allocation2 + $0x100] sm:$0xff] %vm14369_vm9, %v961_v1  ;;  %vm4243_vm4 = vmand %vm8504_vm13, %vm14370_vm8  ;;  %vm13707_vm8 = vcmp.lt.s32.totalorder %v8621_v62, 16 }
 0x15d   : > { %vm4275_vm10 = vmand %vm4243_vm4, %vm14371_vm0  ;;  %vm14377_vm4 = vcmp.lt.s32.totalorder %v14375_v26, 16  ;;  %v8667_v50 = vpop.permute.xlu0 %2327 }
 0x15e   : > { %v4308_v58 = vsel %vm4275_vm10, 1, %v14037_v46  ;;  %vm8647_vm5 = vmand %vm2596_vm11, %vm2628_vm12  ;;  %vm14378_vm11 = vcmask 523264   ;;  %vm14379_vm12 = vnez %v13980_v43  ;;  %v8679_v43 = vpop.permute.xlu1 %2780 }
 0x15f   : > { %4351 = vperm.xlu0 %6209, %v4308_v58   ;;  %vm2692_vm9 = vmand %vm8647_vm5, %vm14376_vm1  ;;  %1031 = vst.msk [vmem:[#allocation2 + $0xf8] sm:$0xff] %vm14378_vm11, %v960_v22  ;;  %v14397_v58 = vld [vmem:[#allocation13_spill] sm:$0xff] }
 0x160   : > { %vm2724_vm10 = vmand %vm2692_vm9, %vm14377_vm4  ;;  %vm14380_vm9 = vcmp.ge.s32.totalorder %v8172_v14, 0  ;;  %vm14399_vm6 = vcmp.lt.s32.totalorder %v14397_v58, 16 }
 0x161   : > { %v2757_v6 = vsel %vm2724_vm10, 1, %v14037_v46  ;;  %vm2208_vm0 = vmand %vm14379_vm12, %vm13708_vm7  ;;  %vm14381_vm10 = vcmp.lt.s32.totalorder %v8172_v14, 16  ;;  %vm14382_vm12 = vcmp.ge.s32.totalorder %v6669_v57, 0  ;;  %v8693_v7 = vpop.permute.xlu0 %2333  ;;  %vm13709_vm7 = vcmp.lt.s32.totalorder %v8689_v47, 16 }
 0x162   : > { %2810 = vperm.xlu1 %6210, %v2757_v6   ;;  %vm2272_vm1 = vmand %vm2208_vm0, %vm13707_vm8  ;;  %v8702_v40 = vpop.permute.xlu1 %2336 }
 0x163   : > { %v2305_v59 = vsel %vm2272_vm1, 1, %v14037_v46  ;;  %vm3404_vm4 = vmand %vm8413_vm2, %vm14380_vm9  ;;  %vm14383_vm2 = vcmp.lt.s32.totalorder %v6669_v57, 16  ;;  %vm3792_vm9 = vcmp.ge.s32.totalorder %v3760_v19, 0 }
 0x164   : > { %2360 = vperm.xlu0 %6209, %v2305_v59   ;;  %vm3436_vm11 = vmand %vm3404_vm4, %vm14381_vm10  ;;  %vm3824_vm4 = vcmp.lt.s32.totalorder %v3760_v19, 16  ;;  %vm14384_vm10 = vcmp.ge.s32.totalorder %v6640_v49, 0 }
 0x165   : > { %v3469_v60 = vsel %vm3436_vm11, 1, %v14037_v46  ;;  %vm3048_vm0 = vmand %vm8573_vm14, %vm14382_vm12  ;;  %vm14385_vm12 = vcmp.lt.s32.totalorder %v6640_v49, 16  ;;  %v8717_v49 = vpop.permute.xlu0 %2783 }
 0x166   : > { %3518 = vperm.xlu1 %6210, %v3469_v60   ;;  %vm3080_vm1 = vmand %vm3048_vm0, %vm14383_vm2  ;;  %vm13710_vm2 = vcmp.ge.s32.totalorder %v8689_v47, 0  ;;  %v8726_v20 = vpop.permute.xlu1 %3137 }
 0x167   : > { %v3113_v36 = vsel %vm3080_vm1, 1, %v14037_v46  ;;  %vm4244_vm11 = vmand %vm8588_vm3, %vm14384_vm10  ;;  %vm14388_vm1 = vcmp.ge.s32.totalorder %v14287_v16, 0 }
 0x168   : > { %3164 = vperm.xlu0 %6209, %v3113_v36   ;;  %vm4276_vm8 = vmand %vm4244_vm11, %vm14385_vm12  ;;  %vm14389_vm11 = vcmp.lt.s32.totalorder %v14287_v16, 16  ;;  %v3761_v16 = vadd.s32 1, %v8348_v10 }
 0x169   : > { %v4309_v4 = vsel %vm4276_vm8, 1, %v14037_v46  ;;  %vm8705_vm0 = vmand %vm3792_vm9, %vm3824_vm4  ;;  %vm14390_vm8 = vnez %v14000_v23  ;;  %v8739_v23 = vld [vmem:[%s13338_s5 + $0x58] sm:$0xff]  ;;  %v8748_v10 = vpop.permute.xlu0 %2786 }
 0x16a   : > { %4354 = vperm.xlu1 %6210, %v4309_v4   ;;  %vm3888_vm10 = vmand %vm8705_vm0, %vm14388_vm1  ;;  %vm14391_vm1 = vcmp.ge.s32.totalorder %v7932_v32, 0  ;;  %v8757_v55 = vpop.permute.xlu1 %2339 }
 0x16b   : > { %vm3920_vm12 = vmand %vm3888_vm10, %vm14389_vm11  ;;  %vm14392_vm11 = vcmp.lt.s32.totalorder %v7932_v32, 16 }
 0x16c   : > { %v3953_v53 = vsel %vm3920_vm12, 1, %v14037_v46  ;;  %vm2209_vm9 = vmand %vm14390_vm8, %vm13710_vm2  ;;  %vm2597_vm8 = vcmp.ge.s32.totalorder %v8739_v23, 0  ;;  %vm3825_vm2 = vcmp.lt.s32.totalorder %v3761_v16, 16 }
 0x16d   : > { %4000 = vperm.xlu0 %6209, %v3953_v53   ;;  %vm2273_vm4 = vmand %vm2209_vm9, %vm13709_vm7  ;;  %vm2629_vm9 = vcmp.lt.s32.totalorder %v8739_v23, 16  ;;  %vm3793_vm7 = vcmp.ge.s32.totalorder %v3761_v16, 0  ;;  %v8765_v22 = vpop.permute.xlu0 %3140 }
 0x16e   : > { %v2306_v18 = vsel %vm2273_vm4, 1, %v14037_v46  ;;  %vm4600_vm10 = vmand %vm8504_vm13, %vm14391_vm1  ;;  %vm14393_vm4 = vcmp.ge.s32.totalorder %v6751_v21, 0  ;;  %vm14394_vm1 = vcmp.lt.s32.totalorder %v6751_v21, 16  ;;  %v8776_v59 = vpop.permute.xlu1 %3143 }
 0x16f   : > { %2363 = vperm.xlu1 %6210, %v2306_v18   ;;  %vm4632_vm12 = vmand %vm4600_vm10, %vm14392_vm11 }
 0x170   : > { %v4665_v17 = vsel %vm4632_vm12, 1, %v14037_v46  ;;  %vm3049_vm13 = vmand %vm8647_vm5, %vm14393_vm4  ;;  %vm14398_vm12 = vcmp.ge.s32.totalorder %v14397_v58, 0 }
 0x171   : > { %4708 = vperm.xlu0 %6209, %v4665_v17   ;;  %vm3081_vm10 = vmand %vm3049_vm13, %vm14394_vm1  ;;  %vm14403_vm1 = vcmp.lt.s32.totalorder %v14311_v5, 16  ;;  %v8787_v63 = vpop.permute.xlu0 %2789  ;;  %v14413_v17 = vld [vmem:[#allocation16_spill] sm:$0xff] }
 0x172   : > { %v3114_v32 = vsel %vm3081_vm10, 1, %v14037_v46  ;;  %vm8753_vm11 = vmand %vm2597_vm8, %vm2629_vm9  ;;  %vm14402_vm9 = vcmp.ge.s32.totalorder %v14311_v5, 0  ;;  %v6236_v5 = vld [vmem:[%s13339_s6 + $0x68] sm:$0xff]  ;;  %v8808_v44 = vpop.permute.xlu1 %3497 }
 0x173   : > { %3167 = vperm.xlu1 %6210, %v3114_v32   ;;  %vm2693_vm4 = vmand %vm8753_vm11, %vm14398_vm12  ;;  %vm14406_vm12 = vcmp.ge.s32.totalorder %v8010_v11, 0  ;;  %v8797_v4 = vadd.s32 1, %v6236_v5 }
 0x174   : > { %vm2725_vm15 = vmand %vm2693_vm4, %vm14399_vm6  ;;  %vm14404_vm6 = vcmp.ge.s32.totalorder %v8324_v29, 0 }
 0x175   : > { %v2758_v6 = vsel %vm2725_vm15, 1, %v14037_v46  ;;  %vm8768_vm8 = vmand %vm3793_vm7, %vm3825_vm2  ;;  %vm14405_vm7 = vcmp.lt.s32.totalorder %v8324_v29, 16 }
 0x176   : > { %2813 = vperm.xlu0 %6209, %v2758_v6   ;;  %vm3889_vm13 = vmand %vm8768_vm8, %vm14402_vm9  ;;  %v3762_v6 = vadd.s32 1, %v8546_v38  ;;  %v6238_v38 = vld [vmem:[%s13339_s6 + $0x70] sm:$0xff] }
 0x177   : > { %vm3921_vm10 = vmand %vm3889_vm13, %vm14403_vm1  ;;  %vm2598_vm13 = vcmp.ge.s32.totalorder %v8804_v24, 0  ;;  %vm2630_vm1 = vcmp.lt.s32.totalorder %v8804_v24, 16 }
 0x178   : > { %v3954_v60 = vsel %vm3921_vm10, 1, %v14037_v46  ;;  %vm3405_vm15 = vmand %vm8573_vm14, %vm14404_vm6  ;;  %vm14407_vm14 = vcmp.lt.s32.totalorder %v8010_v11, 16  ;;  %vm14409_vm6 = vcmp.lt.s32.totalorder %v6614_v42, 16  ;;  %v8817_v11 = vpop.permute.xlu0 %3494 }
 0x179   : > { %4003 = vperm.xlu1 %6210, %v3954_v60   ;;  %vm3437_vm2 = vmand %vm3405_vm15, %vm14405_vm7  ;;  %14410 = vst [vmem:[#allocation14_spill] sm:$0xff] %v8817_v11  ;;  %v9547_v11 = vld [vmem:[#allocation2 + $0x40] sm:$0xff] }
 0x17a   : > { %v3470_v36 = vsel %vm3437_vm2, 1, %v14037_v46  ;;  %vm4601_vm4 = vmand %vm8588_vm3, %vm14406_vm12  ;;  %vm14408_vm3 = vcmp.ge.s32.totalorder %v6614_v42, 0  ;;  %vm13730_vm2 = vcmp.ge.s32.totalorder %v8797_v4, 0  ;;  %vm14414_vm12 = vcmp.ge.s32.totalorder %v14413_v17, 0  ;;  %v8832_v42 = vpop.permute.xlu1 %2792 }
 0x17b   : > { %3521 = vperm.xlu0 %6209, %v3470_v36   ;;  %vm4633_vm9 = vmand %vm4601_vm4, %vm14407_vm14  ;;  %vm13715_vm14 = vcmp.lt.s32.totalorder %v8797_v4, 16  ;;  %14416 = vst [vmem:[#allocation13_spill] sm:$0xff] %v8832_v42  ;;  %v2101_v42 = vld [vmem:[#allocation2 + $0x9] sm:$0xff] }
 0x17c   : > { %v4666_v53 = vsel %vm4633_vm9, 1, %v14037_v46  ;;  %vm4245_vm10 = vmand %vm8705_vm0, %vm14408_vm3  ;;  %vm14415_vm9 = vcmp.lt.s32.totalorder %v14413_v17, 16  ;;  %v8842_v60 = vpop.permute.xlu0 %2342 }
 0x17d   : > { %4711 = vperm.xlu1 %6210, %v4666_v53   ;;  %vm4277_vm15 = vmand %vm4245_vm10, %vm14409_vm6  ;;  %14418 = vst [vmem:[#allocation16_spill] sm:$0xff] %v8842_v60  ;;  %vm14419_vm6 = vcmp.ge.s32.totalorder %v8472_v54, 0  ;;  %v8861_v53 = vadd.s32 1, %v6238_v38  ;;  %v9488_v60 = vld [vmem:[#allocation2 + $0x38] sm:$0xff] }
 0x17e   : > { %v4310_v18 = vsel %vm4277_vm15, 1, %v14037_v46  ;;  %vm8820_vm7 = vmand %vm2598_vm13, %vm2630_vm1  ;;  %vm14417_vm13 = vnez %v13991_v3  ;;  %v8851_v3 = vpop.permute.xlu1 %3500 }
 0x17f   : > { %4357 = vperm.xlu0 %6209, %v4310_v18   ;;  %vm2694_vm4 = vmand %vm8820_vm7, %vm14414_vm12  ;;  %vm14420_vm12 = vcmp.lt.s32.totalorder %v8472_v54, 16  ;;  %14421 = vst [vmem:[#allocation120_spill] sm:$0xff] %v8851_v3 }
 0x180   : > { %vm2726_vm3 = vmand %vm2694_vm4, %vm14415_vm9  ;;  %vm14422_vm9 = vcmp.ge.s32.totalorder %v6724_v8, 0  ;;  %v8865_v52 = vpop.permute.xlu0 %3146 }
 0x181   : > { %v2759_v32 = vsel %vm2726_vm3, 1, %v14037_v46  ;;  %vm2210_vm1 = vmand %vm14417_vm13, %vm13730_vm2  ;;  %14424 = vst [vmem:[#allocation121_spill] sm:$0xff] %v8865_v52  ;;  %v9462_v52 = vld [vmem:[#allocation2 + $0x2f] sm:$0xff] }
 0x182   : > { %2816 = vperm.xlu1 %6210, %v2759_v32   ;;  %vm2274_vm10 = vmand %vm2210_vm1, %vm13715_vm14  ;;  %vm3794_vm1 = vcmp.ge.s32.totalorder %v3762_v6, 0 }
 0x183   : > { %v2307_v36 = vsel %vm2274_vm10, 1, %v14037_v46  ;;  %vm3406_vm15 = vmand %vm8647_vm5, %vm14419_vm6  ;;  %vm14423_vm5 = vcmp.lt.s32.totalorder %v6724_v8, 16  ;;  %vm3826_vm10 = vcmp.lt.s32.totalorder %v3762_v6, 16  ;;  %vm14425_vm6 = vcmp.ge.s32.totalorder %v6697_v0, 0  ;;  %v8880_v6 = vpop.permute.xlu1 %3982 }
 0x184   : > { %2366 = vperm.xlu0 %6209, %v2307_v36   ;;  %vm3438_vm4 = vmand %vm3406_vm15, %vm14420_vm12  ;;  %vm14426_vm12 = vcmp.lt.s32.totalorder %v6697_v0, 16  ;;  %14429 = vst [vmem:[#allocation122_spill] sm:$0xff] %v8880_v6  ;;  %v14721_v6 = vld [vmem:[#allocation6_spill] sm:$0xff] }
 0x185   : > { %v3471_v5 = vsel %vm3438_vm4, 1, %v14037_v46  ;;  %vm3050_vm3 = vmand %vm8753_vm11, %vm14422_vm9 }
 0x186   : > { %3524 = vperm.xlu1 %6210, %v3471_v5   ;;  %vm3082_vm13 = vmand %vm3050_vm3, %vm14423_vm5  ;;  %vm13712_vm3 = vcmp.ge.s32.totalorder %v8861_v53, 0  ;;  %vm14430_vm5 = vcmp.ge.s32.totalorder %v14349_v39, 0  ;;  %v8894_v5 = vpop.permute.xlu0 %3979 }
 0x187   : > { %v3115_v18 = vsel %vm3082_vm13, 1, %v14037_v46  ;;  %vm4246_vm15 = vmand %vm8768_vm8, %vm14425_vm6  ;;  %vm13711_vm6 = vcmp.lt.s32.totalorder %v8861_v53, 16  ;;  %14433 = vst [vmem:[#allocation123_spill] sm:$0xff] %v8894_v5 }
 0x188   : > { %3170 = vperm.xlu0 %6209, %v3115_v18   ;;  %vm4278_vm4 = vmand %vm4246_vm15, %vm14426_vm12  ;;  %vm14431_vm15 = vcmp.lt.s32.totalorder %v14349_v39, 16  ;;  %v3763_v39 = vadd.s32 1, %v8628_v37  ;;  %v8913_v18 = vpop.permute.xlu1 %2795 }
 0x189   : > { %v4311_v32 = vsel %vm4278_vm4, 1, %v14037_v46  ;;  %vm8875_vm9 = vmand %vm3794_vm1, %vm3826_vm10  ;;  %vm14432_vm1 = vnez %v14014_v61  ;;  %v8909_v61 = vld [vmem:[%s13338_s5 + $0x68] sm:$0xff]  ;;  %14436 = vst [vmem:[#allocation124_spill] sm:$0xff] %v8913_v18  ;;  %v14600_v18 = vld [vmem:[#allocation76_spill] sm:$0xff] }
 0x18a   : > { %4360 = vperm.xlu1 %6210, %v4311_v32   ;;  %vm3890_vm13 = vmand %vm8875_vm9, %vm14430_vm5  ;;  %vm14434_vm5 = vcmp.ge.s32.totalorder %v8079_v48, 0 }
 0x18b   : > { %vm3922_vm12 = vmand %vm3890_vm13, %vm14431_vm15  ;;  %vm14435_vm15 = vcmp.lt.s32.totalorder %v8079_v48, 16  ;;  %v8922_v48 = vpop.permute.xlu0 %2345 }
 0x18c   : > { %v3955_v0 = vsel %vm3922_vm12, 1, %v14037_v46  ;;  %vm2211_vm10 = vmand %vm14432_vm1, %vm13712_vm3  ;;  %vm2599_vm1 = vcmp.ge.s32.totalorder %v8909_v61, 0  ;;  %14439 = vst [vmem:[#allocation125_spill] sm:$0xff] %v8922_v48  ;;  %vm3827_vm3 = vcmp.lt.s32.totalorder %v3763_v39, 16  ;;  %v9410_v48 = vld [vmem:[#allocation2 + $0x1f] sm:$0xff] }
 0x18d   : > { %4006 = vperm.xlu0 %6209, %v3955_v0   ;;  %vm2275_vm4 = vmand %vm2211_vm10, %vm13711_vm6  ;;  %vm2631_vm10 = vcmp.lt.s32.totalorder %v8909_v61, 16  ;;  %vm3795_vm6 = vcmp.ge.s32.totalorder %v3763_v39, 0  ;;  %v14442_v0 = vld [vmem:[#allocation15_spill] sm:$0xff] }
 0x18e   : > { %v2308_v38 = vsel %vm2275_vm4, 1, %v14037_v46  ;;  %vm4602_vm13 = vmand %vm8705_vm0, %vm14434_vm5  ;;  %vm14437_vm0 = vcmp.ge.s32.totalorder %v6809_v45, 0  ;;  %vm14438_vm5 = vcmp.lt.s32.totalorder %v6809_v45, 16 }
 0x18f   : > { %2369 = vperm.xlu1 %6210, %v2308_v38   ;;  %vm4634_vm12 = vmand %vm4602_vm13, %vm14435_vm15  ;;  %v8933_v38 = vpop.permute.xlu1 %3503  ;;  %v8942_v12 = vpop.permute.xlu0 %3149 }
 0x190   : > { %v4667_v1 = vsel %vm4634_vm12, 1, %v14037_v46  ;;  %vm3051_vm4 = vmand %vm8820_vm7, %vm14437_vm0  ;;  %vm14443_vm12 = vcmp.ge.s32.totalorder %v14442_v0, 0  ;;  %14444 = vst [vmem:[#allocation15_spill] sm:$0xff] %v8933_v38  ;;  %v9399_v38 = vld [vmem:[#allocation2 + $0x17] sm:$0xff] }
 0x191   : > { %4714 = vperm.xlu0 %6209, %v4667_v1   ;;  %vm3083_vm13 = vmand %vm3051_vm4, %vm14438_vm5  ;;  %vm14445_vm4 = vcmp.lt.s32.totalorder %v14442_v0, 16  ;;  %14448 = vst [vmem:[#allocation126_spill] sm:$0xff] %v8942_v12 }
 0x192   : > { %v3116_v37 = vsel %vm3083_vm13, 1, %v14037_v46  ;;  %vm8925_vm15 = vmand %vm2599_vm1, %vm2631_vm10  ;;  %vm14449_vm1 = vcmp.ge.s32.totalorder %v14375_v26, 0 }
 0x193   : > { %3173 = vperm.xlu1 %6210, %v3116_v37   ;;  %vm2695_vm0 = vmand %vm8925_vm15, %vm14443_vm12  ;;  %vm14450_vm12 = vcmp.lt.s32.totalorder %v14375_v26, 16  ;;  %v8950_v39 = vpop.permute.xlu1 %4336  ;;  %v6240_v26 = vld [vmem:[%s13339_s6 + $0x78] sm:$0xff]  ;;  %v8969_v31 = vpop.permute.xlu0 %3985 }
 0x194   : > { %vm2727_vm5 = vmand %vm2695_vm0, %vm14445_vm4  ;;  %14451 = vst [vmem:[#allocation127_spill] sm:$0xff] %v8950_v39  ;;  %vm14453_vm0 = vcmp.lt.s32.totalorder %v8621_v62, 16  ;;  %v8967_v2 = vadd.s32 1, %v6240_v26 }
 0x195   : > { %v2760_v1 = vsel %vm2727_vm5, 1, %v14037_v46  ;;  %vm8938_vm13 = vmand %vm3795_vm6, %vm3827_vm3  ;;  %vm14452_vm3 = vcmp.ge.s32.totalorder %v8621_v62, 0  ;;  %vm14454_vm5 = vcmp.ge.s32.totalorder %v8172_v14, 0  ;;  %14456 = vst [vmem:[#allocation129_spill] sm:$0xff] %v8969_v31  ;;  %v14588_v31 = vld [vmem:[#allocation10_spill] sm:$0xff] }
 0x196   : > { %2819 = vperm.xlu0 %6209, %v2760_v1   ;;  %vm3891_vm10 = vmand %vm8938_vm13, %vm14449_vm1  ;;  %14455 = vst [vmem:[#allocation128_spill] sm:$0xff] %v8967_v2 }
 0x197   : > { %vm3923_vm14 = vmand %vm3891_vm10, %vm14450_vm12  ;;  %vm2600_vm10 = vcmp.ge.s32.totalorder %v8976_v56, 0  ;;  %vm14458_vm12 = vcmp.ge.s32.totalorder %v6669_v57, 0  ;;  %v8995_v26 = vpop.permute.xlu0 %4339 }
 0x198   : > { %v3956_v37 = vsel %vm3923_vm14, 1, %v14037_v46  ;;  %vm3407_vm6 = vmand %vm8753_vm11, %vm14452_vm3  ;;  %vm14457_vm11 = vcmp.lt.s32.totalorder %v8172_v14, 16  ;;  %14463 = vst [vmem:[#allocation131_spill] sm:$0xff] %v8995_v26 }
 0x199   : > { %4009 = vperm.xlu1 %6210, %v3956_v37   ;;  %vm3439_vm4 = vmand %vm3407_vm6, %vm14453_vm0  ;;  %v8985_v37 = vpop.permute.xlu1 %2348  ;;  %vm14460_vm6 = vcmp.lt.s32.totalorder %v6669_v57, 16 }
 0x19a   : > { %v3472_v1 = vsel %vm3439_vm4, 1, %v14037_v46  ;;  %vm4603_vm1 = vmand %vm8768_vm8, %vm14454_vm5  ;;  %vm2632_vm8 = vcmp.lt.s32.totalorder %v8976_v56, 16  ;;  %14459 = vst [vmem:[#allocation130_spill] sm:$0xff] %v8985_v37  ;;  %vm13729_vm5 = vcmp.ge.s32.totalorder %v8967_v2, 0 }
 0x19b   : > { %3527 = vperm.xlu0 %6209, %v3472_v1   ;;  %vm4635_vm14 = vmand %vm4603_vm1, %vm14457_vm11  ;;  %vm14465_vm1 = vcmp.ge.s32.totalorder %v14464_v51, 0 }
 0x19c   : > { %v4668_v19 = vsel %vm4635_vm14, 1, %v14037_v46  ;;  %vm4247_vm3 = vmand %vm8875_vm9, %vm14458_vm12  ;;  %vm13724_vm14 = vcmp.lt.s32.totalorder %v8967_v2, 16  ;;  %vm14466_vm12 = vcmp.lt.s32.totalorder %v14464_v51, 16 }
 0x19d   : > { %4717 = vperm.xlu1 %6210, %v4668_v19   ;;  %vm4279_vm0 = vmand %vm4247_vm3, %vm14460_vm6  ;;  %v9004_v57 = vpop.permute.xlu1 %3152 }
 0x19e   : > { %v4312_v14 = vsel %vm4279_vm0, 1, %v14037_v46  ;;  %vm8990_vm4 = vmand %vm2600_vm10, %vm2632_vm8  ;;  %14467 = vst [vmem:[#allocation20_spill] sm:$0xff] %v9004_v57  ;;  %vm14468_vm10 = vnez %v14008_v41  ;;  %vm14469_vm0 = vcmp.ge.s32.totalorder %v8689_v47, 0  ;;  %v9019_v57 = vpop.permute.xlu0 %2798 }
 0x19f   : > { %4363 = vperm.xlu0 %6209, %v4312_v14   ;;  %vm2696_vm11 = vmand %vm8990_vm4, %vm14465_vm1  ;;  %v3764_v14 = vadd.s32 1, %v8739_v23  ;;  %14470 = vst [vmem:[#allocation132_spill] sm:$0xff] %v9019_v57  ;;  %v6242_v23 = vld [vmem:[%s13339_s6 + $0x80] sm:$0xff] }
 0x1a0   : > { %vm2728_vm3 = vmand %vm2696_vm11, %vm14466_vm12  ;;  %vm14471_vm11 = vcmp.lt.s32.totalorder %v8689_v47, 16  ;;  %v9031_v16 = vadd.s32 1, %v6242_v23 }
 0x1a1   : > { %v2761_v19 = vsel %vm2728_vm3, 1, %v14037_v46  ;;  %vm2212_vm8 = vmand %vm14468_vm10, %vm13729_vm5  ;;  %vm14472_vm3 = vcmp.ge.s32.totalorder %v6781_v33, 0 }
 0x1a2   : > { %2822 = vperm.xlu1 %6210, %v2761_v19   ;;  %vm2276_vm6 = vmand %vm2212_vm8, %vm13724_vm14  ;;  %14473 = vst [vmem:[#allocation133_spill] sm:$0xff] %v9031_v16  ;;  %v9044_v23 = vpop.permute.xlu0 %3506  ;;  %vm14488_vm14 = vcmp.ge.s32.totalorder %v8324_v29, 0 }
 0x1a3   : > { %v2309_v13 = vsel %vm2276_vm6, 1, %v14037_v46  ;;  %vm3408_vm1 = vmand %vm8820_vm7, %vm14469_vm0  ;;  %vm14474_vm7 = vcmp.lt.s32.totalorder %v6781_v33, 16  ;;  %vm3796_vm6 = vcmp.ge.s32.totalorder %v3764_v14, 0  ;;  %vm3828_vm0 = vcmp.lt.s32.totalorder %v3764_v14, 16  ;;  %14478 = vst [vmem:[#allocation135_spill] sm:$0xff] %v9044_v23  ;;  %v14485_v23 = vld [vmem:[#allocation29_spill] sm:$0xff] }
 0x1a4   : > { %2372 = vperm.xlu0 %6209, %v2309_v13   ;;  %vm3440_vm12 = vmand %vm3408_vm1, %vm14471_vm11  ;;  %v9035_v13 = vpop.permute.xlu1 %3988  ;;  %vm14476_vm1 = vcmp.ge.s32.totalorder %v6751_v21, 0 }
 0x1a5   : > { %v3473_v41 = vsel %vm3440_vm12, 1, %v14037_v46  ;;  %vm3052_vm10 = vmand %vm8925_vm15, %vm14472_vm3  ;;  %14475 = vst [vmem:[#allocation134_spill] sm:$0xff] %v9035_v13  ;;  %vm14477_vm12 = vcmp.lt.s32.totalorder %v6751_v21, 16 }
 0x1a6   : > { %3530 = vperm.xlu1 %6210, %v3473_v41   ;;  %vm3084_vm8 = vmand %vm3052_vm10, %vm14474_vm7  ;;  %v471_v41 = vld [vmem:[%s6530_s18 + $0xf0] sm:$0xff]  ;;  %vm13727_vm7 = vcmp.ge.s32.totalorder %v9031_v16, 0 }
 0x1a7   : > { %v3117_v19 = vsel %vm3084_vm8, 1, %v14037_v46  ;;  %vm4248_vm11 = vmand %vm8938_vm13, %vm14476_vm1  ;;  %vm14481_vm8 = vcmask 130048   ;;  %vm14482_vm1 = vcmp.ge.s32.totalorder %v14397_v58, 0 }
 0x1a8   : > { %3176 = vperm.xlu0 %6209, %v3117_v19   ;;  %vm4280_vm3 = vmand %vm4248_vm11, %vm14477_vm12  ;;  %6069 = vmatprep.mubr.msk.f32.mxu0 %vm14481_vm8, %v471_v41  ;;  %vm13726_vm12 = vcmp.lt.s32.totalorder %v9031_v16, 16  ;;  %v9059_v21 = vpop.permute.xlu1 %4693  ;;  %v472_v41 = vld [vmem:[%s6530_s18 + $0xf8] sm:$0xff] }
 0x1a9   : > { %v4313_v57 = vsel %vm4280_vm3, 1, %v14037_v46  ;;  %vm9048_vm10 = vmand %vm3796_vm6, %vm3828_vm0  ;;  %14483 = vst [vmem:[#allocation136_spill] sm:$0xff] %v9059_v21  ;;  %vm14484_vm3 = vcmp.lt.s32.totalorder %v14397_v58, 16  ;;  %vm14486_vm0 = vnez %v14485_v23  ;;  %v3765_v58 = vadd.s32 1, %v8804_v24  ;;  %v9087_v23 = vld [vmem:[%s13338_s5 + $0x78] sm:$0xff]  ;;  %v14492_v24 = vld [vmem:[#allocation19_spill] sm:$0xff] }
 0x1aa   : > { %4366 = vperm.xlu1 %6210, %v4313_v57   ;;  %vm3892_vm11 = vmand %vm9048_vm10, %vm14482_vm1  ;;  %v9068_v57 = vpop.permute.xlu0 %4342  ;;  %v14581_v21 = vld [vmem:[#allocation72_spill] sm:$0xff] }
 0x1ab   : > { %vm3924_vm6 = vmand %vm3892_vm11, %vm14484_vm3  ;;  %14487 = vst [vmem:[#allocation29_spill] sm:$0xff] %v9068_v57  ;;  %vm14490_vm3 = vcmask 130048  }
 0x1ac   : > { %v3957_v19 = vsel %vm3924_vm6, 1, %v14037_v46  ;;  %vm2213_vm8 = vmand %vm14486_vm0, %vm13727_vm7  ;;  %v9079_v26 = vpop.permute.xlu1 %2351  ;;  %6070 = vmatmul.mubr.msk.f32.gmra.mrb[30].mxu0 %vm14490_vm3, %v472_v41  ;;  %vm14491_vm6 = vcmp.lt.s32.totalorder %v8324_v29, 16  ;;  %vm3829_vm7 = vcmp.lt.s32.totalorder %v3765_v58, 16 }
 0x1ad   : > { %4012 = vperm.xlu0 %6209, %v3957_v19   ;;  %vm2277_vm1 = vmand %vm2213_vm8, %vm13726_vm12  ;;  %14489 = vst [vmem:[#allocation137_spill] sm:$0xff] %v9079_v26  ;;  %vm2601_vm8 = vcmp.ge.s32.totalorder %v9087_v23, 0  ;;  %vm3797_vm12 = vcmp.ge.s32.totalorder %v3765_v58, 0  ;;  %v14499_v26 = vld [vmem:[#allocation18_spill] sm:$0xff] }
 0x1ae   : > { %v2310_v13 = vsel %vm2277_vm1, 1, %v14037_v46  ;;  %vm4604_vm11 = vmand %vm8875_vm9, %vm14488_vm14  ;;  %vm2633_vm1 = vcmp.lt.s32.totalorder %v9087_v23, 16  ;;  %vm14493_vm9 = vcmp.ge.s32.totalorder %v14492_v24, 0  ;;  %vm14501_vm5 = vcmp.lt.s32.totalorder %v14499_v26, 16 }
 0x1af   : > { %2375 = vperm.xlu1 %6210, %v2310_v13   ;;  %vm4636_vm0 = vmand %vm4604_vm11, %vm14491_vm6  ;;  %v9096_v13 = vpop.permute.xlu0 %4696  ;;  %vm14495_vm11 = vcmp.lt.s32.totalorder %v14492_v24, 16 }
 0x1b0   : > { %v4669_v36 = vsel %vm4636_vm0, 1, %v14037_v46  ;;  %vm3053_vm14 = vmand %vm8990_vm4, %vm14493_vm9  ;;  %14494 = vst [vmem:[#allocation19_spill] sm:$0xff] %v9096_v13  ;;  %v9105_v41 = vpop.permute.xlu1 %3155  ;;  %vm14500_vm0 = vcmp.ge.s32.totalorder %v14499_v26, 0 }
 0x1b1   : > { %4720 = vperm.xlu0 %6209, %v4669_v36   ;;  %vm3085_vm3 = vmand %vm3053_vm14, %vm14495_vm11  ;;  %14498 = vst [vmem:[#allocation138_spill] sm:$0xff] %v9105_v41  ;;  %vm14506_vm11 = vcmp.lt.s32.totalorder %v14413_v17, 16 }
 0x1b2   : > { %v3118_v29 = vsel %vm3085_vm3, 1, %v14037_v46  ;;  %vm9101_vm6 = vmand %vm2601_vm8, %vm2633_vm1  ;;  %vm14505_vm8 = vcmp.ge.s32.totalorder %v14413_v17, 0  ;;  %v6244_v17 = vld [vmem:[%s13339_s6 + $0x88] sm:$0xff] }
 0x1b3   : > { %3179 = vperm.xlu1 %6210, %v3118_v29   ;;  %vm2697_vm9 = vmand %vm9101_vm6, %vm14500_vm0  ;;  %v9118_v13 = vpop.permute.xlu0 %2801  ;;  %vm14510_vm0 = vcmp.ge.s32.totalorder %v8472_v54, 0 }
 0x1b4   : > { %vm2729_vm2 = vmand %vm2697_vm9, %vm14501_vm5  ;;  %14504 = vst [vmem:[#allocation18_spill] sm:$0xff] %v9118_v13  ;;  %vm14507_vm5 = vcmp.ge.s32.totalorder %v8797_v4, 0  ;;  %v9131_v29 = vpop.permute.xlu1 %3991  ;;  %v9143_v13 = vadd.s32 1, %v6244_v17  ;;  %v14589_v17 = vld [vmem:[#allocation21_spill] sm:$0xff] }
 0x1b5   : > { %v2762_v36 = vsel %vm2729_vm2, 1, %v14037_v46  ;;  %vm9114_vm14 = vmand %vm3797_vm12, %vm3829_vm7  ;;  %14508 = vst [vmem:[#allocation139_spill] sm:$0xff] %v9131_v29  ;;  %vm14509_vm7 = vcmp.lt.s32.totalorder %v8797_v4, 16  ;;  %v14519_v29 = vld [vmem:[#allocation24_spill] sm:$0xff] }
 0x1b6   : > { %2825 = vperm.xlu0 %6209, %v2762_v36   ;;  %vm3893_vm1 = vmand %vm9114_vm14, %vm14505_vm8 }
 0x1b7   : > { %vm3925_vm3 = vmand %vm3893_vm1, %vm14506_vm11  ;;  %v9145_v32 = vpop.permute.xlu0 %3509  ;;  %vm14513_vm11 = vcmp.ge.s32.totalorder %v6724_v8, 0 }
 0x1b8   : > { %v3958_v58 = vsel %vm3925_vm3, 1, %v14037_v46  ;;  %vm3409_vm2 = vmand %vm8925_vm15, %vm14507_vm5  ;;  %14511 = vst [vmem:[#allocation140_spill] sm:$0xff] %v9145_v32  ;;  %vm14512_vm15 = vcmp.lt.s32.totalorder %v8472_v54, 16  ;;  %vm14515_vm5 = vcmp.lt.s32.totalorder %v6724_v8, 16 }
 0x1b9   : > { %4015 = vperm.xlu1 %6210, %v3958_v58   ;;  %vm3441_vm12 = vmand %vm3409_vm2, %vm14509_vm7  ;;  %v9152_v58 = vld [vmem:[%s13338_s5 + $0x80] sm:$0xff] }
 0x1ba   : > { %v3474_v36 = vsel %vm3441_vm12, 1, %v14037_v46  ;;  %vm4605_vm9 = vmand %vm8938_vm13, %vm14510_vm0  ;;  %vm2602_vm1 = vcmp.ge.s32.totalorder %v9152_v58, 0  ;;  %vm2634_vm13 = vcmp.lt.s32.totalorder %v9152_v58, 16  ;;  %vm13748_vm12 = vcmp.ge.s32.totalorder %v9143_v13, 0 }
 0x1bb   : > { %3533 = vperm.xlu0 %6209, %v3474_v36   ;;  %vm4637_vm8 = vmand %vm4605_vm9, %vm14512_vm15  ;;  %v9161_v36 = vpop.permute.xlu1 %4699  ;;  %v9171_v32 = vpop.permute.xlu0 %4345  ;;  %vm14520_vm0 = vcmp.ge.s32.totalorder %v14519_v29, 0  ;;  %vm13747_vm15 = vcmp.lt.s32.totalorder %v9143_v13, 16 }
 0x1bc   : > { %v4670_v25 = vsel %vm4637_vm8, 1, %v14037_v46  ;;  %vm4249_vm3 = vmand %vm9048_vm10, %vm14513_vm11  ;;  %14514 = vst [vmem:[#allocation141_spill] sm:$0xff] %v9161_v36  ;;  %vm14521_vm8 = vcmp.lt.s32.totalorder %v14519_v29, 16 }
 0x1bd   : > { %4723 = vperm.xlu1 %6210, %v4670_v25   ;;  %vm4281_vm2 = vmand %vm4249_vm3, %vm14515_vm5  ;;  %14518 = vst [vmem:[#allocation142_spill] sm:$0xff] %v9171_v32  ;;  %v14522_v25 = vld [vmem:[#allocation26_spill] sm:$0xff]  ;;  %vm14525_vm5 = vcmp.ge.s32.totalorder %v8861_v53, 0 }
 0x1be   : > { %v4314_v54 = vsel %vm4281_vm2, 1, %v14037_v46  ;;  %vm9166_vm7 = vmand %vm2602_vm1, %vm2634_vm13  ;;  %vm14523_vm1 = vnez %v14522_v25  ;;  %v14528_v25 = vld [vmem:[#allocation17_spill] sm:$0xff] }
 0x1bf   : > { %4369 = vperm.xlu0 %6209, %v4314_v54   ;;  %vm2698_vm9 = vmand %vm9166_vm7, %vm14520_vm0  ;;  %v9185_v41 = vpop.permute.xlu1 %2804  ;;  %v3766_v54 = vadd.s32 1, %v8909_v61  ;;  %v9195_v36 = vpop.permute.xlu0 %2354  ;;  %vm14527_vm0 = vcmp.lt.s32.totalorder %v8861_v53, 16  ;;  %v6246_v61 = vld [vmem:[%s13339_s6 + $0x90] sm:$0xff] }
 0x1c0   : > { %vm2730_vm11 = vmand %vm2698_vm9, %vm14521_vm8  ;;  %14524 = vst [vmem:[#allocation24_spill] sm:$0xff] %v9185_v41  ;;  %vm14529_vm8 = vcmp.ge.s32.totalorder %v14528_v25, 0  ;;  %v9207_v41 = vadd.s32 1, %v6246_v61  ;;  %v9521_v61 = vld [vmem:[%s13336_s3 + $0x2] ss:$0 sm:$0xff] }
 0x1c1   : > { %v2763_v8 = vsel %vm2730_vm11, 1, %v14037_v46  ;;  %vm2214_vm13 = vmand %vm14523_vm1, %vm13748_vm12  ;;  %14526 = vst [vmem:[#allocation26_spill] sm:$0xff] %v9195_v36 }
 0x1c2   : > { %2828 = vperm.xlu1 %6210, %v2763_v8   ;;  %vm2278_vm3 = vmand %vm2214_vm13, %vm13747_vm15  ;;  %14530 = vst [vmem:[#allocation17_spill] sm:$0xff] %v9207_v41  ;;  %vm3798_vm13 = vcmp.ge.s32.totalorder %v3766_v54, 0 }
 0x1c3   : > { %v2311_v32 = vsel %vm2278_vm3, 1, %v14037_v46  ;;  %vm3410_vm2 = vmand %vm8990_vm4, %vm14525_vm5  ;;  %v9209_v1 = vpop.permute.xlu1 %3512  ;;  %vm14532_vm4 = vcmp.lt.s32.totalorder %v14528_v25, 16  ;;  %vm3830_vm3 = vcmp.lt.s32.totalorder %v3766_v54, 16  ;;  %vm14533_vm5 = vcmp.ge.s32.totalorder %v6809_v45, 0  ;;  %v9218_v36 = vpop.permute.xlu0 %3158 }
 0x1c4   : > { %2378 = vperm.xlu0 %6209, %v2311_v32   ;;  %vm3442_vm9 = vmand %vm3410_vm2, %vm14527_vm0  ;;  %14531 = vst [vmem:[#allocation143_spill] sm:$0xff] %v9209_v1  ;;  %vm14535_vm0 = vcmp.lt.s32.totalorder %v6809_v45, 16 }
 0x1c5   : > { %v3475_v8 = vsel %vm3442_vm9, 1, %v14037_v46  ;;  %vm3054_vm11 = vmand %vm9101_vm6, %vm14529_vm8  ;;  %14534 = vst [vmem:[#allocation144_spill] sm:$0xff] %v9218_v36 }
 0x1c6   : > { %3536 = vperm.xlu1 %6210, %v3475_v8   ;;  %vm3086_vm1 = vmand %vm3054_vm11, %vm14532_vm4  ;;  %vm13744_vm11 = vcmp.ge.s32.totalorder %v9207_v41, 0  ;;  %vm14539_vm4 = vcmp.ge.s32.totalorder %v14442_v0, 0 }
 0x1c7   : > { %v3119_v32 = vsel %vm3086_vm1, 1, %v14037_v46  ;;  %vm4250_vm2 = vmand %vm9114_vm14, %vm14533_vm5  ;;  %v9228_v54 = vpop.permute.xlu1 %4348  ;;  %vm13743_vm5 = vcmp.lt.s32.totalorder %v9207_v41, 16 }
 0x1c8   : > { %3182 = vperm.xlu0 %6209, %v3119_v32   ;;  %vm4282_vm9 = vmand %vm4250_vm2, %vm14535_vm0  ;;  %14538 = vst [vmem:[#allocation145_spill] sm:$0xff] %v9228_v54  ;;  %vm14540_vm2 = vcmp.lt.s32.totalorder %v14442_v0, 16  ;;  %v14541_v32 = vld [vmem:[#allocation35_spill] sm:$0xff]  ;;  %v9242_v36 = vpop.permute.xlu0 %3994  ;;  %v3767_v0 = vadd.s32 1, %v8976_v56 }
 0x1c9   : > { %v4315_v8 = vsel %vm4282_vm9, 1, %v14037_v46  ;;  %vm9223_vm8 = vmand %vm3798_vm13, %vm3830_vm3  ;;  %vm14542_vm13 = vnez %v14541_v32  ;;  %14543 = vst [vmem:[#allocation35_spill] sm:$0xff] %v9242_v36  ;;  %v14547_v32 = vld [vmem:[#allocation23_spill] sm:$0xff]  ;;  %v14554_v36 = vld [vmem:[#allocation22_spill] sm:$0xff] }
 0x1ca   : > { %4372 = vperm.xlu1 %6210, %v4315_v8   ;;  %vm3894_vm1 = vmand %vm9223_vm8, %vm14539_vm4  ;;  %vm14544_vm4 = vcmp.ge.s32.totalorder %v8621_v62, 0  ;;  %vm14556_vm15 = vcmp.lt.s32.totalorder %v14554_v36, 16 }
 0x1cb   : > { %vm3926_vm0 = vmand %vm3894_vm1, %vm14540_vm2  ;;  %v9252_v54 = vpop.permute.xlu1 %2357  ;;  %vm14546_vm2 = vcmp.lt.s32.totalorder %v8621_v62, 16 }
 0x1cc   : > { %v3959_v45 = vsel %vm3926_vm0, 1, %v14037_v46  ;;  %vm2215_vm3 = vmand %vm14542_vm13, %vm13744_vm11  ;;  %14545 = vst [vmem:[#allocation146_spill] sm:$0xff] %v9252_v54  ;;  %v9268_v56 = vpop.permute.xlu0 %4702  ;;  %vm3831_vm11 = vcmp.lt.s32.totalorder %v3767_v0, 16 }
 0x1cd   : > { %4018 = vperm.xlu0 %6209, %v3959_v45   ;;  %vm2279_vm9 = vmand %vm2215_vm3, %vm13743_vm5  ;;  %v9259_v45 = vld [vmem:[%s13338_s5 + $0x88] sm:$0xff]  ;;  %14549 = vst [vmem:[#allocation23_spill] sm:$0xff] %v9268_v56  ;;  %vm3799_vm5 = vcmp.ge.s32.totalorder %v3767_v0, 0  ;;  %v9676_v56 = vld [vmem:[%s13338_s5 + $0xa0] sm:$0xff] }
 0x1ce   : > { %v2312_v8 = vsel %vm2279_vm9, 1, %v14037_v46  ;;  %vm4606_vm1 = vmand %vm9048_vm10, %vm14544_vm4  ;;  %vm2603_vm13 = vcmp.ge.s32.totalorder %v9259_v45, 0  ;;  %vm2635_vm3 = vcmp.lt.s32.totalorder %v9259_v45, 16  ;;  %vm14548_vm10 = vcmp.ge.s32.totalorder %v14547_v32, 0 }
 0x1cf   : > { %2381 = vperm.xlu1 %6210, %v2312_v8   ;;  %vm4638_vm0 = vmand %vm4606_vm1, %vm14546_vm2  ;;  %vm14550_vm4 = vcmp.lt.s32.totalorder %v14547_v32, 16  ;;  %v9277_v54 = vpop.permute.xlu1 %3161 }
 0x1d0   : > { %v4671_v14 = vsel %vm4638_vm0, 1, %v14037_v46  ;;  %vm3055_vm9 = vmand %vm9166_vm7, %vm14548_vm10  ;;  %14553 = vst [vmem:[#allocation147_spill] sm:$0xff] %v9277_v54  ;;  %vm14555_vm0 = vcmp.ge.s32.totalorder %v14554_v36, 0  ;;  %v14580_v54 = vld [vmem:[#allocation70_spill] sm:$0xff]  ;;  %v9486_v36 = vld [vmem:[#allocation2 + $0x37] sm:$0xff] }
 0x1d1   : > { %4726 = vperm.xlu0 %6209, %v4671_v14   ;;  %vm3087_vm1 = vmand %vm3055_vm9, %vm14550_vm4  ;;  %vm14561_vm4 = vcmp.lt.s32.totalorder %v14464_v51, 16  ;;  %14617 = vst [vmem:[#allocation76_spill] sm:$0xff] %v9486_v36 }
 0x1d2   : > { %v3120_v62 = vsel %vm3087_vm1, 1, %v14037_v46  ;;  %vm9273_vm2 = vmand %vm2603_vm13, %vm2635_vm3  ;;  %v9290_v1 = vpop.permute.xlu0 %2807  ;;  %vm14560_vm13 = vcmp.ge.s32.totalorder %v14464_v51, 0  ;;  %v6248_v51 = vld [vmem:[%s13339_s6 + $0x98] sm:$0xff] }
 0x1d3   : > { %3185 = vperm.xlu1 %6210, %v3120_v62   ;;  %vm2699_vm10 = vmand %vm9273_vm2, %vm14555_vm0  ;;  %14559 = vst [vmem:[#allocation148_spill] sm:$0xff] %v9290_v1  ;;  %vm14565_vm0 = vcmp.ge.s32.totalorder %v8689_v47, 0  ;;  %v9315_v1 = vadd.s32 1, %v6248_v51 }
 0x1d4   : > { %vm2731_vm12 = vmand %vm2699_vm10, %vm14556_vm15  ;;  %vm14562_vm15 = vcmp.ge.s32.totalorder %v8967_v2, 0 }
 0x1d5   : > { %v2764_v14 = vsel %vm2731_vm12, 1, %v14037_v46  ;;  %vm9286_vm9 = vmand %vm3799_vm5, %vm3831_vm11  ;;  %vm14564_vm11 = vcmp.lt.s32.totalorder %v8967_v2, 16  ;;  %14566 = vst [vmem:[#allocation150_spill] sm:$0xff] %v9315_v1 }
 0x1d6   : > { %2831 = vperm.xlu0 %6209, %v2764_v14   ;;  %vm3895_vm3 = vmand %vm9286_vm9, %vm14560_vm13  ;;  %v9303_v62 = vpop.permute.xlu1 %3997 }
 0x1d7   : > { %vm3927_vm1 = vmand %vm3895_vm3, %vm14561_vm4  ;;  %14563 = vst [vmem:[#allocation149_spill] sm:$0xff] %v9303_v62  ;;  %vm14570_vm4 = vcmp.ge.s32.totalorder %v6781_v33, 0  ;;  %v14576_v62 = vld [vmem:[#allocation30_spill] sm:$0xff] }
 0x1d8   : > { %v3960_v0 = vsel %vm3927_vm1, 1, %v14037_v46  ;;  %vm3411_vm12 = vmand %vm9101_vm6, %vm14562_vm15  ;;  %v9317_v19 = vpop.permute.xlu0 %3515  ;;  %vm14568_vm6 = vcmp.lt.s32.totalorder %v8689_v47, 16  ;;  %vm14572_vm15 = vcmp.lt.s32.totalorder %v6781_v33, 16  ;;  %v1681_v33 = vld [vmem:[#allocation2 + $0x10] sm:$0xff] }
 0x1d9   : > { %4021 = vperm.xlu1 %6210, %v3960_v0   ;;  %vm3443_vm5 = vmand %vm3411_vm12, %vm14564_vm11  ;;  %14567 = vst [vmem:[#allocation151_spill] sm:$0xff] %v9317_v19  ;;  %v9324_v0 = vld [vmem:[%s13338_s5 + $0x90] sm:$0xff] }
 0x1da   : > { %v3476_v14 = vsel %vm3443_vm5, 1, %v14037_v46  ;;  %vm4607_vm10 = vmand %vm9114_vm14, %vm14565_vm0  ;;  %14569 = vst [vmem:[#allocation152_spill] sm:$0xff] %v9324_v0  ;;  %vm2604_vm3 = vcmp.ge.s32.totalorder %v9324_v0, 0  ;;  %vm2636_vm14 = vcmp.lt.s32.totalorder %v9324_v0, 16  ;;  %vm13775_vm5 = vcmp.ge.s32.totalorder %v9315_v1, 0 }
 0x1db   : > { %3539 = vperm.xlu0 %6209, %v3476_v14   ;;  %vm4639_vm13 = vmand %vm4607_vm10, %vm14568_vm6  ;;  %v9333_v14 = vpop.permute.xlu1 %4705  ;;  %vm14577_vm0 = vcmp.ge.s32.totalorder %v14576_v62, 0  ;;  %vm13774_vm6 = vcmp.lt.s32.totalorder %v9315_v1, 16  ;;  %v14595_v1 = vld [vmem:[#allocation71_spill] sm:$0xff] }
 0x1dc   : > { %v4672_v57 = vsel %vm4639_vm13, 1, %v14037_v46  ;;  %vm4251_vm1 = vmand %vm9223_vm8, %vm14570_vm4  ;;  %14571 = vst [vmem:[#allocation153_spill] sm:$0xff] %v9333_v14  ;;  %v1099_v14 = vld [vmem:[#allocation2 + $0x7] sm:$0xff]  ;;  %vm1548_vm4 = vcmp.eq.s32.totalorder %v14580_v54, 1  ;;  %v9368_v54 = vld [vmem:[%s13336_s3 + $0x1] ss:$0 sm:$0xff] }
 0x1dd   : > { %4729 = vperm.xlu1 %6210, %v4672_v57   ;;  %vm4283_vm12 = vmand %vm4251_vm1, %vm14572_vm15  ;;  %v14578_v57 = vld [vmem:[#allocation95_spill] sm:$0xff]  ;;  %vm1549_vm1 = vcmp.eq.s32.totalorder %v14581_v21, 1  ;;  %14611 = vst [vmem:[#allocation71_spill] sm:$0xff] %v9462_v52 }
 0x1de   : > { %v4316_v47 = vsel %vm4283_vm12, 1, %v14037_v46  ;;  %vm9338_vm11 = vmand %vm2604_vm3, %vm2636_vm14  ;;  %v9343_v19 = vpop.permute.xlu0 %4351  ;;  %vm1970_vm13 = vcmp.eq.s32.totalorder %v14578_v57, 1  ;;  %vm14579_vm3 = vcmp.lt.s32.totalorder %v14576_v62, 16  ;;  %v3768_v57 = vadd.s32 1, %v9087_v23 }
 0x1df   : > { %14575 = vst [vmem:[#allocation154_spill] sm:$0xff] %v9343_v19  ;;  %4375 = vperm.xlu0 %6209, %v4316_v47   ;;  %vm2700_vm10 = vmand %vm9338_vm11, %vm14577_vm0  ;;  %v14582_v19 = vld [vmem:[#allocation32_spill] sm:$0xff]  ;;  %v2002_v21 = vsel %vm1970_vm13, %v1681_v33, 0.0  ;;  %v1580_v23 = vsel %vm1548_vm4, %v1099_v14, 0.0  ;;  %v1680_v33 = vld [vmem:[#allocation2 + $0x8] sm:$0xff] }
 0x1e0   : > { %vm2732_vm14 = vmand %vm2700_vm10, %vm14579_vm3  ;;  %vm14583_vm15 = vnez %v14582_v19  ;;  %vm14585_vm10 = vcmp.ge.s32.totalorder %v9031_v16, 0  ;;  %v2038_v12 = vmul.f32 %v9368_v54, %v2002_v21 }
 0x1e1   : > { %v2765_v47 = vsel %vm2732_vm14, 1, %v14037_v46  ;;  %vm2216_vm12 = vmand %vm14583_vm15, %vm13775_vm5  ;;  %v9360_v37 = vpop.permute.xlu1 %2810  ;;  %vm14587_vm14 = vcmp.lt.s32.totalorder %v9031_v16, 16  ;;  %vm1969_vm15 = vcmp.eq.s32.totalorder %v14588_v31, 1  ;;  %vm14601_vm5 = vcmp.lt.s32.totalorder %v14492_v24, 16 }
 0x1e2   : > { %14584 = vst [vmem:[#allocation95_spill] sm:$0xff] %v9360_v37  ;;  %2834 = vperm.xlu1 %6210, %v2765_v47   ;;  %vm2280_vm0 = vmand %vm2216_vm12, %vm13774_vm6  ;;  %v9380_v47 = vld [vmem:[%s13336_s3] ss:$0 sm:$0xff]  ;;  %v1581_v37 = vsel %vm1549_vm1, %v1100_v15, 0.0  ;;  %vm14594_vm1 = vcmp.lt.s32.totalorder %v14589_v17, 16  ;;  %vm14613_vm6 = vcmp.lt.s32.totalorder %v14499_v26, 16 }
 0x1e3   : > { %v2313_v35 = vsel %vm2280_vm0, 1, %v14037_v46  ;;  %vm3412_vm3 = vmand %vm9166_vm7, %vm14585_vm10  ;;  %v9375_v19 = vpop.permute.xlu0 %2360  ;;  %vm14590_vm7 = vcmp.ge.s32.totalorder %v14589_v17, 0  ;;  %vm3800_vm10 = vcmp.ge.s32.totalorder %v3768_v57, 0  ;;  %v9404_v16 = vmul.f32 %v9380_v47, %v1580_v23  ;;  %v14598_v17 = vld [vmem:[#allocation73_spill] sm:$0xff]  ;;  %v14599_v23 = vld [vmem:[#allocation74_spill] sm:$0xff] }
 0x1e4   : > { %14586 = vst [vmem:[#allocation70_spill] sm:$0xff] %v9375_v19  ;;  %2384 = vperm.xlu0 %6209, %v2313_v35   ;;  %vm3444_vm13 = vmand %vm3412_vm3, %vm14587_vm14  ;;  %v6250_v19 = vld [vmem:[%s13339_s6 + $0xa0] sm:$0xff]  ;;  %vm3832_vm3 = vcmp.lt.s32.totalorder %v3768_v57, 16  ;;  %vm1971_vm14 = vcmp.eq.s32.totalorder %v8193_v28, 1 }
 0x1e5   : > { %v3477_v39 = vsel %vm3444_vm13, 1, %v14037_v46  ;;  %vm3056_vm12 = vmand %vm9273_vm2, %vm14590_vm7  ;;  %v9393_v14 = vadd.s32 1, %v6250_v19  ;;  %v9395_v15 = vpop.permute.xlu1 %3518  ;;  %v14593_v35 = vld [vmem:[#allocation69_spill] sm:$0xff]  ;;  %v1617_v19 = vmul.f32 %v9380_v47, %v1581_v37  ;;  %vm14596_vm13 = vcmp.ge.s32.totalorder %v14492_v24, 0 }
 0x1e6   : > { %14592 = vst [vmem:[#allocation32_spill] sm:$0xff] %v9395_v15  ;;  %vm1550_vm4 = vcmp.eq.s32.totalorder %v14593_v35, 1  ;;  %3542 = vperm.xlu1 %6210, %v3477_v39   ;;  %vm3088_vm0 = vmand %vm3056_vm12, %vm14594_vm1  ;;  %v9408_v15 = vld [vmem:[#allocation2 + $0x18] sm:$0xff]  ;;  %vm1552_vm1 = vcmp.eq.s32.totalorder %v14599_v23, 1  ;;  %v2001_v37 = vsel %vm1969_vm15, %v1680_v33, 0.0  ;;  %v9448_v35 = vld [vmem:[#allocation2 + $0x27] sm:$0xff] }
 0x1e7   : > { %14591 = vst [vmem:[#allocation72_spill] sm:$0xff] %v9393_v14  ;;  %v3121_v21 = vsel %vm3088_vm0, 1, %v14037_v46  ;;  %vm4252_vm7 = vmand %vm9286_vm9, %vm14596_vm13  ;;  %v9417_v39 = vpop.permute.xlu0 %3164  ;;  %v1582_v62 = vsel %vm1550_vm4, %v9399_v38, 0.0  ;;  %vm13807_vm15 = vcmp.ge.s32.totalorder %v9393_v14, 0  ;;  %v9442_v24 = vadd.f32 %v2038_v12, %v1617_v19  ;;  %v14607_v12 = vld [vmem:[#allocation75_spill] sm:$0xff]  ;;  %v14608_v19 = vld [vmem:[#allocation96_spill] sm:$0xff] }
 0x1e8   : > { %14597 = vst [vmem:[#allocation10_spill] sm:$0xff] %v9417_v39  ;;  %3188 = vperm.xlu0 %6209, %v3121_v21   ;;  %vm4284_vm0 = vmand %vm4252_vm7, %vm14601_vm5  ;;  %v9430_v39 = vld [vmem:[#allocation2 + $0x20] sm:$0xff]  ;;  %v2003_v28 = vsel %vm1971_vm14, %v9408_v15, 0.0  ;;  %vm14605_vm5 = vcmp.eq.s32.totalorder %v14595_v1, 1  ;;  %v9450_v21 = vld [vmem:[#allocation2 + $0x28] sm:$0xff]  ;;  %vm14606_vm4 = vcmp.ge.s32.totalorder %v14499_v26, 0  ;;  %v2037_v57 = vmul.f32 %v9368_v54, %v2001_v37 }
 0x1e9   : > { %v4317_v5 = vsel %vm4284_vm0, 1, %v14037_v46  ;;  %vm9435_vm13 = vmand %vm3800_vm10, %vm3832_vm3  ;;  %v9440_v31 = vpop.permute.xlu1 %4354  ;;  %v1583_v33 = vsel %vm14605_vm5, %v9410_v48, 0.0  ;;  %vm13801_vm3 = vcmp.lt.s32.totalorder %v9393_v14, 16  ;;  %vm1972_vm14 = vcmp.eq.s32.totalorder %v14608_v19, 1  ;;  %v14609_v1 = vld [vmem:[#allocation97_spill] sm:$0xff]  ;;  %14618 = vst [vmem:[#allocation75_spill] sm:$0xff] %v9488_v60 }
 0x1ea   : > { %14604 = vst [vmem:[#allocation69_spill] sm:$0xff] %v9440_v31  ;;  %4378 = vperm.xlu1 %6210, %v4317_v5   ;;  %vm3896_vm10 = vmand %vm9435_vm13, %vm14606_vm4  ;;  %v14610_v31 = vld [vmem:[#allocation98_spill] sm:$0xff]  ;;  %v9464_v5 = vld [vmem:[#allocation2 + $0x30] sm:$0xff]  ;;  %vm1975_vm4 = vcmp.eq.s32.totalorder %v8259_v34, 1  ;;  %v1618_v9 = vmul.f32 %v9380_v47, %v1582_v62  ;;  %v2004_v0 = vsel %vm1972_vm14, %v9430_v39, 0.0  ;;  %v2039_v2 = vmul.f32 %v9368_v54, %v2003_v28 }
 0x1eb   : > { %vm1973_vm5 = vcmp.eq.s32.totalorder %v14610_v31, 1  ;;  %14612 = vst [vmem:[#allocation73_spill] sm:$0xff] %v9464_v5  ;;  %vm3928_vm12 = vmand %vm3896_vm10, %vm14613_vm6  ;;  %v14614_v19 = vld [vmem:[#allocation41_spill] sm:$0xff]  ;;  %v9480_v26 = vmul.f32 %v9380_v47, %v1583_v33  ;;  %v1584_v62 = vsel %vm1552_vm1, %v9448_v35, 0.0  ;;  %vm14620_vm10 = vcmp.eq.s32.totalorder %v14609_v1, 1  ;;  %v9513_v1 = vld [vmem:[%s13338_s5 + $0x98] sm:$0xff] }
 0x1ec   : > { %v3961_v37 = vsel %vm3928_vm12, 1, %v14037_v46  ;;  %vm14615_vm7 = vnez %v14614_v19  ;;  %v9476_v31 = vpop.permute.xlu0 %4000  ;;  %v2005_v3 = vsel %vm1973_vm5, %v9450_v21, 0.0  ;;  %vm14619_vm12 = vcmp.eq.s32.totalorder %v14598_v17, 1  ;;  %14624 = vst [vmem:[#allocation97_spill] sm:$0xff] %v9513_v1  ;;  %v14627_v14 = vld [vmem:[#allocation28_spill] sm:$0xff] }
 0x1ed   : > { %vm2217_vm0 = vmand %vm14615_vm7, %vm13807_vm15  ;;  %14616 = vst [vmem:[#allocation74_spill] sm:$0xff] %v9476_v31  ;;  %4024 = vperm.xlu0 %6209, %v3961_v37   ;;  %v1585_v28 = vsel %vm14619_vm12, %v9462_v52, 0.0  ;;  %v2006_v33 = vsel %vm14620_vm10, %v9464_v5, 0.0  ;;  %vm14621_vm1 = vcmp.ge.s32.totalorder %v8797_v4, 0  ;;  %v3769_v37 = vadd.s32 1, %v9152_v58  ;;  %v2102_v31 = vld [vmem:[#allocation2 + $0x11] sm:$0xff] }
 0x1ee   : > { %vm2281_vm6 = vmand %vm2217_vm0, %vm13801_vm3  ;;  %v9504_v19 = vpop.permute.xlu1 %2363  ;;  %vm2423_vm14 = vcmp.eq.s32.totalorder %v8657_v27, 1  ;;  %v2040_v17 = vmul.f32 %v9368_v54, %v2004_v0  ;;  %vm14623_vm0 = vcmp.lt.s32.totalorder %v8797_v4, 16  ;;  %v14625_v58 = vld [vmem:[#allocation78_spill] sm:$0xff]  ;;  %v1620_v0 = vmul.f32 %v9380_v47, %v1584_v62  ;;  %v9541_v34 = vld [vmem:[#allocation2 + $0x3f] sm:$0xff] }
 0x1ef   : > { %v2314_v23 = vsel %vm2281_vm6, 1, %v14037_v46  ;;  %vm4608_vm7 = vmand %vm9223_vm8, %vm14621_vm1  ;;  %14622 = vst [vmem:[#allocation96_spill] sm:$0xff] %v9504_v19  ;;  %vm2605_vm8 = vcmp.ge.s32.totalorder %v9513_v1, 0  ;;  %vm2637_vm6 = vcmp.lt.s32.totalorder %v9513_v1, 16  ;;  %vm14626_vm10 = vcmp.eq.s32.totalorder %v14600_v18, 1  ;;  %v14634_v27 = vld [vmem:[#allocation99_spill] sm:$0xff] }
 0x1f0   : > { %2387 = vperm.xlu1 %6210, %v2314_v23   ;;  %vm4640_vm5 = vmand %vm4608_vm7, %vm14623_vm0  ;;  %v1586_v4 = vsel %vm14626_vm10, %v9486_v36, 0.0  ;;  %v2007_v23 = vsel %vm1975_vm4, %v9488_v60, 0.0  ;;  %vm14628_vm1 = vcmp.ge.s32.totalorder %v14627_v14, 0  ;;  %v9535_v5 = vpop.permute.xlu0 %4708  ;;  %vm2422_vm0 = vcmp.eq.s32.totalorder %v8667_v50, 1  ;;  %v14637_v1 = vld [vmem:[#allocation101_spill] sm:$0xff] }
 0x1f1   : > { %v4673_v19 = vsel %vm4640_vm5, 1, %v14037_v46  ;;  %vm3057_vm7 = vmand %vm9338_vm11, %vm14628_vm1  ;;  %14629 = vst [vmem:[#allocation98_spill] sm:$0xff] %v9535_v5  ;;  %v2041_v62 = vmul.f32 %v9368_v54, %v2005_v3  ;;  %v1621_v18 = vmul.f32 %v9380_v47, %v1585_v28  ;;  %v2042_v36 = vmul.f32 %v9368_v54, %v2006_v33 }
 0x1f2   : > { %4732 = vperm.xlu0 %6209, %v4673_v19   ;;  %vm14630_vm4 = vcmp.lt.s32.totalorder %v14627_v14, 16  ;;  %v2455_v60 = vsel %vm2423_vm14, %v2102_v31, 0.0  ;;  %vm9554_vm10 = vmand %vm2605_vm8, %vm2637_vm6  ;;  %vm3801_vm1 = vcmp.ge.s32.totalorder %v3769_v37, 0  ;;  %vm3833_vm3 = vcmp.lt.s32.totalorder %v3769_v37, 16  ;;  %v9558_v28 = vpop.permute.xlu1 %3167  ;;  %v14635_v14 = vld [vmem:[#allocation27_spill] sm:$0xff]  ;;  %v14645_v37 = vld [vmem:[#allocation77_spill] sm:$0xff] }
 0x1f3   : > { %vm3089_vm5 = vmand %vm3057_vm7, %vm14630_vm4  ;;  %14633 = vst [vmem:[#allocation41_spill] sm:$0xff] %v9558_v28  ;;  %v2069_v33 = vadd.f32 %v2037_v57, %v9404_v16  ;;  %vm1976_vm14 = vcmp.eq.s32.totalorder %v14634_v27, 1  ;;  %v1622_v31 = vmul.f32 %v9380_v47, %v1586_v4  ;;  %v2043_v19 = vmul.f32 %v9368_v54, %v2007_v23  ;;  %v9600_v23 = vld [vmem:[#allocation2 + $0x47] sm:$0xff] }
 0x1f4   : > { %v3122_v5 = vsel %vm3089_vm5, 1, %v14037_v46  ;;  %vm14636_vm7 = vcmp.ge.s32.totalorder %v14635_v14, 0  ;;  %v2454_v52 = vsel %vm2422_vm0, %v2101_v42, 0.0  ;;  %v9571_v28 = vadd.f32 %v2039_v2, %v1618_v9  ;;  %vm9586_vm0 = vmand %vm3801_vm1, %vm3833_vm3  ;;  %v9602_v27 = vld [vmem:[#allocation2 + $0x48] sm:$0xff] }
 0x1f5   : > { %3191 = vperm.xlu1 %6210, %v3122_v5   ;;  %vm2701_vm8 = vmand %vm9554_vm10, %vm14636_vm7  ;;  %vm14638_vm4 = vcmp.eq.s32.totalorder %v14607_v12, 1  ;;  %vm14639_vm5 = vcmp.lt.s32.totalorder %v14635_v14, 16  ;;  %v2491_v57 = vmul.f32 %v9521_v61, %v2455_v60  ;;  %vm2875_vm12 = vcmp.eq.s32.totalorder %v8679_v43, 1  ;;  %v9580_v5 = vld [vmem:[#allocation2 + $0x19] sm:$0xff]  ;;  %v9590_v2 = vpop.permute.xlu0 %2813  ;;  %14643 = vst [vmem:[#allocation99_spill] sm:$0xff] %v9602_v27 }
 0x1f6   : > { %v1587_v16 = vsel %vm14638_vm4, %v9541_v34, 0.0  ;;  %vm2733_vm15 = vmand %vm2701_vm8, %vm14639_vm5  ;;  %v2008_v4 = vsel %vm1976_vm14, %v9547_v11, 0.0  ;;  %14642 = vst [vmem:[#allocation78_spill] sm:$0xff] %v9590_v2  ;;  %vm2424_vm7 = vcmp.eq.s32.totalorder %v8693_v7, 1  ;;  %v9594_v42 = vadd.f32 %v2040_v17, %v9480_v26  ;;  %v14646_v2 = vld [vmem:[#allocation100_spill] sm:$0xff]  ;;  %v9611_v17 = vld [vmem:[#allocation2 + $0x21] sm:$0xff] }
 0x1f7   : > { %v2766_v50 = vsel %vm2733_vm15, 1, %v14037_v46  ;;  %v9596_v60 = vadd.f32 %v2041_v62, %v1620_v0  ;;  %v9598_v12 = vadd.f32 %v2042_v36, %v1621_v18  ;;  %vm14644_vm15 = vcmp.ge.s32.totalorder %v14519_v29, 0  ;;  %v9622_v0 = vld [vmem:[%s13336_s3 + $0x3] ss:$0 sm:$0xff] }
 0x1f8   : > { %2837 = vperm.xlu0 %6209, %v2766_v50   ;;  %vm3897_vm3 = vmand %vm9586_vm0, %vm14644_vm15  ;;  %vm1557_vm1 = vcmp.eq.s32.totalorder %v14645_v37, 1  ;;  %v2490_v26 = vmul.f32 %v9521_v61, %v2454_v52  ;;  %vm2425_vm8 = vcmp.eq.s32.totalorder %v8702_v40, 1  ;;  %vm2876_vm4 = vcmp.eq.s32.totalorder %v8717_v49, 1  ;;  %v14655_v40 = vld [vmem:[#allocation80_spill] sm:$0xff] }
 0x1f9   : > { %v9615_v36 = vadd.f32 %v2043_v19, %v1622_v31  ;;  %vm14647_vm5 = vcmp.lt.s32.totalorder %v14519_v29, 16  ;;  %v2907_v52 = vsel %vm2875_vm12, %v9399_v38, 0.0  ;;  %v1623_v62 = vmul.f32 %v9380_v47, %v1587_v16  ;;  %v9634_v29 = vpop.permute.xlu1 %4003 }
 0x1fa   : > { %vm3929_vm6 = vmand %vm3897_vm3, %vm14647_vm5  ;;  %v2044_v18 = vmul.f32 %v9368_v54, %v2008_v4  ;;  %vm14648_vm15 = vcmp.ge.s32.totalorder %v9143_v13, 0  ;;  %14649 = vst [vmem:[#allocation27_spill] sm:$0xff] %v9634_v29  ;;  %v9637_v31 = vadd.f32 %v2491_v57, %v9442_v24  ;;  %v2456_v43 = vsel %vm2424_vm7, %v9580_v5, 0.0  ;;  %v9666_v16 = vpop.permute.xlu0 %3521  ;;  %v14656_v57 = vld [vmem:[#allocation102_spill] sm:$0xff]  ;;  %v14665_v29 = vld [vmem:[#allocation36_spill] sm:$0xff] }
 0x1fb   : > { %v3962_v50 = vsel %vm3929_vm6, 1, %v14037_v46  ;;  %vm3413_vm3 = vmand %vm9273_vm2, %vm14648_vm15  ;;  %vm14650_vm12 = vcmp.eq.s32.totalorder %v14625_v58, 1  ;;  %vm14651_vm6 = vcmp.eq.s32.totalorder %v14637_v1, 1  ;;  %vm14652_vm2 = vcmp.lt.s32.totalorder %v9143_v13, 16  ;;  %v6252_v1 = vld [vmem:[%s13339_s6 + $0xa8] sm:$0xff]  ;;  %14654 = vst [vmem:[#allocation101_spill] sm:$0xff] %v9666_v16 }
 0x1fc   : > { %v1588_v38 = vsel %vm14650_vm12, %v9600_v23, 0.0  ;;  %v2009_v19 = vsel %vm14651_vm6, %v9602_v27, 0.0  ;;  %4027 = vperm.xlu1 %6210, %v3962_v50   ;;  %vm3445_vm5 = vmand %vm3413_vm3, %vm14652_vm2  ;;  %v2457_v8 = vsel %vm2425_vm8, %v9611_v17, 0.0  ;;  %v2908_v7 = vsel %vm2876_vm4, %v9410_v48, 0.0 }
 0x1fd   : > { %v3478_v24 = vsel %vm3445_vm5, 1, %v14037_v46  ;;  %vm14653_vm7 = vcmp.ge.s32.totalorder %v8861_v53, 0  ;;  %v9664_v58 = vadd.s32 1, %v6252_v1  ;;  %v2522_v49 = vadd.f32 %v2490_v26, %v2069_v33  ;;  %v9698_v1 = vld [vmem:[#allocation2 + $0x29] sm:$0xff] }
 0x1fe   : > { %vm4609_vm15 = vmand %vm9286_vm9, %vm14653_vm7  ;;  %v2943_v48 = vmul.f32 %v9622_v0, %v2907_v52  ;;  %3545 = vperm.xlu0 %6209, %v3478_v24   ;;  %vm14657_vm4 = vcmp.lt.s32.totalorder %v8861_v53, 16  ;;  %vm2606_vm9 = vcmp.ge.s32.totalorder %v9676_v56, 0  ;;  %vm2638_vm6 = vcmp.lt.s32.totalorder %v9676_v56, 16  ;;  %v9688_v53 = vpop.permute.xlu1 %4711 }
 0x1ff   : > { %vm4641_vm12 = vmand %vm4609_vm15, %vm14657_vm4  ;;  %vm3232_vm2 = vcmp.eq.s32.totalorder %v8726_v20, 1  ;;  %v1624_v4 = vmul.f32 %v9380_v47, %v1588_v38  ;;  %v2045_v33 = vmul.f32 %v9368_v54, %v2009_v19  ;;  %vm14658_vm5 = vcmp.ge.s32.totalorder %v14528_v25, 0  ;;  %14659 = vst [vmem:[#allocation77_spill] sm:$0xff] %v9688_v53  ;;  %v9694_v38 = vld [vmem:[#allocation2 + $0x4f] sm:$0xff] }
 0x200   : > { %v4674_v26 = vsel %vm4641_vm12, 1, %v14037_v46  ;;  %vm4253_vm7 = vmand %vm9435_vm13, %vm14658_vm5  ;;  %v2492_v52 = vmul.f32 %v9521_v61, %v2456_v43  ;;  %v2493_v50 = vmul.f32 %v9521_v61, %v2457_v8  ;;  %v2944_v24 = vmul.f32 %v9622_v0, %v2908_v7  ;;  %14660 = vst [vmem:[#allocation100_spill] sm:$0xff] %v9694_v38  ;;  %v1689_v19 = vld [vmem:[#allocation2 + $0x50] sm:$0xff] }
 0x201   : > { %vm2877_vm15 = vcmp.eq.s32.totalorder %v8748_v10, 1  ;;  %4735 = vperm.xlu1 %6210, %v4674_v26   ;;  %vm14661_vm4 = vcmp.lt.s32.totalorder %v14528_v25, 16  ;;  %vm2426_vm5 = vcmp.eq.s32.totalorder %v8757_v55, 1  ;;  %vm3233_vm3 = vcmp.eq.s32.totalorder %v8765_v22, 1  ;;  %vm9707_vm8 = vmand %vm2606_vm9, %vm2638_vm6  ;;  %v9712_v25 = vpop.permute.xlu0 %4357  ;;  %v9717_v26 = vld [vmem:[%s13336_s3 + $0x4] ss:$0 sm:$0xff] }
 0x202   : > { %vm4285_vm12 = vmand %vm4253_vm7, %vm14661_vm4  ;;  %vm13814_vm14 = vcmp.ge.s32.totalorder %v9664_v58, 0  ;;  %14664 = vst [vmem:[#allocation80_spill] sm:$0xff] %v9712_v25  ;;  %v2975_v7 = vadd.f32 %v2943_v48, %v2522_v49  ;;  %v3264_v16 = vsel %vm3232_vm2, %v9408_v15, 0.0  ;;  %v9722_v53 = vadd.f32 %v2044_v18, %v1623_v62  ;;  %v1692_v25 = vld [vmem:[#allocation2 + $0x68] sm:$0xff] }
 0x203   : > { %v4318_v43 = vsel %vm4285_vm12, 1, %v14037_v46  ;;  %vm14666_vm9 = vcmp.ge.s32.totalorder %v14665_v29, 0  ;;  %vm13813_vm7 = vcmp.lt.s32.totalorder %v9664_v58, 16  ;;  %v2909_v49 = vsel %vm2877_vm15, %v9448_v35, 0.0 }
 0x204   : > { %4381 = vperm.xlu0 %6209, %v4318_v43   ;;  %vm2702_vm6 = vmand %vm9707_vm8, %vm14666_vm9  ;;  %v9732_v48 = vadd.f32 %v2045_v33, %v1624_v4  ;;  %v1589_v20 = vsel %vm1557_vm1, %v9694_v38, 0.0  ;;  %vm14668_vm2 = vcmp.eq.s32.totalorder %v14646_v2, 1  ;;  %vm14669_vm4 = vcmp.lt.s32.totalorder %v14665_v29, 16  ;;  %v2562_v4 = vld [vmem:[#allocation2 + $0x57] sm:$0xff]  ;;  %v14670_v2 = vld [vmem:[#allocation38_spill] sm:$0xff] }
 0x205   : > { %v2010_v15 = vsel %vm14668_vm2, %v1689_v19, 0.0  ;;  %vm2734_vm12 = vmand %vm2702_vm6, %vm14669_vm4  ;;  %v2524_v62 = vadd.f32 %v2492_v52, %v9571_v28  ;;  %v2458_v18 = vsel %vm2426_vm5, %v9698_v1, 0.0  ;;  %v3265_v10 = vsel %vm3233_vm3, %v9430_v39, 0.0  ;;  %v1690_v33 = vld [vmem:[#allocation2 + $0x58] sm:$0xff]  ;;  %v9753_v19 = vpop.permute.xlu1 %2816  ;;  %v14673_v39 = vld [vmem:[#allocation79_spill] sm:$0xff] }
 0x206   : > { %14667 = vst [vmem:[#allocation102_spill] sm:$0xff] %v9732_v48  ;;  %v2767_v37 = vsel %vm2734_vm12, 1, %v14037_v46  ;;  %vm14671_vm1 = vnez %v14670_v2  ;;  %14672 = vst [vmem:[#allocation36_spill] sm:$0xff] %v9753_v19  ;;  %v9756_v28 = vadd.f32 %v2493_v50, %v9594_v42  ;;  %v2976_v55 = vadd.f32 %v2944_v24, %v9637_v31  ;;  %v14674_v43 = vld [vmem:[#allocation9_spill] sm:$0xff] }
 0x207   : > { %vm2218_vm15 = vmand %vm14671_vm1, %vm13814_vm14  ;;  %v3300_v52 = vmul.f32 %v9717_v26, %v3264_v16  ;;  %2840 = vperm.xlu1 %6210, %v2767_v37   ;;  %v3770_v22 = vadd.s32 1, %v9259_v45  ;;  %vm1559_vm5 = vcmp.eq.s32.totalorder %v14673_v39, 1  ;;  %vm1980_vm9 = vcmp.eq.s32.totalorder %v14674_v43, 1  ;;  %v9773_v16 = vpop.permute.xlu0 %2366  ;;  %v14677_v45 = vld [vmem:[#allocation81_spill] sm:$0xff] }
 0x208   : > { %vm2282_vm3 = vmand %vm2218_vm15, %vm13813_vm7  ;;  %v2945_v2 = vmul.f32 %v9622_v0, %v2909_v49  ;;  %v1625_v19 = vmul.f32 %v9380_v47, %v1589_v20  ;;  %v2046_v42 = vmul.f32 %v9368_v54, %v2010_v15  ;;  %vm14675_vm6 = vcmp.ge.s32.totalorder %v9207_v41, 0  ;;  %14676 = vst [vmem:[#allocation38_spill] sm:$0xff] %v9773_v16  ;;  %v14681_v15 = vld [vmem:[#allocation25_spill] sm:$0xff] }
 0x209   : > { %v2315_v31 = vsel %vm2282_vm3, 1, %v14037_v46  ;;  %vm3414_vm2 = vmand %vm9338_vm11, %vm14675_vm6  ;;  %v2494_v50 = vmul.f32 %v9521_v61, %v2458_v18  ;;  %v3301_v24 = vmul.f32 %v9717_v26, %v3265_v10  ;;  %vm14678_vm12 = vcmp.eq.s32.totalorder %v14655_v40, 1  ;;  %v6254_v40 = vld [vmem:[%s13339_s6 + $0xb0] sm:$0xff]  ;;  %v9797_v18 = vpop.permute.xlu1 %3524  ;;  %v14726_v38 = vld [vmem:[#allocation121_spill] sm:$0xff] }
 0x20a   : > { %v1590_v49 = vsel %vm14678_vm12, %v2562_v4, 0.0  ;;  %vm14679_vm1 = vcmp.eq.s32.totalorder %v14656_v57, 1  ;;  %2390 = vperm.xlu0 %6209, %v2315_v31   ;;  %vm14680_vm15 = vcmp.lt.s32.totalorder %v9207_v41, 16  ;;  %vm3234_vm6 = vcmp.eq.s32.totalorder %v8776_v59, 1  ;;  %14684 = vst [vmem:[#allocation9_spill] sm:$0xff] %v9797_v18  ;;  %v14700_v18 = vld [vmem:[#allocation120_spill] sm:$0xff] }
 0x20b   : > { %v2011_v20 = vsel %vm14679_vm1, %v1690_v33, 0.0  ;;  %vm3446_vm3 = vmand %vm3414_vm2, %vm14680_vm15  ;;  %vm2878_vm7 = vcmp.eq.s32.totalorder %v8787_v63, 1  ;;  %vm14682_vm14 = vcmp.ge.s32.totalorder %v14681_v15, 0  ;;  %v9795_v57 = vadd.s32 1, %v6254_v40  ;;  %v2564_v40 = vld [vmem:[#allocation2 + $0x67] sm:$0xff] }
 0x20c   : > { %v3479_v51 = vsel %vm3446_vm3, 1, %v14037_v46  ;;  %vm3058_vm12 = vmand %vm9554_vm10, %vm14682_vm14  ;;  %v9799_v10 = vadd.f32 %v3300_v52, %v2975_v7  ;;  %vm3590_vm2 = vcmp.eq.s32.totalorder %v8808_v44, 1  ;;  %vm14685_vm1 = vcmp.lt.s32.totalorder %v14681_v15, 16  ;;  %v9813_v7 = vpop.permute.xlu0 %3170  ;;  %v9850_v44 = vld [vmem:[#allocation2 + $0x31] sm:$0xff]  ;;  %v14733_v41 = vld [vmem:[#allocation33_spill] sm:$0xff] }
 0x20d   : > { %14683 = vst [vmem:[#allocation79_spill] sm:$0xff] %v9795_v57  ;;  %3548 = vperm.xlu1 %6210, %v3479_v51   ;;  %vm3090_vm15 = vmand %vm3058_vm12, %vm14685_vm1  ;;  %vm3802_vm3 = vcmp.ge.s32.totalorder %v3770_v22, 0  ;;  %vm3834_vm11 = vcmp.lt.s32.totalorder %v3770_v22, 16  ;;  %v9804_v4 = vadd.f32 %v2046_v42, %v1625_v19  ;;  %v1626_v33 = vmul.f32 %v9380_v47, %v1590_v49  ;;  %v14689_v42 = vld [vmem:[#allocation71_spill] sm:$0xff]  ;;  %v14699_v22 = vld [vmem:[#allocation4_spill] sm:$0xff] }
 0x20e   : > { %v2047_v37 = vmul.f32 %v9368_v54, %v2011_v20  ;;  %v3123_v31 = vsel %vm3090_vm15, 1, %v14037_v46  ;;  %vm14687_vm14 = vcmp.ge.s32.totalorder %v14547_v32, 0  ;;  %14688 = vst [vmem:[#allocation155_spill] sm:$0xff] %v9813_v7  ;;  %v9815_v52 = vadd.f32 %v2945_v2, %v2524_v62  ;;  %v9829_v20 = vld [vmem:[%s13336_s3 + $0x5] ss:$0 sm:$0xff]  ;;  %v2566_v15 = vld [vmem:[#allocation2 + $0x77] sm:$0xff] }
 0x20f   : > { %14686 = vst [vmem:[#allocation81_spill] sm:$0xff] %v9804_v4  ;;  %vm4254_vm4 = vmand %vm9586_vm0, %vm14687_vm14  ;;  %v9818_v51 = vadd.f32 %v2494_v50, %v9596_v60  ;;  %v3266_v19 = vsel %vm3234_vm6, %v9450_v21, 0.0  ;;  %v2910_v49 = vsel %vm2878_vm7, %v14689_v42, 0.0  ;;  %3194 = vperm.xlu0 %6209, %v3123_v31   ;;  %vm14690_vm12 = vcmp.lt.s32.totalorder %v14547_v32, 16  ;;  %v2563_v60 = vld [vmem:[#allocation2 + $0x5f] sm:$0xff]  ;;  %v9846_v32 = vpop.permute.xlu1 %4360  ;;  %v14697_v31 = vld [vmem:[#allocation22_spill] sm:$0xff] }
 0x210   : > { %vm4286_vm1 = vmand %vm4254_vm4, %vm14690_vm12  ;;  %v9833_v62 = vadd.f32 %v3301_v24, %v2976_v55  ;;  %v3622_v59 = vsel %vm3590_vm2, %v9611_v17, 0.0  ;;  %v1691_v2 = vld [vmem:[#allocation2 + $0x60] sm:$0xff]  ;;  %vm13826_vm6 = vcmp.ge.s32.totalorder %v9795_v57, 0  ;;  %14693 = vst [vmem:[#allocation71_spill] sm:$0xff] %v9846_v32  ;;  %v14694_v55 = vld [vmem:[#allocation14_spill] sm:$0xff]  ;;  %vm14698_vm14 = vcmp.ge.s32.totalorder %v14697_v31, 0 }
 0x211   : > { %v4319_v63 = vsel %vm4286_vm1, 1, %v14037_v46  ;;  %vm9841_vm7 = vmand %vm3802_vm3, %vm3834_vm11  ;;  %vm3589_vm4 = vcmp.eq.s32.totalorder %v14694_v55, 1  ;;  %v14695_v24 = vld [vmem:[#allocation13_spill] sm:$0xff]  ;;  %v14696_v17 = vld [vmem:[#allocation16_spill] sm:$0xff]  ;;  %vm13825_vm3 = vcmp.lt.s32.totalorder %v9795_v57, 16  ;;  %v3302_v32 = vmul.f32 %v9717_v26, %v3266_v19 }
 0x212   : > { %4384 = vperm.xlu1 %6210, %v4319_v63   ;;  %vm3898_vm11 = vmand %vm9841_vm7, %vm14698_vm14  ;;  %v2946_v7 = vmul.f32 %v9622_v0, %v2910_v49  ;;  %v9862_v16 = vadd.f32 %v2047_v37, %v1626_v33  ;;  %vm14702_vm2 = vcmp.lt.s32.totalorder %v14697_v31, 16  ;;  %v3658_v63 = vmul.f32 %v9829_v20, %v3622_v59  ;;  %v14703_v49 = vld [vmem:[#allocation47_spill] sm:$0xff]  ;;  %v9876_v33 = vpop.permute.xlu0 %4006  ;;  %v14706_v37 = vld [vmem:[#allocation82_spill] sm:$0xff] }
 0x213   : > { %vm3930_vm15 = vmand %vm3898_vm11, %vm14702_vm2  ;;  %v1591_v4 = vsel %vm1559_vm5, %v2563_v60, 0.0  ;;  %v2012_v48 = vsel %vm1980_vm9, %v1691_v2, 0.0  ;;  %vm14704_vm14 = vnez %v14703_v49  ;;  %14705 = vst [vmem:[#allocation13_spill] sm:$0xff] %v9876_v33  ;;  %v14707_v31 = vld [vmem:[#allocation103_spill] sm:$0xff]  ;;  %v3621_v39 = vsel %vm3589_vm4, %v9580_v5, 0.0  ;;  %v14708_v59 = vld [vmem:[#allocation76_spill] sm:$0xff] }
 0x214   : > { %14701 = vst [vmem:[#allocation14_spill] sm:$0xff] %v9862_v16  ;;  %v3963_v19 = vsel %vm3930_vm15, 1, %v14037_v46  ;;  %vm2219_vm12 = vmand %vm14704_vm14, %vm13826_vm6  ;;  %vm1982_vm2 = vcmp.eq.s32.totalorder %v14707_v31, 1  ;;  %vm14709_vm5 = vcmp.eq.s32.totalorder %v14695_v24, 1  ;;  %vm14710_vm9 = vcmp.eq.s32.totalorder %v14696_v17, 1  ;;  %v14714_v49 = vld [vmem:[#allocation128_spill] sm:$0xff] }
 0x215   : > { %v2911_v43 = vsel %vm14709_vm5, %v14708_v59, 0.0  ;;  %v2459_v60 = vsel %vm14710_vm9, %v9850_v44, 0.0  ;;  %vm14711_vm15 = vcmp.eq.s32.totalorder %v14677_v45, 1  ;;  %4030 = vperm.xlu0 %6209, %v3963_v19   ;;  %vm2283_vm11 = vmand %vm2219_vm12, %vm13825_vm3  ;;  %vm14712_vm14 = vcmp.eq.s32.totalorder %v14700_v18, 1  ;;  %v14716_v45 = vld [vmem:[#allocation152_spill] sm:$0xff]  ;;  %v14718_v19 = vld [vmem:[#allocation105_spill] sm:$0xff] }
 0x216   : > { %v1592_v2 = vsel %vm14711_vm15, %v2564_v40, 0.0  ;;  %v3623_v55 = vsel %vm14712_vm14, %v9698_v1, 0.0  ;;  %vm14713_vm4 = vcmp.eq.s32.totalorder %v8371_v30, 1  ;;  %v2316_v24 = vsel %vm2283_vm11, 1, %v14037_v46  ;;  %v9904_v40 = vpop.permute.xlu1 %2369  ;;  %v9914_v30 = vld [vmem:[%s13338_s5 + $0xa8] sm:$0xff] }
 0x217   : > { %v2013_v5 = vsel %vm14713_vm4, %v1692_v25, 0.0  ;;  %vm14715_vm5 = vcmp.ge.s32.totalorder %v14714_v49, 0  ;;  %v3771_v17 = vadd.s32 1, %v14716_v45  ;;  %14717 = vst [vmem:[#allocation16_spill] sm:$0xff] %v9904_v40  ;;  %v1627_v33 = vmul.f32 %v9380_v47, %v1591_v4  ;;  %2393 = vperm.xlu1 %6210, %v2316_v24   ;;  %14720 = vst [vmem:[#allocation22_spill] sm:$0xff] %v9914_v30  ;;  %v14722_v25 = vld [vmem:[#allocation104_spill] sm:$0xff]  ;;  %v9928_v40 = vpop.permute.xlu0 %4714 }
 0x218   : > { %vm4610_vm9 = vmand %vm9435_vm13, %vm14715_vm5  ;;  %v2048_v18 = vmul.f32 %v9368_v54, %v2012_v48  ;;  %vm14719_vm15 = vcmp.lt.s32.totalorder %v14714_v49, 16  ;;  %vm2607_vm13 = vcmp.ge.s32.totalorder %v9914_v30, 0  ;;  %vm2639_vm11 = vcmp.lt.s32.totalorder %v9914_v30, 16  ;;  %v14723_v45 = vld [vmem:[#allocation34_spill] sm:$0xff]  ;;  %14725 = vst [vmem:[#allocation4_spill] sm:$0xff] %v9928_v40  ;;  %v1693_v30 = vld [vmem:[#allocation2 + $0x70] sm:$0xff] }
 0x219   : > { %vm4642_vm14 = vmand %vm4610_vm9, %vm14719_vm15  ;;  %v3657_v4 = vmul.f32 %v9829_v20, %v3621_v39  ;;  %v2947_v48 = vmul.f32 %v9622_v0, %v2911_v43  ;;  %v1628_v24 = vmul.f32 %v9380_v47, %v1592_v2  ;;  %vm14724_vm9 = vcmp.ge.s32.totalorder %v14723_v45, 0  ;;  %v2565_v43 = vld [vmem:[#allocation2 + $0x6f] sm:$0xff] }
 0x21a   : > { %v4675_v49 = vsel %vm4642_vm14, 1, %v14037_v46  ;;  %vm3059_vm15 = vmand %vm9707_vm8, %vm14724_vm9  ;;  %v2495_v16 = vmul.f32 %v9521_v61, %v2459_v60  ;;  %v3659_v57 = vmul.f32 %v9829_v20, %v3623_v55  ;;  %vm3235_vm3 = vcmp.eq.s32.totalorder %v14726_v38, 1  ;;  %v14728_v2 = vld [vmem:[#allocation122_spill] sm:$0xff]  ;;  %v9946_v55 = vpop.permute.xlu1 %3173 }
 0x21b   : > { %v2049_v39 = vmul.f32 %v9368_v54, %v2013_v5  ;;  %4738 = vperm.xlu0 %6209, %v4675_v49   ;;  %vm14727_vm6 = vcmp.lt.s32.totalorder %v14723_v45, 16  ;;  %vm4075_vm5 = vcmp.eq.s32.totalorder %v14728_v2, 1  ;;  %vm9942_vm9 = vmand %vm2607_vm13, %vm2639_vm11  ;;  %vm3803_vm4 = vcmp.ge.s32.totalorder %v3771_v17, 0  ;;  %14731 = vst [vmem:[#allocation120_spill] sm:$0xff] %v9946_v55  ;;  %v14747_v2 = vld [vmem:[#allocation3_spill] sm:$0xff] }
 0x21c   : > { %vm3091_vm14 = vmand %vm3059_vm15, %vm14727_vm6  ;;  %vm3835_vm12 = vcmp.lt.s32.totalorder %v3771_v17, 16  ;;  %v3334_v5 = vadd.f32 %v3302_v32, %v9815_v52  ;;  %v9950_v49 = vadd.f32 %v2946_v7, %v9756_v28  ;;  %v9953_v40 = vadd.f32 %v3658_v63, %v9833_v62  ;;  %v14735_v52 = vld [vmem:[#allocation73_spill] sm:$0xff]  ;;  %v14736_v7 = vld [vmem:[#allocation123_spill] sm:$0xff] }
 0x21d   : > { %v3124_v27 = vsel %vm3091_vm14, 1, %v14037_v46  ;;  %v9955_v45 = vadd.f32 %v2048_v18, %v1627_v33  ;;  %vm14734_vm6 = vcmp.ge.s32.totalorder %v14733_v41, 0  ;;  %v9962_v55 = vadd.f32 %v3657_v4, %v9799_v10  ;;  %v9981_v10 = vld [vmem:[%s13336_s3 + $0x6] ss:$0 sm:$0xff]  ;;  %v14744_v4 = vld [vmem:[#allocation30_spill] sm:$0xff] }
 0x21e   : > { %3197 = vperm.xlu1 %6210, %v3124_v27   ;;  %vm2703_vm13 = vmand %vm9942_vm9, %vm14734_vm6  ;;  %v3267_v28 = vsel %vm3235_vm3, %v14735_v52, 0.0  ;;  %vm4074_vm11 = vcmp.eq.s32.totalorder %v14736_v7, 1  ;;  %vm14737_vm15 = vcmp.eq.s32.totalorder %v14699_v22, 1  ;;  %vm14738_vm14 = vcmp.lt.s32.totalorder %v14733_v41, 16  ;;  %v10029_v7 = vpop.permute.xlu1 %4009  ;;  %v10466_v63 = vld [vmem:[%s13338_s5 + $0xc0] sm:$0xff] }
 0x21f   : > { %14732 = vst [vmem:[#allocation47_spill] sm:$0xff] %v9955_v45  ;;  %v1593_v62 = vsel %vm14737_vm15, %v2565_v43, 0.0  ;;  %vm2735_vm1 = vmand %vm2703_vm13, %vm14738_vm14  ;;  %v9973_v27 = vadd.f32 %v2947_v48, %v9818_v51  ;;  %v9976_v32 = vadd.f32 %v2495_v16, %v9598_v12  ;;  %v4107_v38 = vsel %vm4075_vm5, %v14689_v42, 0.0  ;;  %v1694_v51 = vld [vmem:[#allocation2 + $0x78] sm:$0xff]  ;;  %v9993_v12 = vpop.permute.xlu0 %2819  ;;  %v14742_v16 = vld [vmem:[#allocation83_spill] sm:$0xff] }
 0x220   : > { %v2768_v22 = vsel %vm2735_vm1, 1, %v14037_v46  ;;  %vm9989_vm3 = vmand %vm3803_vm4, %vm3835_vm12  ;;  %14741 = vst [vmem:[#allocation82_spill] sm:$0xff] %v9993_v12  ;;  %vm1564_vm6 = vcmp.eq.s32.totalorder %v14742_v16, 1  ;;  %v9996_v33 = vadd.f32 %v3659_v57, %v3334_v5  ;;  %v9998_v18 = vadd.f32 %v2049_v39, %v1628_v24  ;;  %v2567_v48 = vld [vmem:[#allocation2 + $0x7f] sm:$0xff]  ;;  %v14748_v57 = vld [vmem:[#allocation106_spill] sm:$0xff] }
 0x221   : > { %v2014_v42 = vsel %vm1982_vm2, %v1693_v30, 0.0  ;;  %2843 = vperm.xlu0 %6209, %v2768_v22   ;;  %vm14745_vm1 = vcmp.ge.s32.totalorder %v14744_v4, 0  ;;  %vm14746_vm4 = vcmp.eq.s32.totalorder %v14706_v37, 1  ;;  %v1695_v43 = vld [vmem:[#allocation2 + $0x80] sm:$0xff]  ;;  %v3303_v24 = vmul.f32 %v9717_v26, %v3267_v28  ;;  %v14749_v30 = vld [vmem:[#allocation124_spill] sm:$0xff]  ;;  %v14752_v28 = vld [vmem:[#allocation150_spill] sm:$0xff] }
 0x222   : > { %14743 = vst [vmem:[#allocation103_spill] sm:$0xff] %v9998_v18  ;;  %vm3899_vm12 = vmand %vm9989_vm3, %vm14745_vm1  ;;  %v1594_v17 = vsel %vm14746_vm4, %v2566_v15, 0.0  ;;  %v4106_v31 = vsel %vm4074_vm11, %v9448_v35, 0.0  ;;  %vm2880_vm2 = vcmp.eq.s32.totalorder %v14749_v30, 1  ;;  %v1629_v39 = vmul.f32 %v9380_v47, %v1593_v62  ;;  %v10019_v37 = vld [vmem:[#allocation2 + $0x39] sm:$0xff]  ;;  %v10066_v30 = vld [vmem:[%s13338_s5 + $0xb0] sm:$0xff] }
 0x223   : > { %vm14750_vm15 = vcmp.lt.s32.totalorder %v14744_v4, 16  ;;  %v4143_v15 = vmul.f32 %v9981_v10, %v4107_v38  ;;  %v14751_v5 = vld [vmem:[#allocation125_spill] sm:$0xff]  ;;  %vm14753_vm4 = vcmp.ge.s32.totalorder %v14752_v28, 0  ;;  %vm14754_vm5 = vcmp.eq.s32.totalorder %v14718_v19, 1  ;;  %14755 = vst [vmem:[#allocation76_spill] sm:$0xff] %v10029_v7  ;;  %v14785_v16 = vld [vmem:[#allocation75_spill] sm:$0xff] }
 0x224   : > { %vm3931_vm14 = vmand %vm3899_vm12, %vm14750_vm15  ;;  %vm2428_vm1 = vcmp.eq.s32.totalorder %v14751_v5, 1  ;;  %v2015_v35 = vsel %vm14754_vm5, %v1694_v51, 0.0  ;;  %v2050_v62 = vmul.f32 %v9368_v54, %v2014_v42  ;;  %vm14756_vm12 = vcmp.lt.s32.totalorder %v14752_v28, 16  ;;  %v14759_v42 = vld [vmem:[#allocation133_spill] sm:$0xff]  ;;  %v1696_v28 = vld [vmem:[#allocation2 + $0x88] sm:$0xff] }
 0x225   : > { %v3964_v22 = vsel %vm3931_vm14, 1, %v14037_v46  ;;  %vm3415_vm11 = vmand %vm9554_vm10, %vm14753_vm4  ;;  %v1630_v38 = vmul.f32 %v9380_v47, %v1594_v17  ;;  %vm14757_vm14 = vcmp.eq.s32.totalorder %v14721_v6, 1  ;;  %vm14758_vm13 = vcmp.eq.s32.totalorder %v14722_v25, 1  ;;  %v6256_v6 = vld [vmem:[%s13339_s6 + $0xb8] sm:$0xff]  ;;  %v10053_v25 = vpop.permute.xlu0 %3527 }
 0x226   : > { %4033 = vperm.xlu1 %6210, %v3964_v22   ;;  %vm3447_vm15 = vmand %vm3415_vm11, %vm14756_vm12  ;;  %v1595_v4 = vsel %vm14757_vm14, %v2567_v48, 0.0  ;;  %v2016_v3 = vsel %vm14758_vm13, %v1695_v43, 0.0  ;;  %v4142_v12 = vmul.f32 %v9981_v10, %v4106_v31  ;;  %v2912_v19 = vsel %vm2880_vm2, %v9541_v34, 0.0  ;;  %14762 = vst [vmem:[#allocation152_spill] sm:$0xff] %v10053_v25  ;;  %v14763_v48 = vld [vmem:[#allocation5_spill] sm:$0xff]  ;;  %v14764_v43 = vld [vmem:[#allocation12_spill] sm:$0xff] }
 0x227   : > { %v3480_v51 = vsel %vm3447_vm15, 1, %v14037_v46  ;;  %vm14760_vm10 = vcmp.ge.s32.totalorder %v14759_v42, 0  ;;  %v10051_v17 = vadd.s32 1, %v6256_v6  ;;  %v2460_v31 = vsel %vm2428_vm1, %v10019_v37, 0.0  ;;  %v14766_v22 = vld [vmem:[#allocation108_spill] sm:$0xff]  ;;  %v2568_v6 = vld [vmem:[#allocation2 + $0x87] sm:$0xff] }
 0x228   : > { %vm4611_vm5 = vmand %vm9586_vm0, %vm14760_vm10  ;;  %3551 = vperm.xlu0 %6209, %v3480_v51   ;;  %vm14765_vm2 = vcmp.lt.s32.totalorder %v14759_v42, 16  ;;  %v2051_v9 = vmul.f32 %v9368_v54, %v2015_v35  ;;  %vm2608_vm11 = vcmp.ge.s32.totalorder %v10066_v30, 0  ;;  %vm2640_vm12 = vcmp.lt.s32.totalorder %v10066_v30, 16  ;;  %v14767_v42 = vld [vmem:[#allocation21_spill] sm:$0xff]  ;;  %v10079_v35 = vpop.permute.xlu1 %4717 }
 0x229   : > { %14761 = vst [vmem:[#allocation128_spill] sm:$0xff] %v10051_v17  ;;  %vm4643_vm0 = vmand %vm4611_vm5, %vm14765_vm2  ;;  %v10072_v5 = vadd.f32 %v3303_v24, %v9950_v49  ;;  %vm14768_vm1 = vcmp.ge.s32.totalorder %v14767_v42, 0  ;;  %v1631_v25 = vmul.f32 %v9380_v47, %v1595_v4  ;;  %v2052_v7 = vmul.f32 %v9368_v54, %v2016_v3  ;;  %v14770_v24 = vld [vmem:[#allocation15_spill] sm:$0xff]  ;;  %v14773_v4 = vld [vmem:[#allocation126_spill] sm:$0xff] }
 0x22a   : > { %v4676_v51 = vsel %vm4643_vm0, 1, %v14037_v46  ;;  %vm4255_vm14 = vmand %vm9841_vm7, %vm14768_vm1  ;;  %14769 = vst [vmem:[#allocation105_spill] sm:$0xff] %v10079_v35  ;;  %v10084_v18 = vadd.f32 %v4143_v15, %v9953_v40  ;;  %v2948_v49 = vmul.f32 %v9622_v0, %v2912_v19  ;;  %vm3592_vm10 = vcmp.eq.s32.totalorder %v14770_v24, 1  ;;  %v2569_v35 = vld [vmem:[#allocation2 + $0x8f] sm:$0xff]  ;;  %v14777_v15 = vld [vmem:[#allocation84_spill] sm:$0xff] }
 0x22b   : > { %v10088_v45 = vadd.f32 %v2050_v62, %v1629_v39  ;;  %4741 = vperm.xlu1 %6210, %v4676_v51   ;;  %vm14772_vm5 = vcmp.lt.s32.totalorder %v14767_v42, 16  ;;  %v2496_v41 = vmul.f32 %v9521_v61, %v2460_v31  ;;  %vm3236_vm0 = vcmp.eq.s32.totalorder %v14773_v4, 1  ;;  %vm10099_vm1 = vmand %vm2608_vm11, %vm2640_vm12  ;;  %v10104_v39 = vpop.permute.xlu0 %4363  ;;  %v14779_v31 = vld [vmem:[#allocation42_spill] sm:$0xff]  ;;  %v14786_v24 = vld [vmem:[#allocation127_spill] sm:$0xff] }
 0x22c   : > { %vm4287_vm2 = vmand %vm4255_vm14, %vm14772_vm5  ;;  %vm13846_vm15 = vcmp.ge.s32.totalorder %v10051_v17, 0  ;;  %14776 = vst [vmem:[#allocation104_spill] sm:$0xff] %v10104_v39  ;;  %v10108_v62 = vadd.f32 %v4142_v12, %v9962_v55  ;;  %v10110_v19 = vadd.f32 %v2051_v9, %v1630_v38  ;;  %vm14780_vm5 = vcmp.ge.s32.totalorder %v14779_v31, 0  ;;  %v14806_v39 = vld [vmem:[#allocation136_spill] sm:$0xff]  ;;  %v6267_v40 = vld [vmem:[#allocation2 + $0x47] sm:$0xff] }
 0x22d   : > { %14771 = vst [vmem:[#allocation6_spill] sm:$0xff] %v10088_v45  ;;  %v4320_v3 = vsel %vm4287_vm2, 1, %v14037_v46  ;;  %vm2704_vm11 = vmand %vm10099_vm1, %vm14780_vm5  ;;  %vm13844_vm12 = vcmp.lt.s32.totalorder %v10051_v17, 16  ;;  %v1596_v51 = vsel %vm1564_vm6, %v2568_v6, 0.0  ;;  %v3624_v42 = vsel %vm3592_vm10, %v9850_v44, 0.0 }
 0x22e   : > { %4387 = vperm.xlu0 %6209, %v4320_v3   ;;  %14778 = vst [vmem:[#allocation121_spill] sm:$0xff] %v10110_v19  ;;  %vm14781_vm2 = vcmp.lt.s32.totalorder %v14779_v31, 16  ;;  %v10124_v55 = vadd.f32 %v2052_v7, %v1631_v25  ;;  %vm14783_vm13 = vcmp.eq.s32.totalorder %v14748_v57, 1  ;;  %vm14784_vm4 = vcmp.eq.s32.totalorder %v14747_v2, 1  ;;  %v14787_v7 = vld [vmem:[#allocation44_spill] sm:$0xff]  ;;  %v10142_v57 = vpop.permute.xlu1 %2822  ;;  %v14790_v25 = vld [vmem:[#allocation107_spill] sm:$0xff] }
 0x22f   : > { %vm2736_vm14 = vmand %vm2704_vm11, %vm14781_vm2  ;;  %v2017_v12 = vsel %vm14783_vm13, %v1696_v28, 0.0  ;;  %v1597_v38 = vsel %vm14784_vm4, %v2569_v35, 0.0  ;;  %v10131_v9 = vadd.f32 %v2948_v49, %v9976_v32  ;;  %v3268_v6 = vsel %vm3236_vm0, %v14785_v16, 0.0  ;;  %14789 = vst [vmem:[#allocation73_spill] sm:$0xff] %v10142_v57  ;;  %v2570_v2 = vld [vmem:[#allocation2 + $0x97] sm:$0xff]  ;;  %v14791_v35 = vld [vmem:[#allocation129_spill] sm:$0xff] }
 0x230   : > { %14782 = vst [vmem:[#allocation122_spill] sm:$0xff] %v10124_v55  ;;  %vm4431_vm6 = vcmp.eq.s32.totalorder %v14786_v24, 1  ;;  %v2769_v3 = vsel %vm2736_vm14, 1, %v14037_v46  ;;  %vm14788_vm10 = vnez %v14787_v7  ;;  %v1697_v28 = vld [vmem:[#allocation2 + $0x90] sm:$0xff]  ;;  %vm1988_vm13 = vcmp.eq.s32.totalorder %v14790_v25, 1  ;;  %v14792_v49 = vld [vmem:[#allocation97_spill] sm:$0xff] }
 0x231   : > { %vm2220_vm5 = vmand %vm14788_vm10, %vm13846_vm15  ;;  %v10146_v32 = vadd.f32 %v2496_v41, %v9615_v36  ;;  %vm4076_vm4 = vcmp.eq.s32.totalorder %v14791_v35, 1  ;;  %2846 = vperm.xlu1 %6210, %v2769_v3   ;;  %v3772_v4 = vadd.s32 1, %v14792_v49  ;;  %v1632_v16 = vmul.f32 %v9380_v47, %v1596_v51  ;;  %v1698_v7 = vld [vmem:[#allocation2 + $0x98] sm:$0xff]  ;;  %v10159_v41 = vpop.permute.xlu0 %2372  ;;  %v10167_v51 = vld [vmem:[%s13336_s3 + $0x7] ss:$0 sm:$0xff] }
 0x232   : > { %vm2284_vm0 = vmand %vm2220_vm5, %vm13844_vm12  ;;  %v3660_v55 = vmul.f32 %v9829_v20, %v3624_v42  ;;  %v14793_v19 = vld [vmem:[#allocation72_spill] sm:$0xff]  ;;  %14795 = vst [vmem:[#allocation123_spill] sm:$0xff] %v10159_v41  ;;  %v2053_v36 = vmul.f32 %v9368_v54, %v2017_v12  ;;  %v1633_v3 = vmul.f32 %v9380_v47, %v1597_v38  ;;  %v3304_v49 = vmul.f32 %v9717_v26, %v3268_v6  ;;  %v14800_v24 = vld [vmem:[#allocation31_spill] sm:$0xff] }
 0x233   : > { %v2317_v57 = vsel %vm2284_vm0, 1, %v14037_v46  ;;  %vm14794_vm14 = vcmp.ge.s32.totalorder %v14793_v19, 0  ;;  %v4463_v42 = vsel %vm4431_vm6, %v9450_v21, 0.0  ;;  %vm14797_vm10 = vcmp.eq.s32.totalorder %v14764_v43, 1  ;;  %v14799_v38 = vld [vmem:[#allocation8_spill] sm:$0xff]  ;;  %v6258_v21 = vld [vmem:[%s13339_s6 + $0xc0] sm:$0xff] }
 0x234   : > { %vm3416_vm11 = vmand %vm9707_vm8, %vm14794_vm14  ;;  %2396 = vperm.xlu0 %6209, %v2317_v57   ;;  %vm14796_vm8 = vcmp.lt.s32.totalorder %v14793_v19, 16  ;;  %v2018_v8 = vsel %vm14797_vm10, %v1697_v28, 0.0  ;;  %vm14798_vm5 = vcmp.eq.s32.totalorder %v14763_v48, 1  ;;  %v4108_v6 = vsel %vm4076_vm4, %v14708_v59, 0.0  ;;  %v10192_v48 = vpop.permute.xlu1 %3530  ;;  %v14804_v59 = vld [vmem:[#allocation110_spill] sm:$0xff]  ;;  %v14812_v19 = vld [vmem:[#allocation109_spill] sm:$0xff] }
 0x235   : > { %vm3448_vm2 = vmand %vm3416_vm11, %vm14796_vm8  ;;  %v1598_v12 = vsel %vm14798_vm5, %v2570_v2, 0.0  ;;  %vm14801_vm6 = vcmp.ge.s32.totalorder %v14800_v24, 0  ;;  %v10190_v43 = vadd.s32 1, %v6258_v21  ;;  %14802 = vst [vmem:[#allocation83_spill] sm:$0xff] %v10192_v48  ;;  %vm14803_vm11 = vcmp.eq.s32.totalorder %v14766_v22, 1  ;;  %v2571_v2 = vld [vmem:[#allocation2 + $0x9f] sm:$0xff]  ;;  %v10212_v45 = vpop.permute.xlu0 %3176 }
 0x236   : > { %v3481_v41 = vsel %vm3448_vm2, 1, %v14037_v46  ;;  %vm3060_vm14 = vmand %vm9942_vm9, %vm14801_vm6  ;;  %v2019_v57 = vsel %vm14803_vm11, %v1698_v7, 0.0  ;;  %v10197_v28 = vld [vmem:[#allocation2 + $0x41] sm:$0xff]  ;;  %vm4788_vm2 = vcmp.eq.s32.totalorder %v14806_v39, 1  ;;  %vm14807_vm10 = vcmp.lt.s32.totalorder %v14800_v24, 16  ;;  %v14808_v48 = vld [vmem:[#allocation28_spill] sm:$0xff] }
 0x237   : > { %v14805_v35 = vld [vmem:[#allocation130_spill] sm:$0xff]  ;;  %3554 = vperm.xlu1 %6210, %v3481_v41   ;;  %vm3092_vm5 = vmand %vm3060_vm14, %vm14807_vm10  ;;  %vm3804_vm6 = vcmp.ge.s32.totalorder %v3772_v4, 0  ;;  %vm3836_vm12 = vcmp.lt.s32.totalorder %v3772_v4, 16  ;;  %v10204_v21 = vadd.f32 %v3660_v55, %v10072_v5  ;;  %v4499_v22 = vmul.f32 %v10167_v51, %v4463_v42  ;;  %14810 = vst [vmem:[#allocation30_spill] sm:$0xff] %v10212_v45  ;;  %v14811_v24 = vld [vmem:[#allocation85_spill] sm:$0xff] }
 0x238   : > { %vm2429_vm8 = vcmp.eq.s32.totalorder %v14805_v35, 1  ;;  %v3125_v7 = vsel %vm3092_vm5, 1, %v14037_v46  ;;  %vm14809_vm11 = vcmp.ge.s32.totalorder %v14808_v48, 0  ;;  %v2054_v41 = vmul.f32 %v9368_v54, %v2018_v8  ;;  %v1699_v45 = vld [vmem:[#allocation2 + $0xa0] sm:$0xff]  ;;  %v14826_v25 = vld [vmem:[#allocation87_spill] sm:$0xff] }
 0x239   : > { %vm4256_vm15 = vmand %vm9989_vm3, %vm14809_vm11  ;;  %vm1569_vm14 = vcmp.eq.s32.totalorder %v14811_v24, 1  ;;  %vm1990_vm10 = vcmp.eq.s32.totalorder %v14812_v19, 1  ;;  %v4144_v5 = vmul.f32 %v9981_v10, %v4108_v6  ;;  %3200 = vperm.xlu0 %6209, %v3125_v7   ;;  %vm14813_vm4 = vcmp.lt.s32.totalorder %v14808_v48, 16  ;;  %v10230_v6 = vld [vmem:[%s13336_s3 + $0x8] ss:$0 sm:$0xff] }
 0x23a   : > { %vm4288_vm0 = vmand %vm4256_vm15, %vm14813_vm4  ;;  %v1634_v55 = vmul.f32 %v9380_v47, %v1598_v12  ;;  %v2055_v42 = vmul.f32 %v9368_v54, %v2019_v57  ;;  %vm14814_vm5 = vcmp.eq.s32.totalorder %v14777_v15, 1  ;;  %v2461_v8 = vsel %vm2429_vm8, %v10197_v28, 0.0  ;;  %v10243_v15 = vpop.permute.xlu1 %4366 }
 0x23b   : > { %v1599_v17 = vsel %vm14814_vm5, %v2571_v2, 0.0  ;;  %v4820_v48 = vsel %vm4788_vm2, %v9698_v1, 0.0  ;;  %v4321_v12 = vsel %vm4288_vm0, 1, %v14037_v46  ;;  %vm10238_vm15 = vmand %vm3804_vm6, %vm3836_vm12  ;;  %vm13852_vm4 = vcmp.ge.s32.totalorder %v10190_v43, 0  ;;  %14817 = vst [vmem:[#allocation3_spill] sm:$0xff] %v10243_v15  ;;  %v14818_v2 = vld [vmem:[#allocation131_spill] sm:$0xff] }
 0x23c   : > { %v10246_v57 = vadd.f32 %v3304_v49, %v9973_v27  ;;  %vm4432_vm8 = vcmp.eq.s32.totalorder %v14818_v2, 1  ;;  %4390 = vperm.xlu1 %6210, %v4321_v12   ;;  %vm14819_vm2 = vcmp.ge.s32.totalorder %v14635_v14, 0  ;;  %vm13853_vm12 = vcmp.lt.s32.totalorder %v10190_v43, 16  ;;  %v2572_v27 = vld [vmem:[#allocation2 + $0xa7] sm:$0xff]  ;;  %v14832_v12 = vld [vmem:[#allocation19_spill] sm:$0xff] }
 0x23d   : > { %vm3900_vm0 = vmand %vm10238_vm15, %vm14819_vm2  ;;  %v10254_v1 = vadd.f32 %v2053_v36, %v1632_v16  ;;  %v4531_v39 = vadd.f32 %v4499_v22, %v10108_v62  ;;  %vm14821_vm6 = vcmp.lt.s32.totalorder %v14635_v14, 16  ;;  %v10259_v4 = vadd.f32 %v2054_v41, %v1633_v3  ;;  %v14823_v36 = vld [vmem:[#allocation53_spill] sm:$0xff] }
 0x23e   : > { %vm3932_vm11 = vmand %vm3900_vm0, %vm14821_vm6  ;;  %v10262_v49 = vmul.f32 %v9380_v47, %v1599_v17  ;;  %v2020_v35 = vsel %vm1988_vm13, %v1699_v45, 0.0  ;;  %v10267_v7 = vadd.f32 %v4144_v5, %v9996_v33  ;;  %v10270_v16 = vmul.f32 %v9521_v61, %v2461_v8  ;;  %v10278_v47 = vpop.permute.xlu0 %4012  ;;  %v1700_v17 = vld [vmem:[#allocation2 + $0xa8] sm:$0xff]  ;;  %v14827_v61 = vld [vmem:[#allocation20_spill] sm:$0xff] }
 0x23f   : > { %14820 = vst [vmem:[#allocation106_spill] sm:$0xff] %v10254_v1  ;;  %14822 = vst [vmem:[#allocation124_spill] sm:$0xff] %v10259_v4  ;;  %v4856_v62 = vmul.f32 %v10230_v6, %v4820_v48  ;;  %v3965_v14 = vsel %vm3932_vm11, 1, %v14037_v46  ;;  %vm14824_vm5 = vnez %v14823_v36  ;;  %v4464_v45 = vsel %vm4432_vm8, %v14735_v52, 0.0  ;;  %v14828_v33 = vld [vmem:[#allocation132_spill] sm:$0xff]  ;;  %v10296_v52 = vpop.permute.xlu1 %2375  ;;  %v1701_v48 = vld [vmem:[#allocation2 + $0xb0] sm:$0xff] }
 0x240   : > { %vm2221_vm2 = vmand %vm14824_vm5, %vm13852_vm4  ;;  %14825 = vst [vmem:[#allocation125_spill] sm:$0xff] %v10278_v47  ;;  %vm3237_vm0 = vcmp.eq.s32.totalorder %v14827_v61, 1  ;;  %vm2881_vm6 = vcmp.eq.s32.totalorder %v14828_v33, 1  ;;  %4036 = vperm.xlu0 %6209, %v3965_v14   ;;  %v10288_v3 = vadd.f32 %v2055_v42, %v1634_v55  ;;  %vm14830_vm5 = vcmp.ge.s32.totalorder %v9143_v13, 0  ;;  %v10301_v5 = vld [vmem:[%s13336_s3 + $0x1] ss:$0 sm:$0xff] }
 0x241   : > { %vm2285_vm11 = vmand %vm2221_vm2, %vm13853_vm12  ;;  %v3773_v41 = vadd.s32 1, %v9676_v56  ;;  %v2056_v8 = vmul.f32 %v10301_v5, %v2020_v35  ;;  %vm14831_vm8 = vcmp.eq.s32.totalorder %v14799_v38, 1  ;;  %v2573_v42 = vld [vmem:[#allocation2 + $0xaf] sm:$0xff]  ;;  %vm4789_vm2 = vcmp.eq.s32.totalorder %v14832_v12, 1  ;;  %v10312_v56 = vld [vmem:[%s13338_s5 + $0xb8] sm:$0xff] }
 0x242   : > { %14829 = vst [vmem:[#allocation133_spill] sm:$0xff] %v10288_v3  ;;  %v2318_v22 = vsel %vm2285_vm11, 1, %v14037_v46  ;;  %vm4612_vm4 = vmand %vm9841_vm7, %vm14830_vm5  ;;  %v1600_v55 = vsel %vm14831_vm8, %v2572_v27, 0.0  ;;  %vm14833_vm7 = vcmp.lt.s32.totalorder %v9143_v13, 16  ;;  %vm2609_vm5 = vcmp.ge.s32.totalorder %v10312_v56, 0  ;;  %v14835_v35 = vld [vmem:[#allocation40_spill] sm:$0xff]  ;;  %v10329_v14 = vpop.permute.xlu0 %4720 }
 0x243   : > { %2399 = vperm.xlu1 %6210, %v2318_v22   ;;  %vm4644_vm11 = vmand %vm4612_vm4, %vm14833_vm7  ;;  %vm2641_vm12 = vcmp.lt.s32.totalorder %v10312_v56, 16  ;;  %vm14834_vm13 = vcmp.eq.s32.totalorder %v14804_v59, 1  ;;  %v3269_v38 = vsel %vm3237_vm0, %v9547_v11, 0.0  ;;  %v2913_v13 = vsel %vm2881_vm6, %v9600_v23, 0.0  ;;  %14837 = vst [vmem:[#allocation5_spill] sm:$0xff] %v10329_v14  ;;  %v14838_v59 = vld [vmem:[#allocation112_spill] sm:$0xff]  ;;  %v10357_v24 = vpop.permute.xlu1 %3179 }
 0x244   : > { %v2021_v50 = vsel %vm14834_vm13, %v1700_v17, 0.0  ;;  %v4888_v2 = vadd.f32 %v4856_v62, %v4531_v39  ;;  %v4677_v27 = vsel %vm4644_vm11, 1, %v14037_v46  ;;  %vm14836_vm4 = vcmp.ge.s32.totalorder %v14835_v35, 0  ;;  %v14839_v17 = vld [vmem:[#allocation134_spill] sm:$0xff]  ;;  %v10337_v11 = vld [vmem:[%s13337_s4] ss:$0 sm:$0xff]  ;;  %vm10353_vm11 = vmand %vm2609_vm5, %vm2641_vm12 }
 0x245   : > { %vm3061_vm8 = vmand %vm10099_vm1, %vm14836_vm4  ;;  %vm1991_vm13 = vcmp.eq.s32.totalorder %v14838_v59, 1  ;;  %v4500_v36 = vmul.f32 %v10167_v51, %v4464_v45  ;;  %vm4077_vm0 = vcmp.eq.s32.totalorder %v14839_v17, 1  ;;  %4744 = vperm.xlu0 %6209, %v4677_v27   ;;  %vm14840_vm6 = vcmp.lt.s32.totalorder %v14835_v35, 16  ;;  %14843 = vst [vmem:[#allocation12_spill] sm:$0xff] %v10357_v24  ;;  %v10368_v22 = vld [vmem:[%s13336_s3] ss:$0 sm:$0xff] }
 0x246   : > { %vm3093_vm7 = vmand %vm3061_vm8, %vm14840_vm6  ;;  %v1601_v23 = vsel %vm1569_vm14, %v2573_v42, 0.0  ;;  %v2022_v39 = vsel %vm1990_vm10, %v1701_v48, 0.0  ;;  %v4821_v62 = vsel %vm4789_vm2, %v9850_v44, 0.0  ;;  %vm3805_vm4 = vcmp.ge.s32.totalorder %v3773_v41, 0  ;;  %v14844_v44 = vld [vmem:[#allocation39_spill] sm:$0xff]  ;;  %v14846_v27 = vld [vmem:[#allocation86_spill] sm:$0xff]  ;;  %v10392_v17 = vpop.permute.xlu0 %2825 }
 0x247   : > { %v3126_v45 = vsel %vm3093_vm7, 1, %v14037_v46  ;;  %vm3837_vm8 = vcmp.lt.s32.totalorder %v3773_v41, 16  ;;  %v3305_v19 = vmul.f32 %v9717_v26, %v3269_v38  ;;  %v2949_v33 = vmul.f32 %v9622_v0, %v2913_v13  ;;  %v2574_v12 = vld [vmem:[#allocation2 + $0xb7] sm:$0xff]  ;;  %14852 = vst [vmem:[#allocation108_spill] sm:$0xff] %v10392_v17  ;;  %v14857_v17 = vld [vmem:[#allocation89_spill] sm:$0xff]  ;;  %v14907_v1 = vld [vmem:[#allocation34_spill] sm:$0xff] }
 0x248   : > { %3203 = vperm.xlu1 %6210, %v3126_v45   ;;  %vm14845_vm14 = vcmp.ge.s32.totalorder %v14844_v44, 0  ;;  %v1636_v42 = vmul.f32 %v10368_v22, %v1600_v55  ;;  %v2057_v48 = vmul.f32 %v10301_v5, %v2021_v50  ;;  %vm1571_vm12 = vcmp.eq.s32.totalorder %v14846_v27, 1  ;;  %v14847_v38 = vld [vmem:[#allocation135_spill] sm:$0xff]  ;;  %v14849_v55 = vld [vmem:[#allocation29_spill] sm:$0xff]  ;;  %v14881_v27 = vld [vmem:[#allocation88_spill] sm:$0xff] }
 0x249   : > { %vm2705_vm10 = vmand %vm10353_vm11, %vm14845_vm14  ;;  %v4109_v0 = vsel %vm4077_vm0, %v9541_v34, 0.0  ;;  %vm3593_vm2 = vcmp.eq.s32.totalorder %v14847_v38, 1  ;;  %v10378_v13 = vadd.f32 %v10337_v11, %v4888_v2  ;;  %vm14848_vm5 = vcmp.lt.s32.totalorder %v14844_v44, 16  ;;  %v14853_v47 = vld [vmem:[#allocation111_spill] sm:$0xff]  ;;  %v6263_v38 = vld [vmem:[%s13339_s6 + $0xc8] sm:$0xff] }
 0x24a   : > { %vm2737_vm6 = vmand %vm2705_vm10, %vm14848_vm5  ;;  %v1637_v45 = vmul.f32 %v10368_v22, %v1601_v23  ;;  %vm4433_vm7 = vcmp.eq.s32.totalorder %v14849_v55, 1  ;;  %v4857_v50 = vmul.f32 %v10230_v6, %v4821_v62  ;;  %v2058_v2 = vmul.f32 %v10301_v5, %v2022_v39  ;;  %v14894_v3 = vld [vmem:[#allocation79_spill] sm:$0xff] }
 0x24b   : > { %v2770_v24 = vsel %vm2737_vm6, 1, %v14037_v46  ;;  %vm10388_vm14 = vmand %vm3805_vm4, %vm3837_vm8  ;;  %vm1992_vm0 = vcmp.eq.s32.totalorder %v14853_v47, 1  ;;  %v10398_v23 = vadd.f32 %v10270_v16, %v9722_v53  ;;  %v4532_v62 = vadd.f32 %v4500_v36, %v10084_v18  ;;  %v6262_v36 = vld [vmem:[#allocation2 + $0x38] sm:$0xff] }
 0x24c   : > { %2849 = vperm.xlu0 %6209, %v2770_v24   ;;  %vm14854_vm10 = vcmp.ge.s32.totalorder %v14665_v29, 0  ;;  %v10406_v41 = vadd.f32 %v2056_v8, %v10262_v49  ;;  %vm14856_vm8 = vcmp.eq.s32.totalorder %v14826_v25, 1  ;;  %v10412_v14 = vadd.f32 %v3305_v19, %v10131_v9  ;;  %v1702_v49 = vld [vmem:[#allocation2 + $0xb8] sm:$0xff] }
 0x24d   : > { %vm3901_vm4 = vmand %vm10388_vm14, %vm14854_vm10  ;;  %v1602_v39 = vsel %vm14856_vm8, %v2574_v12, 0.0  ;;  %v4145_v53 = vmul.f32 %v9981_v10, %v4109_v0  ;;  %v3625_v18 = vsel %vm3593_vm2, %v10019_v37, 0.0  ;;  %vm14858_vm6 = vcmp.lt.s32.totalorder %v14665_v29, 16  ;;  %v10433_v29 = vpop.permute.xlu1 %4015  ;;  %v14866_v0 = vld [vmem:[#allocation17_spill] sm:$0xff] }
 0x24e   : > { %14855 = vst [vmem:[#allocation21_spill] sm:$0xff] %v10406_v41  ;;  %vm3933_vm10 = vmand %vm3901_vm4, %vm14858_vm6  ;;  %v10420_v16 = vadd.f32 %v2057_v48, %v1636_v42  ;;  %v10423_v25 = vadd.f32 %v2949_v33, %v10146_v32  ;;  %v4959_v8 = vadd.f32 3.0, %v10378_v13  ;;  %v4465_v9 = vsel %vm4433_vm7, %v6262_v36, 0.0  ;;  %v14862_v42 = vld [vmem:[#allocation141_spill] sm:$0xff]  ;;  %v14865_v48 = vld [vmem:[#allocation114_spill] sm:$0xff] }
 0x24f   : > { %v3966_v24 = vsel %vm3933_vm10, 1, %v14037_v46  ;;  %vm14860_vm8 = vcmp.ge.s32.totalorder %v9664_v58, 0  ;;  %14861 = vst [vmem:[#allocation126_spill] sm:$0xff] %v10433_v29  ;;  %v4889_v19 = vadd.f32 %v4857_v50, %v4532_v62  ;;  %vm4790_vm4 = vcmp.eq.s32.totalorder %v14862_v42, 1  ;;  %v14872_v36 = vld [vmem:[#allocation25_spill] sm:$0xff]  ;;  %v14884_v29 = vld [vmem:[#allocation99_spill] sm:$0xff] }
 0x250   : > { %14859 = vst [vmem:[#allocation15_spill] sm:$0xff] %v10420_v16  ;;  %vm3417_vm2 = vmand %vm9942_vm9, %vm14860_vm8  ;;  %4039 = vperm.xlu1 %6210, %v3966_v24   ;;  %vm14863_vm6 = vcmp.lt.s32.totalorder %v9664_v58, 16  ;;  %v10438_v32 = vadd.f32 %v2058_v2, %v1637_v45  ;;  %v1638_v33 = vmul.f32 %v10368_v22, %v1602_v39  ;;  %v3661_v12 = vmul.f32 %v9829_v20, %v3625_v18  ;;  %v10453_v45 = vpop.permute.xlu0 %3533  ;;  %v2575_v2 = vld [vmem:[#allocation2 + $0xbf] sm:$0xff]  ;;  %v10470_v18 = vld [vmem:[#allocation2 + $0x49] sm:$0xff] }
 0x251   : > { %vm3449_vm5 = vmand %vm3417_vm2, %vm14863_vm6  ;;  %vm14867_vm9 = vcmp.ge.s32.totalorder %v14866_v0, 0  ;;  %v10451_v55 = vadd.s32 1, %v6263_v38  ;;  %14869 = vst [vmem:[#allocation75_spill] sm:$0xff] %v10453_v45  ;;  %v2023_v50 = vsel %vm1991_vm13, %v1702_v49, 0.0  ;;  %v10458_v62 = vadd.f32 %v4145_v53, %v10204_v21  ;;  %v14871_v21 = vld [vmem:[#allocation137_spill] sm:$0xff]  ;;  %v14877_v45 = vld [vmem:[#allocation18_spill] sm:$0xff] }
 0x252   : > { %14864 = vst [vmem:[#allocation84_spill] sm:$0xff] %v10438_v32  ;;  %v3482_v60 = vsel %vm3449_vm5, 1, %v14037_v46  ;;  %vm4613_vm10 = vmand %vm9989_vm3, %vm14867_vm9  ;;  %v4501_v39 = vmul.f32 %v10167_v51, %v4465_v9  ;;  %vm14870_vm3 = vcmp.lt.s32.totalorder %v14866_v0, 16  ;;  %vm2610_vm8 = vcmp.ge.s32.totalorder %v10466_v63, 0  ;;  %v10481_v9 = vpop.permute.xlu1 %4723  ;;  %v1703_v24 = vld [vmem:[#allocation2 + $0xc0] sm:$0xff]  ;;  %v14887_v32 = vld [vmem:[#allocation100_spill] sm:$0xff] }
 0x253   : > { %14868 = vst [vmem:[#allocation42_spill] sm:$0xff] %v10451_v55  ;;  %3557 = vperm.xlu0 %6209, %v3482_v60   ;;  %vm4645_vm5 = vmand %vm4613_vm10, %vm14870_vm3  ;;  %vm2642_vm2 = vcmp.lt.s32.totalorder %v10466_v63, 16  ;;  %v4991_v59 = vmax.f32 %v4959_v8, 0.0  ;;  %vm2430_vm13 = vcmp.eq.s32.totalorder %v14871_v21, 1  ;;  %v4822_v53 = vsel %vm4790_vm4, %v10019_v37, 0.0  ;;  %v14875_v60 = vld [vmem:[#allocation138_spill] sm:$0xff] }
 0x254   : > { %v4678_v49 = vsel %vm4645_vm5, 1, %v14037_v46  ;;  %vm14873_vm6 = vcmp.ge.s32.totalorder %v14872_v36, 0  ;;  %14874 = vst [vmem:[#allocation127_spill] sm:$0xff] %v10481_v9  ;;  %v10484_v8 = vadd.f32 %v10337_v11, %v4889_v19  ;;  %vm3238_vm10 = vcmp.eq.s32.totalorder %v14875_v60, 1  ;;  %v2576_v42 = vld [vmem:[#allocation2 + $0xc7] sm:$0xff]  ;;  %vm10501_vm5 = vmand %vm2610_vm8, %vm2642_vm2 }
 0x255   : > { %vm4257_vm9 = vmand %vm10238_vm15, %vm14873_vm6  ;;  %4747 = vperm.xlu1 %6210, %v4678_v49   ;;  %vm14876_vm3 = vcmp.lt.s32.totalorder %v14872_v36, 16  ;;  %v2059_v37 = vmul.f32 %v10301_v5, %v2023_v50  ;;  %v1603_v0 = vsel %vm1571_vm12, %v2575_v2, 0.0  ;;  %v10493_v38 = vadd.f32 %v3661_v12, %v10246_v57  ;;  %v10506_v50 = vpop.permute.xlu0 %4369  ;;  %v14882_v2 = vld [vmem:[#allocation48_spill] sm:$0xff]  ;;  %v14998_v49 = vld [vmem:[#allocation70_spill] sm:$0xff] }
 0x256   : > { %vm4289_vm7 = vmand %vm4257_vm9, %vm14876_vm3  ;;  %vm2882_vm4 = vcmp.eq.s32.totalorder %v14877_v45, 1  ;;  %vm13864_vm6 = vcmp.ge.s32.totalorder %v10451_v55, 0  ;;  %14880 = vst [vmem:[#allocation44_spill] sm:$0xff] %v10506_v50  ;;  %vm1573_vm12 = vcmp.eq.s32.totalorder %v14881_v27, 1  ;;  %v2462_v57 = vsel %vm2430_vm13, %v10470_v18, 0.0 }
 0x257   : > { %v4322_v19 = vsel %vm4289_vm7, 1, %v14037_v46  ;;  %v4858_v12 = vmul.f32 %v10230_v6, %v4822_v53  ;;  %vm14883_vm7 = vcmp.ge.s32.totalorder %v14882_v2, 0  ;;  %vm13862_vm2 = vcmp.lt.s32.totalorder %v10451_v55, 16 }
 0x258   : > { %4393 = vperm.xlu0 %6209, %v4322_v19   ;;  %vm2706_vm8 = vmand %vm10501_vm5, %vm14883_vm7  ;;  %v2024_v36 = vsel %vm1992_vm0, %v1703_v24, 0.0  ;;  %v5023_v50 = vmin.f32 %v4991_v59, 6.0  ;;  %v4533_v9 = vadd.f32 %v4501_v39, %v10267_v7  ;;  %v3270_v21 = vsel %vm3238_vm10, %v14884_v29, 0.0  ;;  %v1704_v19 = vld [vmem:[#allocation2 + $0xc8] sm:$0xff]  ;;  %v14888_v59 = vld [vmem:[#allocation139_spill] sm:$0xff]  ;;  %v10538_v39 = vpop.permute.xlu1 %2828 }
 0x259   : > { %vm14885_vm13 = vcmp.lt.s32.totalorder %v14882_v2, 16  ;;  %vm14886_vm3 = vcmp.eq.s32.totalorder %v14857_v17, 1  ;;  %v4960_v15 = vadd.f32 3.0, %v10484_v8  ;;  %v2914_v47 = vsel %vm2882_vm4, %v14887_v32, 0.0  ;;  %v14889_v29 = vld [vmem:[#allocation50_spill] sm:$0xff] }
 0x25a   : > { %vm2738_vm9 = vmand %vm2706_vm8, %vm14885_vm13  ;;  %v1604_v53 = vsel %vm14886_vm3, %v2576_v42, 0.0  ;;  %vm4078_vm0 = vcmp.eq.s32.totalorder %v14888_v59, 1  ;;  %vm14890_vm10 = vnez %v14889_v29  ;;  %v10543_v17 = vld [vmem:[%s13336_s3 + $0x2] ss:$0 sm:$0xff]  ;;  %v14891_v32 = vld [vmem:[#allocation22_spill] sm:$0xff]  ;;  %v10549_v60 = vadd.f32 %v2059_v37, %v1638_v33 }
 0x25b   : > { %v2771_v7 = vsel %vm2738_vm9, 1, %v14037_v46  ;;  %vm2222_vm7 = vmand %vm14890_vm10, %vm13864_vm6  ;;  %v2498_v24 = vmul.f32 %v10543_v17, %v2462_v57  ;;  %v3774_v45 = vadd.s32 1, %v14891_v32  ;;  %v1639_v42 = vmul.f32 %v10368_v22, %v1603_v0  ;;  %v14893_v29 = vld [vmem:[#allocation113_spill] sm:$0xff]  ;;  %v10558_v57 = vpop.permute.xlu0 %2378  ;;  %v14897_v37 = vld [vmem:[#allocation90_spill] sm:$0xff] }
 0x25c   : > { %2852 = vperm.xlu1 %6210, %v2771_v7   ;;  %vm2286_vm4 = vmand %vm2222_vm7, %vm13862_vm2  ;;  %14892 = vst [vmem:[#allocation107_spill] sm:$0xff] %v10549_v60  ;;  %vm1994_vm8 = vcmp.eq.s32.totalorder %v14893_v29, 1  ;;  %v4890_v16 = vadd.f32 %v4858_v12, %v4533_v9  ;;  %vm14895_vm13 = vcmp.ge.s32.totalorder %v14894_v3, 0  ;;  %v2060_v7 = vmul.f32 %v10301_v5, %v2024_v36  ;;  %v10568_v9 = vld [vmem:[%s13336_s3 + $0x3] ss:$0 sm:$0xff]  ;;  %v14903_v60 = vld [vmem:[#allocation140_spill] sm:$0xff] }
 0x25d   : > { %v2319_v41 = vsel %vm2286_vm4, 1, %v14037_v46  ;;  %vm3418_vm9 = vmand %vm10099_vm1, %vm14895_vm13  ;;  %vm14896_vm3 = vcmp.eq.s32.totalorder %v14865_v48, 1  ;;  %v3306_v0 = vmul.f32 %v9717_v26, %v3270_v21  ;;  %v2950_v12 = vmul.f32 %v10568_v9, %v2914_v47  ;;  %v14899_v21 = vld [vmem:[#allocation37_spill] sm:$0xff]  ;;  %v6268_v47 = vld [vmem:[%s13339_s6 + $0xd0] sm:$0xff] }
 0x25e   : > { %v2025_v33 = vsel %vm14896_vm3, %v1704_v19, 0.0  ;;  %v4110_v32 = vsel %vm4078_vm0, %v6267_v40, 0.0  ;;  %2402 = vperm.xlu0 %6209, %v2319_v41   ;;  %vm14898_vm1 = vcmp.lt.s32.totalorder %v14894_v3, 16  ;;  %v1640_v48 = vmul.f32 %v10368_v22, %v1604_v53  ;;  %v10586_v41 = vpop.permute.xlu1 %3536  ;;  %v2577_v40 = vld [vmem:[#allocation2 + $0xcf] sm:$0xff]  ;;  %v10674_v29 = vld [vmem:[#allocation2 + $0x57] sm:$0xff] }
 0x25f   : > { %vm3450_vm7 = vmand %vm3418_vm9, %vm14898_vm1  ;;  %v5055_v36 = vmul.f32 0.16666667, %v5023_v50  ;;  %v4992_v19 = vmax.f32 %v4960_v15, 0.0  ;;  %vm14900_vm4 = vcmp.ge.s32.totalorder %v14899_v21, 0  ;;  %v10584_v59 = vadd.s32 1, %v6268_v47  ;;  %14902 = vst [vmem:[#allocation97_spill] sm:$0xff] %v10586_v41 }
 0x260   : > { %v3483_v26 = vsel %vm3450_vm7, 1, %v14037_v46  ;;  %vm3062_vm13 = vmand %vm10353_vm11, %vm14900_vm4  ;;  %vm3594_vm0 = vcmp.eq.s32.totalorder %v14903_v60, 1  ;;  %vm14904_vm9 = vcmp.lt.s32.totalorder %v14899_v21, 16  ;;  %vm3806_vm1 = vcmp.ge.s32.totalorder %v3774_v45, 0  ;;  %v14905_v50 = vld [vmem:[#allocation102_spill] sm:$0xff]  ;;  %v14917_v60 = vld [vmem:[#allocation33_spill] sm:$0xff] }
 0x261   : > { %14901 = vst [vmem:[#allocation129_spill] sm:$0xff] %v10584_v59  ;;  %3560 = vperm.xlu1 %6210, %v3483_v26   ;;  %vm3094_vm3 = vmand %vm3062_vm13, %vm14904_vm9  ;;  %vm3838_vm7 = vcmp.lt.s32.totalorder %v3774_v45, 16  ;;  %v2061_v15 = vmul.f32 %v10301_v5, %v2025_v33  ;;  %v10593_v53 = vadd.f32 %v2498_v24, %v14905_v50  ;;  %v4146_v4 = vmul.f32 %v9981_v10, %v4110_v32  ;;  %v10604_v26 = vpop.permute.xlu0 %3182 }
 0x262   : > { %v10597_v47 = vadd.f32 %v10337_v11, %v4890_v16  ;;  %v3127_v41 = vsel %vm3094_vm3, 1, %v14037_v46  ;;  %vm14908_vm4 = vcmp.ge.s32.totalorder %v14907_v1, 0  ;;  %14909 = vst [vmem:[#allocation110_spill] sm:$0xff] %v10604_v26  ;;  %v10607_v21 = vadd.f32 %v3306_v0, %v10423_v25  ;;  %vm10624_vm3 = vmand %vm3806_vm1, %vm3838_vm7  ;;  %v2578_v0 = vld [vmem:[#allocation2 + $0xd7] sm:$0xff] }
 0x263   : > { %vm4258_vm2 = vmand %vm10388_vm14, %vm14908_vm4  ;;  %v10610_v24 = vadd.f32 %v2950_v12, %v10398_v23  ;;  %3206 = vperm.xlu0 %6209, %v3127_v41   ;;  %vm14910_vm13 = vcmp.lt.s32.totalorder %v14907_v1, 16  ;;  %v10614_v16 = vadd.f32 %v2060_v7, %v1639_v42  ;;  %v1605_v33 = vsel %vm1573_vm12, %v2577_v40, 0.0  ;;  %v10629_v1 = vpop.permute.xlu1 %4372  ;;  %v1705_v42 = vld [vmem:[#allocation2 + $0xd0] sm:$0xff]  ;;  %v14916_v7 = vld [vmem:[#allocation142_spill] sm:$0xff] }
 0x264   : > { %14906 = vst [vmem:[#allocation8_spill] sm:$0xff] %v10597_v47  ;;  %vm4290_vm9 = vmand %vm4258_vm2, %vm14910_vm13  ;;  %v5024_v32 = vmin.f32 %v4992_v19, 6.0  ;;  %v3626_v50 = vsel %vm3594_vm0, %v10197_v28, 0.0  ;;  %vm13868_vm2 = vcmp.ge.s32.totalorder %v10584_v59, 0  ;;  %v10632_v27 = vmul.f32 %v5055_v36, %v10378_v13  ;;  %v14920_v13 = vld [vmem:[#allocation24_spill] sm:$0xff]  ;;  %v14939_v26 = vld [vmem:[#allocation11_spill] sm:$0xff] }
 0x265   : > { %14911 = vst [vmem:[#allocation130_spill] sm:$0xff] %v10614_v16  ;;  %v4323_v25 = vsel %vm4290_vm9, 1, %v14037_v46  ;;  %14914 = vst [vmem:[#allocation136_spill] sm:$0xff] %v10629_v1  ;;  %vm4434_vm12 = vcmp.eq.s32.totalorder %v14916_v7, 1  ;;  %vm14918_vm0 = vcmp.ge.s32.totalorder %v14917_v60, 0  ;;  %vm13873_vm1 = vcmp.lt.s32.totalorder %v10584_v59, 16 }
 0x266   : > { %14915 = vst [vmem:[#allocation28_spill] sm:$0xff] %v10632_v27  ;;  %4396 = vperm.xlu1 %6210, %v4323_v25   ;;  %vm3902_vm4 = vmand %vm10624_vm3, %vm14918_vm0  ;;  %v10640_v45 = vadd.f32 %v2061_v15, %v1640_v48  ;;  %v10643_v12 = vadd.f32 %v4146_v4, %v10493_v38  ;;  %v4961_v19 = vadd.f32 3.0, %v10597_v47  ;;  %vm2883_vm7 = vcmp.eq.s32.totalorder %v14920_v13, 1  ;;  %v10653_v40 = vld [vmem:[#allocation2 + $0x51] sm:$0xff]  ;;  %v14922_v48 = vld [vmem:[#allocation26_spill] sm:$0xff]  ;;  %v10661_v38 = vpop.permute.xlu0 %4018 }
 0x267   : > { %vm14921_vm13 = vcmp.lt.s32.totalorder %v14917_v60, 16  ;;  %v10650_v36 = vmul.f32 %v10368_v22, %v1605_v33  ;;  %v3662_v41 = vmul.f32 %v9829_v20, %v3626_v50  ;;  %vm2431_vm0 = vcmp.eq.s32.totalorder %v14922_v48, 1  ;;  %v14923_v4 = vld [vmem:[#allocation59_spill] sm:$0xff]  ;;  %14925 = vst [vmem:[#allocation109_spill] sm:$0xff] %v10661_v38  ;;  %v6269_v50 = vld [vmem:[#allocation2 + $0x40] sm:$0xff]  ;;  %v10696_v13 = vld [vmem:[%s13338_s5 + $0xc8] sm:$0xff] }
 0x268   : > { %14919 = vst [vmem:[#allocation85_spill] sm:$0xff] %v10640_v45  ;;  %vm3934_vm9 = vmand %vm3902_vm4, %vm14921_vm13  ;;  %vm14924_vm6 = vnez %v14923_v4  ;;  %v2026_v25 = vsel %vm1994_vm8, %v1705_v42, 0.0  ;;  %v14926_v33 = vld [vmem:[#allocation115_spill] sm:$0xff]  ;;  %v5056_v60 = vmul.f32 0.16666667, %v5024_v32  ;;  %v4466_v27 = vsel %vm4434_vm12, %v6269_v50, 0.0 }
 0x269   : > { %v3967_v15 = vsel %vm3934_vm9, 1, %v14037_v46  ;;  %vm2223_vm10 = vmand %vm14924_vm6, %vm13868_vm2  ;;  %vm1995_vm4 = vcmp.eq.s32.totalorder %v14926_v33, 1  ;;  %v14927_v47 = vld [vmem:[#allocation143_spill] sm:$0xff]  ;;  %vm14928_vm6 = vcmp.eq.s32.totalorder %v14897_v37, 1  ;;  %v2915_v32 = vsel %vm2883_vm7, %v10674_v29, 0.0  ;;  %v14931_v50 = vld [vmem:[#allocation150_spill] sm:$0xff] }
 0x26a   : > { %vm3595_vm13 = vcmp.eq.s32.totalorder %v14927_v47, 1  ;;  %4042 = vperm.xlu0 %6209, %v3967_v15   ;;  %vm2287_vm9 = vmand %vm2223_vm10, %vm13873_vm1  ;;  %v1606_v4 = vsel %vm14928_vm6, %v2578_v0, 0.0  ;;  %v14929_v38 = vld [vmem:[#allocation7_spill] sm:$0xff]  ;;  %vm14932_vm12 = vcmp.ge.s32.totalorder %v14931_v50, 0  ;;  %v3775_v37 = vadd.s32 1, %v10066_v30  ;;  %v10686_v0 = vpop.permute.xlu1 %2381  ;;  %14934 = vst [vmem:[#allocation131_spill] sm:$0xff] %v10696_v13 }
 0x26b   : > { %vm1575_vm2 = vcmp.eq.s32.totalorder %v14929_v38, 1  ;;  %v14930_v42 = vld [vmem:[#allocation23_spill] sm:$0xff]  ;;  %v2320_v7 = vsel %vm2287_vm9, 1, %v14037_v46  ;;  %vm4614_vm10 = vmand %vm10238_vm15, %vm14932_vm12  ;;  %v4993_v15 = vmax.f32 %v4961_v19, 0.0  ;;  %v2463_v1 = vsel %vm2431_vm0, %v10653_v40, 0.0  ;;  %v14935_v19 = vld [vmem:[#allocation144_spill] sm:$0xff] }
 0x26c   : > { %vm4791_vm8 = vcmp.eq.s32.totalorder %v14930_v42, 1  ;;  %2405 = vperm.xlu1 %6210, %v2320_v7   ;;  %vm14933_vm7 = vcmp.lt.s32.totalorder %v14931_v50, 16  ;;  %vm2611_vm15 = vcmp.ge.s32.totalorder %v10696_v13, 0  ;;  %vm2643_vm9 = vcmp.lt.s32.totalorder %v10696_v13, 16  ;;  %v14936_v7 = vld [vmem:[#allocation46_spill] sm:$0xff]  ;;  %v10710_v50 = vpop.permute.xlu0 %4726  ;;  %v14944_v42 = vld [vmem:[#allocation145_spill] sm:$0xff] }
 0x26d   : > { %vm4646_vm6 = vmand %vm4614_vm10, %vm14933_vm7  ;;  %v4502_v30 = vmul.f32 %v10167_v51, %v4466_v27  ;;  %v3627_v54 = vsel %vm3595_vm13, %v10470_v18, 0.0  ;;  %vm3239_vm0 = vcmp.eq.s32.totalorder %v14935_v19, 1  ;;  %vm14937_vm12 = vcmp.ge.s32.totalorder %v14936_v7, 0  ;;  %14938 = vst [vmem:[#allocation53_spill] sm:$0xff] %v10710_v50  ;;  %v2579_v19 = vld [vmem:[#allocation2 + $0xdf] sm:$0xff] }
 0x26e   : > { %v4679_v48 = vsel %vm4646_vm6, 1, %v14037_v46  ;;  %vm3063_vm10 = vmand %vm10501_vm5, %vm14937_vm12  ;;  %vm1996_vm7 = vcmp.eq.s32.totalorder %v14939_v26, 1  ;;  %v10714_v45 = vadd.f32 %v3662_v41, %v10412_v14  ;;  %v2951_v27 = vmul.f32 %v10568_v9, %v2915_v32  ;;  %v2118_v14 = vld [vmem:[#allocation2 + $0x91] sm:$0xff] }
 0x26f   : > { %v4823_v47 = vsel %vm4791_vm8, %v10197_v28, 0.0  ;;  %4750 = vperm.xlu0 %6209, %v4679_v48   ;;  %vm14940_vm13 = vcmp.lt.s32.totalorder %v14936_v7, 16  ;;  %v2062_v16 = vmul.f32 %v10301_v5, %v2026_v25  ;;  %v2499_v59 = vmul.f32 %v10543_v17, %v2463_v1  ;;  %vm10729_vm12 = vmand %vm2611_vm15, %vm2643_vm9  ;;  %v10733_v28 = vpop.permute.xlu1 %3185  ;;  %v10736_v25 = vld [vmem:[#allocation2 + $0x50] sm:$0xff]  ;;  %v14945_v48 = vld [vmem:[#allocation45_spill] sm:$0xff] }
 0x270   : > { %vm3095_vm6 = vmand %vm3063_vm10, %vm14940_vm13  ;;  %vm3807_vm1 = vcmp.ge.s32.totalorder %v3775_v37, 0  ;;  %vm3839_vm8 = vcmp.lt.s32.totalorder %v3775_v37, 16  ;;  %14943 = vst [vmem:[#allocation87_spill] sm:$0xff] %v10733_v28  ;;  %v5025_v41 = vmin.f32 %v4993_v15, 6.0  ;;  %v3663_v32 = vmul.f32 %v9829_v20, %v3627_v54  ;;  %v1706_v7 = vld [vmem:[#allocation2 + $0xd8] sm:$0xff]  ;;  %v14949_v28 = vld [vmem:[#allocation35_spill] sm:$0xff] }
 0x271   : > { %v3128_v50 = vsel %vm3095_vm6, 1, %v14037_v46  ;;  %v3271_v1 = vsel %vm3239_vm0, %v10736_v25, 0.0  ;;  %vm4435_vm10 = vcmp.eq.s32.totalorder %v14944_v42, 1  ;;  %vm14946_vm15 = vcmp.ge.s32.totalorder %v14945_v48, 0 }
 0x272   : > { %3209 = vperm.xlu1 %6210, %v3128_v50   ;;  %vm2707_vm9 = vmand %vm10729_vm12, %vm14946_vm15  ;;  %v10747_v13 = vmul.f32 %v5056_v60, %v10484_v8  ;;  %v4534_v20 = vadd.f32 %v4502_v30, %v10458_v62  ;;  %v4859_v15 = vmul.f32 %v10230_v6, %v4823_v47  ;;  %vm14948_vm13 = vcmp.lt.s32.totalorder %v14945_v48, 16  ;;  %v10767_v8 = vpop.permute.xlu0 %2831  ;;  %v14955_v30 = vld [vmem:[#allocation117_spill] sm:$0xff]  ;;  %v14956_v48 = vld [vmem:[#allocation146_spill] sm:$0xff] }
 0x273   : > { %vm2739_vm6 = vmand %vm2707_vm9, %vm14948_vm13  ;;  %v10754_v54 = vmul.f32 %v10368_v22, %v1606_v4  ;;  %v10757_v50 = vadd.f32 %v2951_v27, %v10593_v53  ;;  %vm4079_vm0 = vcmp.eq.s32.totalorder %v14949_v28, 1  ;;  %14952 = vst [vmem:[#allocation132_spill] sm:$0xff] %v10767_v8  ;;  %v10770_v60 = vadd.f32 %v2062_v16, %v10650_v36  ;;  %v14954_v4 = vld [vmem:[#allocation92_spill] sm:$0xff]  ;;  %v10777_v53 = vld [vmem:[%s13336_s3 + $0x4] ss:$0 sm:$0xff] }
 0x274   : > { %14947 = vst [vmem:[#allocation20_spill] sm:$0xff] %v10747_v13  ;;  %v2772_v3 = vsel %vm2739_vm6, 1, %v14037_v46  ;;  %vm10763_vm15 = vmand %vm3807_vm1, %vm3839_vm8  ;;  %v3307_v37 = vmul.f32 %v10777_v53, %v3271_v1  ;;  %v6274_v27 = vld [vmem:[#allocation2 + $0x48] sm:$0xff]  ;;  %v10782_v13 = vld [vmem:[#allocation2 + $0x59] sm:$0xff]  ;;  %vm2432_vm1 = vcmp.eq.s32.totalorder %v14956_v48, 1  ;;  %vm14957_vm8 = vcmp.ge.s32.totalorder %v14779_v31, 0 }
 0x275   : > { %14953 = vst [vmem:[#allocation19_spill] sm:$0xff] %v10770_v60  ;;  %v4467_v47 = vsel %vm4435_vm10, %v6274_v27, 0.0  ;;  %2855 = vperm.xlu0 %6209, %v2772_v3   ;;  %vm3903_vm6 = vmand %vm10763_vm15, %vm14957_vm8  ;;  %v2027_v16 = vsel %vm1995_vm4, %v1706_v7, 0.0  ;;  %v10791_v36 = vmul.f32 0.16666667, %v5025_v41  ;;  %v14959_v1 = vld [vmem:[#allocation81_spill] sm:$0xff]  ;;  %v10797_v42 = vadd.f32 %v3663_v32, %v10607_v21 }
 0x276   : > { %v10794_v60 = vadd.f32 %v2499_v59, %v14959_v1  ;;  %vm14960_vm10 = vcmp.lt.s32.totalorder %v14779_v31, 16  ;;  %v1607_v3 = vsel %vm1575_vm2, %v2579_v19, 0.0  ;;  %v1707_v27 = vld [vmem:[#allocation2 + $0xe0] sm:$0xff]  ;;  %v6275_v8 = vld [vmem:[#allocation2 + $0x4f] sm:$0xff]  ;;  %v4891_v7 = vadd.f32 %v4859_v15, %v4534_v20  ;;  %v14962_v1 = vld [vmem:[#allocation128_spill] sm:$0xff]  ;;  %v10811_v31 = vpop.permute.xlu1 %4021 }
 0x277   : > { %14958 = vst [vmem:[#allocation40_spill] sm:$0xff] %v10791_v36  ;;  %vm3935_vm13 = vmand %vm3903_vm6, %vm14960_vm10  ;;  %v4111_v33 = vsel %vm4079_vm0, %v6275_v8, 0.0  ;;  %v14961_v41 = vld [vmem:[#allocation147_spill] sm:$0xff]  ;;  %vm14963_vm8 = vcmp.ge.s32.totalorder %v14962_v1, 0  ;;  %v4503_v21 = vmul.f32 %v10167_v51, %v4467_v47  ;;  %v2464_v38 = vsel %vm2432_vm1, %v10782_v13, 0.0  ;;  %v14965_v28 = vld [vmem:[#allocation153_spill] sm:$0xff]  ;;  %v10834_v8 = vpop.permute.xlu0 %3539 }
 0x278   : > { %vm3240_vm4 = vcmp.eq.s32.totalorder %v14961_v41, 1  ;;  %v3968_v59 = vsel %vm3935_vm13, 1, %v14037_v46  ;;  %vm3419_vm9 = vmand %vm10353_vm11, %vm14963_vm8  ;;  %14964 = vst [vmem:[#allocation112_spill] sm:$0xff] %v10811_v31  ;;  %vm4792_vm2 = vcmp.eq.s32.totalorder %v14965_v28, 1  ;;  %vm14966_vm0 = vcmp.lt.s32.totalorder %v14962_v1, 16  ;;  %v14967_v15 = vld [vmem:[#allocation72_spill] sm:$0xff] }
 0x279   : > { %4045 = vperm.xlu1 %6210, %v3968_v59   ;;  %vm3451_vm6 = vmand %vm3419_vm9, %vm14966_vm0  ;;  %v2063_v32 = vmul.f32 %v10301_v5, %v2027_v16  ;;  %v10822_v20 = vadd.f32 %v3307_v37, %v10610_v24  ;;  %vm14968_vm11 = vcmp.ge.s32.totalorder %v14967_v15, 0  ;;  %v6276_v48 = vld [vmem:[%s13339_s6 + $0xd8] sm:$0xff]  ;;  %14969 = vst [vmem:[#allocation134_spill] sm:$0xff] %v10834_v8  ;;  %v2028_v47 = vsel %vm1996_vm7, %v1707_v27, 0.0  ;;  %v10849_v16 = vld [vmem:[%s13338_s5 + $0xd0] sm:$0xff] }
 0x27a   : > { %v3484_v61 = vsel %vm3451_vm6, 1, %v14037_v46  ;;  %vm4615_vm13 = vmand %vm10388_vm14, %vm14968_vm11  ;;  %v10832_v19 = vadd.s32 1, %v6276_v48  ;;  %v4147_v24 = vmul.f32 %v9981_v10, %v4111_v33  ;;  %v10839_v37 = vld [vmem:[#allocation2 + $0x58] sm:$0xff]  ;;  %vm14970_vm14 = vcmp.lt.s32.totalorder %v14967_v15, 16  ;;  %v14972_v41 = vld [vmem:[#allocation31_spill] sm:$0xff]  ;;  %v10865_v59 = vpop.permute.xlu1 %4729 }
 0x27b   : > { %v3272_v34 = vsel %vm3240_vm4, %v10839_v37, 0.0  ;;  %3563 = vperm.xlu0 %6209, %v3484_v61   ;;  %vm4647_vm9 = vmand %vm4615_vm13, %vm14970_vm14  ;;  %vm2612_vm1 = vcmp.ge.s32.totalorder %v10849_v16, 0  ;;  %vm2644_vm7 = vcmp.lt.s32.totalorder %v10849_v16, 16  ;;  %v2500_v10 = vmul.f32 %v10543_v17, %v2464_v38  ;;  %14974 = vst [vmem:[#allocation86_spill] sm:$0xff] %v10865_v59  ;;  %v2580_v61 = vld [vmem:[#allocation2 + $0xe7] sm:$0xff]  ;;  %v14977_v36 = vld [vmem:[#allocation148_spill] sm:$0xff] }
 0x27c   : > { %v10855_v26 = vadd.f32 %v10337_v11, %v4891_v7  ;;  %v4824_v27 = vsel %vm4792_vm2, %v10470_v18, 0.0  ;;  %v4680_v33 = vsel %vm4647_vm9, 1, %v14037_v46  ;;  %vm14973_vm10 = vcmp.ge.s32.totalorder %v14972_v41, 0  ;;  %v1708_v15 = vld [vmem:[#allocation2 + $0xe8] sm:$0xff]  ;;  %vm10882_vm6 = vmand %vm2612_vm1, %vm2644_vm7  ;;  %v11084_v31 = vld [vmem:[%s13338_s5 + $0xd8] sm:$0xff] }
 0x27d   : > { %vm4259_vm4 = vmand %vm10624_vm3, %vm14973_vm10  ;;  %v4535_v38 = vadd.f32 %v4503_v21, %v10643_v12  ;;  %4753 = vperm.xlu1 %6210, %v4680_v33   ;;  %vm14975_vm8 = vcmp.lt.s32.totalorder %v14972_v41, 16  ;;  %v10871_v7 = vadd.f32 %v2063_v32, %v10754_v54  ;;  %v1643_v18 = vmul.f32 %v10368_v22, %v1607_v3  ;;  %v10887_v54 = vpop.permute.xlu0 %4375  ;;  %v14981_v21 = vld [vmem:[#allocation54_spill] sm:$0xff]  ;;  %v11238_v62 = vld [vmem:[%s13338_s5 + $0xe0] sm:$0xff] }
 0x27e   : > { %14971 = vst [vmem:[#allocation39_spill] sm:$0xff] %v10855_v26  ;;  %vm4291_vm0 = vmand %vm4259_vm4, %vm14975_vm8  ;;  %v2064_v28 = vmul.f32 %v10301_v5, %v2028_v47  ;;  %v3308_v48 = vmul.f32 %v10777_v53, %v3272_v34  ;;  %vm2884_vm2 = vcmp.eq.s32.totalorder %v14977_v36, 1  ;;  %vm13885_vm11 = vcmp.ge.s32.totalorder %v10832_v19, 0  ;;  %v14985_v33 = vld [vmem:[#allocation14_spill] sm:$0xff] }
 0x27f   : > { %14976 = vst [vmem:[#allocation135_spill] sm:$0xff] %v10871_v7  ;;  %v4324_v59 = vsel %vm4291_vm0, 1, %v14037_v46  ;;  %14980 = vst [vmem:[#allocation29_spill] sm:$0xff] %v10887_v54  ;;  %v4860_v3 = vmul.f32 %v10230_v6, %v4824_v27  ;;  %vm14982_vm13 = vcmp.ge.s32.totalorder %v14981_v21, 0  ;;  %vm13884_vm9 = vcmp.lt.s32.totalorder %v10832_v19, 16  ;;  %v10909_v54 = vld [vmem:[#allocation2 + $0x5f] sm:$0xff] }
 0x280   : > { %4399 = vperm.xlu0 %6209, %v4324_v59   ;;  %vm2708_vm14 = vmand %vm10882_vm6, %vm14982_vm13  ;;  %vm14983_vm10 = vcmp.eq.s32.totalorder %v14954_v4, 1  ;;  %vm14984_vm1 = vcmp.eq.s32.totalorder %v14955_v30, 1  ;;  %v10900_v34 = vadd.f32 %v4147_v24, %v10714_v45  ;;  %v10903_v41 = vadd.f32 %v2500_v10, %v14985_v33  ;;  %v14986_v59 = vld [vmem:[#allocation149_spill] sm:$0xff]  ;;  %v14988_v30 = vld [vmem:[#allocation154_spill] sm:$0xff]  ;;  %v10920_v10 = vpop.permute.xlu1 %2834  ;;  %15056 = vst [vmem:[#allocation90_spill] sm:$0xff] %v11238_v62 }
 0x281   : > { %v1608_v32 = vsel %vm14983_vm10, %v2580_v61, 0.0  ;;  %v2029_v47 = vsel %vm14984_vm1, %v1708_v15, 0.0  ;;  %v4962_v27 = vadd.f32 3.0, %v10855_v26  ;;  %vm4080_vm7 = vcmp.eq.s32.totalorder %v14986_v59, 1  ;;  %v14989_v24 = vld [vmem:[#allocation56_spill] sm:$0xff]  ;;  %v14992_v8 = vld [vmem:[#allocation98_spill] sm:$0xff] }
 0x282   : > { %vm14987_vm4 = vcmp.lt.s32.totalorder %v14981_v21, 16  ;;  %v2916_v4 = vsel %vm2884_vm2, %v10909_v54, 0.0  ;;  %vm4436_vm0 = vcmp.eq.s32.totalorder %v14988_v30, 1  ;;  %vm14990_vm13 = vnez %v14989_v24  ;;  %v11111_v7 = vld [vmem:[#allocation2 + $0x6f] sm:$0xff]  ;;  %v2120_v12 = vld [vmem:[#allocation2 + $0xa1] sm:$0xff] }
 0x283   : > { %vm2740_vm8 = vmand %vm2708_vm14, %vm14987_vm4  ;;  %v10922_v61 = vadd.f32 %v2064_v28, %v1643_v18  ;;  %v10925_v15 = vadd.f32 %v3308_v48, %v10757_v50  ;;  %v3776_v36 = vadd.s32 1, %v10312_v56  ;;  %v1644_v33 = vmul.f32 %v10368_v22, %v1608_v32  ;;  %v10939_v50 = vpop.permute.xlu0 %2384  ;;  %v14994_v22 = vld [vmem:[#allocation151_spill] sm:$0xff]  ;;  %15029 = vst [vmem:[#allocation48_spill] sm:$0xff] %v11111_v7 }
 0x284   : > { %v2773_v45 = vsel %vm2740_vm8, 1, %v14037_v46  ;;  %vm2224_vm10 = vmand %vm14990_vm13, %vm13885_vm11  ;;  %v2065_v59 = vmul.f32 %v10301_v5, %v2029_v47  ;;  %v4112_v24 = vsel %vm4080_vm7, %v10674_v29, 0.0  ;;  %v4892_v26 = vadd.f32 %v4860_v3, %v4535_v38  ;;  %v14996_v29 = vld [vmem:[#allocation95_spill] sm:$0xff]  ;;  %v10949_v38 = vld [vmem:[#allocation2 + $0x61] sm:$0xff]  ;;  %v10962_v47 = vpop.permute.xlu1 %3542 }
 0x285   : > { %14991 = vst [vmem:[#allocation111_spill] sm:$0xff] %v10922_v61  ;;  %2858 = vperm.xlu1 %6210, %v2773_v45   ;;  %vm2288_vm2 = vmand %vm2224_vm10, %vm13884_vm9  ;;  %vm4793_vm14 = vcmp.eq.s32.totalorder %v14992_v8, 1  ;;  %vm14993_vm1 = vcmp.ge.s32.totalorder %v10190_v43, 0  ;;  %v4994_v28 = vmax.f32 %v4962_v27, 0.0  ;;  %v2952_v56 = vmul.f32 %v10568_v9, %v2916_v4  ;;  %v14999_v3 = vld [vmem:[#allocation43_spill] sm:$0xff]  ;;  %v10992_v61 = vld [vmem:[#allocation2 + $0x67] sm:$0xff] }
 0x286   : > { %v2321_v18 = vsel %vm2288_vm2, 1, %v14037_v46  ;;  %vm3420_vm4 = vmand %vm10501_vm5, %vm14993_vm1  ;;  %vm3596_vm8 = vcmp.eq.s32.totalorder %v14994_v22, 1  ;;  %v4468_v5 = vsel %vm4436_vm0, %v10736_v25, 0.0  ;;  %vm14995_vm7 = vcmp.lt.s32.totalorder %v10190_v43, 16  ;;  %14997 = vst [vmem:[#allocation89_spill] sm:$0xff] %v10949_v38  ;;  %v6280_v25 = vld [vmem:[%s13339_s6 + $0xe0] sm:$0xff] }
 0x287   : > { %2408 = vperm.xlu0 %6209, %v2321_v18   ;;  %vm3452_vm13 = vmand %vm3420_vm4, %vm14995_vm7  ;;  %vm2885_vm10 = vcmp.eq.s32.totalorder %v14996_v29, 1  ;;  %vm2433_vm5 = vcmp.eq.s32.totalorder %v14998_v49, 1  ;;  %vm15000_vm2 = vcmp.ge.s32.totalorder %v14999_v3, 0  ;;  %v10960_v32 = vadd.s32 1, %v6280_v25  ;;  %v10967_v27 = vld [vmem:[%s13336_s3 + $0x6] ss:$0 sm:$0xff]  ;;  %v10987_v8 = vpop.permute.xlu0 %3188 }
 0x288   : > { %v3485_v48 = vsel %vm3452_vm13, 1, %v14037_v46  ;;  %vm3064_vm1 = vmand %vm10729_vm12, %vm15000_vm2  ;;  %v4148_v4 = vmul.f32 %v10967_v27, %v4112_v24  ;;  %v4825_v30 = vsel %vm4793_vm14, %v10653_v40, 0.0  ;;  %vm15001_vm0 = vcmp.lt.s32.totalorder %v14999_v3, 16  ;;  %v11014_v49 = vpop.permute.xlu1 %4378 }
 0x289   : > { %3566 = vperm.xlu1 %6210, %v3485_v48   ;;  %vm3096_vm4 = vmand %vm3064_vm1, %vm15001_vm0  ;;  %vm3808_vm7 = vcmp.ge.s32.totalorder %v3776_v36, 0  ;;  %vm3840_vm13 = vcmp.lt.s32.totalorder %v3776_v36, 16  ;;  %v3628_v45 = vsel %vm3596_vm8, %v10653_v40, 0.0  ;;  %v10979_v18 = vadd.f32 %v10337_v11, %v4892_v26  ;;  %15009 = vst [vmem:[#allocation17_spill] sm:$0xff] %v11014_v49 }
 0x28a   : > { %v4504_v25 = vmul.f32 %v10167_v51, %v4468_v5  ;;  %v3129_v24 = vsel %vm3096_vm4, 1, %v14037_v46  ;;  %vm15003_vm2 = vcmp.ge.s32.totalorder %v14835_v35, 0  ;;  %v10990_v48 = vadd.f32 %v2952_v56, %v10794_v60  ;;  %v15006_v5 = vld [vmem:[#allocation32_spill] sm:$0xff]  ;;  %vm11009_vm4 = vmand %vm3808_vm7, %vm3840_vm13 }
 0x28b   : > { %15002 = vst [vmem:[#allocation141_spill] sm:$0xff] %v10979_v18  ;;  %vm4260_vm14 = vmand %vm10763_vm15, %vm15003_vm2  ;;  %v2917_v40 = vsel %vm2885_vm10, %v10992_v61, 0.0  ;;  %v2465_v26 = vsel %vm2433_vm5, %v10949_v38, 0.0  ;;  %3212 = vperm.xlu0 %6209, %v3129_v24   ;;  %vm15004_vm8 = vcmp.lt.s32.totalorder %v14835_v35, 16  ;;  %v11002_v22 = vadd.f32 %v2065_v59, %v1644_v33  ;;  %v15013_v24 = vld [vmem:[#allocation69_spill] sm:$0xff] }
 0x28c   : > { %vm4292_vm1 = vmand %vm4260_vm14, %vm15004_vm8  ;;  %vm3597_vm0 = vcmp.eq.s32.totalorder %v15006_v5, 1  ;;  %v4861_v60 = vmul.f32 %v10230_v6, %v4825_v30  ;;  %vm13888_vm10 = vcmp.ge.s32.totalorder %v10960_v32, 0  ;;  %v11016_v35 = vmin.f32 %v4994_v28, 6.0  ;;  %v11024_v6 = vld [vmem:[%s13336_s3 + $0x5] ss:$0 sm:$0xff] }
 0x28d   : > { %15005 = vst [vmem:[#allocation114_spill] sm:$0xff] %v11002_v22  ;;  %v4325_v56 = vsel %vm4292_vm1, 1, %v14037_v46  ;;  %v11019_v33 = vadd.f32 %v4148_v4, %v10797_v42  ;;  %v11027_v36 = vmul.f32 %v11024_v6, %v3628_v45  ;;  %vm15010_vm5 = vcmp.ge.s32.totalorder %v14844_v44, 0  ;;  %v15011_v4 = vld [vmem:[#allocation10_spill] sm:$0xff]  ;;  %v15020_v5 = vld [vmem:[#allocation41_spill] sm:$0xff] }
 0x28e   : > { %4402 = vperm.xlu1 %6210, %v4325_v56   ;;  %vm3904_vm7 = vmand %vm11009_vm4, %vm15010_vm5  ;;  %vm13895_vm13 = vcmp.lt.s32.totalorder %v10960_v32, 16  ;;  %v11035_v59 = vadd.f32 3.0, %v10979_v18  ;;  %v4536_v42 = vadd.f32 %v4504_v25, %v10900_v34  ;;  %v2953_v28 = vmul.f32 %v10568_v9, %v2917_v40  ;;  %v15014_v34 = vld [vmem:[#allocation65_spill] sm:$0xff]  ;;  %v11052_v25 = vpop.permute.xlu0 %4024  ;;  %v15017_v40 = vld [vmem:[#allocation74_spill] sm:$0xff] }
 0x28f   : > { %vm3241_vm2 = vcmp.eq.s32.totalorder %v15011_v4, 1  ;;  %vm15012_vm14 = vcmp.lt.s32.totalorder %v14844_v44, 16  ;;  %v2501_v30 = vmul.f32 %v10543_v17, %v2465_v26  ;;  %v3629_v45 = vsel %vm3597_vm0, %v10782_v13, 0.0  ;;  %15016 = vst [vmem:[#allocation137_spill] sm:$0xff] %v11052_v25  ;;  %v11055_v44 = vld [vmem:[#allocation2 + $0x69] sm:$0xff]  ;;  %v15019_v26 = vld [vmem:[#allocation96_spill] sm:$0xff] }
 0x290   : > { %vm3936_vm8 = vmand %vm3904_vm7, %vm15012_vm14  ;;  %vm4437_vm1 = vcmp.eq.s32.totalorder %v15013_v24, 1  ;;  %vm15015_vm5 = vnez %v15014_v34  ;;  %vm4081_vm11 = vcmp.eq.s32.totalorder %v15017_v40, 1  ;;  %15018 = vst [vmem:[#allocation25_spill] sm:$0xff] %v11055_v44  ;;  %vm2434_vm7 = vcmp.eq.s32.totalorder %v15019_v26, 1  ;;  %v11061_v22 = vld [vmem:[#allocation2 + $0x60] sm:$0xff]  ;;  %v15021_v25 = vld [vmem:[#allocation78_spill] sm:$0xff] }
 0x291   : > { %v3969_v56 = vsel %vm3936_vm8, 1, %v14037_v46  ;;  %vm2225_vm9 = vmand %vm15015_vm5, %vm13888_vm10  ;;  %v4893_v18 = vadd.f32 %v4861_v60, %v4536_v42  ;;  %vm3242_vm0 = vcmp.eq.s32.totalorder %v15020_v5, 1  ;;  %v3273_v34 = vsel %vm3241_vm2, %v11061_v22, 0.0  ;;  %v11073_v42 = vpop.permute.xlu1 %2387 }
 0x292   : > { %4048 = vperm.xlu0 %6209, %v3969_v56   ;;  %vm2289_vm14 = vmand %vm2225_vm9, %vm13895_vm13  ;;  %vm2886_vm8 = vcmp.eq.s32.totalorder %v15021_v25, 1  ;;  %vm15022_vm5 = vcmp.ge.s32.totalorder %v9664_v58, 0  ;;  %v3777_v60 = vadd.s32 1, %v10466_v63  ;;  %v4995_v56 = vmax.f32 %v11035_v59, 0.0  ;;  %v15025_v59 = vld [vmem:[#allocation52_spill] sm:$0xff]  ;;  %v11104_v24 = vpop.permute.xlu0 %4732 }
 0x293   : > { %v2322_v49 = vsel %vm2289_vm14, 1, %v14037_v46  ;;  %vm4616_vm10 = vmand %vm10624_vm3, %vm15022_vm5  ;;  %v4469_v4 = vsel %vm4437_vm1, %v10839_v37, 0.0  ;;  %vm15023_vm9 = vcmp.lt.s32.totalorder %v9664_v58, 16  ;;  %vm2613_vm3 = vcmp.ge.s32.totalorder %v11084_v31, 0  ;;  %v11094_v37 = vld [vmem:[#allocation2 + $0x68] sm:$0xff]  ;;  %15027 = vst [vmem:[#allocation18_spill] sm:$0xff] %v11104_v24 }
 0x294   : > { %2411 = vperm.xlu1 %6210, %v2322_v49   ;;  %vm4648_vm2 = vmand %vm4616_vm10, %vm15023_vm9  ;;  %vm2645_vm14 = vcmp.lt.s32.totalorder %v11084_v31, 16  ;;  %v4113_v63 = vsel %vm4081_vm11, %v10909_v54, 0.0  ;;  %v2466_v23 = vsel %vm2434_vm7, %v11055_v44, 0.0  ;;  %15024 = vst [vmem:[#allocation138_spill] sm:$0xff] %v11094_v37  ;;  %v3274_v58 = vsel %vm3242_vm0, %v11094_v37, 0.0 }
 0x295   : > { %v4681_v49 = vsel %vm4648_vm2, 1, %v14037_v46  ;;  %vm15026_vm10 = vcmp.ge.s32.totalorder %v15025_v59, 0  ;;  %v3665_v54 = vmul.f32 %v11024_v6, %v3629_v45  ;;  %v3309_v40 = vmul.f32 %v10777_v53, %v3273_v34  ;;  %vm11124_vm0 = vmand %vm2613_vm3, %vm2645_vm14  ;;  %v15033_v34 = vld [vmem:[#allocation27_spill] sm:$0xff] }
 0x296   : > { %vm3065_vm1 = vmand %vm10882_vm6, %vm15026_vm10  ;;  %v11109_v26 = vadd.f32 %v10337_v11, %v4893_v18  ;;  %v2918_v5 = vsel %vm2886_vm8, %v11111_v7, 0.0  ;;  %4756 = vperm.xlu0 %6209, %v4681_v49   ;;  %vm15030_vm11 = vcmp.lt.s32.totalorder %v15025_v59, 16  ;;  %v4505_v37 = vmul.f32 %v10167_v51, %v4469_v4  ;;  %v11128_v18 = vpop.permute.xlu1 %3191  ;;  %v15034_v4 = vld [vmem:[#allocation51_spill] sm:$0xff]  ;;  %v15039_v59 = vld [vmem:[#allocation77_spill] sm:$0xff] }
 0x297   : > { %vm3097_vm7 = vmand %vm3065_vm1, %vm15030_vm11  ;;  %vm3809_vm5 = vcmp.ge.s32.totalorder %v3777_v60, 0  ;;  %vm3841_vm9 = vcmp.lt.s32.totalorder %v3777_v60, 16  ;;  %v4149_v45 = vmul.f32 %v10967_v27, %v4113_v63  ;;  %v2502_v25 = vmul.f32 %v10543_v17, %v2466_v23 }
 0x298   : > { %15028 = vst [vmem:[#allocation88_spill] sm:$0xff] %v11109_v26  ;;  %v3130_v24 = vsel %vm3097_vm7, 1, %v14037_v46  ;;  %v3310_v51 = vmul.f32 %v10777_v53, %v3274_v58  ;;  %vm4082_vm8 = vcmp.eq.s32.totalorder %v15033_v34, 1  ;;  %vm15035_vm2 = vcmp.ge.s32.totalorder %v15034_v4, 0  ;;  %v15038_v58 = vld [vmem:[#allocation47_spill] sm:$0xff]  ;;  %vm11155_vm11 = vmand %vm3809_vm5, %vm3841_vm9 }
 0x299   : > { %3215 = vperm.xlu1 %6210, %v3130_v24   ;;  %vm2709_vm3 = vmand %vm11124_vm0, %vm15035_vm2  ;;  %v11139_v49 = vmul.f32 0.16666667, %v11016_v35  ;;  %v3696_v7 = vadd.f32 %v11027_v36, %v10822_v20  ;;  %v2985_v63 = vadd.f32 %v2953_v28, %v10903_v41  ;;  %v2954_v23 = vmul.f32 %v10568_v9, %v2918_v5  ;;  %v11159_v41 = vpop.permute.xlu0 %2837  ;;  %v2117_v34 = vld [vmem:[#allocation2 + $0x89] sm:$0xff] }
 0x29a   : > { %vm15037_vm14 = vcmp.lt.s32.totalorder %v15034_v4, 16  ;;  %v2533_v24 = vadd.f32 %v2501_v30, %v15038_v58  ;;  %v11149_v44 = vadd.f32 3.0, %v11109_v26  ;;  %vm4794_vm1 = vcmp.eq.s32.totalorder %v15039_v59, 1 }
 0x29b   : > { %15036 = vst [vmem:[#allocation99_spill] sm:$0xff] %v11139_v49  ;;  %vm2741_vm10 = vmand %vm2709_vm3, %vm15037_vm14  ;;  %v11161_v36 = vmin.f32 %v4995_v56, 6.0  ;;  %v11164_v28 = vadd.f32 %v3665_v54, %v10925_v15  ;;  %v11167_v30 = vadd.f32 %v3309_v40, %v10990_v48  ;;  %v4114_v5 = vsel %vm4082_vm8, %v10992_v61, 0.0  ;;  %v15044_v15 = vld [vmem:[#allocation103_spill] sm:$0xff]  ;;  %v15063_v49 = vld [vmem:[#allocation132_spill] sm:$0xff] }
 0x29c   : > { %v2774_v35 = vsel %vm2741_vm10, 1, %v14037_v46  ;;  %vm15043_vm7 = vcmp.ge.s32.totalorder %v14882_v2, 0  ;;  %v11177_v60 = vadd.f32 %v4505_v37, %v11019_v33  ;;  %v11179_v56 = vadd.f32 %v4149_v45, %v3696_v7  ;;  %v11199_v33 = vpop.permute.xlu1 %4027  ;;  %v15050_v45 = vld [vmem:[#allocation101_spill] sm:$0xff] }
 0x29d   : > { %15042 = vst [vmem:[#allocation100_spill] sm:$0xff] %v11161_v36  ;;  %2861 = vperm.xlu0 %6209, %v2774_v35   ;;  %vm3905_vm5 = vmand %vm11155_vm11, %vm15043_vm7  ;;  %v11182_v54 = vadd.f32 %v2502_v25, %v15044_v15  ;;  %v11184_v48 = vadd.f32 %v3310_v51, %v2985_v63  ;;  %vm15047_vm9 = vcmp.lt.s32.totalorder %v14882_v2, 16  ;;  %v11188_v61 = vadd.f32 %v2954_v23, %v2533_v24  ;;  %v15053_v51 = vld [vmem:[#allocation79_spill] sm:$0xff]  ;;  %v11223_v63 = vpop.permute.xlu0 %3545  ;;  %v11228_v23 = vld [vmem:[%s13336_s3 + $0x8] ss:$0 sm:$0xff] }
 0x29e   : > { %vm3937_vm2 = vmand %vm3905_vm5, %vm15047_vm9  ;;  %v4826_v40 = vsel %vm4794_vm1, %v10782_v13, 0.0  ;;  %vm2438_vm8 = vcmp.eq.s32.totalorder %v10296_v52, 1  ;;  %vm15049_vm3 = vcmp.ge.s32.totalorder %v10451_v55, 0  ;;  %v4996_v2 = vmax.f32 %v11149_v44, 0.0  ;;  %v6288_v13 = vld [vmem:[%s13339_s6 + $0xe8] sm:$0xff]  ;;  %v11215_v44 = vld [vmem:[#allocation2 + $0x99] sm:$0xff] }
 0x29f   : > { %15045 = vst [vmem:[#allocation139_spill] sm:$0xff] %v11182_v54  ;;  %15046 = vst [vmem:[#allocation50_spill] sm:$0xff] %v11184_v48  ;;  %v3970_v7 = vsel %vm3937_vm2, 1, %v14037_v46  ;;  %v11203_v37 = vmul.f32 %v10967_v27, %v4114_v5  ;;  %vm3598_vm10 = vcmp.eq.s32.totalorder %v15050_v45, 1  ;;  %vm15051_vm1 = vcmp.lt.s32.totalorder %v10451_v55, 16  ;;  %v15057_v35 = vld [vmem:[#allocation80_spill] sm:$0xff] }
 0x2a0   : > { %15048 = vst [vmem:[#allocation22_spill] sm:$0xff] %v11188_v61  ;;  %vm3421_vm14 = vmand %vm10729_vm12, %vm15049_vm3  ;;  %4051 = vperm.xlu1 %6210, %v3970_v7   ;;  %v11211_v59 = vadd.s32 1, %v6288_v13  ;;  %vm2891_vm12 = vcmp.eq.s32.totalorder %v10538_v39, 1  ;;  %vm2439_vm5 = vcmp.eq.s32.totalorder %v10558_v57, 1  ;;  %vm2440_vm9 = vcmp.eq.s32.totalorder %v10686_v0, 1  ;;  %v15058_v5 = vld [vmem:[#allocation87_spill] sm:$0xff]  ;;  %v11252_v7 = vpop.permute.xlu1 %4735 }
 0x2a1   : > { %vm3453_vm7 = vmand %vm3421_vm14, %vm15051_vm1  ;;  %vm15054_vm2 = vcmp.ge.s32.totalorder %v15053_v51, 0  ;;  %v4862_v58 = vmul.f32 %v11228_v23, %v4826_v40  ;;  %v2470_v24 = vsel %vm2438_vm8, %v2117_v34, 0.0  ;;  %vm15055_vm14 = vcmp.lt.s32.totalorder %v15053_v51, 16  ;;  %v15059_v15 = vld [vmem:[#allocation37_spill] sm:$0xff]  ;;  %v15061_v40 = vld [vmem:[#allocation131_spill] sm:$0xff]  ;;  %15062 = vst [vmem:[#allocation140_spill] sm:$0xff] %v11252_v7  ;;  %v11275_v57 = vpop.permute.xlu0 %4381 }
 0x2a2   : > { %15052 = vst [vmem:[#allocation113_spill] sm:$0xff] %v11211_v59  ;;  %v3486_v25 = vsel %vm3453_vm7, 1, %v14037_v46  ;;  %vm4617_vm3 = vmand %vm10763_vm15, %vm15054_vm2  ;;  %vm2614_vm15 = vcmp.ge.s32.totalorder %v11238_v62, 0  ;;  %vm2646_vm7 = vcmp.lt.s32.totalorder %v11238_v62, 16  ;;  %vm4438_vm2 = vcmp.eq.s32.totalorder %v15057_v35, 1  ;;  %v6291_v13 = vld [vmem:[#allocation2 + $0x97] sm:$0xff] }
 0x2a3   : > { %3569 = vperm.xlu0 %6209, %v3486_v25   ;;  %vm4649_vm1 = vmand %vm4617_vm3, %vm15055_vm14  ;;  %vm3248_vm13 = vcmp.eq.s32.totalorder %v15058_v5, 1  ;;  %vm15060_vm8 = vcmp.ge.s32.totalorder %v15059_v15, 0  ;;  %v11250_v34 = vadd.s32 1, %v15061_v40  ;;  %v2923_v25 = vsel %vm2891_vm12, %v6291_v13, 0.0  ;;  %15067 = vst [vmem:[#allocation102_spill] sm:$0xff] %v11275_v57  ;;  %v6292_v0 = vld [vmem:[%s13339_s6 + $0xf0] sm:$0xff] }
 0x2a4   : > { %v4682_v52 = vsel %vm4649_vm1, 1, %v14037_v46  ;;  %vm4261_vm3 = vmand %vm11009_vm4, %vm15060_vm8  ;;  %v2471_v51 = vsel %vm2439_vm5, %v2118_v14, 0.0  ;;  %v2472_v26 = vsel %vm2440_vm9, %v11215_v44, 0.0  ;;  %vm2892_vm14 = vcmp.eq.s32.totalorder %v15063_v49, 1  ;;  %v15070_v7 = vld [vmem:[#allocation60_spill] sm:$0xff]  ;;  %v11317_v49 = vpop.permute.xlu1 %2840  ;;  %v15076_v35 = vld [vmem:[#allocation129_spill] sm:$0xff] }
 0x2a5   : > { %4759 = vperm.xlu1 %6210, %v4682_v52   ;;  %vm15064_vm1 = vcmp.lt.s32.totalorder %v15059_v15, 16  ;;  %v2506_v40 = vmul.f32 %v10543_v17, %v2470_v24  ;;  %vm11270_vm12 = vmand %vm2614_vm15, %vm2646_vm7  ;;  %vm13901_vm5 = vcmp.ge.s32.totalorder %v11211_v59, 0  ;;  %v11280_v14 = vadd.s32 1, %v6292_v0  ;;  %v6293_v15 = vld [vmem:[#allocation2 + $0x98] sm:$0xff]  ;;  %v15102_v54 = vld [vmem:[#allocation58_spill] sm:$0xff] }
 0x2a6   : > { %vm4293_vm8 = vmand %vm4261_vm3, %vm15064_vm1  ;;  %v11282_v24 = vmin.f32 %v4996_v2, 6.0  ;;  %v11287_v52 = vsel %vm3598_vm10, %v10949_v38, 0.0  ;;  %v3280_v13 = vsel %vm3248_vm13, %v6293_v15, 0.0  ;;  %vm15071_vm9 = vcmp.ge.s32.totalorder %v15070_v7, 0 }
 0x2a7   : > { %v4326_v36 = vsel %vm4293_vm8, 1, %v14037_v46  ;;  %15068 = vst [vmem:[#allocation34_spill] sm:$0xff] %v11280_v14  ;;  %vm2710_vm15 = vmand %vm11270_vm12, %vm15071_vm9  ;;  %vm13900_vm7 = vcmp.lt.s32.totalorder %v11211_v59, 16  ;;  %v2959_v2 = vmul.f32 %v10568_v9, %v2923_v25  ;;  %v2507_v0 = vmul.f32 %v10543_v17, %v2471_v51  ;;  %v15075_v51 = vld [vmem:[#allocation106_spill] sm:$0xff] }
 0x2a8   : > { %15069 = vst [vmem:[#allocation142_spill] sm:$0xff] %v11282_v24  ;;  %4405 = vperm.xlu0 %6209, %v4326_v36   ;;  %v2508_v45 = vmul.f32 %v10543_v17, %v2472_v26  ;;  %v6294_v24 = vld [vmem:[#allocation2 + $0x9f] sm:$0xff]  ;;  %vm15072_vm13 = vcmp.lt.s32.totalorder %v15070_v7, 16  ;;  %v11304_v36 = vadd.f32 %v4862_v58, %v11177_v60  ;;  %v11309_v5 = vsel %vm4438_vm2, %v11061_v22, 0.0  ;;  %v15073_v26 = vld [vmem:[#allocation62_spill] sm:$0xff] }
 0x2a9   : > { %v2924_v57 = vsel %vm2892_vm14, %v6294_v24, 0.0  ;;  %vm2742_vm10 = vmand %vm2710_vm15, %vm15072_vm13  ;;  %vm15074_vm3 = vnez %v15073_v26  ;;  %v2538_v24 = vadd.f32 %v2506_v40, %v15075_v51  ;;  %v3316_v60 = vmul.f32 %v10777_v53, %v3280_v13  ;;  %v11332_v40 = vpop.permute.xlu0 %2390  ;;  %v15079_v51 = vld [vmem:[#allocation133_spill] sm:$0xff] }
 0x2aa   : > { %v2775_v25 = vsel %vm2742_vm10, 1, %v14037_v46  ;;  %vm2226_vm1 = vmand %vm15074_vm3, %vm13901_vm5  ;;  %v2960_v22 = vmul.f32 %v10568_v9, %v2924_v57  ;;  %vm15077_vm15 = vcmp.ge.s32.totalorder %v15076_v35, 0  ;;  %v11335_v15 = vadd.s32 1, %v10849_v16  ;;  %v15081_v57 = vld [vmem:[#allocation49_spill] sm:$0xff] }
 0x2ab   : > { %2864 = vperm.xlu1 %6210, %v2775_v25   ;;  %vm2290_vm2 = vmand %vm2226_vm1, %vm13900_vm7  ;;  %v2991_v13 = vadd.f32 %v2959_v2, %v2538_v24  ;;  %v15078_v25 = vld [vmem:[#allocation124_spill] sm:$0xff]  ;;  %v11339_v7 = vadd.f32 %v2508_v45, %v15079_v51  ;;  %vm2893_vm3 = vcmp.eq.s32.totalorder %v10920_v10, 1  ;;  %vm15080_vm1 = vcmp.lt.s32.totalorder %v15076_v35, 16  ;;  %v11352_v2 = vpop.permute.xlu1 %3548  ;;  %v11356_v45 = vld [vmem:[#allocation2 + $0xa9] sm:$0xff] }
 0x2ac   : > { %v2323_v58 = vsel %vm2290_vm2, 1, %v14037_v46  ;;  %vm3422_vm13 = vmand %vm10882_vm6, %vm15077_vm15  ;;  %v2539_v26 = vadd.f32 %v2507_v0, %v15078_v25  ;;  %vm2441_vm6 = vcmp.eq.s32.totalorder %v10939_v50, 1  ;;  %vm3605_vm15 = vcmp.eq.s32.totalorder %v10962_v47, 1  ;;  %v11374_v51 = vld [vmem:[%s13338_s5 + $0xe8] sm:$0xff] }
 0x2ad   : > { %2414 = vperm.xlu0 %6209, %v2323_v58   ;;  %vm3454_vm2 = vmand %vm3422_vm13, %vm15080_vm1  ;;  %vm3249_vm7 = vcmp.eq.s32.totalorder %v10987_v8, 1  ;;  %vm15082_vm5 = vcmp.ge.s32.totalorder %v15081_v57, 0  ;;  %v11354_v0 = vadd.f32 %v3316_v60, %v2991_v13  ;;  %vm2442_vm13 = vcmp.eq.s32.totalorder %v11073_v42, 1  ;;  %v6295_v58 = vld [vmem:[#allocation2 + $0xa7] sm:$0xff]  ;;  %v11378_v10 = vpop.permute.xlu0 %3194 }
 0x2ae   : > { %v3487_v16 = vsel %vm3454_vm2, 1, %v14037_v46  ;;  %vm3066_vm10 = vmand %vm11124_vm0, %vm15082_vm5  ;;  %vm2894_vm9 = vcmp.eq.s32.totalorder %v11159_v41, 1  ;;  %vm15083_vm2 = vcmp.lt.s32.totalorder %v15081_v57, 16  ;;  %v2992_v24 = vadd.f32 %v2960_v22, %v2539_v26  ;;  %v15084_v13 = vld [vmem:[#allocation46_spill] sm:$0xff]  ;;  %v15092_v41 = vld [vmem:[#allocation45_spill] sm:$0xff] }
 0x2af   : > { %3572 = vperm.xlu1 %6210, %v3487_v16   ;;  %vm3098_vm14 = vmand %vm3066_vm10, %vm15083_vm2  ;;  %v2925_v25 = vsel %vm2893_vm3, %v6295_v58, 0.0  ;;  %vm4090_vm5 = vcmp.eq.s32.totalorder %v11199_v33, 1  ;;  %vm15085_vm8 = vcmp.ge.s32.totalorder %v15084_v13, 0  ;;  %vm2615_vm10 = vcmp.ge.s32.totalorder %v11374_v51, 0  ;;  %v6297_v16 = vld [vmem:[#allocation2 + $0xa0] sm:$0xff]  ;;  %v11393_v50 = vld [vmem:[#allocation2 + $0xa8] sm:$0xff] }
 0x2b0   : > { %v3131_v60 = vsel %vm3098_vm14, 1, %v14037_v46  ;;  %vm4262_vm1 = vmand %vm11155_vm11, %vm15085_vm8  ;;  %vm2647_vm2 = vcmp.lt.s32.totalorder %v11374_v51, 16  ;;  %v2473_v22 = vsel %vm2441_vm6, %v2120_v12, 0.0  ;;  %v3637_v26 = vsel %vm3605_vm15, %v11215_v44, 0.0  ;;  %v11398_v44 = vld [vmem:[#allocation2 + $0xaf] sm:$0xff] }
 0x2b1   : > { %v3281_v35 = vsel %vm3249_vm7, %v6297_v16, 0.0  ;;  %3218 = vperm.xlu0 %6209, %v3131_v60   ;;  %vm3606_vm14 = vcmp.eq.s32.totalorder %v11223_v63, 1  ;;  %vm15086_vm8 = vcmp.lt.s32.totalorder %v15084_v13, 16  ;;  %v2474_v57 = vsel %vm2442_vm13, %v11356_v45, 0.0  ;;  %v11412_v13 = vpop.permute.xlu1 %4384 }
 0x2b2   : > { %vm4294_vm3 = vmand %vm4262_vm1, %vm15086_vm8  ;;  %vm15087_vm6 = vcmp.eq.s32.totalorder %v11128_v18, 1  ;;  %v2926_v8 = vsel %vm2894_vm9, %v11398_v44, 0.0  ;;  %vm15088_vm7 = vcmp.lt.s32.totalorder %v11250_v34, 16  ;;  %vm15089_vm15 = vcmp.ge.s32.totalorder %v11250_v34, 0  ;;  %v11422_v34 = vld [vmem:[#allocation2 + $0xb1] sm:$0xff] }
 0x2b3   : > { %v3282_v47 = vsel %vm15087_vm6, %v11393_v50, 0.0  ;;  %v4327_v60 = vsel %vm4294_vm3, 1, %v14037_v46  ;;  %vm11408_vm1 = vmand %vm15089_vm15, %vm15088_vm7  ;;  %v2961_v18 = vmul.f32 %v10568_v9, %v2925_v25  ;;  %v4122_v16 = vsel %vm4090_vm5, %v6295_v58, 0.0 }
 0x2b4   : > { %4408 = vperm.xlu1 %6210, %v4327_v60   ;;  %vm15093_vm9 = vcmp.ge.s32.totalorder %v15092_v41, 0  ;;  %vm2895_vm8 = vcmp.eq.s32.totalorder %v11317_v49, 1  ;;  %vm2443_vm3 = vcmp.eq.s32.totalorder %v11332_v40, 1  ;;  %v2509_v38 = vmul.f32 %v10543_v17, %v2473_v22  ;;  %v15096_v22 = vld [vmem:[#allocation68_spill] sm:$0xff] }
 0x2b5   : > { %vm3906_vm13 = vmand %vm11408_vm1, %vm15093_vm9  ;;  %v3673_v25 = vmul.f32 %v11024_v6, %v3637_v26  ;;  %v3317_v33 = vmul.f32 %v10777_v53, %v3281_v35  ;;  %v3638_v58 = vsel %vm3606_vm14, %v2120_v12, 0.0  ;;  %vm15094_vm5 = vcmp.lt.s32.totalorder %v15092_v41, 16  ;;  %v11441_v35 = vpop.permute.xlu0 %4030  ;;  %v11446_v12 = vld [vmem:[#allocation2 + $0xb7] sm:$0xff]  ;;  %v15100_v41 = vld [vmem:[#allocation21_spill] sm:$0xff] }
 0x2b6   : > { %vm3938_vm7 = vmand %vm3906_vm13, %vm15094_vm5  ;;  %v2510_v60 = vmul.f32 %v10543_v17, %v2474_v57  ;;  %v3318_v59 = vmul.f32 %v10777_v53, %v3282_v47  ;;  %v2962_v62 = vmul.f32 %v10568_v9, %v2926_v8  ;;  %vm15095_vm15 = vcmp.ge.s32.totalorder %v11280_v14, 0  ;;  %v6301_v49 = vld [vmem:[%s13339_s6 + $0xf8] sm:$0xff] }
 0x2b7   : > { %v3971_v61 = vsel %vm3938_vm7, 1, %v14037_v46  ;;  %vm15097_vm9 = vnez %v15096_v22  ;;  %v4158_v63 = vmul.f32 %v10967_v27, %v4122_v16  ;;  %vm15098_vm14 = vcmp.lt.s32.totalorder %v11280_v14, 16 }
 0x2b8   : > { %vm2227_vm6 = vmand %vm15097_vm9, %vm15095_vm15  ;;  %4054 = vperm.xlu0 %6209, %v3971_v61   ;;  %v2927_v57 = vsel %vm2895_vm8, %v11446_v12, 0.0  ;;  %v2475_v26 = vsel %vm2443_vm3, %v11422_v34, 0.0  ;;  %vm3607_vm5 = vcmp.eq.s32.totalorder %v11352_v2, 1  ;;  %v3674_v47 = vmul.f32 %v11024_v6, %v3638_v58  ;;  %v11462_v61 = vpop.permute.xlu1 %2393  ;;  %v15176_v2 = vld [vmem:[#allocation16_spill] sm:$0xff] }
 0x2b9   : > { %vm2291_vm13 = vmand %vm2227_vm6, %vm15098_vm14  ;;  %vm15099_vm7 = vcmp.ge.s32.totalorder %v14962_v1, 0  ;;  %vm3843_vm15 = vcmp.lt.s32.totalorder %v11335_v15, 16  ;;  %v11467_v40 = vadd.s32 1, %v6301_v49  ;;  %v2993_v16 = vadd.f32 %v2961_v18, %v11339_v7  ;;  %v11484_v7 = vpop.permute.xlu0 %4738  ;;  %v15111_v49 = vld [vmem:[#allocation84_spill] sm:$0xff] }
 0x2ba   : > { %v2324_v8 = vsel %vm2291_vm13, 1, %v14037_v46  ;;  %vm4618_vm6 = vmand %vm11009_vm4, %vm15099_vm7  ;;  %v2541_v58 = vadd.f32 %v2509_v38, %v15100_v41  ;;  %v3705_v22 = vadd.f32 %v3673_v25, %v11354_v0  ;;  %v3349_v14 = vadd.f32 %v3317_v33, %v2992_v24  ;;  %15104 = vst [vmem:[#allocation33_spill] sm:$0xff] %v11484_v7  ;;  %v15105_v0 = vld [vmem:[#allocation15_spill] sm:$0xff]  ;;  %v11528_v41 = vld [vmem:[#allocation2 + $0xb8] sm:$0xff] }
 0x2bb   : > { %2417 = vperm.xlu1 %6210, %v2324_v8   ;;  %vm15101_vm4 = vcmp.lt.s32.totalorder %v14962_v1, 16  ;;  %v2963_v48 = vmul.f32 %v10568_v9, %v2927_v57  ;;  %v2511_v55 = vmul.f32 %v10543_v17, %v2475_v26  ;;  %vm15103_vm3 = vcmp.ge.s32.totalorder %v15102_v54, 0  ;;  %v6071_v17 = vpop.f32.mrb[30].mxu0  ;;  %v11519_v26 = vld [vmem:[%s13338_s5 + $0xf0] sm:$0xff] }
 0x2bc   : > { %vm4650_vm8 = vmand %vm4618_vm6, %vm15101_vm4  ;;  %v3639_v38 = vsel %vm3607_vm5, %v11356_v45, 0.0  ;;  %v2542_v1 = vadd.f32 %v2510_v60, %v15105_v0  ;;  %v3350_v24 = vadd.f32 %v3318_v59, %v2993_v16  ;;  %v11487_v18 = vadd.f32 %v2962_v62, %v2541_v58  ;;  %v3198_v59 = vpop.permute.xlu1 %3197  ;;  %v6302_v62 = vld [vmem:[%s13335_s2] ss:$0 sm:$0xff] }
 0x2bd   : > { %v4683_v29 = vsel %vm4650_vm8, 1, %v14037_v46  ;;  %vm3067_vm9 = vmand %vm11270_vm12, %vm15103_vm3  ;;  %v11489_v25 = vadd.f32 %v4158_v63, %v3705_v22  ;;  %vm15106_vm14 = vcmp.lt.s32.totalorder %v15102_v54, 16  ;;  %v11493_v9 = vadd.f32 %v3674_v47, %v3349_v14  ;;  %v795_v14 = vpop.f32.mrb[31].mxu0  ;;  %v15109_v63 = vld [vmem:[#allocation57_spill] sm:$0xff] }
 0x2be   : > { %4762 = vperm.xlu0 %6209, %v4683_v29   ;;  %vm3099_vm13 = vmand %vm3067_vm9, %vm15106_vm14  ;;  %vm3251_vm7 = vcmp.eq.s32.totalorder %v11378_v10, 1  ;;  %v11508_v60 = vadd.f32 %v6302_v62, %v6071_v17  ;;  %vm15110_vm6 = vcmp.ge.s32.totalorder %v15109_v63, 0  ;;  %v3675_v57 = vmul.f32 %v11024_v6, %v3639_v38  ;;  %v11533_v38 = vld [vmem:[#allocation2 + $0xb0] sm:$0xff] }
 0x2bf   : > { %v3132_v33 = vsel %vm3099_vm13, 1, %v14037_v46  ;;  %vm11500_vm5 = vmand %vm2615_vm10, %vm2647_vm2  ;;  %vm4447_vm10 = vcmp.eq.s32.totalorder %v11412_v13, 1  ;;  %vm2648_vm8 = vcmp.lt.s32.totalorder %v11519_v26, 16  ;;  %vm3252_vm3 = vcmp.eq.s32.totalorder %v3198_v59, 1 }
 0x2c0   : > { %3221 = vperm.xlu1 %6210, %v3132_v33   ;;  %vm2711_vm4 = vmand %vm11500_vm5, %vm15110_vm6  ;;  %v11523_v47 = vadd.f32 %v6302_v62, %v795_v14  ;;  %v2995_v8 = vadd.f32 %v2963_v48, %v2542_v1  ;;  %v2543_v16 = vadd.f32 %v2511_v55, %v15111_v49  ;;  %vm15112_vm9 = vcmp.lt.s32.totalorder %v15109_v63, 16  ;;  %v2844_v1 = vpop.permute.xlu0 %2843  ;;  %v11562_v62 = vld [vmem:[#allocation2 + $0xbf] sm:$0xff] }
 0x2c1   : > { %vm2743_vm14 = vmand %vm2711_vm4, %vm15112_vm9  ;;  %v3284_v58 = vsel %vm3252_vm3, %v11528_v41, 0.0  ;;  %v835_v22 = vadd.f32 3.0, %v11508_v60  ;;  %v3283_v0 = vsel %vm3251_vm7, %v11533_v38, 0.0  ;;  %vm15113_vm13 = vcmp.ge.s32.totalorder %v11335_v15, 0 }
 0x2c2   : > { %v2776_v29 = vsel %vm2743_vm14, 1, %v14037_v46  ;;  %vm11542_vm6 = vmand %vm15113_vm13, %vm3843_vm15  ;;  %v3320_v48 = vmul.f32 %v10777_v53, %v3284_v58  ;;  %v834_v17 = vadd.f32 3.0, %v11523_v47  ;;  %vm15116_vm4 = vcmp.ge.s32.totalorder %v14981_v21, 0 }
 0x2c3   : > { %2867 = vperm.xlu0 %6209, %v2776_v29   ;;  %vm3907_vm3 = vmand %vm11542_vm6, %vm15116_vm4  ;;  %v4479_v10 = vsel %vm4447_vm10, %v11393_v50, 0.0  ;;  %vm4091_vm15 = vcmp.eq.s32.totalorder %v11441_v35, 1  ;;  %vm13919_vm7 = vcmp.ge.s32.totalorder %v11467_v40, 0  ;;  %vm2896_vm9 = vcmp.eq.s32.totalorder %v2844_v1, 1 }
 0x2c4   : > { %v867_v15 = vmax.f32 %v835_v22, 0.0  ;;  %v3707_v33 = vadd.f32 %v3675_v57, %v3350_v24  ;;  %vm15117_vm14 = vcmp.lt.s32.totalorder %v14981_v21, 16  ;;  %vm13912_vm2 = vcmp.lt.s32.totalorder %v11467_v40, 16  ;;  %v11574_v21 = vld [vmem:[%s13336_s3 + $0x3] ss:$0 sm:$0xff]  ;;  %v4034_v57 = vpop.permute.xlu1 %4033  ;;  %v3552_v1 = vpop.permute.xlu0 %3551 }
 0x2c5   : > { %vm3939_vm13 = vmand %vm3907_vm3, %vm15117_vm14  ;;  %v11560_v59 = vadd.f32 %v3320_v48, %v2995_v8  ;;  %v2928_v14 = vsel %vm2896_vm9, %v11562_v62, 0.0  ;;  %v866_v13 = vmax.f32 %v834_v17, 0.0  ;;  %v3319_v50 = vmul.f32 %v10777_v53, %v3283_v0  ;;  %v11582_v53 = vld [vmem:[%s13336_s3 + $0x7] ss:$0 sm:$0xff] }
 0x2c6   : > { %v3972_v49 = vsel %vm3939_vm13, 1, %v14037_v46  ;;  %vm15118_vm10 = vcmp.ge.s32.totalorder %v10832_v19, 0  ;;  %v2964_v24 = vmul.f32 %v11574_v21, %v2928_v14  ;;  %v899_v8 = vmin.f32 %v867_v15, 6.0 }
 0x2c7   : > { %vm3423_vm4 = vmand %vm11124_vm0, %vm15118_vm10  ;;  %4057 = vperm.xlu1 %6210, %v3972_v49   ;;  %vm15119_vm3 = vcmp.lt.s32.totalorder %v10832_v19, 16  ;;  %v4515_v11 = vmul.f32 %v11582_v53, %v4479_v10  ;;  %v4123_v58 = vsel %vm4091_vm15, %v11398_v44, 0.0  ;;  %vm4092_vm0 = vcmp.eq.s32.totalorder %v4034_v57, 1  ;;  %v11598_v44 = vld [vmem:[#allocation2 + $0xb9] sm:$0xff] }
 0x2c8   : > { %vm3455_vm9 = vmand %vm3423_vm4, %vm15119_vm3  ;;  %v898_v22 = vmin.f32 %v866_v13, 6.0  ;;  %vm15120_vm14 = vcmp.ge.s32.totalorder %v10190_v43, 0  ;;  %v11593_v0 = vadd.f32 %v2964_v24, %v2543_v16  ;;  %v4124_v48 = vsel %vm4092_vm0, %v11446_v12, 0.0  ;;  %v4742_v12 = vpop.permute.xlu1 %4741 }
 0x2c9   : > { %v3488_v29 = vsel %vm3455_vm9, 1, %v14037_v46  ;;  %vm4619_vm13 = vmand %vm11155_vm11, %vm15120_vm14  ;;  %v931_v17 = vmul.f32 0.16666667, %v899_v8  ;;  %vm15121_vm10 = vcmp.lt.s32.totalorder %v10190_v43, 16  ;;  %vm2444_vm15 = vcmp.eq.s32.totalorder %v11462_v61, 1  ;;  %v15128_v61 = vld [vmem:[#allocation66_spill] sm:$0xff] }
 0x2ca   : > { %3575 = vperm.xlu0 %6209, %v3488_v29   ;;  %vm4651_vm4 = vmand %vm4619_vm13, %vm15121_vm10  ;;  %v4160_v35 = vmul.f32 %v10967_v27, %v4124_v48  ;;  %vm3608_vm3 = vcmp.eq.s32.totalorder %v3552_v1, 1  ;;  %v930_v10 = vmul.f32 0.16666667, %v898_v22  ;;  %v4159_v20 = vmul.f32 %v10967_v27, %v4123_v58  ;;  %v11657_v29 = vld [vmem:[%s13336_s3 + $0x2] ss:$0 sm:$0xff]  ;;  %v15134_v1 = vld [vmem:[#allocation67_spill] sm:$0xff] }
 0x2cb   : > { %v4684_v16 = vsel %vm4651_vm4, 1, %v14037_v46  ;;  %vm15122_vm11 = vcmp.ge.s32.totalorder %v14999_v3, 0  ;;  %v3640_v43 = vsel %vm3608_vm3, %v11422_v34, 0.0  ;;  %v963_v15 = vmul.f32 %v931_v17, %v11508_v60  ;;  %v4388_v60 = vpop.permute.xlu0 %4387 }
 0x2cc   : > { %vm4263_vm9 = vmand %vm11408_vm1, %vm15122_vm11  ;;  %v3351_v14 = vadd.f32 %v3319_v50, %v11487_v18  ;;  %4765 = vperm.xlu1 %6210, %v4684_v16   ;;  %vm15123_vm0 = vcmp.lt.s32.totalorder %v14999_v3, 16  ;;  %v11613_v13 = vadd.f32 %v4160_v35, %v3707_v33  ;;  %v3676_v49 = vmul.f32 %v11024_v6, %v3640_v43  ;;  %v2847_v17 = vpop.permute.xlu1 %2846  ;;  %v11683_v43 = vld [vmem:[#allocation2 + $0x77] sm:$0xff] }
 0x2cd   : > { %vm4295_vm14 = vmand %vm4263_vm9, %vm15123_vm0  ;;  %vm4804_vm13 = vcmp.eq.s32.totalorder %v4742_v12, 1  ;;  %v2476_v57 = vsel %vm2444_vm15, %v11598_v44, 0.0  ;;  %vm15124_vm10 = vcmp.ge.s32.totalorder %v11519_v26, 0  ;;  %vm15127_vm3 = vcmask 523264   ;;  %v11700_v12 = vld [vmem:[#allocation2 + $0x71] sm:$0xff] }
 0x2ce   : > { %v4328_v24 = vsel %vm4295_vm14, 1, %v14037_v46  ;;  %vm11624_vm4 = vmand %vm15124_vm10, %vm2648_vm8  ;;  %v4836_v3 = vsel %vm4804_vm13, %v11356_v45, 0.0  ;;  %1034 = vst.msk [vmem:[#allocation2 + $0x110] sm:$0xff] %vm15127_vm3, %v963_v15  ;;  %v962_v33 = vmul.f32 %v930_v10, %v11523_v47  ;;  %v4547_v50 = vadd.f32 %v4515_v11, %v11489_v25  ;;  %v11642_v45 = vld [vmem:[%s13337_s4] ss:$0 sm:$0xff]  ;;  %v15131_v25 = vld [vmem:[#allocation36_spill] sm:$0xff] }
 0x2cf   : > { %4411 = vperm.xlu0 %6209, %v4328_v24   ;;  %vm15129_vm15 = vcmp.ge.s32.totalorder %v15128_v61, 0  ;;  %v11636_v8 = vadd.f32 %v3676_v49, %v3351_v14  ;;  %v4872_v58 = vmul.f32 %v11228_v23, %v4836_v3  ;;  %vm4448_vm8 = vcmp.eq.s32.totalorder %v4388_v60, 1  ;;  %vm15133_vm13 = vmmov %vm15127_vm3  ;;  %v15139_v15 = vld [vmem:[#allocation38_spill] sm:$0xff]  ;;  %v15140_v14 = vld [vmem:[#allocation9_spill] sm:$0xff] }
 0x2d0   : > { %vm2712_vm11 = vmand %vm11624_vm4, %vm15129_vm15  ;;  %v11646_v47 = vadd.f32 %v11642_v45, %v11304_v36  ;;  %vm2887_vm9 = vcmp.eq.s32.totalorder %v15131_v25, 1  ;;  %v4191_v11 = vadd.f32 %v4159_v20, %v11493_v9  ;;  %vm15132_vm0 = vcmp.lt.s32.totalorder %v15128_v61, 16  ;;  %1033 = vst.msk [vmem:[#allocation2 + $0x108] sm:$0xff] %vm15133_vm13, %v962_v33  ;;  %v11706_v49 = vld [vmem:[#allocation2 + $0xc7] sm:$0xff]  ;;  %v15142_v24 = vld [vmem:[#allocation155_spill] sm:$0xff] }
 0x2d1   : > { %vm2744_vm14 = vmand %vm2712_vm11, %vm15132_vm0  ;;  %v4480_v22 = vsel %vm4448_vm8, %v11533_v38, 0.0  ;;  %v2512_v48 = vmul.f32 %v11657_v29, %v2476_v57  ;;  %vm15135_vm10 = vnez %v15134_v1  ;;  %v11665_v9 = vadd.f32 %v4872_v58, %v4547_v50  ;;  %v15143_v57 = vld [vmem:[#allocation107_spill] sm:$0xff]  ;;  %v3555_v58 = vpop.permute.xlu1 %3554 }
 0x2d2   : > { %15130 = vst [vmem:[#allocation24_spill] sm:$0xff] %v11646_v47  ;;  %v2777_v36 = vsel %vm2744_vm14, 1, %v14037_v46  ;;  %vm2228_vm3 = vmand %vm15135_vm10, %vm13919_vm7  ;;  %v4516_v38 = vmul.f32 %v11582_v53, %v4480_v22  ;;  %v11670_v35 = vadd.f32 %v11203_v37, %v11164_v28  ;;  %v11674_v10 = vmul.f32 %v11024_v6, %v11287_v52  ;;  %v15144_v33 = vld [vmem:[#allocation55_spill] sm:$0xff] }
 0x2d3   : > { %15136 = vst [vmem:[#allocation26_spill] sm:$0xff] %v11665_v9  ;;  %2870 = vperm.xlu1 %6210, %v2777_v36   ;;  %vm2292_vm15 = vmand %vm2228_vm3, %vm13912_vm2  ;;  %v3780_v20 = vadd.s32 1, %v11084_v31  ;;  %vm2897_vm11 = vcmp.eq.s32.totalorder %v2847_v17, 1  ;;  %v11681_v16 = vmul.f32 %v11582_v53, %v11309_v5  ;;  %v2919_v28 = vsel %vm2887_vm9, %v11683_v43, 0.0  ;;  %v11695_v31 = vpop.permute.xlu0 %2396  ;;  %v15149_v17 = vld [vmem:[#allocation25_spill] sm:$0xff]  ;;  %v15168_v9 = vld [vmem:[#allocation50_spill] sm:$0xff] }
 0x2d4   : > { %v2325_v37 = vsel %vm2292_vm15, 1, %v14037_v46  ;;  %vm15137_vm8 = vcmp.ge.s32.totalorder %v10960_v32, 0  ;;  %v11693_v52 = vadd.f32 %v4516_v38, %v4191_v11  ;;  %v11698_v5 = vadd.f32 3.0, %v11646_v47  ;;  %v15159_v47 = vld [vmem:[#allocation63_spill] sm:$0xff] }
 0x2d5   : > { %vm3424_vm0 = vmand %vm11270_vm12, %vm15137_vm8  ;;  %vm2435_vm14 = vcmp.eq.s32.totalorder %v15139_v15, 1  ;;  %vm3599_vm9 = vcmp.eq.s32.totalorder %v15140_v14, 1  ;;  %2420 = vperm.xlu0 %6209, %v2325_v37   ;;  %vm15141_vm13 = vcmp.lt.s32.totalorder %v10960_v32, 16  ;;  %v2929_v39 = vsel %vm2897_vm11, %v11706_v49, 0.0  ;;  %v11734_v37 = vld [vmem:[#allocation2 + $0x70] sm:$0xff]  ;;  %v15214_v14 = vld [vmem:[#allocation85_spill] sm:$0xff] }
 0x2d6   : > { %15138 = vst [vmem:[#allocation59_spill] sm:$0xff] %v11698_v5  ;;  %vm3456_vm10 = vmand %vm3424_vm0, %vm15141_vm13  ;;  %vm3243_vm12 = vcmp.eq.s32.totalorder %v15142_v24, 1  ;;  %v2544_v3 = vadd.f32 %v2512_v48, %v15143_v57  ;;  %vm15145_vm3 = vcmp.ge.s32.totalorder %v15144_v33, 0  ;;  %v2965_v50 = vmul.f32 %v11574_v21, %v2929_v39  ;;  %v15147_v48 = vld [vmem:[#allocation52_spill] sm:$0xff] }
 0x2d7   : > { %v3489_v60 = vsel %vm3456_vm10, 1, %v14037_v46  ;;  %vm3068_vm15 = vmand %vm11500_vm5, %vm15145_vm3  ;;  %v2955_v25 = vmul.f32 %v11574_v21, %v2919_v28  ;;  %vm15146_vm8 = vcmp.lt.s32.totalorder %v15144_v33, 16  ;;  %vm3812_vm0 = vcmp.ge.s32.totalorder %v3780_v20, 0  ;;  %v3201_v38 = vpop.permute.xlu0 %3200  ;;  %v11752_v24 = vld [vmem:[%s13338_s5 + $0xf8] sm:$0xff] }
 0x2d8   : > { %3578 = vperm.xlu1 %6210, %v3489_v60   ;;  %vm3100_vm11 = vmand %vm3068_vm15, %vm15146_vm8  ;;  %vm3844_vm13 = vcmp.lt.s32.totalorder %v3780_v20, 16  ;;  %vm3609_vm2 = vcmp.eq.s32.totalorder %v3555_v58, 1  ;;  %v2467_v11 = vsel %vm2435_vm14, %v11700_v12, 0.0  ;;  %vm15148_vm10 = vcmp.ge.s32.totalorder %v15147_v48, 0 }
 0x2d9   : > { %v3133_v22 = vsel %vm3100_vm11, 1, %v14037_v46  ;;  %vm4264_vm3 = vmand %vm11542_vm6, %vm15148_vm10  ;;  %v11728_v36 = vadd.f32 %v2965_v50, %v2544_v3  ;;  %v3641_v1 = vsel %vm3609_vm2, %v11598_v44, 0.0  ;;  %v3631_v28 = vsel %vm3599_vm9, %v15149_v17, 0.0  ;;  %v11756_v3 = vld [vmem:[#allocation2 + $0xc0] sm:$0xff]  ;;  %v4391_v50 = vpop.permute.xlu1 %4390 }
 0x2da   : > { %v3275_v15 = vsel %vm3243_vm12, %v11734_v37, 0.0  ;;  %3224 = vperm.xlu0 %6209, %v3133_v22   ;;  %vm15150_vm14 = vcmp.lt.s32.totalorder %v15147_v48, 16  ;;  %v3677_v39 = vmul.f32 %v11024_v6, %v3641_v1  ;;  %vm3253_vm8 = vcmp.eq.s32.totalorder %v3201_v38, 1  ;;  %vm11745_vm2 = vmand %vm3812_vm0, %vm3844_vm13  ;;  %v11770_v22 = vld [vmem:[%s13336_s3 + $0x4] ss:$0 sm:$0xff]  ;;  %v15154_v38 = vld [vmem:[#allocation71_spill] sm:$0xff] }
 0x2db   : > { %vm4296_vm15 = vmand %vm4264_vm3, %vm15150_vm14  ;;  %vm2617_vm9 = vcmp.ge.s32.totalorder %v11752_v24, 0  ;;  %vm2649_vm12 = vcmp.lt.s32.totalorder %v11752_v24, 16  ;;  %v3285_v60 = vsel %vm3253_vm8, %v11756_v3, 0.0  ;;  %v2503_v20 = vmul.f32 %v11657_v29, %v2467_v11 }
 0x2dc   : > { %v4329_v57 = vsel %vm4296_vm15, 1, %v14037_v46  ;;  %vm15153_vm11 = vcmp.ge.s32.totalorder %v15034_v4, 0  ;;  %v11765_v58 = vadd.f32 %v3677_v39, %v11560_v59  ;;  %v3321_v48 = vmul.f32 %v11770_v22, %v3285_v60  ;;  %v15156_v39 = vld [vmem:[#allocation13_spill] sm:$0xff]  ;;  %vm11785_vm8 = vmand %vm2617_vm9, %vm2649_vm12 }
 0x2dd   : > { %4414 = vperm.xlu1 %6210, %v4329_v57   ;;  %vm3908_vm0 = vmand %vm11745_vm2, %vm15153_vm11  ;;  %vm4449_vm13 = vcmp.eq.s32.totalorder %v4391_v50, 1  ;;  %v3667_v1 = vmul.f32 %v11024_v6, %v3631_v28  ;;  %v3311_v11 = vmul.f32 %v11770_v22, %v3275_v15  ;;  %vm4439_vm10 = vcmp.eq.s32.totalorder %v15154_v38, 1  ;;  %v4037_v28 = vpop.permute.xlu0 %4036  ;;  %v15165_v15 = vld [vmem:[#allocation42_spill] sm:$0xff] }
 0x2de   : > { %vm15155_vm3 = vcmp.lt.s32.totalorder %v15034_v4, 16  ;;  %v4481_v59 = vsel %vm4449_vm13, %v11528_v41, 0.0  ;;  %vm4083_vm15 = vcmp.eq.s32.totalorder %v15156_v39, 1  ;;  %v11790_v6 = vadd.f32 %v3321_v48, %v11593_v0  ;;  %v15161_v0 = vld [vmem:[#allocation139_spill] sm:$0xff]  ;;  %v15169_v38 = vld [vmem:[#allocation22_spill] sm:$0xff] }
 0x2df   : > { %vm3940_vm14 = vmand %vm3908_vm0, %vm15155_vm3  ;;  %v4517_v4 = vmul.f32 %v11582_v53, %v4481_v59  ;;  %v11795_v41 = vadd.f32 %v11674_v10, %v11167_v30  ;;  %v11800_v50 = vadd.f32 %v11681_v16, %v11179_v56  ;;  %vm15160_vm9 = vcmp.ge.s32.totalorder %v15159_v47, 0  ;;  %v11811_v30 = vld [vmem:[#allocation2 + $0xc1] sm:$0xff]  ;;  %v11818_v16 = vpop.permute.xlu1 %2399 }
 0x2e0   : > { %v3973_v57 = vsel %vm3940_vm14, 1, %v14037_v46  ;;  %vm2713_vm12 = vmand %vm11785_vm8, %vm15160_vm9  ;;  %vm4093_vm11 = vcmp.eq.s32.totalorder %v4037_v28, 1  ;;  %v11807_v48 = vadd.f32 %v2955_v25, %v15161_v0  ;;  %vm15162_vm0 = vcmp.lt.s32.totalorder %v15159_v47, 16  ;;  %v15163_v59 = vld [vmem:[#allocation138_spill] sm:$0xff]  ;;  %v15164_v25 = vld [vmem:[#allocation48_spill] sm:$0xff] }
 0x2e1   : > { %4060 = vperm.xlu0 %6209, %v3973_v57   ;;  %vm2745_vm13 = vmand %vm2713_vm12, %vm15162_vm0  ;;  %vm2445_vm3 = vcmp.eq.s32.totalorder %v11695_v31, 1  ;;  %v11815_v56 = vadd.f32 %v4517_v4, %v11613_v13  ;;  %v4125_v10 = vsel %vm4093_vm11, %v11562_v62, 0.0  ;;  %v4471_v57 = vsel %vm4439_vm10, %v15163_v59, 0.0  ;;  %v15167_v62 = vld [vmem:[#allocation6_spill] sm:$0xff]  ;;  %v4745_v7 = vpop.permute.xlu0 %4744 }
 0x2e2   : > { %v4115_v28 = vsel %vm4083_vm15, %v15164_v25, 0.0  ;;  %v2778_v0 = vsel %vm2745_vm13, 1, %v14037_v46  ;;  %vm15166_vm14 = vcmp.ge.s32.totalorder %v15165_v15, 0  ;;  %v4161_v13 = vmul.f32 %v10967_v27, %v4125_v10  ;;  %v15171_v39 = vld [vmem:[#allocation90_spill] sm:$0xff]  ;;  %v15172_v10 = vld [vmem:[#allocation113_spill] sm:$0xff] }
 0x2e3   : > { %vm4620_vm9 = vmand %vm11408_vm1, %vm15166_vm14  ;;  %v11833_v4 = vadd.f32 %v2503_v20, %v15167_v62  ;;  %v11836_v5 = vadd.f32 %v3667_v1, %v15168_v9  ;;  %v11839_v59 = vadd.f32 %v3311_v11, %v15169_v38  ;;  %2873 = vperm.xlu1 %6210, %v2778_v0   ;;  %vm15170_vm10 = vcmp.lt.s32.totalorder %v15165_v15, 16  ;;  %v15174_v15 = vld [vmem:[#allocation4_spill] sm:$0xff]  ;;  %v3204_v0 = vpop.permute.xlu1 %3203 }
 0x2e4   : > { %vm4652_vm15 = vmand %vm4620_vm9, %vm15170_vm10  ;;  %v3781_v25 = vadd.s32 1, %v15171_v39  ;;  %v2477_v20 = vsel %vm2445_vm3, %v11811_v30, 0.0  ;;  %vm15173_vm1 = vcmp.ge.s32.totalorder %v15172_v10, 0  ;;  %v11853_v9 = vadd.f32 %v4161_v13, %v11636_v8  ;;  %v11861_v62 = vld [vmem:[#allocation2 + $0x79] sm:$0xff] }
 0x2e5   : > { %v4685_v42 = vsel %vm4652_vm15, 1, %v14037_v46  ;;  %vm3425_vm12 = vmand %vm11500_vm5, %vm15173_vm1  ;;  %vm4805_vm11 = vcmp.eq.s32.totalorder %v4745_v7, 1  ;;  %v4507_v1 = vmul.f32 %v11582_v53, %v4471_v57  ;;  %v4151_v11 = vmul.f32 %v10967_v27, %v4115_v28  ;;  %v15177_v7 = vld [vmem:[#allocation64_spill] sm:$0xff]  ;;  %v15180_v13 = vld [vmem:[#allocation89_spill] sm:$0xff] }
 0x2e6   : > { %vm4795_vm0 = vcmp.eq.s32.totalorder %v15174_v15, 1  ;;  %4768 = vperm.xlu0 %6209, %v4685_v42   ;;  %vm15175_vm13 = vcmp.lt.s32.totalorder %v15172_v10, 16  ;;  %v4837_v31 = vsel %vm4805_vm11, %v11422_v34, 0.0  ;;  %vm2436_vm5 = vcmp.eq.s32.totalorder %v15176_v2, 1  ;;  %v11873_v34 = vld [vmem:[#allocation2 + $0xc8] sm:$0xff]  ;;  %v15181_v42 = vld [vmem:[#allocation49_spill] sm:$0xff] }
 0x2e7   : > { %vm3457_vm14 = vmand %vm3425_vm12, %vm15175_vm13  ;;  %vm15178_vm3 = vcmp.ge.s32.totalorder %v15177_v7, 0  ;;  %v4873_v27 = vmul.f32 %v11228_v23, %v4837_v31  ;;  %vm3254_vm10 = vcmp.eq.s32.totalorder %v3204_v0, 1  ;;  %v2513_v57 = vmul.f32 %v11657_v29, %v2477_v20  ;;  %v2850_v0 = vpop.permute.xlu0 %2849  ;;  %v15184_v10 = vld [vmem:[#allocation120_spill] sm:$0xff] }
 0x2e8   : > { %v3490_v8 = vsel %vm3457_vm14, 1, %v14037_v46  ;;  %vm3069_vm9 = vmand %vm11624_vm4, %vm15178_vm3  ;;  %vm15179_vm15 = vcmp.lt.s32.totalorder %v15177_v7, 16  ;;  %vm3813_vm12 = vcmp.ge.s32.totalorder %v3781_v25, 0  ;;  %vm3845_vm11 = vcmp.lt.s32.totalorder %v3781_v25, 16  ;;  %v15189_v25 = vld [vmem:[#allocation60_spill] sm:$0xff] }
 0x2e9   : > { %3581 = vperm.xlu1 %6210, %v3490_v8   ;;  %vm3101_vm1 = vmand %vm3069_vm9, %vm15179_vm15  ;;  %v3286_v28 = vsel %vm3254_vm10, %v11873_v34, 0.0  ;;  %v4827_v38 = vsel %vm4795_vm0, %v15180_v13, 0.0  ;;  %vm15182_vm13 = vcmp.ge.s32.totalorder %v15181_v42, 0  ;;  %v11885_v20 = vadd.f32 %v4873_v27, %v11693_v52 }
 0x2ea   : > { %v3134_v39 = vsel %vm3101_vm1, 1, %v14037_v46  ;;  %vm4265_vm14 = vmand %vm11745_vm2, %vm15182_vm13  ;;  %v3322_v31 = vmul.f32 %v11770_v22, %v3286_v28  ;;  %v2468_v8 = vsel %vm2436_vm5, %v11861_v62, 0.0  ;;  %vm3244_vm3 = vcmp.eq.s32.totalorder %v15184_v10, 1  ;;  %v11908_v28 = vld [vmem:[#allocation2 + $0xcf] sm:$0xff] }
 0x2eb   : > { %15183 = vst [vmem:[#allocation115_spill] sm:$0xff] %v11885_v20  ;;  %3227 = vperm.xlu0 %6209, %v3134_v39   ;;  %vm15185_vm0 = vcmp.lt.s32.totalorder %v15181_v42, 16  ;;  %v3782_v15 = vadd.s32 1, %v11374_v51  ;;  %vm2898_vm10 = vcmp.eq.s32.totalorder %v2850_v0, 1  ;;  %v11896_v13 = vadd.f32 %v4507_v1, %v11670_v35  ;;  %vm11901_vm15 = vmand %vm3813_vm12, %vm3845_vm11  ;;  %v15188_v1 = vld [vmem:[#allocation130_spill] sm:$0xff]  ;;  %v11924_v20 = vld [vmem:[#allocation2 + $0x78] sm:$0xff]  ;;  %v3558_v10 = vpop.permute.xlu0 %3557 }
 0x2ec   : > { %vm4297_vm9 = vmand %vm4265_vm14, %vm15185_vm0  ;;  %v11906_v2 = vadd.f32 %v3322_v31, %v11728_v36  ;;  %v2930_v39 = vsel %vm2898_vm10, %v11908_v28, 0.0  ;;  %v11912_v51 = vadd.f32 %v4151_v11, %v11795_v41  ;;  %v4863_v35 = vmul.f32 %v11228_v23, %v4827_v38  ;;  %v4040_v31 = vpop.permute.xlu1 %4039  ;;  %15191 = vst [vmem:[#allocation143_spill] sm:$0xff] %v11924_v20  ;;  %v15192_v11 = vld [vmem:[#allocation82_spill] sm:$0xff]  ;;  %v15194_v38 = vld [vmem:[#allocation61_spill] sm:$0xff] }
 0x2ed   : > { %v4330_v52 = vsel %vm4297_vm9, 1, %v14037_v46  ;;  %v2545_v42 = vadd.f32 %v2513_v57, %v15188_v1  ;;  %vm15190_vm5 = vcmp.ge.s32.totalorder %v15189_v25, 0  ;;  %v2966_v36 = vmul.f32 %v11574_v21, %v2930_v39  ;;  %v11942_v39 = vld [vmem:[#allocation2 + $0xc9] sm:$0xff]  ;;  %v11948_v1 = vld [vmem:[%s13336_s3 + $0x6] ss:$0 sm:$0xff] }
 0x2ee   : > { %4417 = vperm.xlu1 %6210, %v4330_v52   ;;  %vm3909_vm1 = vmand %vm11901_vm15, %vm15190_vm5  ;;  %v11922_v0 = vmul.f32 %v11657_v29, %v2468_v8  ;;  %v3276_v41 = vsel %vm3244_vm3, %v11924_v20, 0.0  ;;  %vm2888_vm12 = vcmp.eq.s32.totalorder %v15192_v11, 1  ;;  %vm15193_vm11 = vcmp.lt.s32.totalorder %v15189_v25, 16  ;;  %v15197_v25 = vld [vmem:[#allocation76_spill] sm:$0xff] }
 0x2ef   : > { %vm3941_vm13 = vmand %vm3909_vm1, %vm15193_vm11  ;;  %vm4094_vm14 = vcmp.eq.s32.totalorder %v4040_v31, 1  ;;  %vm15195_vm0 = vcmp.ge.s32.totalorder %v15194_v38, 0  ;;  %v11937_v8 = vadd.f32 %v2966_v36, %v2545_v42  ;;  %vm15196_vm3 = vcmp.lt.s32.totalorder %v15194_v38, 16  ;;  %v15198_v31 = vld [vmem:[#allocation129_spill] sm:$0xff] }
 0x2f0   : > { %v3974_v57 = vsel %vm3941_vm13, 1, %v14037_v46  ;;  %vm3070_vm9 = vmand %vm11785_vm8, %vm15195_vm0  ;;  %v4126_v52 = vsel %vm4094_vm14, %v11706_v49, 0.0  ;;  %vm2446_vm1 = vcmp.eq.s32.totalorder %v11818_v16, 1  ;;  %vm3846_vm11 = vcmp.lt.s32.totalorder %v3782_v15, 16  ;;  %v4748_v20 = vpop.permute.xlu1 %4747  ;;  %v15200_v38 = vld [vmem:[#allocation105_spill] sm:$0xff] }
 0x2f1   : > { %4063 = vperm.xlu0 %6209, %v3974_v57   ;;  %vm3102_vm5 = vmand %vm3070_vm9, %vm15196_vm3  ;;  %v4162_v42 = vmul.f32 %v11948_v1, %v4126_v52  ;;  %vm3610_vm13 = vcmp.eq.s32.totalorder %v3558_v10, 1  ;;  %v4895_v49 = vadd.f32 %v4863_v35, %v11800_v50  ;;  %vm4084_vm14 = vcmp.eq.s32.totalorder %v15197_v25, 1  ;;  %v11968_v35 = vld [vmem:[%s13336_s3 + $0x5] ss:$0 sm:$0xff] }
 0x2f2   : > { %v3135_v36 = vsel %vm3102_vm5, 1, %v14037_v46  ;;  %vm15199_vm0 = vcmp.ge.s32.totalorder %v15198_v31, 0  ;;  %v3642_v57 = vsel %vm3610_vm13, %v11811_v30, 0.0  ;;  %vm4796_vm3 = vcmp.eq.s32.totalorder %v15200_v38, 1  ;;  %v11971_v52 = vld [vmem:[#allocation2 + $0x7f] sm:$0xff] }
 0x2f3   : > { %vm4621_vm9 = vmand %vm11542_vm6, %vm15199_vm0  ;;  %3230 = vperm.xlu1 %6210, %v3135_v36   ;;  %vm15201_vm7 = vcmp.lt.s32.totalorder %v15198_v31, 16  ;;  %v11963_v50 = vadd.f32 %v4162_v42, %v11765_v58  ;;  %v3678_v55 = vmul.f32 %v11968_v35, %v3642_v57  ;;  %vm4806_vm6 = vcmp.eq.s32.totalorder %v4748_v20, 1  ;;  %v4394_v31 = vpop.permute.xlu0 %4393  ;;  %v15206_v57 = vld [vmem:[#allocation152_spill] sm:$0xff] }
 0x2f4   : > { %vm4653_vm10 = vmand %vm4621_vm9, %vm15201_vm7  ;;  %v2920_v10 = vsel %vm2888_vm12, %v11971_v52, 0.0  ;;  %v2478_v58 = vsel %vm2446_vm1, %v11942_v39, 0.0  ;;  %vm15202_vm7 = vcmp.ge.s32.totalorder %v3782_v15, 0  ;;  %v4838_v20 = vsel %vm4806_vm6, %v11598_v44, 0.0 }
 0x2f5   : > { %v4686_v36 = vsel %vm4653_vm10, 1, %v14037_v46  ;;  %vm11982_vm5 = vmand %vm15202_vm7, %vm3846_vm11  ;;  %v4116_v11 = vsel %vm4084_vm14, %v11683_v43, 0.0  ;;  %vm15205_vm12 = vcmp.ge.s32.totalorder %v15109_v63, 0  ;;  %v11995_v16 = vadd.f32 %v3678_v55, %v11790_v6  ;;  %v15208_v55 = vld [vmem:[#allocation34_spill] sm:$0xff] }
 0x2f6   : > { %4771 = vperm.xlu0 %6209, %v4686_v36   ;;  %vm3910_vm10 = vmand %vm11982_vm5, %vm15205_vm12  ;;  %v4874_v15 = vmul.f32 %v11228_v23, %v4838_v20  ;;  %vm4450_vm1 = vcmp.eq.s32.totalorder %v4394_v31, 1  ;;  %vm3600_vm11 = vcmp.eq.s32.totalorder %v15206_v57, 1  ;;  %v4828_v44 = vsel %vm4796_vm3, %v15149_v17, 0.0  ;;  %v12040_v31 = vld [vmem:[#allocation2 + $0xd7] sm:$0xff] }
 0x2f7   : > { %vm15207_vm13 = vcmp.lt.s32.totalorder %v15109_v63, 16  ;;  %v3783_v43 = vadd.s32 1, %v11519_v26  ;;  %v4482_v25 = vsel %vm4450_vm1, %v11756_v3, 0.0  ;;  %v2514_v36 = vmul.f32 %v11657_v29, %v2478_v58  ;;  %v2853_v63 = vpop.permute.xlu1 %2852 }
 0x2f8   : > { %vm3942_vm14 = vmand %vm3910_vm10, %vm15207_vm13  ;;  %vm15209_vm0 = vcmp.ge.s32.totalorder %v15208_v55, 0  ;;  %v12013_v20 = vadd.f32 %v4874_v15, %v11815_v56  ;;  %v4518_v17 = vmul.f32 %v11582_v53, %v4482_v25  ;;  %v12017_v38 = vadd.f32 %v11642_v45, %v4895_v49  ;;  %v12035_v49 = vpop.permute.xlu0 %2402  ;;  %v15213_v15 = vld [vmem:[#allocation104_spill] sm:$0xff] }
 0x2f9   : > { %v3975_v6 = vsel %vm3942_vm14, 1, %v14037_v46  ;;  %vm3426_vm9 = vmand %vm11624_vm4, %vm15209_vm0  ;;  %v3312_v26 = vmul.f32 %v11770_v22, %v3276_v41  ;;  %v2956_v3 = vmul.f32 %v11574_v21, %v2920_v10  ;;  %vm15210_vm3 = vcmp.lt.s32.totalorder %v15208_v55, 16 }
 0x2fa   : > { %4066 = vperm.xlu1 %6210, %v3975_v6   ;;  %vm3458_vm6 = vmand %vm3426_vm9, %vm15210_vm3  ;;  %vm2899_vm7 = vcmp.eq.s32.totalorder %v2853_v63, 1  ;;  %v4152_v18 = vmul.f32 %v11948_v1, %v4116_v11  ;;  %v3632_v56 = vsel %vm3600_vm11, %v11700_v12, 0.0  ;;  %vm15211_vm4 = vcmp.ge.s32.totalorder %v10832_v19, 0 }
 0x2fb   : > { %v3491_v58 = vsel %vm3458_vm6, 1, %v14037_v46  ;;  %vm4622_vm12 = vmand %vm11745_vm2, %vm15211_vm4  ;;  %v12033_v41 = vadd.f32 %v4518_v17, %v11853_v9  ;;  %v4864_v10 = vmul.f32 %v11228_v23, %v4828_v44  ;;  %vm15212_vm10 = vcmp.lt.s32.totalorder %v10832_v19, 16  ;;  %v3561_v23 = vpop.permute.xlu1 %3560  ;;  %v15216_v44 = vld [vmem:[#allocation121_spill] sm:$0xff] }
 0x2fc   : > { %3584 = vperm.xlu0 %6209, %v3491_v58   ;;  %vm4654_vm1 = vmand %vm4622_vm12, %vm15212_vm10  ;;  %vm3815_vm13 = vcmp.ge.s32.totalorder %v3783_v43, 0  ;;  %vm3847_vm11 = vcmp.lt.s32.totalorder %v3783_v43, 16  ;;  %v2931_v11 = vsel %vm2899_vm7, %v12040_v31, 0.0  ;;  %vm4440_vm14 = vcmp.eq.s32.totalorder %v15213_v15, 1 }
 0x2fd   : > { %v2546_v57 = vadd.f32 %v2514_v36, %v15214_v14  ;;  %v4687_v9 = vsel %vm4654_vm1, 1, %v14037_v46  ;;  %vm15215_vm2 = vcmp.ge.s32.totalorder %v15102_v54, 0  ;;  %v2967_v19 = vmul.f32 %v11574_v21, %v2931_v11  ;;  %vm12067_vm7 = vmand %vm3815_vm13, %vm3847_vm11 }
 0x2fe   : > { %vm4266_vm0 = vmand %vm11901_vm15, %vm15215_vm2  ;;  %v12053_v25 = vadd.f32 %v11922_v0, %v15216_v44  ;;  %v12056_v6 = vadd.f32 3.0, %v12017_v38  ;;  %v12059_v17 = vadd.f32 %v3312_v26, %v11807_v48  ;;  %4774 = vperm.xlu1 %6210, %v4687_v9   ;;  %vm15217_vm9 = vcmp.lt.s32.totalorder %v15102_v54, 16  ;;  %v3207_v26 = vpop.permute.xlu0 %3206  ;;  %v12112_v9 = vld [vmem:[#allocation2 + $0x81] sm:$0xff] }
 0x2ff   : > { %vm4298_vm3 = vmand %vm4266_vm0, %vm15217_vm9  ;;  %vm3611_vm6 = vcmp.eq.s32.totalorder %v3561_v23, 1  ;;  %v3668_v36 = vmul.f32 %v11968_v35, %v3632_v56  ;;  %v12071_v58 = vadd.f32 %v2967_v19, %v2546_v57  ;;  %v12075_v11 = vadd.f32 %v2956_v3, %v11833_v4  ;;  %v15221_v4 = vld [vmem:[#allocation73_spill] sm:$0xff]  ;;  %v4397_v15 = vpop.permute.xlu1 %4396 }
 0x300   : > { %v4331_v63 = vsel %vm4298_vm3, 1, %v14037_v46  ;;  %v3643_v48 = vsel %vm3611_vm6, %v11942_v39, 0.0  ;;  %v4472_v54 = vsel %vm4440_vm14, %v11734_v37, 0.0  ;;  %vm15220_vm4 = vcmp.ge.s32.totalorder %v15128_v61, 0  ;;  %v12092_v37 = vld [vmem:[#allocation2 + $0xd0] sm:$0xff] }
 0x301   : > { %4420 = vperm.xlu0 %6209, %v4331_v63   ;;  %vm3911_vm12 = vmand %vm12067_vm7, %vm15220_vm4  ;;  %v3679_v43 = vmul.f32 %v11968_v35, %v3643_v48  ;;  %vm3255_vm10 = vcmp.eq.s32.totalorder %v3207_v26, 1  ;;  %v12086_v56 = vadd.f32 %v4152_v18, %v11836_v5  ;;  %v4896_v14 = vadd.f32 %v4864_v10, %v11896_v13  ;;  %v15227_v63 = vld [vmem:[#allocation83_spill] sm:$0xff] }
 0x302   : > { %vm2889_vm1 = vcmp.eq.s32.totalorder %v15221_v4, 1  ;;  %vm15222_vm13 = vcmp.lt.s32.totalorder %v15128_v61, 16  ;;  %v3287_v3 = vsel %vm3255_vm10, %v12092_v37, 0.0  ;;  %vm15223_vm14 = vcmp.ge.s32.totalorder %v11467_v40, 0  ;;  %v4043_v44 = vpop.permute.xlu0 %4042 }
 0x303   : > { %vm3943_vm11 = vmand %vm3911_vm12, %vm15222_vm13  ;;  %v12101_v5 = vadd.f32 %v3679_v43, %v11906_v2  ;;  %v3323_v13 = vmul.f32 %v11770_v22, %v3287_v3  ;;  %vm4451_vm0 = vcmp.eq.s32.totalorder %v4397_v15, 1  ;;  %v12105_v61 = vadd.f32 %v3668_v36, %v11839_v59  ;;  %v15225_v2 = vld [vmem:[#allocation123_spill] sm:$0xff]  ;;  %v15232_v3 = vld [vmem:[#allocation30_spill] sm:$0xff] }
 0x304   : > { %v3976_v57 = vsel %vm3943_vm11, 1, %v14037_v46  ;;  %vm3427_vm2 = vmand %vm11785_vm8, %vm15223_vm14  ;;  %v4508_v18 = vmul.f32 %v11582_v53, %v4472_v54  ;;  %vm15224_vm9 = vcmp.lt.s32.totalorder %v11467_v40, 16  ;;  %v3784_v10 = vadd.s32 1, %v11752_v24  ;;  %v12147_v54 = vpop.permute.xlu1 %2405 }
 0x305   : > { %4069 = vperm.xlu1 %6210, %v3976_v57   ;;  %vm3459_vm3 = vmand %vm3427_vm2, %vm15224_vm9  ;;  %v4483_v60 = vsel %vm4451_vm0, %v11873_v34, 0.0  ;;  %vm2437_vm8 = vcmp.eq.s32.totalorder %v15225_v2, 1  ;;  %vm15226_vm6 = vcmp.ge.s32.totalorder %v10960_v32, 0  ;;  %v12121_v59 = vadd.f32 %v3323_v13, %v11937_v8  ;;  %v12127_v34 = vld [vmem:[#allocation2 + $0x87] sm:$0xff]  ;;  %v12140_v8 = vld [vmem:[#allocation2 + $0xd1] sm:$0xff] }
 0x306   : > { %v3492_v19 = vsel %vm3459_vm3, 1, %v14037_v46  ;;  %vm4623_vm4 = vmand %vm11901_vm15, %vm15226_vm6  ;;  %v4519_v23 = vmul.f32 %v11582_v53, %v4483_v60  ;;  %v12125_v24 = vadd.f32 %v11642_v45, %v4896_v14  ;;  %v2921_v36 = vsel %vm2889_vm1, %v12127_v34, 0.0 }
 0x307   : > { %vm3601_vm12 = vcmp.eq.s32.totalorder %v15227_v63, 1  ;;  %3587 = vperm.xlu0 %6209, %v3492_v19   ;;  %vm15228_vm15 = vcmp.lt.s32.totalorder %v10960_v32, 16  ;;  %vm4095_vm13 = vcmp.eq.s32.totalorder %v4043_v44, 1  ;;  %vm15229_vm11 = vcmp.ge.s32.totalorder %v15144_v33, 0 }
 0x308   : > { %vm4655_vm10 = vmand %vm4623_vm4, %vm15228_vm15  ;;  %vm2447_vm2 = vcmp.eq.s32.totalorder %v12035_v49, 1  ;;  %v12144_v48 = vadd.f32 %v4519_v23, %v11963_v50  ;;  %v4127_v26 = vsel %vm4095_vm13, %v11908_v28, 0.0  ;;  %v2469_v32 = vsel %vm2437_vm8, %v12112_v9, 0.0  ;;  %v3210_v60 = vpop.permute.xlu1 %3209 }
 0x309   : > { %v4688_v27 = vsel %vm4655_vm10, 1, %v14037_v46  ;;  %vm4267_vm14 = vmand %vm11982_vm5, %vm15229_vm11  ;;  %vm15230_vm1 = vcmp.lt.s32.totalorder %v15144_v33, 16  ;;  %vm3816_vm9 = vcmp.ge.s32.totalorder %v3784_v10, 0  ;;  %vm3848_vm3 = vcmp.lt.s32.totalorder %v3784_v10, 16  ;;  %v4751_v33 = vpop.permute.xlu0 %4750 }
 0x30a   : > { %4777 = vperm.xlu1 %6210, %v4688_v27   ;;  %vm4299_vm0 = vmand %vm4267_vm14, %vm15230_vm1  ;;  %v4163_v43 = vmul.f32 %v11948_v1, %v4127_v26  ;;  %v12156_v14 = vadd.f32 %v4508_v18, %v11912_v51  ;;  %v2957_v50 = vmul.f32 %v11574_v21, %v2921_v36  ;;  %v3633_v28 = vsel %vm3601_vm12, %v11861_v62, 0.0  ;;  %v12206_v36 = vld [vmem:[#allocation2 + $0x80] sm:$0xff]  ;;  %v12214_v26 = vld [vmem:[#allocation2 + $0xd8] sm:$0xff] }
 0x30b   : > { %v4332_v4 = vsel %vm4299_vm0, 1, %v14037_v46  ;;  %vm15231_vm8 = vcmp.ge.s32.totalorder %v15177_v7, 0  ;;  %vm3245_vm4 = vcmp.eq.s32.totalorder %v15232_v3, 1  ;;  %v2479_v51 = vsel %vm2447_vm2, %v12140_v8, 0.0  ;;  %vm12180_vm13 = vmand %vm3816_vm9, %vm3848_vm3 }
 0x30c   : > { %vm4268_vm6 = vmand %vm12067_vm7, %vm15231_vm8  ;;  %4423 = vperm.xlu0 %6209, %v4332_v4   ;;  %vm15233_vm15 = vcmp.lt.s32.totalorder %v15177_v7, 16  ;;  %v12174_v15 = vadd.f32 %v4163_v43, %v11995_v16  ;;  %vm4807_vm12 = vcmp.eq.s32.totalorder %v4751_v33, 1  ;;  %v2505_v57 = vmul.f32 %v11657_v29, %v2469_v32  ;;  %v5189_v7 = vld [vmem:[%s13340_s7] sm:$0xff]  ;;  %v5190_v16 = vld [vmem:[%s13340_s7 + $0x8] sm:$0xff] }
 0x30d   : > { %vm4300_vm10 = vmand %vm4268_vm6, %vm15233_vm15  ;;  %v4839_v49 = vsel %vm4807_vm12, %v11811_v30, 0.0  ;;  %v3669_v2 = vmul.f32 %v11968_v35, %v3633_v28  ;;  %vm15236_vm11 = vcmp.ge.s32.totalorder %v15159_v47, 0  ;;  %v12199_v30 = vld [vmem:[%s13336_s3 + $0x8] ss:$0 sm:$0xff]  ;;  %vm3256_vm2 = vcmp.eq.s32.totalorder %v3210_v60, 1  ;;  %v15238_v43 = vld [vmem:[#allocation3_spill] sm:$0xff] }
 0x30e   : > { %v4333_v13 = vsel %vm4300_vm10, 1, %v14037_v46  ;;  %vm3912_vm14 = vmand %vm12180_vm13, %vm15236_vm11  ;;  %v4875_v10 = vmul.f32 %v12199_v30, %v4839_v49  ;;  %v6396_v19 = vmov 0.0|0.0   ;;  %v6167_v23 = vpack.c.bf16 %v5190_v16, %v5189_v7  ;;  %v15239_v4 = vld [vmem:[#allocation61_spill] sm:$0xff] }
 0x30f   : > { %4426 = vperm.xlu1 %6210, %v4333_v13   ;;  %6166 = vmatprep.subr.bf16.mxu0 %v6396_v19  ;;  %v12204_v44 = vadd.f32 3.0, %v12125_v24  ;;  %v3277_v63 = vsel %vm3245_vm4, %v12206_v36, 0.0  ;;  %v2515_v27 = vmul.f32 %v11657_v29, %v2479_v51  ;;  %vm15237_vm1 = vcmp.lt.s32.totalorder %v15159_v47, 16  ;;  %v2856_v47 = vpop.permute.xlu0 %2855  ;;  %v15241_v13 = vld [vmem:[#allocation122_spill] sm:$0xff]  ;;  %v15242_v60 = vld [vmem:[#allocation5_spill] sm:$0xff] }
 0x310   : > { %vm3944_vm0 = vmand %vm3912_vm14, %vm15237_vm1  ;;  %v3288_v32 = vsel %vm3256_vm2, %v12214_v26, 0.0  ;;  %vm4441_vm9 = vcmp.eq.s32.totalorder %v15238_v43, 1  ;;  %vm15240_vm3 = vcmp.ge.s32.totalorder %v15239_v4, 0  ;;  %v12224_v33 = vadd.f32 %v4875_v10, %v12033_v41  ;;  %6168 = vmatpush3.bf16.msra.mxu0 %v6167_v23  ;;  %v15244_v16 = vld [vmem:[#allocation113_spill] sm:$0xff]  ;;  %v15246_v23 = vld [vmem:[#allocation143_spill] sm:$0xff] }
 0x311   : > { %v3977_v28 = vsel %vm3944_vm0, 1, %v14037_v46  ;;  %vm4269_vm8 = vmand %vm12180_vm13, %vm15240_vm3  ;;  %v3324_v3 = vmul.f32 %v11770_v22, %v3288_v32  ;;  %v12228_v51 = vadd.f32 %v2957_v50, %v12053_v25  ;;  %v12231_v49 = vadd.f32 %v2505_v57, %v15241_v13  ;;  %6169 = vmatprep.subr.bf16.mxu0 %v6396_v19  ;;  %v12248_v50 = vld [vmem:[#allocation2 + $0xdf] sm:$0xff] }
 0x312   : > { %vm4797_vm6 = vcmp.eq.s32.totalorder %v15242_v60, 1  ;;  %4072 = vperm.xlu0 %6209, %v3977_v28   ;;  %vm15243_vm4 = vcmp.lt.s32.totalorder %v15239_v4, 16  ;;  %vm2900_vm10 = vcmp.eq.s32.totalorder %v2856_v47, 1  ;;  %v12238_v41 = vadd.f32 %v3669_v2, %v12059_v17  ;;  %v15247_v2 = vld [vmem:[#allocation19_spill] sm:$0xff]  ;;  %v15249_v28 = vld [vmem:[#allocation125_spill] sm:$0xff]  ;;  %v15253_v13 = vld [vmem:[#allocation108_spill] sm:$0xff] }
 0x313   : > { %vm4301_vm15 = vmand %vm4269_vm8, %vm15243_vm4  ;;  %vm15245_vm12 = vcmp.ge.s32.totalorder %v15244_v16, 0  ;;  %v12246_v25 = vadd.f32 %v3324_v3, %v12071_v58  ;;  %v2932_v57 = vsel %vm2900_vm10, %v12248_v50, 0.0  ;;  %v3313_v10 = vmul.f32 %v11770_v22, %v3277_v63  ;;  %v4046_v58 = vpop.permute.xlu1 %4045  ;;  %v12271_v43 = vld [vmem:[#allocation2 + $0xd9] sm:$0xff]  ;;  %v3564_v47 = vpop.permute.xlu0 %3563 }
 0x314   : > { %v4334_v7 = vsel %vm4301_vm15, 1, %v14037_v46  ;;  %vm4624_vm11 = vmand %vm11982_vm5, %vm15245_vm12  ;;  %v4473_v17 = vsel %vm4441_vm9, %v15246_v23, 0.0  ;;  %v2547_v32 = vadd.f32 %v2515_v27, %v15247_v2  ;;  %vm15248_vm14 = vcmp.lt.s32.totalorder %v15244_v16, 16  ;;  %v15251_v27 = vld [vmem:[#allocation12_spill] sm:$0xff]  ;;  %v12303_v2 = vld [vmem:[#allocation2 + $0x88] sm:$0xff] }
 0x315   : > { %4429 = vperm.xlu1 %6210, %v4334_v7   ;;  %vm4656_vm2 = vmand %vm4624_vm11, %vm15248_vm14  ;;  %v2968_v42 = vmul.f32 %v11574_v21, %v2932_v57  ;;  %vm4085_vm5 = vcmp.eq.s32.totalorder %v15249_v28, 1  ;;  %v4829_v4 = vsel %vm4797_vm6, %v11700_v12, 0.0  ;;  %vm15250_vm1 = vcmp.ge.s32.totalorder %v11467_v40, 0 }
 0x316   : > { %v4689_v63 = vsel %vm4656_vm2, 1, %v14037_v46  ;;  %vm4626_vm0 = vmand %vm12180_vm13, %vm15250_vm1  ;;  %vm4096_vm9 = vcmp.eq.s32.totalorder %v4046_v58, 1  ;;  %vm3246_vm3 = vcmp.eq.s32.totalorder %v15251_v27, 1  ;;  %vm15252_vm8 = vcmp.lt.s32.totalorder %v11467_v40, 16 }
 0x317   : > { %4780 = vperm.xlu0 %6209, %v4689_v63   ;;  %vm4658_vm4 = vmand %vm4626_vm0, %vm15252_vm8  ;;  %vm2448_vm15 = vcmp.eq.s32.totalorder %v12147_v54, 1  ;;  %v12274_v3 = vadd.f32 %v2968_v42, %v2547_v32  ;;  %v4128_v12 = vsel %vm4096_vm9, %v12040_v31, 0.0  ;;  %vm2890_vm6 = vcmp.eq.s32.totalorder %v15253_v13, 1  ;;  %v4754_v0 = vpop.permute.xlu1 %4753  ;;  %v12308_v32 = vld [vmem:[#allocation2 + $0x8f] sm:$0xff] }
 0x318   : > { %v4691_v18 = vsel %vm4658_vm4, 1, %v14037_v46  ;;  %vm15254_vm13 = vcmp.ge.s32.totalorder %v15208_v55, 0  ;;  %v4164_v40 = vmul.f32 %v11948_v1, %v4128_v12  ;;  %vm3612_vm12 = vcmp.eq.s32.totalorder %v3564_v47, 1  ;;  %v15256_v54 = vld [vmem:[#allocation126_spill] sm:$0xff]  ;;  %v15257_v47 = vld [vmem:[#allocation127_spill] sm:$0xff] }
 0x319   : > { %vm4625_vm10 = vmand %vm12067_vm7, %vm15254_vm13  ;;  %v12285_v60 = vadd.f32 %v3313_v10, %v12075_v11  ;;  %v4117_v31 = vsel %vm4085_vm5, %v11971_v52, 0.0  ;;  %v4865_v7 = vmul.f32 %v12199_v30, %v4829_v4  ;;  %4786 = vperm.xlu1 %6210, %v4691_v18   ;;  %vm15255_vm11 = vcmp.lt.s32.totalorder %v15208_v55, 16 }
 0x31a   : > { %vm4657_vm14 = vmand %vm4625_vm10, %vm15255_vm11  ;;  %v3644_v16 = vsel %vm3612_vm12, %v12140_v8, 0.0  ;;  %v2480_v11 = vsel %vm2448_vm15, %v12271_v43, 0.0  ;;  %v12299_v10 = vadd.f32 %v4164_v40, %v12101_v5  ;;  %v4509_v23 = vmul.f32 %v11582_v53, %v4473_v17  ;;  %v4400_v5 = vpop.permute.xlu0 %4399 }
 0x31b   : > { %v4690_v57 = vsel %vm4657_vm14, 1, %v14037_v46  ;;  %v3680_v52 = vmul.f32 %v11968_v35, %v3644_v16  ;;  %v3278_v55 = vsel %vm3246_vm3, %v12303_v2, 0.0  ;;  %v2922_v46 = vsel %vm2890_vm6, %v12308_v32, 0.0  ;;  %v2859_v13 = vpop.permute.xlu1 %2858  ;;  %v12341_v16 = vld [vmem:[#allocation2 + $0xe7] sm:$0xff] }
 0x31c   : > { %4783 = vperm.xlu0 %6209, %v4690_v57   ;;  %vm4808_vm7 = vcmp.eq.s32.totalorder %v4754_v0, 1  ;;  %vm4086_vm2 = vcmp.eq.s32.totalorder %v15256_v54, 1  ;;  %vm4452_vm5 = vcmp.eq.s32.totalorder %v4400_v5, 1  ;;  %v4153_v58 = vmul.f32 %v11948_v1, %v4117_v31  ;;  %v15258_v31 = vld [vmem:[#allocation75_spill] sm:$0xff] }
 0x31d   : > { %v12315_v42 = vadd.f32 %v3680_v52, %v12121_v59  ;;  %v4840_v17 = vsel %vm4808_vm7, %v11942_v39, 0.0  ;;  %v2516_v28 = vmul.f32 %v11657_v29, %v2480_v11  ;;  %v4484_v63 = vsel %vm4452_vm5, %v12092_v37, 0.0  ;;  %v5191_v37 = vld [vmem:[%s13340_s7 + $0x10] sm:$0xff] }
 0x31e   : > { %v4876_v4 = vmul.f32 %v12199_v30, %v4840_v17  ;;  %v4897_v27 = vadd.f32 %v4865_v7, %v12156_v14  ;;  %v3314_v12 = vmul.f32 %v11770_v22, %v3278_v55  ;;  %vm4798_vm1 = vcmp.eq.s32.totalorder %v15257_v47, 1  ;;  %v5192_v14 = vld [vmem:[%s13340_s7 + $0x18] sm:$0xff]  ;;  %v15259_v52 = vld [vmem:[#allocation135_spill] sm:$0xff]  ;;  %v15262_v47 = vld [vmem:[#allocation110_spill] sm:$0xff] }
 0x31f   : > { %v4520_v59 = vmul.f32 %v11582_v53, %v4484_v63  ;;  %v2958_v39 = vmul.f32 %v11574_v21, %v2922_v46  ;;  %v4118_v18 = vsel %vm4086_vm2, %v12127_v34, 0.0  ;;  %vm2901_vm0 = vcmp.eq.s32.totalorder %v2859_v13, 1  ;;  %v15260_v17 = vld [vmem:[#allocation44_spill] sm:$0xff] }
 0x320   : > { %v12329_v40 = vadd.f32 %v4876_v4, %v12144_v48  ;;  %vm3602_vm9 = vcmp.eq.s32.totalorder %v15258_v31, 1  ;;  %v2933_v34 = vsel %vm2901_vm0, %v12341_v16, 0.0  ;;  %v12344_v48 = vpop.permute.xlu0 %2408  ;;  %v6170_v0 = vpack.c.bf16 %v5192_v14, %v5191_v37  ;;  %v3567_v4 = vpop.permute.xlu1 %3566  ;;  %v12374_v37 = vld [vmem:[#allocation2 + $0x89] sm:$0xff] }
 0x321   : > { %v12339_v7 = vadd.f32 %v4520_v59, %v12174_v15  ;;  %v4541_v57 = vadd.f32 %v4509_v23, %v12086_v56  ;;  %v4830_v11 = vsel %vm4798_vm1, %v11861_v62, 0.0  ;;  %v2548_v55 = vadd.f32 %v2516_v28, %v15259_v52  ;;  %v15261_v62 = vld [vmem:[#allocation97_spill] sm:$0xff] }
 0x322   : > { %v2969_v46 = vmul.f32 %v11574_v21, %v2933_v34  ;;  %v4185_v15 = vadd.f32 %v4153_v58, %v12105_v61  ;;  %v12354_v5 = vadd.f32 %v11642_v45, %v4897_v27  ;;  %v4154_v54 = vmul.f32 %v11948_v1, %v4118_v18  ;;  %6171 = vmatpush3.bf16.msra.mxu0 %v6170_v0  ;;  %v6335_v0 = vld [vmem:[#allocation2 + $0x90] sm:$0xff] }
 0x323   : > { %vm4442_vm3 = vcmp.eq.s32.totalorder %v15260_v17, 1  ;;  %v3634_v56 = vsel %vm3602_vm9, %v12112_v9, 0.0  ;;  %vm3603_vm8 = vcmp.eq.s32.totalorder %v15261_v62, 1  ;;  %vm3613_vm4 = vcmp.eq.s32.totalorder %v3567_v4, 1  ;;  %6172 = vmatprep.subr.bf16.mxu0 %v6396_v19 }
 0x324   : > { %v12362_v23 = vadd.f32 %v2969_v46, %v2548_v55  ;;  %v3346_v21 = vadd.f32 %v3314_v12, %v12228_v51  ;;  %v2990_v61 = vadd.f32 %v2958_v39, %v12231_v49  ;;  %v4866_v58 = vmul.f32 %v12199_v30, %v4830_v11  ;;  %v3213_v63 = vpop.permute.xlu0 %3212  ;;  %v12379_v49 = vld [vmem:[#allocation2 + $0xe0] sm:$0xff]  ;;  %v15263_v39 = vld [vmem:[#allocation136_spill] sm:$0xff] }
 0x325   : > { %v3645_v28 = vsel %vm3613_vm4, %v12271_v43, 0.0  ;;  %v4474_v27 = vsel %vm4442_vm3, %v12206_v36, 0.0  ;;  %vm3247_vm15 = vcmp.eq.s32.totalorder %v15262_v47, 1  ;;  %vm3257_vm6 = vcmp.eq.s32.totalorder %v3213_v63, 1  ;;  %v4403_v36 = vpop.permute.xlu1 %4402  ;;  %v15264_v55 = vld [vmem:[#allocation109_spill] sm:$0xff] }
 0x326   : > { %v3681_v59 = vmul.f32 %v11968_v35, %v3645_v28  ;;  %v4186_v13 = vadd.f32 %v4154_v54, %v12238_v41  ;;  %v3670_v18 = vmul.f32 %v11968_v35, %v3634_v56  ;;  %v3635_v51 = vsel %vm3603_vm8, %v12374_v37, 0.0  ;;  %v15265_v46 = vld [vmem:[#allocation53_spill] sm:$0xff]  ;;  %v15266_v56 = vld [vmem:[#allocation112_spill] sm:$0xff] }
 0x327   : > { %v3289_v12 = vsel %vm3257_vm6, %v12379_v49, 0.0  ;;  %vm4443_vm13 = vcmp.eq.s32.totalorder %v15263_v39, 1  ;;  %vm4453_vm10 = vcmp.eq.s32.totalorder %v4403_v36, 1  ;;  %v4898_v31 = vadd.f32 %v4866_v58, %v4541_v57 }
 0x328   : > { %v12384_v14 = vadd.f32 %v3681_v59, %v12246_v25  ;;  %v3325_v41 = vmul.f32 %v11770_v22, %v3289_v12  ;;  %v4510_v34 = vmul.f32 %v11582_v53, %v4474_v27  ;;  %v3279_v11 = vsel %vm3247_vm15, %v6335_v0, 0.0  ;;  %v4049_v17 = vpop.permute.xlu0 %4048  ;;  %v6336_v59 = vld [vmem:[#allocation2 + $0x97] sm:$0xff] }
 0x329   : > { %v4485_v52 = vsel %vm4453_vm10, %v12214_v26, 0.0  ;;  %vm4087_vm12 = vcmp.eq.s32.totalorder %v15264_v55, 1  ;;  %vm4799_vm11 = vcmp.eq.s32.totalorder %v15265_v46, 1  ;;  %v3671_v57 = vmul.f32 %v11968_v35, %v3635_v51  ;;  %v12401_v26 = vld [vmem:[#allocation2 + $0xe1] sm:$0xff]  ;;  %v12408_v28 = vpop.permute.xlu1 %2411 }
 0x32a   : > { %v12394_v54 = vadd.f32 %v3325_v41, %v12274_v3  ;;  %v4521_v25 = vmul.f32 %v11582_v53, %v4485_v52  ;;  %v4475_v4 = vsel %vm4443_vm13, %v12303_v2, 0.0  ;;  %vm4088_vm14 = vcmp.eq.s32.totalorder %v15266_v56, 1  ;;  %v15267_v41 = vld [vmem:[#allocation134_spill] sm:$0xff]  ;;  %v15269_v52 = vld [vmem:[#allocation29_spill] sm:$0xff] }
 0x32b   : > { %vm4097_vm7 = vcmp.eq.s32.totalorder %v4049_v17, 1  ;;  %v3315_v62 = vmul.f32 %v11770_v22, %v3279_v11  ;;  %vm2449_vm2 = vcmp.eq.s32.totalorder %v12344_v48, 1  ;;  %v3702_v63 = vadd.f32 %v3670_v18, %v12285_v60 }
 0x32c   : > { %v12405_v58 = vadd.f32 %v4521_v25, %v12299_v10  ;;  %v4129_v3 = vsel %vm4097_vm7, %v12248_v50, 0.0  ;;  %v4119_v2 = vsel %vm4087_vm12, %v12308_v32, 0.0  ;;  %v4831_v27 = vsel %vm4799_vm11, %v12112_v9, 0.0  ;;  %v4757_v18 = vpop.permute.xlu0 %4756 }
 0x32d   : > { %v4165_v47 = vmul.f32 %v11948_v1, %v4129_v3  ;;  %v12419_v48 = vadd.f32 %v11642_v45, %v4898_v31  ;;  %v4542_v10 = vadd.f32 %v4510_v34, %v4185_v15  ;;  %v4511_v50 = vmul.f32 %v11582_v53, %v4475_v4  ;;  %v3216_v36 = vpop.permute.xlu1 %3215  ;;  %v12440_v34 = vld [vmem:[#allocation2 + $0xe8] sm:$0xff] }
 0x32e   : > { %v4120_v60 = vsel %vm4088_vm14, %v6336_v59, 0.0  ;;  %v3703_v51 = vadd.f32 %v3671_v57, %v3346_v21  ;;  %v2481_v32 = vsel %vm2449_vm2, %v12401_v26, 0.0  ;;  %vm4809_vm5 = vcmp.eq.s32.totalorder %v4757_v18, 1  ;;  %v6338_v57 = vld [vmem:[#allocation2 + $0x91] sm:$0xff]  ;;  %v15273_v59 = vld [vmem:[#allocation137_spill] sm:$0xff]  ;;  %v12479_v18 = vld [vmem:[#allocation2 + $0xe9] sm:$0xff] }
 0x32f   : > { %v12426_v12 = vadd.f32 %v4165_v47, %v12315_v42  ;;  %v12428_v9 = vadd.f32 %v3315_v62, %v2990_v61  ;;  %v4155_v45 = vmul.f32 %v11948_v1, %v4119_v2  ;;  %v4867_v15 = vmul.f32 %v12199_v30, %v4831_v27  ;;  %v15268_v42 = vld [vmem:[#allocation86_spill] sm:$0xff]  ;;  %v15271_v27 = vld [vmem:[#allocation111_spill] sm:$0xff] }
 0x330   : > { %v4841_v53 = vsel %vm4809_vm5, %v12140_v8, 0.0  ;;  %v4156_v39 = vmul.f32 %v11948_v1, %v4120_v60  ;;  %vm3604_vm1 = vcmp.eq.s32.totalorder %v15267_v41, 1  ;;  %vm3258_vm0 = vcmp.eq.s32.totalorder %v3216_v36, 1  ;;  %v15270_v8 = vld [vmem:[#allocation17_spill] sm:$0xff]  ;;  %v2862_v25 = vpop.permute.xlu0 %2861  ;;  %v12455_v4 = vld [vmem:[#allocation2 + $0xef] sm:$0xff] }
 0x331   : > { %v4877_v21 = vmul.f32 %v12199_v30, %v4841_v53  ;;  %v12436_v31 = vadd.f32 %v4511_v50, %v4186_v13  ;;  %vm4800_vm9 = vcmp.eq.s32.totalorder %v15268_v42, 1  ;;  %v2517_v61 = vmul.f32 %v11657_v29, %v2481_v32  ;;  %v15274_v60 = vld [vmem:[#allocation18_spill] sm:$0xff]  ;;  %v6342_v41 = vld [vmem:[#allocation2 + $0x9f] sm:$0xff] }
 0x332   : > { %v3290_v11 = vsel %vm3258_vm0, %v12440_v34, 0.0  ;;  %vm4444_vm3 = vcmp.eq.s32.totalorder %v15269_v52, 1  ;;  %vm4445_vm8 = vcmp.eq.s32.totalorder %v15270_v8, 1  ;;  %v12449_v13 = vadd.f32 %v4155_v45, %v3702_v63  ;;  %v6339_v63 = vld [vmem:[#allocation2 + $0x98] sm:$0xff] }
 0x333   : > { %v12446_v55 = vadd.f32 %v4877_v21, %v12339_v7  ;;  %v3326_v46 = vmul.f32 %v11770_v22, %v3290_v11  ;;  %v12451_v17 = vadd.f32 %v4867_v15, %v4542_v10  ;;  %v3636_v29 = vsel %vm3604_vm1, %v6338_v57, 0.0  ;;  %v12472_v10 = vld [vmem:[%s13336_s3 + $0x3] ss:$0 sm:$0xff]  ;;  %v12488_v15 = vld [vmem:[%s13336_s3 + $0x7] ss:$0 sm:$0xff]  ;;  %v15275_v42 = vld [vmem:[#allocation140_spill] sm:$0xff] }
 0x334   : > { %vm2902_vm4 = vcmp.eq.s32.totalorder %v2862_v25, 1  ;;  %v12457_v56 = vadd.f32 %v4156_v39, %v3703_v51  ;;  %v4832_v7 = vsel %vm4800_vm9, %v12374_v37, 0.0  ;;  %v4476_v3 = vsel %vm4444_vm3, %v6335_v0, 0.0  ;;  %15272 = vst [vmem:[#allocation7_spill] sm:$0xff] %v12472_v10  ;;  %v4052_v37 = vpop.permute.xlu1 %4051  ;;  %v3570_v45 = vpop.permute.xlu0 %3569  ;;  %v5194_v25 = vld [vmem:[%s13340_s7 + $0x28] sm:$0xff] }
 0x335   : > { %v12463_v22 = vadd.f32 %v3326_v46, %v12362_v23  ;;  %v2934_v62 = vsel %vm2902_vm4, %v12455_v4, 0.0  ;;  %v4477_v2 = vsel %vm4445_vm8, %v6339_v63, 0.0  ;;  %v2549_v47 = vadd.f32 %v2517_v61, %v15271_v27  ;;  %v5193_v46 = vld [vmem:[%s13340_s7 + $0x20] sm:$0xff] }
 0x336   : > { %v2970_v50 = vmul.f32 %v12472_v10, %v2934_v62  ;;  %v3672_v23 = vmul.f32 %v11968_v35, %v3636_v29  ;;  %vm4089_vm15 = vcmp.eq.s32.totalorder %v15273_v59, 1  ;;  %vm4801_vm6 = vcmp.eq.s32.totalorder %v15274_v60, 1  ;;  %v15276_v29 = vld [vmem:[#allocation102_spill] sm:$0xff] }
 0x337   : > { %vm4098_vm13 = vcmp.eq.s32.totalorder %v4052_v37, 1  ;;  %v4868_v0 = vmul.f32 %v12199_v30, %v4832_v7  ;;  %vm2450_vm10 = vcmp.eq.s32.totalorder %v12408_v28, 1  ;;  %v4512_v53 = vmul.f32 %v12488_v15, %v4476_v3  ;;  %v6343_v3 = vld [vmem:[#allocation2 + $0x99] sm:$0xff] }
 0x338   : > { %v12482_v51 = vadd.f32 %v2970_v50, %v2549_v47  ;;  %v4130_v32 = vsel %vm4098_vm13, %v12341_v16, 0.0  ;;  %v4513_v36 = vmul.f32 %v12488_v15, %v4477_v2  ;;  %vm3614_vm12 = vcmp.eq.s32.totalorder %v3570_v45, 1  ;;  %v4760_v61 = vpop.permute.xlu1 %4759  ;;  %v4406_v7 = vpop.permute.xlu0 %4405  ;;  %v12526_v50 = vld [vmem:[%s13336_s3 + $0x2] ss:$0 sm:$0xff] }
 0x339   : > { %v4166_v39 = vmul.f32 %v11948_v1, %v4130_v32  ;;  %v4121_v21 = vsel %vm4089_vm15, %v6342_v41, 0.0  ;;  %v4833_v28 = vsel %vm4801_vm6, %v6338_v57, 0.0  ;;  %vm4802_vm11 = vcmp.eq.s32.totalorder %v15275_v42, 1  ;;  %v5195_v57 = vld [vmem:[%s13340_s7 + $0x30] sm:$0xff]  ;;  %v6345_v32 = vld [vmem:[#allocation2 + $0xa0] sm:$0xff] }
 0x33a   : > { %v3646_v16 = vsel %vm3614_vm12, %v12401_v26, 0.0  ;;  %v2482_v11 = vsel %vm2450_vm10, %v12479_v18, 0.0  ;;  %vm4810_vm14 = vcmp.eq.s32.totalorder %v4760_v61, 1  ;;  %vm4446_vm7 = vcmp.eq.s32.totalorder %v15276_v29, 1 }
 0x33b   : > { %v12497_v52 = vadd.f32 %v4166_v39, %v12384_v14  ;;  %v3682_v8 = vmul.f32 %v11968_v35, %v3646_v16  ;;  %v4842_v14 = vsel %vm4810_vm14, %v12271_v43, 0.0  ;;  %v6173_v62 = vpack.c.bf16 %v5194_v25, %v5193_v46  ;;  %v5196_v35 = vld [vmem:[%s13340_s7 + $0x38] sm:$0xff]  ;;  %v15278_v43 = vld [vmem:[#allocation33_spill] sm:$0xff] }
 0x33c   : > { %v4834_v63 = vsel %vm4802_vm11, %v6343_v3, 0.0  ;;  %v4878_v27 = vmul.f32 %v12199_v30, %v4842_v14  ;;  %vm4454_vm2 = vcmp.eq.s32.totalorder %v4406_v7, 1  ;;  %vm6397_vm5 = vmmov 0   ;;  %v2865_v42 = vpop.permute.xlu1 %2864 }
 0x33d   : > { %v12517_v2 = vadd.f32 %v3682_v8, %v12394_v54  ;;  %v15277_v47 = vmov 0.0   ;;  %vm4803_vm1 = vcmp.eq.s32.totalorder %v15278_v43, 1  ;;  %v2518_v37 = vmul.f32 %v12526_v50, %v2482_v11  ;;  %6174 = vmatpush3.bf16.msra.mxu0 %v6173_v62  ;;  %v12541_v11 = vld [vmem:[#allocation2 + $0xf7] sm:$0xff]  ;;  %v6346_v8 = vld [vmem:[#allocation2 + $0xa1] sm:$0xff] }
 0x33e   : > { %6088 = vmatprep.mubr.msk.f32.mxu0 %vm6397_vm5, %v15277_v47  ;;  %v4486_v59 = vsel %vm4454_vm2, %v12379_v49, 0.0  ;;  %v6176_v54 = vpack.c.bf16 %v5196_v35, %v5195_v57  ;;  %v4869_v60 = vmul.f32 %v12199_v30, %v4833_v28  ;;  %v4478_v45 = vsel %vm4446_vm7, %v6345_v32, 0.0  ;;  %6175 = vmatprep.subr.bf16.mxu0 %v6396_v19  ;;  %v12550_v57 = vpop.permute.xlu0 %2414 }
 0x33f   : > { %v12534_v39 = vadd.f32 %v4878_v27, %v12405_v58  ;;  %v4522_v41 = vmul.f32 %v12488_v15, %v4486_v59  ;;  %v3704_v16 = vadd.f32 %v3672_v23, %v12428_v9  ;;  %v4544_v49 = vadd.f32 %v4512_v53, %v12449_v13  ;;  %v15279_v13 = vld [vmem:[#allocation114_spill] sm:$0xff]  ;;  %v15285_v59 = vld [vmem:[#allocation59_spill] sm:$0xff] }
 0x340   : > { %v4157_v61 = vmul.f32 %v11948_v1, %v4121_v21  ;;  %vm2903_vm0 = vcmp.eq.s32.totalorder %v2865_v42, 1  ;;  %v4870_v28 = vmul.f32 %v12199_v30, %v4834_v63  ;;  %v4835_v58 = vsel %vm4803_vm1, %v6346_v8, 0.0  ;;  %v12559_v7 = vpop.permute.xlu1 %3572  ;;  %v15284_v63 = vld [vmem:[#allocation100_spill] sm:$0xff] }
 0x341   : > { %v12547_v46 = vadd.f32 %v4522_v41, %v12426_v12  ;;  %v2935_v25 = vsel %vm2903_vm0, %v12541_v11, 0.0  ;;  %v4900_v9 = vadd.f32 %v4868_v0, %v12436_v31  ;;  %v4514_v1 = vmul.f32 %v12488_v15, %v4478_v45  ;;  %6177 = vmatpush3.bf16.msra.mxu0 %v6176_v54  ;;  %v12565_v31 = vld [vmem:[%s13337_s4] ss:$0 sm:$0xff]  ;;  %v15287_v41 = vld [vmem:[#allocation20_spill] sm:$0xff] }
 0x342   : > { %v2550_v23 = vadd.f32 %v2518_v37, %v15279_v13  ;;  %v2971_v53 = vmul.f32 %v12472_v10, %v2935_v25  ;;  %v4998_v21 = vmax.f32 %v12056_v6, 0.0  ;;  %v4968_v29 = vadd.f32 3.0, %v12354_v5  ;;  %6178 = vmatprep.subr.bf16.mxu0 %v6396_v19  ;;  %v12580_v37 = vpop.permute.xlu0 %3218  ;;  %v15291_v25 = vld [vmem:[#allocation99_spill] sm:$0xff] }
 0x343   : > { %v4545_v12 = vadd.f32 %v4513_v36, %v12457_v56  ;;  %v4901_v14 = vadd.f32 %v4869_v60, %v4544_v49  ;;  %v12569_v0 = vadd.f32 %v12565_v31, %v12451_v17  ;;  %v4189_v62 = vadd.f32 %v4157_v61, %v3704_v16  ;;  %v15281_v56 = vld [vmem:[#allocation8_spill] sm:$0xff]  ;;  %v15289_v16 = vld [vmem:[#allocation142_spill] sm:$0xff] }
 0x344   : > { %v4871_v6 = vmul.f32 %v12199_v30, %v4835_v58  ;;  %v12572_v35 = vadd.f32 %v2971_v53, %v2550_v23  ;;  %v15282_v36 = vld [vmem:[#allocation40_spill] sm:$0xff]  ;;  %v5059_v19 = vmul.f32 0.16666667, %v15284_v63  ;;  %v4969_v27 = vadd.f32 3.0, %v12419_v48  ;;  %v15290_v58 = vld [vmem:[#allocation39_spill] sm:$0xff] }
 0x345   : > { %v12576_v3 = vmul.f32 %v15282_v36, %v15281_v56  ;;  %v4902_v43 = vadd.f32 %v4870_v28, %v4545_v12  ;;  %v15286_v54 = vmax.f32 %v15285_v59, 0.0  ;;  %v4999_v60 = vmax.f32 %v12204_v44, 0.0  ;;  %v12594_v28 = vpop.permute.xlu1 %4408 }
 0x346   : > { %15280 = vst [vmem:[#allocation23_spill] sm:$0xff] %v12572_v35  ;;  %v12586_v32 = vadd.f32 %v12565_v31, %v4900_v9  ;;  %v4546_v45 = vadd.f32 %v4514_v1, %v4189_v62  ;;  %vm15288_vm9 = vcmask 523264   ;;  %v5060_v49 = vmul.f32 0.16666667, %v15289_v16  ;;  %v15293_v1 = vld [vmem:[#allocation28_spill] sm:$0xff]  ;;  %v15296_v62 = vld [vmem:[#allocation141_spill] sm:$0xff]  ;;  %v12612_v59 = vpop.permute.xlu0 %4054 }
 0x347   : > { %15283 = vst [vmem:[#allocation150_spill] sm:$0xff] %v12576_v3  ;;  %v5029_v17 = vmin.f32 %v15286_v54, 6.0  ;;  %v5120_v42 = vsel %vm15288_vm9, %v15287_v41, 0.0  ;;  %v5000_v61 = vmax.f32 %v4968_v29, 0.0  ;;  %v12592_v8 = vadd.f32 %v12565_v31, %v4901_v14  ;;  %vm15294_vm3 = vmmov %vm15288_vm9  ;;  %v15298_v54 = vld [vmem:[#allocation88_spill] sm:$0xff] }
 0x348   : > { %v12598_v13 = vmul.f32 %v15291_v25, %v15290_v58  ;;  %v5030_v44 = vmin.f32 %v4998_v21, 6.0  ;;  %v4970_v9 = vadd.f32 3.0, %v12569_v0  ;;  %v4903_v23 = vadd.f32 %v4871_v6, %v4546_v45  ;;  %vm15295_vm8 = vmmov %vm15294_vm3 }
 0x349   : > { %v5119_v53 = vsel %vm15294_vm3, %v15293_v1, 0.0  ;;  %v5122_v12 = vsel %vm15295_vm8, %v12576_v3, 0.0  ;;  %v5001_v29 = vmax.f32 %v4969_v27, 0.0  ;;  %v12606_v14 = vadd.f32 %v12565_v31, %v4902_v43  ;;  %vm15300_vm4 = vmmov %vm15294_vm3 }
 0x34a   : > { %15292 = vst [vmem:[#allocation144_spill] sm:$0xff] %v12598_v13  ;;  %v12609_v56 = vmul.f32 %v5059_v19, %v15296_v62  ;;  %v5061_v36 = vmul.f32 0.16666667, %v5029_v17  ;;  %v5031_v63 = vmin.f32 %v4999_v60, 6.0  ;;  %v4971_v21 = vadd.f32 3.0, %v12586_v32  ;;  %v12623_v17 = vpop.permute.xlu1 %2417  ;;  %vm15302_vm15 = vmmov %vm15294_vm3 }
 0x34b   : > { %v5121_v6 = vadd.f32 %v5120_v42, %v5119_v53  ;;  %v12615_v45 = vmul.f32 %v5060_v49, %v15298_v54  ;;  %v5032_v16 = vmin.f32 %v5000_v61, 6.0  ;;  %v4972_v58 = vadd.f32 3.0, %v12592_v8  ;;  %v15301_v53 = vld [vmem:[#allocation26_spill] sm:$0xff]  ;;  %v15303_v54 = vld [vmem:[#allocation24_spill] sm:$0xff]  ;;  %vm15305_vm6 = vmmov %vm15294_vm3 }
 0x34c   : > { %15297 = vst [vmem:[#allocation11_spill] sm:$0xff] %v12609_v56  ;;  %v5124_v27 = vsel %vm15300_vm4, %v12598_v13, 0.0  ;;  %v5062_v43 = vmul.f32 0.16666667, %v5030_v44  ;;  %v5002_v25 = vmax.f32 %v4970_v9, 0.0  ;;  %v12621_v19 = vadd.f32 %v12565_v31, %v4903_v23  ;;  %v12635_v23 = vpop.permute.xlu0 %4762  ;;  %vm15308_vm13 = vmmov %vm15294_vm3 }
 0x34d   : > { %15299 = vst [vmem:[#allocation145_spill] sm:$0xff] %v12615_v45  ;;  %v5123_v60 = vadd.f32 %v5122_v12, %v5121_v6  ;;  %v5033_v62 = vmin.f32 %v5001_v29, 6.0  ;;  %v4973_v42 = vadd.f32 3.0, %v12606_v14  ;;  %v12628_v49 = vadd.f32 %v12565_v31, %v15301_v53  ;;  %vm15312_vm12 = vmmov %vm15294_vm3 }
 0x34e   : > { %v5126_v61 = vsel %vm15302_vm15, %v12609_v56, 0.0  ;;  %v12633_v13 = vmul.f32 %v5061_v36, %v15303_v54  ;;  %v5063_v44 = vmul.f32 0.16666667, %v5031_v63  ;;  %v5003_v9 = vmax.f32 %v4971_v21, 0.0  ;;  %v15307_v56 = vld [vmem:[#allocation115_spill] sm:$0xff]  ;;  %v12647_v63 = vpop.permute.xlu1 %3221  ;;  %vm15314_vm11 = vmmov %vm15294_vm3 }
 0x34f   : > { %v5125_v3 = vadd.f32 %v5124_v27, %v5123_v60  ;;  %v5128_v12 = vsel %vm15305_vm6, %v12615_v45, 0.0  ;;  %v5064_v29 = vmul.f32 0.16666667, %v5032_v16  ;;  %v5004_v6 = vmax.f32 %v4972_v58, 0.0  ;;  %vm15316_vm7 = vmmov %vm15294_vm3 }
 0x350   : > { %15304 = vst [vmem:[#allocation35_spill] sm:$0xff] %v12633_v13  ;;  %v12640_v41 = vmul.f32 %v5062_v43, %v12017_v38  ;;  %v5034_v53 = vmin.f32 %v5002_v25, 6.0  ;;  %v4974_v1 = vadd.f32 3.0, %v12621_v19  ;;  %v12645_v36 = vadd.f32 %v12565_v31, %v15307_v56  ;;  %vm15318_vm2 = vmmov %vm15294_vm3 }
 0x351   : > { %v5127_v21 = vadd.f32 %v5126_v61, %v5125_v3  ;;  %v5065_v54 = vmul.f32 0.16666667, %v5033_v62  ;;  %v5005_v27 = vmax.f32 %v4973_v42, 0.0  ;;  %v4975_v60 = vadd.f32 3.0, %v12628_v49  ;;  %v12662_v62 = vpop.permute.xlu0 %2867  ;;  %v15311_v42 = vld [vmem:[#allocation91_spill] sm:$0xff]  ;;  %vm15323_vm9 = vmmov %vm15318_vm2 }
 0x352   : > { %15306 = vst [vmem:[#allocation92_spill] sm:$0xff] %v12640_v41  ;;  %v5130_v16 = vsel %vm15308_vm13, %v12633_v13, 0.0  ;;  %v12653_v38 = vmul.f32 %v5063_v44, %v12125_v24  ;;  %v5035_v58 = vmin.f32 %v5003_v9, 6.0  ;;  %v12657_v43 = vadd.f32 %v12565_v31, %v12013_v20  ;;  %vm15326_vm8 = vmmov %vm15318_vm2 }
 0x353   : > { %v5129_v56 = vadd.f32 %v5128_v12, %v5127_v21  ;;  %v12660_v25 = vmul.f32 %v5064_v29, %v12354_v5  ;;  %v5036_v3 = vmin.f32 %v5004_v6, 6.0  ;;  %vm1577_vm10 = vcmp.eq.s32.totalorder %v15311_v42, 1  ;;  %vm15327_vm4 = vmmov %vm15318_vm2 }
 0x354   : > { %15309 = vst [vmem:[#allocation117_spill] sm:$0xff] %v12653_v38  ;;  %v5132_v61 = vsel %vm15312_vm12, %v12640_v41, 0.0  ;;  %v5066_v13 = vmul.f32 0.16666667, %v5034_v53  ;;  %v5006_v24 = vmax.f32 %v4974_v1, 0.0  ;;  %v4976_v44 = vadd.f32 3.0, %v12645_v36  ;;  %v12678_v53 = vpop.permute.xlu1 %4057  ;;  %vm15330_vm15 = vmmov %vm15318_vm2 }
 0x355   : > { %15310 = vst [vmem:[#allocation146_spill] sm:$0xff] %v12660_v25  ;;  %v5131_v9 = vadd.f32 %v5130_v16, %v5129_v56  ;;  %v12669_v20 = vmul.f32 %v5065_v54, %v12419_v48  ;;  %v5037_v12 = vmin.f32 %v5005_v27, 6.0  ;;  %v5007_v21 = vmax.f32 %v4975_v60, 0.0  ;;  %v15315_v1 = vld [vmem:[#allocation94_spill] sm:$0xff]  ;;  %vm15335_vm12 = vmmov %vm15318_vm2 }
 0x356   : > { %v5134_v5 = vsel %vm15314_vm11, %v12653_v38, 0.0  ;;  %v5067_v29 = vmul.f32 0.16666667, %v5035_v58  ;;  %v4977_v6 = vadd.f32 3.0, %v12657_v43  ;;  %v12676_v45 = vadd.f32 %v12565_v31, %v12224_v33  ;;  %v12690_v33 = vpop.permute.xlu0 %3575 }
 0x357   : > { %15313 = vst [vmem:[#allocation81_spill] sm:$0xff] %v12669_v20  ;;  %vm1578_vm14 = vcmp.eq.s32.totalorder %v15315_v1, 1  ;;  %v5133_v16 = vadd.f32 %v5132_v61, %v5131_v9  ;;  %v5136_v48 = vsel %vm15316_vm7, %v12660_v25, 0.0  ;;  %v5068_v54 = vmul.f32 0.16666667, %v5036_v3 }
 0x358   : > { %v12684_v27 = vmul.f32 %v5066_v13, %v12569_v0  ;;  %v5038_v60 = vmin.f32 %v5006_v24, 6.0  ;;  %v5008_v58 = vmax.f32 %v4976_v44, 0.0  ;;  %v12688_v56 = vadd.f32 %v12565_v31, %v12329_v40  ;;  %v12702_v40 = vpop.permute.xlu1 %4765  ;;  %v15320_v24 = vld [vmem:[#allocation116_spill] sm:$0xff]  ;;  %v15321_v44 = vld [vmem:[#allocation119_spill] sm:$0xff] }
 0x359   : > { %v5135_v38 = vadd.f32 %v5134_v5, %v5133_v16  ;;  %v5138_v41 = vsel %vm15318_vm2, %v12669_v20, 0.0  ;;  %v5069_v61 = vmul.f32 0.16666667, %v5037_v12  ;;  %v5039_v9 = vmin.f32 %v5007_v21, 6.0  ;;  %v12712_v16 = vld [vmem:[#allocation2 + $0xf0] sm:$0xff] }
 0x35a   : > { %15317 = vst [vmem:[#allocation147_spill] sm:$0xff] %v12684_v27  ;;  %v12695_v25 = vmul.f32 %v5067_v29, %v12586_v32  ;;  %v5009_v3 = vmax.f32 %v4977_v6, 0.0  ;;  %v4978_v0 = vadd.f32 3.0, %v12676_v45  ;;  %v12700_v13 = vadd.f32 %v12565_v31, %v12446_v55  ;;  %v12714_v55 = vpop.permute.xlu0 %4411 }
 0x35b   : > { %vm1998_vm1 = vcmp.eq.s32.totalorder %v15320_v24, 1  ;;  %vm1999_vm0 = vcmp.eq.s32.totalorder %v15321_v44, 1  ;;  %v5137_v5 = vadd.f32 %v5136_v48, %v5135_v38  ;;  %v12707_v12 = vmul.f32 %v5068_v54, %v12592_v8  ;;  %v15325_v38 = vld [vmem:[#allocation93_spill] sm:$0xff] }
 0x35c   : > { %15319 = vst [vmem:[#allocation128_spill] sm:$0xff] %v12695_v25  ;;  %v5140_v32 = vsel %vm15323_vm9, %v12684_v27, 0.0  ;;  %v5070_v21 = vmul.f32 0.16666667, %v5038_v60  ;;  %v5040_v29 = vmin.f32 %v5008_v58, 6.0  ;;  %v4979_v6 = vadd.f32 3.0, %v12688_v56 }
 0x35d   : > { %15322 = vst [vmem:[#allocation153_spill] sm:$0xff] %v12707_v12  ;;  %v5139_v20 = vadd.f32 %v5138_v41, %v5137_v5  ;;  %v12717_v47 = vmul.f32 %v5069_v61, %v12606_v14  ;;  %v5071_v10 = vmul.f32 0.16666667, %v5039_v9  ;;  %v1609_v8 = vsel %vm1577_vm10, %v12455_v4, 0.0  ;;  %v12726_v27 = vld [vmem:[#allocation2 + $0xf8] sm:$0xff]  ;;  %v12736_v9 = vpop.permute.xlu1 %2870  ;;  %vm15334_vm10 = vmmov %vm15318_vm2 }
 0x35e   : > { %vm1579_vm3 = vcmp.eq.s32.totalorder %v15325_v38, 1  ;;  %v5142_v48 = vsel %vm15326_vm8, %v12695_v25, 0.0  ;;  %v5041_v54 = vmin.f32 %v5009_v3, 6.0  ;;  %v5010_v60 = vmax.f32 %v4978_v0, 0.0  ;;  %15328 = vst [vmem:[#allocation31_spill] sm:$0xff] %v12736_v9  ;;  %v12753_v25 = vpop.permute.xlu0 %2420 }
 0x35f   : > { %15324 = vst [vmem:[#allocation72_spill] sm:$0xff] %v12717_v47  ;;  %v4980_v58 = vadd.f32 3.0, %v12700_v13  ;;  %v5141_v41 = vadd.f32 %v5140_v32, %v5139_v20  ;;  %v5144_v14 = vsel %vm15327_vm4, %v12707_v12, 0.0  ;;  %v2030_v42 = vsel %vm1998_vm1, %v12712_v16, 0.0  ;;  %15331 = vst [vmem:[#allocation54_spill] sm:$0xff] %v12753_v25 }
 0x360   : > { %v1610_v61 = vsel %vm1578_vm14, %v12541_v11, 0.0  ;;  %v12739_v3 = vmul.f32 %v5070_v21, %v12621_v19  ;;  %v5072_v0 = vmul.f32 0.16666667, %v5040_v29  ;;  %v5011_v5 = vmax.f32 %v4979_v6, 0.0  ;;  %vm15336_vm14 = vmmov %vm15318_vm2 }
 0x361   : > { %v12743_v20 = vadd.f32 %v12565_v31, %v12534_v39  ;;  %v5143_v32 = vadd.f32 %v5142_v48, %v5141_v41  ;;  %v5146_v24 = vsel %vm15330_vm15, %v12717_v47, 0.0  ;;  %v12748_v12 = vmul.f32 %v5071_v10, %v12628_v49  ;;  %v15332_v39 = vld [vmem:[#allocation118_spill] sm:$0xff]  ;;  %v6348_v48 = vld [vmem:[%s13336_s3] ss:$0 sm:$0xff]  ;;  %v6349_v49 = vld [vmem:[%s13336_s3 + $0x1] ss:$0 sm:$0xff]  ;;  %v12763_v41 = vpop.permute.xlu1 %3578 }
 0x362   : > { %15329 = vst [vmem:[#allocation148_spill] sm:$0xff] %v12739_v3  ;;  %v2031_v1 = vsel %vm1999_vm0, %v12726_v27, 0.0  ;;  %v5073_v19 = vmul.f32 0.16666667, %v5041_v54  ;;  %v5042_v21 = vmin.f32 %v5010_v60, 6.0  ;;  %v5012_v29 = vmax.f32 %v4980_v58, 0.0  ;;  %v12776_v9 = vpop.permute.xlu0 %3224 }
 0x363   : > { %vm4811_vm6 = vcmp.eq.s32.totalorder %v12635_v23, 1  ;;  %vm2000_vm13 = vcmp.eq.s32.totalorder %v15332_v39, 1  ;;  %v5145_v6 = vadd.f32 %v5144_v14, %v5143_v32  ;;  %v1645_v10 = vmul.f32 %v6348_v48, %v1609_v8  ;;  %15333 = vst [vmem:[#allocation14_spill] sm:$0xff] %v12763_v41  ;;  %v12771_v32 = vld [vmem:[#allocation2 + $0xff] sm:$0xff] }
 0x364   : > { %v2066_v44 = vmul.f32 %v6349_v49, %v2030_v42  ;;  %v5148_v54 = vsel %vm15334_vm10, %v12739_v3, 0.0  ;;  %v12768_v60 = vmul.f32 %v5072_v0, %v12645_v36  ;;  %v5043_v58 = vmin.f32 %v5011_v5, 6.0  ;;  %v12783_v41 = vld [vmem:[#allocation2 + $0x100] sm:$0xff] }
 0x365   : > { %v4981_v14 = vadd.f32 3.0, %v12743_v20  ;;  %v5147_v47 = vadd.f32 %v5146_v24, %v5145_v6  ;;  %v1646_v8 = vmul.f32 %v6348_v48, %v1610_v61  ;;  %v2067_v25 = vmul.f32 %v6349_v49, %v2031_v1  ;;  %v12791_v23 = vpop.permute.xlu1 %4414 }
 0x366   : > { %v4843_v42 = vsel %vm4811_vm6, %v12401_v26, 0.0  ;;  %v5150_v3 = vsel %vm15335_vm12, %v12748_v12, 0.0  ;;  %v12781_v36 = vmul.f32 %v5073_v19, %v12657_v43  ;;  %v5074_v0 = vmul.f32 0.16666667, %v5042_v21  ;;  %vm15338_vm6 = vmmov %vm15318_vm2 }
 0x367   : > { %v5044_v5 = vmin.f32 %v5012_v29, 6.0  ;;  %v5149_v35 = vadd.f32 %v5148_v54, %v5147_v47  ;;  %v12785_v24 = vadd.f32 %v2066_v44, %v1645_v10  ;;  %vm4455_vm11 = vcmp.eq.s32.totalorder %v12594_v28, 1  ;;  %v12808_v44 = vpop.permute.xlu0 %4060 }
 0x368   : > { %v1611_v26 = vsel %vm1579_vm3, %v12771_v32, 0.0  ;;  %v5152_v61 = vsel %vm15336_vm14, %v12768_v60, 0.0  ;;  %v5075_v43 = vmul.f32 0.16666667, %v5043_v58  ;;  %v5013_v1 = vmax.f32 %v4981_v14, 0.0  ;;  %vm15337_vm3 = vmmov %vm15318_vm2 }
 0x369   : > { %v4879_v19 = vmul.f32 %v12199_v30, %v4843_v42  ;;  %v5151_v21 = vadd.f32 %v5150_v3, %v5149_v35  ;;  %v12796_v29 = vadd.f32 %v2067_v25, %v1646_v8  ;;  %vm4812_vm7 = vcmp.eq.s32.totalorder %v12702_v40, 1  ;;  %v12810_v25 = vld [vmem:[#allocation2 + $0xf1] sm:$0xff]  ;;  %v12821_v8 = vpop.permute.xlu1 %2873 }
 0x36a   : > { %v2032_v47 = vsel %vm2000_vm13, %v12783_v41, 0.0  ;;  %v5154_v28 = vsel %vm15318_vm2, %v12781_v36, 0.0  ;;  %v12805_v38 = vmul.f32 %v5074_v0, %v12676_v45  ;;  %v5076_v6 = vmul.f32 0.16666667, %v5044_v5  ;;  %vm15339_vm13 = vmmov %vm15318_vm2 }
 0x36b   : > { %v4487_v10 = vsel %vm4455_vm11, %v12440_v34, 0.0  ;;  %v5153_v35 = vadd.f32 %v5152_v61, %v5151_v21  ;;  %vm2451_vm1 = vcmp.eq.s32.totalorder %v12550_v57, 1  ;;  %vm3615_vm0 = vcmp.eq.s32.totalorder %v12559_v7, 1  ;;  %v4769_v42 = vpop.permute.xlu0 %4768 }
 0x36c   : > { %v1647_v40 = vmul.f32 %v6348_v48, %v1611_v26  ;;  %v12815_v3 = vmul.f32 %v5075_v43, %v12688_v56  ;;  %v5045_v39 = vmin.f32 %v5013_v1, 6.0  ;;  %v4911_v45 = vadd.f32 %v4879_v19, %v12547_v46  ;;  %v12831_v48 = vld [vmem:[#allocation2 + $0xf9] sm:$0xff]  ;;  %v12853_v19 = vld [vmem:[%s13336_s3 + $0x5] ss:$0 sm:$0xff] }
 0x36d   : > { %v4844_v54 = vsel %vm4812_vm7, %v12479_v18, 0.0  ;;  %v5155_v58 = vadd.f32 %v5154_v28, %v5153_v35  ;;  %vm3259_vm9 = vcmp.eq.s32.totalorder %v12580_v37, 1  ;;  %v4523_v34 = vmul.f32 %v12488_v15, %v4487_v10  ;;  %v12870_v10 = vld [vmem:[%s13336_s3 + $0x4] ss:$0 sm:$0xff] }
 0x36e   : > { %v2068_v14 = vmul.f32 %v6349_v49, %v2032_v47  ;;  %v5156_v57 = vsel %vm15337_vm3, %v12805_v38, 0.0  ;;  %v12826_v7 = vmul.f32 %v5076_v6, %v12700_v13  ;;  %v2483_v56 = vsel %vm2451_vm1, %v12810_v25, 0.0 }
 0x36f   : > { %v3647_v46 = vsel %vm3615_vm0, %v12479_v18, 0.0  ;;  %vm4099_vm8 = vcmp.eq.s32.totalorder %v12612_v59, 1  ;;  %vm2452_vm4 = vcmp.eq.s32.totalorder %v12623_v17, 1  ;;  %vm3260_vm15 = vcmp.eq.s32.totalorder %v12647_v63, 1  ;;  %v12873_v35 = vpop.permute.xlu0 %3227 }
 0x370   : > { %v4880_v49 = vmul.f32 %v12199_v30, %v4844_v54  ;;  %v5158_v0 = vsel %vm15338_vm6, %v12815_v3, 0.0  ;;  %v5077_v13 = vmul.f32 0.16666667, %v5045_v39  ;;  %v3291_v5 = vsel %vm3259_vm9, %v12712_v16, 0.0  ;;  %v12848_v30 = vpop.permute.xlu1 %3581 }
 0x371   : > { %v12842_v18 = vadd.f32 %v12565_v31, %v4911_v45  ;;  %v5157_v26 = vadd.f32 %v5156_v57, %v5155_v58  ;;  %v2519_v61 = vmul.f32 %v12526_v50, %v2483_v56  ;;  %v4555_v43 = vadd.f32 %v4523_v34, %v12497_v52 }
 0x372   : > { %v12846_v1 = vadd.f32 %v2068_v14, %v1647_v40  ;;  %v3683_v37 = vmul.f32 %v12853_v19, %v3647_v46  ;;  %v4131_v21 = vsel %vm4099_vm8, %v12455_v4, 0.0  ;;  %v2484_v47 = vsel %vm2452_vm4, %v12831_v48, 0.0  ;;  %v12884_v40 = vld [vmem:[%s13336_s3 + $0x6] ss:$0 sm:$0xff] }
 0x373   : > { %v3292_v52 = vsel %vm3260_vm15, %v12726_v27, 0.0  ;;  %v5159_v28 = vadd.f32 %v5158_v0, %v5157_v26  ;;  %v5160_v6 = vsel %vm15339_vm13, %v12826_v7, 0.0  ;;  %v3327_v59 = vmul.f32 %v12870_v10, %v3291_v5 }
 0x374   : > { %v4912_v4 = vadd.f32 %v4880_v49, %v4555_v43  ;;  %v12876_v17 = vmul.f32 %v5077_v13, %v12743_v20  ;;  %v4982_v63 = vadd.f32 3.0, %v12842_v18  ;;  %vm2904_vm10 = vcmp.eq.s32.totalorder %v12662_v62, 1  ;;  %v4418_v20 = vpop.permute.xlu1 %4417  ;;  %v15341_v13 = vld [vmem:[#allocation7_spill] sm:$0xff] }
 0x375   : > { %vm4456_vm12 = vcmp.eq.s32.totalorder %v12714_v55, 1  ;;  %v4167_v39 = vmul.f32 %v12884_v40, %v4131_v21  ;;  %v2520_v45 = vmul.f32 %v12526_v50, %v2484_v47  ;;  %v3328_v54 = vmul.f32 %v12870_v10, %v3292_v52  ;;  %v15342_v43 = vld [vmem:[#allocation31_spill] sm:$0xff]  ;;  %v2132_v21 = vld [vmem:[#allocation2 + $0x101] sm:$0xff] }
 0x376   : > { %vm4100_vm11 = vcmp.eq.s32.totalorder %v12678_v53, 1  ;;  %v12890_v58 = vadd.f32 %v5160_v6, %v5159_v28  ;;  %v2551_v62 = vadd.f32 %v2519_v61, %v12785_v24  ;;  %v3715_v55 = vadd.f32 %v3683_v37, %v12463_v22  ;;  %v12906_v22 = vpop.permute.xlu0 %4063  ;;  %v2584_v61 = vld [vmem:[#allocation2 + $0x107] sm:$0xff] }
 0x377   : > { %vm4813_vm14 = vcmp.eq.s32.totalorder %v4769_v42, 1  ;;  %v2936_v34 = vsel %vm2904_vm10, %v12771_v32, 0.0  ;;  %vm3616_vm7 = vcmp.eq.s32.totalorder %v12690_v33, 1  ;;  %v12897_v14 = vadd.f32 %v12565_v31, %v4912_v4  ;;  %v15340_v42 = vld [vmem:[#allocation23_spill] sm:$0xff]  ;;  %v15343_v47 = vld [vmem:[#allocation54_spill] sm:$0xff] }
 0x378   : > { %v4488_v57 = vsel %vm4456_vm12, %v12712_v16, 0.0  ;;  %v12902_v53 = vsel %vm15318_vm2, %v12876_v17, 0.0  ;;  %v3359_v56 = vadd.f32 %v3327_v59, %v12482_v51  ;;  %v5014_v46 = vmax.f32 %v4982_v63, 0.0 }
 0x379   : > { %v4132_v24 = vsel %vm4100_vm11, %v12541_v11, 0.0  ;;  %v4199_v49 = vadd.f32 %v4167_v39, %v12517_v2  ;;  %v12910_v33 = vadd.f32 %v2520_v45, %v12796_v29  ;;  %v12913_v0 = vadd.f32 %v3328_v54, %v15340_v42  ;;  %v12920_v11 = vpop.permute.xlu1 %3230 }
 0x37a   : > { %v4845_v16 = vsel %vm4813_vm14, %v12810_v25, 0.0  ;;  %v2972_v5 = vmul.f32 %v15341_v13, %v2936_v34  ;;  %v3648_v26 = vsel %vm3616_vm7, %v12810_v25, 0.0  ;;  %v4524_v51 = vmul.f32 %v12488_v15, %v4488_v57  ;;  %v15344_v25 = vld [vmem:[#allocation14_spill] sm:$0xff]  ;;  %v4772_v28 = vpop.permute.xlu0 %4771 }
 0x37b   : > { %vm4457_vm1 = vcmp.eq.s32.totalorder %v12791_v23, 1  ;;  %v4168_v2 = vmul.f32 %v12884_v40, %v4132_v24  ;;  %v4983_v29 = vadd.f32 3.0, %v12897_v14  ;;  %vm2905_vm0 = vcmp.eq.s32.totalorder %v15342_v43, 1  ;;  %v12931_v23 = vld [vmem:[%s13336_s3 + $0x8] ss:$0 sm:$0xff] }
 0x37c   : > { %vm4101_vm9 = vcmp.eq.s32.totalorder %v12808_v44, 1  ;;  %v5046_v37 = vmin.f32 %v5014_v46, 6.0  ;;  %vm2453_vm3 = vcmp.eq.s32.totalorder %v15343_v47, 1  ;;  %vm3617_vm8 = vcmp.eq.s32.totalorder %v15344_v25, 1  ;;  %v3037_v25 = vld [vmem:[#allocation2 + $0x108] sm:$0xff] }
 0x37d   : > { %v4881_v52 = vmul.f32 %v12931_v23, %v4845_v16  ;;  %v3684_v6 = vmul.f32 %v12853_v19, %v3648_v26  ;;  %v4489_v59 = vsel %vm4457_vm1, %v12726_v27, 0.0  ;;  %vm4458_vm4 = vcmp.eq.s32.totalorder %v4418_v20, 1  ;;  %v12939_v46 = vpop.permute.xlu1 %4066 }
 0x37e   : > { %vm4814_vm15 = vcmp.eq.s32.totalorder %v4772_v28, 1  ;;  %v3004_v44 = vadd.f32 %v2972_v5, %v2551_v62  ;;  %v4556_v4 = vadd.f32 %v4524_v51, %v4199_v49  ;;  %v2937_v63 = vsel %vm2905_vm0, %v2584_v61, 0.0  ;;  %v12945_v16 = vpop.permute.xlu0 %3584 }
 0x37f   : > { %v4133_v39 = vsel %vm4101_vm9, %v12771_v32, 0.0  ;;  %v5015_v45 = vmax.f32 %v4983_v29, 0.0  ;;  %v2485_v54 = vsel %vm2453_vm3, %v2132_v21, 0.0  ;;  %v3649_v34 = vsel %vm3617_vm8, %v12831_v48, 0.0 }
 0x380   : > { %v4846_v57 = vsel %vm4814_vm15, %v12831_v48, 0.0  ;;  %vm3261_vm6 = vcmp.eq.s32.totalorder %v12776_v9, 1  ;;  %v4525_v24 = vmul.f32 %v12488_v15, %v4489_v59  ;;  %v4913_v27 = vadd.f32 %v4881_v52, %v4556_v4 }
 0x381   : > { %v4490_v20 = vsel %vm4458_vm4, %v12783_v41, 0.0  ;;  %v5078_v62 = vmul.f32 0.16666667, %v5046_v37  ;;  %v4200_v49 = vadd.f32 %v4168_v2, %v3715_v55  ;;  %v3716_v42 = vadd.f32 %v3684_v6, %v3359_v56  ;;  %v4775_v55 = vpop.permute.xlu1 %4774  ;;  %v2585_v37 = vld [vmem:[#allocation2 + $0x10f] sm:$0xff] }
 0x382   : > { %v4169_v32 = vmul.f32 %v12884_v40, %v4133_v39  ;;  %v2973_v5 = vmul.f32 %v15341_v13, %v2937_v63  ;;  %v2521_v48 = vmul.f32 %v12526_v50, %v2485_v54  ;;  %v3685_v26 = vmul.f32 %v12853_v19, %v3649_v34  ;;  %v3038_v54 = vld [vmem:[#allocation2 + $0x110] sm:$0xff] }
 0x383   : > { %v4882_v9 = vmul.f32 %v12931_v23, %v4846_v57  ;;  %v5047_v51 = vmin.f32 %v5015_v45, 6.0  ;;  %v3293_v29 = vsel %vm3261_vm6, %v12783_v41, 0.0  ;;  %v4526_v43 = vmul.f32 %v12488_v15, %v4490_v20  ;;  %v4421_v41 = vpop.permute.xlu0 %4420 }
 0x384   : > { %vm4102_vm13 = vcmp.eq.s32.totalorder %v12906_v22, 1  ;;  %v4557_v56 = vadd.f32 %v4525_v24, %v4200_v49  ;;  %vm2906_vm10 = vcmp.eq.s32.totalorder %v12821_v8, 1  ;;  %v12956_v2 = vadd.f32 %v12565_v31, %v4913_v27 }
 0x385   : > { %vm4815_vm12 = vcmp.eq.s32.totalorder %v4775_v55, 1  ;;  %v4201_v50 = vadd.f32 %v4169_v32, %v3716_v42  ;;  %vm3618_vm11 = vcmp.eq.s32.totalorder %v12848_v30, 1  ;;  %vm3262_vm14 = vcmp.eq.s32.totalorder %v12873_v35, 1  ;;  %v4070_v34 = vpop.permute.xlu1 %4069 }
 0x386   : > { %v4847_v47 = vsel %vm4815_vm12, %v2132_v21, 0.0  ;;  %v4134_v52 = vsel %vm4102_vm13, %v2584_v61, 0.0  ;;  %v4914_v28 = vadd.f32 %v4882_v9, %v4557_v56  ;;  %vm4459_vm7 = vcmp.eq.s32.totalorder %v4421_v41, 1 }
 0x387   : > { %v4883_v22 = vmul.f32 %v12931_v23, %v4847_v47  ;;  %v12962_v6 = vmul.f32 %v5078_v62, %v12842_v18  ;;  %v3005_v59 = vadd.f32 %v2973_v5, %v12910_v33  ;;  %v3329_v4 = vmul.f32 %v12870_v10, %v3293_v29  ;;  %v3395_v47 = vld [vmem:[#allocation2 + $0x111] sm:$0xff] }
 0x388   : > { %v4558_v63 = vadd.f32 %v4526_v43, %v4201_v50  ;;  %v2938_v39 = vsel %vm2906_vm10, %v2585_v37, 0.0  ;;  %v4984_v45 = vadd.f32 3.0, %v12956_v2  ;;  %vm3263_vm2 = vcmp.eq.s32.totalorder %v12920_v11, 1  ;;  %v3588_v11 = vpop.permute.xlu0 %3587 }
 0x389   : > { %v4491_v61 = vsel %vm4459_vm7, %v3037_v25, 0.0  ;;  %v3650_v57 = vsel %vm3618_vm11, %v2132_v21, 0.0  ;;  %v3294_v18 = vsel %vm3262_vm14, %v3037_v25, 0.0  ;;  %v4170_v33 = vmul.f32 %v12884_v40, %v4134_v52 }
 0x38a   : > { %v4915_v24 = vadd.f32 %v4883_v22, %v4558_v63  ;;  %v5079_v27 = vmul.f32 0.16666667, %v5047_v51  ;;  %v2553_v8 = vadd.f32 %v2521_v48, %v12846_v1  ;;  %v3717_v20 = vadd.f32 %v3685_v26, %v12913_v0  ;;  %v4778_v1 = vpop.permute.xlu1 %4777  ;;  %v3394_v0 = vld [vmem:[#allocation2 + $0x109] sm:$0xff]  ;;  %v3752_v63 = vld [vmem:[#allocation2 + $0x11f] sm:$0xff] }
 0x38b   : > { %v12978_v62 = vadd.f32 %v12565_v31, %v4914_v28  ;;  %v3361_v49 = vadd.f32 %v3329_v4, %v3004_v44  ;;  %v2974_v42 = vmul.f32 %v15341_v13, %v2938_v39  ;;  %v3295_v30 = vsel %vm3263_vm2, %v3038_v54, 0.0 }
 0x38c   : > { %v4527_v21 = vmul.f32 %v12488_v15, %v4491_v61  ;;  %v5016_v35 = vmax.f32 %v4984_v45, 0.0  ;;  %v3686_v32 = vmul.f32 %v12853_v19, %v3650_v57  ;;  %v3330_v5 = vmul.f32 %v12870_v10, %v3294_v18  ;;  %v4424_v51 = vpop.permute.xlu0 %4423  ;;  %v3751_v61 = vld [vmem:[#allocation2 + $0x117] sm:$0xff] }
 0x38d   : > { %vm4103_vm1 = vcmp.eq.s32.totalorder %v12939_v46, 1  ;;  %v4202_v48 = vadd.f32 %v4170_v33, %v3717_v20  ;;  %vm3619_vm0 = vcmp.eq.s32.totalorder %v12945_v16, 1  ;;  %v12987_v26 = vadd.f32 %v12565_v31, %v4915_v24  ;;  %v4236_v24 = vld [vmem:[#allocation2 + $0x118] sm:$0xff] }
 0x38e   : > { %vm4816_vm9 = vcmp.eq.s32.totalorder %v4778_v1, 1  ;;  %v3331_v13 = vmul.f32 %v12870_v10, %v3295_v30  ;;  %v4985_v44 = vadd.f32 3.0, %v12978_v62  ;;  %vm3620_vm3 = vcmp.eq.s32.totalorder %v3588_v11, 1  ;;  %v4427_v41 = vpop.permute.xlu1 %4426 }
 0x38f   : > { %v4848_v9 = vsel %vm4816_vm9, %v3394_v0, 0.0  ;;  %v4135_v29 = vsel %vm4103_vm1, %v2585_v37, 0.0  ;;  %v4559_v43 = vadd.f32 %v4527_v21, %v4202_v48  ;;  %vm4460_vm8 = vcmp.eq.s32.totalorder %v4424_v51, 1 }
 0x390   : > { %v4884_v46 = vmul.f32 %v12931_v23, %v4848_v9  ;;  %v12993_v55 = vmul.f32 %v5079_v27, %v12897_v14  ;;  %v3006_v16 = vadd.f32 %v2974_v42, %v2553_v8  ;;  %v3718_v56 = vadd.f32 %v3686_v32, %v3361_v49 }
 0x391   : > { %v3651_v50 = vsel %vm3619_vm0, %v3394_v0, 0.0  ;;  %v4986_v10 = vadd.f32 3.0, %v12987_v26  ;;  %vm4104_vm4 = vcmp.eq.s32.totalorder %v4070_v34, 1  ;;  %v3652_v25 = vsel %vm3620_vm3, %v3395_v47, 0.0  ;;  %v4073_v18 = vpop.permute.xlu0 %4072 }
 0x392   : > { %v4916_v52 = vadd.f32 %v4884_v46, %v4559_v43  ;;  %v3362_v28 = vadd.f32 %v3330_v5, %v3005_v59  ;;  %v5017_v22 = vmax.f32 %v4985_v44, 0.0  ;;  %v4171_v37 = vmul.f32 %v12884_v40, %v4135_v29  ;;  %v4237_v59 = vld [vmem:[#allocation2 + $0x120] sm:$0xff] }
 0x393   : > { %v4492_v4 = vsel %vm4460_vm8, %v3038_v54, 0.0  ;;  %v5048_v39 = vmin.f32 %v5016_v35, 6.0  ;;  %v3363_v45 = vadd.f32 %v3331_v13, %v3006_v16  ;;  %v3687_v14 = vmul.f32 %v12853_v19, %v3651_v50  ;;  %v4594_v13 = vld [vmem:[#allocation2 + $0x121] sm:$0xff] }
 0x394   : > { %v12999_v57 = vadd.f32 %v12565_v31, %v4916_v52  ;;  %v4136_v33 = vsel %vm4104_vm4, %v3751_v61, 0.0  ;;  %v3688_v34 = vmul.f32 %v12853_v19, %v3652_v25  ;;  %vm4461_vm15 = vcmp.eq.s32.totalorder %v4427_v41, 1  ;;  %v4430_v11 = vpop.permute.xlu1 %4429 }
 0x395   : > { %vm4105_vm6 = vcmp.eq.s32.totalorder %v4073_v18, 1  ;;  %v5018_v27 = vmax.f32 %v4986_v10, 0.0  ;;  %v4528_v8 = vmul.f32 %v12488_v15, %v4492_v4  ;;  %v5049_v49 = vmin.f32 %v5017_v22, 6.0 }
 0x396   : > { %v4987_v54 = vadd.f32 3.0, %v12999_v57  ;;  %v4137_v20 = vsel %vm4105_vm6, %v3752_v63, 0.0  ;;  %v4203_v42 = vadd.f32 %v4171_v37, %v3718_v56  ;;  %vm4462_vm13 = vcmp.eq.s32.totalorder %v4430_v11, 1  ;;  %v4781_v5 = vpop.permute.xlu0 %4780  ;;  %v4593_v56 = vld [vmem:[#allocation2 + $0x119] sm:$0xff] }
 0x397   : > { %v4173_v30 = vmul.f32 %v12884_v40, %v4137_v20  ;;  %v4172_v21 = vmul.f32 %v12884_v40, %v4136_v33  ;;  %v4493_v19 = vsel %vm4461_vm15, %v4236_v24, 0.0  ;;  %v4494_v32 = vsel %vm4462_vm13, %v4237_v59, 0.0 }
 0x398   : > { %v5019_v35 = vmax.f32 %v4987_v54, 0.0  ;;  %v5080_v1 = vmul.f32 0.16666667, %v5048_v39  ;;  %v3720_v48 = vadd.f32 %v3688_v34, %v3363_v45  ;;  %v4530_v0 = vmul.f32 %v12488_v15, %v4494_v32  ;;  %v4787_v43 = vpop.permute.xlu1 %4786 }
 0x399   : > { %vm4817_vm10 = vcmp.eq.s32.totalorder %v4781_v5, 1  ;;  %v3719_v44 = vadd.f32 %v3687_v14, %v3362_v28  ;;  %v5050_v9 = vmin.f32 %v5018_v27, 6.0  ;;  %v4560_v51 = vadd.f32 %v4528_v8, %v4203_v42 }
 0x39a   : > { %v4849_v29 = vsel %vm4817_vm10, %v3395_v47, 0.0  ;;  %v4529_v46 = vmul.f32 %v12488_v15, %v4493_v19  ;;  %v4205_v16 = vadd.f32 %v4173_v30, %v3720_v48  ;;  %vm4819_vm12 = vcmp.eq.s32.totalorder %v4787_v43, 1 }
 0x39b   : > { %v4885_v40 = vmul.f32 %v12931_v23, %v4849_v29  ;;  %v5081_v50 = vmul.f32 0.16666667, %v5049_v49  ;;  %v4204_v41 = vadd.f32 %v4172_v21, %v3719_v44  ;;  %v5051_v10 = vmin.f32 %v5019_v35, 6.0  ;;  %v4784_v52 = vpop.permute.xlu0 %4783 }
 0x39c   : > { %v4851_v25 = vsel %vm4819_vm12, %v4594_v13, 0.0  ;;  %v4562_v22 = vadd.f32 %v4530_v0, %v4205_v16  ;;  %vm4818_vm11 = vcmp.eq.s32.totalorder %v4784_v52, 1  ;;  %vm15345_vm14 = vcmask 523264  }
 0x39d   : > { %v4917_v37 = vadd.f32 %v4885_v40, %v4560_v51  ;;  %v4887_v28 = vmul.f32 %v12931_v23, %v4851_v25  ;;  %v5164_v47 = vsel %vm15345_vm14, %v12962_v6, 0.0  ;;  %v13013_v15 = vmul.f32 %v5080_v1, %v12956_v2  ;;  %vm15346_vm7 = vmmov %vm15345_vm14 }
 0x39e   : > { %v5082_v4 = vmul.f32 0.16666667, %v5050_v9  ;;  %v4850_v63 = vsel %vm4818_vm11, %v4593_v56, 0.0  ;;  %v4561_v39 = vadd.f32 %v4529_v46, %v4204_v41  ;;  %v5163_v18 = vadd.f32 %v12902_v53, %v12890_v58  ;;  %vm15347_vm2 = vmmov %vm15346_vm7 }
 0x39f   : > { %v4956_v45 = vadd.f32 %v12565_v31, %v4917_v37  ;;  %v4919_v14 = vadd.f32 %v4887_v28, %v4562_v22  ;;  %v4886_v61 = vmul.f32 %v12931_v23, %v4850_v63  ;;  %v5166_v33 = vsel %vm15346_vm7, %v12993_v55, 0.0  ;;  %vm15348_vm1 = vmmov %vm15347_vm2  ;;  %v5273_v63 = vld [vmem:[%s13342_s9 + $0x8] sm:$0xff] }
 0x3a0   : > { %v13022_v34 = vmul.f32 %v5081_v50, %v12978_v62  ;;  %v5083_v24 = vmul.f32 0.16666667, %v5051_v10  ;;  %v5165_v54 = vadd.f32 %v5164_v47, %v5163_v18  ;;  %v5168_v8 = vsel %vm15347_vm2, %v13013_v15, 0.0  ;;  %vm15349_vm0 = vmmov %vm15348_vm1 }
 0x3a1   : > { %v4988_v2 = vadd.f32 3.0, %v4956_v45  ;;  %v4958_v59 = vadd.f32 %v12565_v31, %v4919_v14  ;;  %v4918_v27 = vadd.f32 %v4886_v61, %v4561_v39  ;;  %v13028_v23 = vmul.f32 %v5082_v4, %v12987_v26  ;;  %vm15350_vm9 = vmmov %vm15349_vm0  ;;  %v5272_v4 = vld [vmem:[%s13342_s9] sm:$0xff] }
 0x3a2   : > { %v5167_v11 = vadd.f32 %v5166_v33, %v5165_v54  ;;  %v5170_v62 = vsel %vm15348_vm1, %v13022_v34, 0.0  ;;  %v13034_v49 = vmul.f32 %v5083_v24, %v12999_v57  ;;  %vm15351_vm3 = vmmov %vm15349_vm0  ;;  %v15355_v47 = vmov 0.0   ;;  %v5388_v24 = vld [vmem:[%s13344_s11] sm:$0xff]  ;;  %v5391_v54 = vld [vmem:[%s13344_s11 + $0x18] sm:$0xff] }
 0x3a3   : > { %v5020_v20 = vmax.f32 %v4988_v2, 0.0  ;;  %v4990_v58 = vadd.f32 3.0, %v4958_v59  ;;  %v4957_v53 = vadd.f32 %v12565_v31, %v4918_v27  ;;  %v5172_v19 = vsel %vm15349_vm0, %v13028_v23, 0.0  ;;  %vm15352_vm8 = vmmov %vm15349_vm0  ;;  %v5389_v2 = vld [vmem:[%s13344_s11 + $0x8] sm:$0xff] }
 0x3a4   : > { %v5169_v35 = vadd.f32 %v5168_v8, %v5167_v11  ;;  %v5174_v31 = vsel %vm15350_vm9, %v13034_v49, 0.0  ;;  %vm15353_vm4 = vmmov %vm15349_vm0  ;;  %v6179_v39 = vpack.c.bf16 %v5273_v63, %v5272_v4  ;;  %vm15356_vm6 = vcmask 130048   ;;  %v5394_v11 = vld [vmem:[%s13344_s11 + $0x30] sm:$0xff]  ;;  %v15372_v4 = vld [vmem:[#allocation117_spill] sm:$0xff] }
 0x3a5   : > { %v5052_v42 = vmin.f32 %v5020_v20, 6.0  ;;  %v5022_v30 = vmax.f32 %v4990_v58, 0.0  ;;  %v4989_v21 = vadd.f32 3.0, %v4957_v53  ;;  %vm15354_vm15 = vmmov %vm15349_vm0  ;;  %v6181_v27 = vpack.c.bf16 %v5389_v2, %v5388_v24  ;;  %v5392_v20 = vld [vmem:[%s13344_s11 + $0x20] sm:$0xff]  ;;  %v5393_v58 = vld [vmem:[%s13344_s11 + $0x28] sm:$0xff] }
 0x3a6   : > { %v5171_v1 = vadd.f32 %v5170_v62, %v5169_v35  ;;  %v5395_v62 = vld [vmem:[%s13344_s11 + $0x38] sm:$0xff]  ;;  %vm15361_vm13 = vmmov %vm15349_vm0 }
 0x3a7   : > { %v5084_v26 = vmul.f32 0.16666667, %v5052_v42  ;;  %v5054_v32 = vmin.f32 %v5022_v30, 6.0  ;;  %v5021_v5 = vmax.f32 %v4989_v21, 0.0  ;;  %6182 = vmatprep.subr.bf16.mxu1 %v6181_v27  ;;  %v6193_v42 = vpack.c.bf16 %v5395_v62, %v5394_v11  ;;  %v5274_v30 = vld [vmem:[%s13343_s10] sm:$0x1]  ;;  %vm15362_vm10 = vmmov %vm15349_vm0 }
 0x3a8   : > { %v5173_v57 = vadd.f32 %v5172_v19, %v5171_v1  ;;  %6184 = vmatpush3.bf16.msra.mxu1 %v6181_v27  ;;  %v5352_v21 = vlaneseq  ;;  %vm15365_vm12 = vmmov %vm15349_vm0  ;;  %v15379_v24 = vld [vmem:[#allocation128_spill] sm:$0xff] }
 0x3a9   : > { %v13040_v48 = vmul.f32 %v5084_v26, %v4956_v45  ;;  %v5086_v0 = vmul.f32 0.16666667, %v5054_v32  ;;  %v5053_v13 = vmin.f32 %v5021_v5, 6.0  ;;  %v5197_v45 = vld [vmem:[%s13341_s8] sm:$0x1]  ;;  %vm15366_vm11 = vmmov %vm15349_vm0 }
 0x3aa   : > { %v5175_v51 = vadd.f32 %v5174_v31, %v5173_v57  ;;  %v5353_v5 = vshrl.u32 %v5352_v21, 7  ;;  %vm15369_vm14 = vmmov %vm15349_vm0  ;;  %v6354_v21 = vld [vmem:[%s6530_s18 + $0x8] sm:$0xff] }
 0x3ab   : > { %v5176_v44 = vsel %vm15351_vm3, %v13040_v48, 0.0  ;;  %v5085_v9 = vmul.f32 0.16666667, %v5053_v13  ;;  %v13044_v29 = vmul.f32 %v5086_v0, %v4958_v59  ;;  %v5390_v59 = vld [vmem:[%s13344_s11 + $0x10] sm:$0xff]  ;;  %vm15370_vm7 = vmmov %vm15349_vm0 }
 0x3ac   : > { %v5177_v46 = vadd.f32 %v5176_v44, %v5175_v51  ;;  %v6185_v8 = vpack.c.bf16 %v5391_v54, %v5390_v59  ;;  %v5354_v0 = vsub.s32 0, %v5353_v5  ;;  %v15357_v44 = vld [vmem:[#allocation28_spill] sm:$0xff]  ;;  %vm15373_vm2 = vmmov %vm15349_vm0  ;;  %v15382_v59 = vld [vmem:[#allocation153_spill] sm:$0xff] }
 0x3ad   : > { %v13046_v43 = vmul.f32 %v5085_v9, %v4957_v53  ;;  %v5180_v56 = vsel %vm15353_vm4, %v13044_v29, 0.0  ;;  %v6189_v53 = vpack.c.bf16 %v5393_v58, %v5392_v20  ;;  %v15358_v51 = vld [vmem:[#allocation20_spill] sm:$0xff]  ;;  %vm15374_vm1 = vmmov %vm15349_vm0 }
 0x3ae   : > { %6186 = vmatprep.subr.bf16.mxu1 %v6185_v8  ;;  %vm15377_vm9 = vmmov %vm15349_vm0  ;;  %v15383_v54 = vld [vmem:[#allocation72_spill] sm:$0xff] }
 0x3af   : > { %v5178_v16 = vsel %vm15352_vm8, %v13046_v43, 0.0  ;;  %6188 = vmatpush3.bf16.msra.mxu1 %v6185_v8  ;;  %vm15380_vm3 = vmmov %vm15349_vm0  ;;  %v15386_v20 = vld [vmem:[#allocation148_spill] sm:$0xff] }
 0x3b0   : > { %v5179_v40 = vadd.f32 %v5178_v16, %v5177_v46  ;;  %6190 = vmatprep.subr.bf16.mxu1 %v6189_v53  ;;  %v15360_v16 = vld [vmem:[#allocation150_spill] sm:$0xff]  ;;  %vm15381_vm8 = vmmov %vm15349_vm0 }
 0x3b1   : > { %vm15384_vm4 = vmmov %vm15349_vm0 }
 0x3b2   : > { %v5181_v50 = vadd.f32 %v5180_v56, %v5179_v40  ;;  %v15363_v56 = vld [vmem:[#allocation144_spill] sm:$0xff] }
 0x3b3   : > { %6192 = vmatpush3.bf16.msra.mxu1 %v6189_v53 }
 0x3b4   : > { %v5182_v41 = vrot.slane %v5181_v50, 4  ;;  %6194 = vmatprep.subr.bf16.mxu1 %v6193_v42 }
 0x3b6   : > { %v5183_v10 = vadd.f32 %v5182_v41, %v5181_v50  ;;  %v15364_v41 = vld [vmem:[#allocation11_spill] sm:$0xff] }
 0x3b7   : > { %6196 = vmatpush3.bf16.msra.mxu1 %v6193_v42 }
 0x3b8   : > { %v5184_v25 = vrot.slane %v5183_v10, 2 }
 0x3ba   : > { %v5185_v52 = vadd.f32 %v5184_v25, %v5183_v10  ;;  %v15367_v25 = vld [vmem:[#allocation145_spill] sm:$0xff] }
 0x3bc   : > { %v5186_v22 = vrot.slane %v5185_v52, 1 }
 0x3be   : > { %v5187_v37 = vadd.f32 %v5186_v22, %v5185_v52  ;;  %v15368_v22 = vld [vmem:[#allocation35_spill] sm:$0xff] }
 0x3c0   : > { %v5188_v28 = vmul.f32 0.00390625, %v5187_v37 }
 0x3c2   : > { %6089 = vmatmul.mubr.msk.f32.vlgmr.msra.gmra.mrb[32].mxu0 %vm15354_vm15, %v5188_v28  ;;  %v15371_v28 = vld [vmem:[#allocation92_spill] sm:$0xff]  ;;  %vm15385_vm15 = vmmov %vm15349_vm0 }
 0x3c3   : > { %6095 = vmatprep.mubr.msk.f32.mxu0 %vm6397_vm5, %v15355_v47  ;;  %6180 = vmatpush3.bf16.msra.mxu0 %v6179_v39  ;;  %vm15359_vm5 = vmmov %vm15349_vm0  ;;  %v15375_v39 = vld [vmem:[#allocation146_spill] sm:$0xff] }
 0x495   : > { %v5267_v14 = vpop.f32.mrb[32].mxu0 }
 0x496   : > { %v5268_v61 = vadd.f32 %v5267_v14, %v5197_v45  ;;  %v6090_v18 = vpop.f32.mrb[33].mxu0  ;;  %v15376_v14 = vld [vmem:[#allocation81_spill] sm:$0xff] }
 0x497   : > { %v15378_v18 = vld [vmem:[#allocation147_spill] sm:$0xff] }
 0x498   : > { %v5271_v33 = vmax.f32 %v5268_v61, 0.0 }
 0x49a   : > { %6096 = vmatmul.mubr.msk.f32.vlgmr.msra.gmra.mrb[34].mxu0 %vm15356_vm6, %v5271_v33  ;;  %vm15387_vm6 = vmmov %vm15349_vm0 }
 0x56d   : > { %v5344_v35 = vpop.f32.mrb[34].mxu0 }
 0x56e   : > { %v5345_v19 = vadd.f32 %v5344_v35, %v5274_v30  ;;  %v6097_v26 = vpop.f32.mrb[35].mxu0 }
 0x570   : > { %v5348_v32 = vadd.f32 3.0, %v5345_v19  ;;  %v6355_v19 = vld [vmem:[%s6530_s18] sm:$0xff] }
 0x572   : > { %v5349_v1 = vmax.f32 %v5348_v32, 0.0 }
 0x574   : > { %v5350_v31 = vmin.f32 %v5349_v1, 6.0 }
 0x576   : > { %v5351_v13 = vmul.f32 0.16666667, %v5350_v31 }
 0x578   : > { %v13092_v57 = vrot.slane %v5351_v13, %v5354_v0  ;;  %v6356_v0 = vld [vmem:[%s6530_s18 + $0x18] sm:$0xff] }
 0x57a   : > { %v5356_v9 = vmul.f32 %v13092_v57, %v15357_v44  ;;  %v5357_v46 = vmul.f32 %v13092_v57, %v15358_v51  ;;  %v5358_v40 = vmul.f32 %v13092_v57, %v15360_v16  ;;  %v5359_v50 = vmul.f32 %v13092_v57, %v15363_v56 }
 0x57b   : > { %v5360_v10 = vmul.f32 %v13092_v57, %v15364_v41  ;;  %v5361_v52 = vmul.f32 %v13092_v57, %v15367_v25  ;;  %v5362_v37 = vmul.f32 %v13092_v57, %v15368_v22  ;;  %v5363_v47 = vmul.f32 %v13092_v57, %v15371_v28 }
 0x57c   : > { %6114 = vmatprep.mubr.msk.f32.mxu1 %vm15359_vm5, %v5356_v9  ;;  %v5364_v63 = vmul.f32 %v13092_v57, %v15372_v4  ;;  %v5365_v45 = vmul.f32 %v13092_v57, %v15375_v39  ;;  %v5366_v61 = vmul.f32 %v13092_v57, %v15376_v14  ;;  %v5367_v33 = vmul.f32 %v13092_v57, %v15378_v18  ;;  %vm15388_vm5 = vmmov %vm15349_vm0 }
 0x57d   : > { %6115 = vmatmul.mubr.msk.f32.vlgmr.msra.gmra.mrb[0].mxu1 %vm15361_vm13, %v5357_v46  ;;  %v5368_v2 = vmul.f32 %v13092_v57, %v15379_v24  ;;  %v5369_v27 = vmul.f32 %v13092_v57, %v15382_v59  ;;  %v5370_v8 = vmul.f32 %v13092_v57, %v15383_v54  ;;  %v5371_v58 = vmul.f32 %v13092_v57, %v15386_v20  ;;  %vm15389_vm13 = vmmov %vm15349_vm0 }
 0x57e   : > { %6117 = vmatprep.mubr.msk.f32.mxu1 %vm15362_vm10, %v5358_v40  ;;  %v5372_v53 = vmul.f32 %v13092_v57, %v12748_v12  ;;  %v5373_v11 = vmul.f32 %v13092_v57, %v12768_v60  ;;  %v5374_v62 = vmul.f32 %v13092_v57, %v12781_v36  ;;  %vm15390_vm10 = vmmov %vm15349_vm0  ;;  %v5375_v42 = vmul.f32 %v13092_v57, %v12805_v38  ;;  %v6358_v40 = vld [vmem:[%s6530_s18 + $0x28] sm:$0xff] }
 0x57f   : > { %v5376_v12 = vmul.f32 %v13092_v57, %v12815_v3  ;;  %v5377_v60 = vmul.f32 %v13092_v57, %v12826_v7  ;;  %v5378_v36 = vmul.f32 %v13092_v57, %v12876_v17  ;;  %v5379_v38 = vmul.f32 %v13092_v57, %v12962_v6 }
 0x580   : > { %v5380_v3 = vmul.f32 %v13092_v57, %v12993_v55  ;;  %v5381_v7 = vmul.f32 %v13092_v57, %v13013_v15  ;;  %v5382_v17 = vmul.f32 %v13092_v57, %v13022_v34  ;;  %v5383_v6 = vmul.f32 %v13092_v57, %v13028_v23 }
 0x581   : > { %6118 = vmatmul.mubr.msk.f32.gmra.mrb[2].mxu1 %vm15365_vm12, %v5359_v50  ;;  %vm15391_vm12 = vmmov %vm15349_vm0  ;;  %v5384_v55 = vmul.f32 %v13092_v57, %v13034_v49  ;;  %v5385_v15 = vmul.f32 %v13092_v57, %v13040_v48  ;;  %v5386_v34 = vmul.f32 %v13092_v57, %v13046_v43  ;;  %v5387_v23 = vmul.f32 %v13092_v57, %v13044_v29  ;;  %v13193_v49 = vld [vmem:[%s13345_s12] ss:$0 sm:$0xff]  ;;  %v6357_v57 = vld [vmem:[%s6530_s18 + $0x10] sm:$0xff] }
 0x582   : > { %6120 = vmatprep.mubr.msk.f32.mxu1 %vm15366_vm11, %v5360_v10  ;;  %vm15392_vm11 = vmmov %vm15349_vm0  ;;  %v6359_v50 = vld [vmem:[%s6530_s18 + $0x20] sm:$0xff] }
 0x585   : > { %6121 = vmatmul.mubr.msk.f32.gmra.mrb[4].mxu1 %vm15369_vm14, %v5361_v52  ;;  %vm15393_vm14 = vmmov %vm15349_vm0 }
 0x586   : > { %6123 = vmatprep.mubr.msk.f32.mxu1 %vm15370_vm7, %v5362_v37  ;;  %vm15394_vm7 = vmmov %vm15349_vm0  ;;  %v6360_v37 = vld [vmem:[%s6530_s18 + $0x38] sm:$0xff] }
 0x589   : > { %6124 = vmatmul.mubr.msk.f32.gmra.mrb[6].mxu1 %vm15373_vm2, %v5363_v47  ;;  %vm15395_vm2 = vmmov %vm15349_vm0  ;;  %v6361_v47 = vld [vmem:[%s6530_s18 + $0x30] sm:$0xff] }
 0x58a   : > { %6126 = vmatprep.mubr.msk.f32.mxu1 %vm15374_vm1, %v5364_v63  ;;  %vm15396_vm1 = vmmov %vm15349_vm0 }
 0x58d   : > { %6127 = vmatmul.mubr.msk.f32.gmra.mrb[8].mxu1 %vm15349_vm0, %v5365_v45 }
 0x58e   : > { %6129 = vmatprep.mubr.msk.f32.mxu1 %vm15377_vm9, %v5366_v61  ;;  %vm15397_vm9 = vmmov %vm15349_vm0  ;;  %v6362_v61 = vld [vmem:[%s6530_s18 + $0x48] sm:$0xff] }
 0x591   : > { %6130 = vmatmul.mubr.msk.f32.gmra.mrb[10].mxu1 %vm15380_vm3, %v5367_v33  ;;  %vm15398_vm3 = vmmov %vm15349_vm0  ;;  %v6363_v33 = vld [vmem:[%s6530_s18 + $0x40] sm:$0xff] }
 0x592   : > { %6132 = vmatprep.mubr.msk.f32.mxu1 %vm15381_vm8, %v5368_v2  ;;  %vm15399_vm8 = vmmov %vm15349_vm0 }
 0x595   : > { %6133 = vmatmul.mubr.msk.f32.gmra.mrb[12].mxu1 %vm15384_vm4, %v5369_v27  ;;  %vm15400_vm4 = vmmov %vm15349_vm0 }
 0x596   : > { %6135 = vmatprep.mubr.msk.f32.mxu1 %vm15385_vm15, %v5370_v8  ;;  %vm15401_vm15 = vmmov %vm15349_vm0  ;;  %v6364_v8 = vld [vmem:[%s6530_s18 + $0x58] sm:$0xff] }
 0x599   : > { %6136 = vmatmul.mubr.msk.f32.gmra.mrb[14].mxu1 %vm15387_vm6, %v5371_v58  ;;  %vm15402_vm6 = vmmov %vm15349_vm0  ;;  %v6365_v58 = vld [vmem:[%s6530_s18 + $0x50] sm:$0xff] }
 0x59a   : > { %6138 = vmatprep.mubr.msk.f32.mxu1 %vm15388_vm5, %v5372_v53  ;;  %vm15403_vm5 = vcmask 130048  }
 0x59d   : > { %6139 = vmatmul.mubr.msk.f32.gmra.mrb[16].mxu1 %vm15389_vm13, %v5373_v11  ;;  %vm15404_vm13 = vmmov %vm15403_vm5 }
 0x59e   : > { %6141 = vmatprep.mubr.msk.f32.mxu1 %vm15390_vm10, %v5374_v62  ;;  %vm15405_vm10 = vmmov %vm15403_vm5 }
 0x5a1   : > { %6142 = vmatmul.mubr.msk.f32.gmra.mrb[18].mxu1 %vm15391_vm12, %v5375_v42  ;;  %vm15406_vm12 = vmmov %vm15403_vm5 }
 0x5a2   : > { %6144 = vmatprep.mubr.msk.f32.mxu1 %vm15392_vm11, %v5376_v12  ;;  %vm15407_vm11 = vmmov %vm15403_vm5 }
 0x5a5   : > { %6145 = vmatmul.mubr.msk.f32.gmra.mrb[20].mxu1 %vm15393_vm14, %v5377_v60  ;;  %vm15408_vm14 = vmmov %vm15403_vm5  ;;  %v6366_v60 = vld [vmem:[%s6530_s18 + $0x68] sm:$0xff] }
 0x5a6   : > { %6147 = vmatprep.mubr.msk.f32.mxu1 %vm15394_vm7, %v5378_v36  ;;  %vm15409_vm7 = vmmov %vm15403_vm5 }
 0x5a9   : > { %6148 = vmatmul.mubr.msk.f32.gmra.mrb[22].mxu1 %vm15395_vm2, %v5379_v38  ;;  %vm15410_vm2 = vmmov %vm15403_vm5  ;;  %v6367_v38 = vld [vmem:[%s6530_s18 + $0x60] sm:$0xff] }
 0x5aa   : > { %6150 = vmatprep.mubr.msk.f32.mxu1 %vm15396_vm1, %v5380_v3  ;;  %vm15411_vm1 = vmmov %vm15410_vm2 }
 0x5ad   : > { %6151 = vmatmul.mubr.msk.f32.gmra.mrb[24].mxu1 %vm15349_vm0, %v5381_v7  ;;  %vm15412_vm0 = vmmov %vm15411_vm1 }
 0x5ae   : > { %6153 = vmatprep.mubr.msk.f32.mxu1 %vm15397_vm9, %v5382_v17  ;;  %vm15413_vm9 = vmmov %vm15412_vm0 }
 0x5b1   : > { %6154 = vmatmul.mubr.msk.f32.gmra.mrb[26].mxu1 %vm15398_vm3, %v5383_v6  ;;  %vm15414_vm3 = vmmov %vm15412_vm0 }
 0x5b2   : > { %6156 = vmatprep.mubr.msk.f32.mxu1 %vm15399_vm8, %v5384_v55  ;;  %vm15415_vm8 = vmmov %vm15412_vm0 }
 0x5b5   : > { %6157 = vmatmul.mubr.msk.f32.gmra.mrb[28].mxu1 %vm15400_vm4, %v5385_v15  ;;  %vm15416_vm4 = vmmov %vm15412_vm0  ;;  %v6368_v15 = vld [vmem:[%s6530_s18 + $0x78] sm:$0xff] }
 0x5b6   : > { %6159 = vmatprep.mubr.msk.f32.mxu1 %vm15401_vm15, %v5386_v34  ;;  %vm15417_vm15 = vmmov %vm15412_vm0 }
 0x5b9   : > { %6160 = vmatmul.mubr.msk.f32.gmra.mrb[30].mxu1 %vm15402_vm6, %v5387_v23  ;;  %v6369_v23 = vld [vmem:[%s6530_s18 + $0x70] sm:$0xff]  ;;  %vm15418_vm6 = vmmov %vm15412_vm0 }
 0x650   : > { %v6116_v30 = vpop.f32.mrb[0].mxu1 }
 0x651   : > { %v5571_v48 = vadd.f32 %v6116_v30, %v13193_v49  ;;  %v5565_v43 = vpop.f32.mrb[1].mxu1 }
 0x652   : > { %v5566_v29 = vadd.f32 %v13193_v49, %v5565_v43 }
 0x653   : > { %v5725_v35 = vadd.f32 %v6354_v21, %v5571_v48 }
 0x654   : > { %v5724_v26 = vadd.f32 %v6355_v19, %v5566_v29  ;;  %v6119_v32 = vpop.f32.mrb[2].mxu1 }
 0x655   : > { %5757 = vst.msk [vmem:[%s13201_s14 + $0x8] sm:$0xff] %vm15403_vm5, %v5725_v35  ;;  %v5581_v5 = vadd.f32 %v6119_v32, %v13193_v49  ;;  %v5575_v1 = vpop.f32.mrb[3].mxu1  ;;  %v6370_v35 = vld [vmem:[%s6530_s18 + $0x88] sm:$0xff]  ;;  %vm15419_vm5 = vmmov %vm15412_vm0 }
 0x656   : > { %5756 = vst.msk [vmem:[%s13201_s14] sm:$0xff] %vm15404_vm13, %v5724_v26  ;;  %v5576_v31 = vadd.f32 %v13193_v49, %v5575_v1  ;;  %v6371_v26 = vld [vmem:[%s6530_s18 + $0x80] sm:$0xff]  ;;  %vm15420_vm13 = vmmov %vm15412_vm0 }
 0x657   : > { %v5727_v13 = vadd.f32 %v6356_v0, %v5581_v5 }
 0x658   : > { %v5726_v44 = vadd.f32 %v6357_v57, %v5576_v31  ;;  %v6122_v9 = vpop.f32.mrb[4].mxu1 }
 0x659   : > { %5759 = vst.msk [vmem:[%s13201_s14 + $0x18] sm:$0xff] %vm15405_vm10, %v5727_v13  ;;  %v5591_v51 = vadd.f32 %v6122_v9, %v13193_v49  ;;  %v5585_v46 = vpop.f32.mrb[5].mxu1  ;;  %v6372_v13 = vld [vmem:[%s6530_s18 + $0x98] sm:$0xff]  ;;  %vm15421_vm10 = vmmov %vm15412_vm0 }
 0x65a   : > { %5758 = vst.msk [vmem:[%s13201_s14 + $0x10] sm:$0xff] %vm15406_vm12, %v5726_v44  ;;  %v5586_v16 = vadd.f32 %v13193_v49, %v5585_v46  ;;  %v6373_v44 = vld [vmem:[%s6530_s18 + $0x90] sm:$0xff]  ;;  %vm15422_vm12 = vmmov %vm15412_vm0 }
 0x65b   : > { %v5729_v56 = vadd.f32 %v6358_v40, %v5591_v51 }
 0x65c   : > { %v5728_v41 = vadd.f32 %v6359_v50, %v5586_v16  ;;  %v6125_v10 = vpop.f32.mrb[6].mxu1 }
 0x65d   : > { %5761 = vst.msk [vmem:[%s13201_s14 + $0x28] sm:$0xff] %vm15407_vm11, %v5729_v56  ;;  %v5601_v25 = vadd.f32 %v6125_v10, %v13193_v49  ;;  %v5595_v52 = vpop.f32.mrb[7].mxu1  ;;  %v6374_v56 = vld [vmem:[%s6530_s18 + $0xa8] sm:$0xff]  ;;  %vm15423_vm11 = vmmov %vm15412_vm0 }
 0x65e   : > { %5760 = vst.msk [vmem:[%s13201_s14 + $0x20] sm:$0xff] %vm15408_vm14, %v5728_v41  ;;  %v5596_v22 = vadd.f32 %v13193_v49, %v5595_v52  ;;  %v6375_v41 = vld [vmem:[%s6530_s18 + $0xa0] sm:$0xff]  ;;  %vm15424_vm14 = vmmov %vm15412_vm0 }
 0x65f   : > { %v5731_v28 = vadd.f32 %v6360_v37, %v5601_v25 }
 0x660   : > { %v5730_v4 = vadd.f32 %v6361_v47, %v5596_v22  ;;  %v6128_v63 = vpop.f32.mrb[8].mxu1 }
 0x661   : > { %5763 = vst.msk [vmem:[%s13201_s14 + $0x38] sm:$0xff] %vm15409_vm7, %v5731_v28  ;;  %v5611_v39 = vadd.f32 %v6128_v63, %v13193_v49  ;;  %v5605_v45 = vpop.f32.mrb[9].mxu1  ;;  %v6376_v28 = vld [vmem:[%s6530_s18 + $0xb8] sm:$0xff]  ;;  %vm15425_vm7 = vmmov %vm15412_vm0 }
 0x662   : > { %5762 = vst.msk [vmem:[%s13201_s14 + $0x30] sm:$0xff] %vm15410_vm2, %v5730_v4  ;;  %v5606_v14 = vadd.f32 %v13193_v49, %v5605_v45  ;;  %v6377_v4 = vld [vmem:[%s6530_s18 + $0xb0] sm:$0xff]  ;;  %vm15426_vm2 = vmmov %vm15412_vm0 }
 0x663   : > { %v5733_v18 = vadd.f32 %v6362_v61, %v5611_v39 }
 0x664   : > { %v5732_v24 = vadd.f32 %v6363_v33, %v5606_v14  ;;  %v6131_v2 = vpop.f32.mrb[10].mxu1 }
 0x665   : > { %5765 = vst.msk [vmem:[%s13201_s14 + $0x48] sm:$0xff] %vm15411_vm1, %v5733_v18  ;;  %v5621_v59 = vadd.f32 %v6131_v2, %v13193_v49  ;;  %v5615_v27 = vpop.f32.mrb[11].mxu1  ;;  %v6378_v18 = vld [vmem:[%s6530_s18 + $0xc8] sm:$0xff]  ;;  %vm15427_vm1 = vmmov %vm15412_vm0 }
 0x666   : > { %5764 = vst.msk [vmem:[%s13201_s14 + $0x40] sm:$0xff] %vm15412_vm0, %v5732_v24  ;;  %v5616_v54 = vadd.f32 %v13193_v49, %v5615_v27  ;;  %v6379_v24 = vld [vmem:[%s6530_s18 + $0xc0] sm:$0xff] }
 0x667   : > { %v5735_v20 = vadd.f32 %v6364_v8, %v5621_v59 }
 0x668   : > { %v5734_v53 = vadd.f32 %v6365_v58, %v5616_v54  ;;  %v6134_v11 = vpop.f32.mrb[12].mxu1 }
 0x669   : > { %5767 = vst.msk [vmem:[%s13201_s14 + $0x58] sm:$0xff] %vm15413_vm9, %v5735_v20  ;;  %v5631_v62 = vadd.f32 %v6134_v11, %v13193_v49  ;;  %v5625_v42 = vpop.f32.mrb[13].mxu1  ;;  %v6380_v20 = vld [vmem:[%s6530_s18 + $0xd8] sm:$0xff]  ;;  %vm15428_vm9 = vmmov %vm15412_vm0 }
 0x66a   : > { %5766 = vst.msk [vmem:[%s13201_s14 + $0x50] sm:$0xff] %vm15414_vm3, %v5734_v53  ;;  %v5626_v12 = vadd.f32 %v13193_v49, %v5625_v42  ;;  %v6381_v53 = vld [vmem:[%s6530_s18 + $0xd0] sm:$0xff]  ;;  %vm15429_vm3 = vmmov %vm15412_vm0 }
 0x66b   : > { %v5737_v36 = vadd.f32 %v6366_v60, %v5631_v62 }
 0x66c   : > { %v5736_v3 = vadd.f32 %v6367_v38, %v5626_v12  ;;  %v6137_v7 = vpop.f32.mrb[14].mxu1 }
 0x66d   : > { %5769 = vst.msk [vmem:[%s13201_s14 + $0x68] sm:$0xff] %vm15415_vm8, %v5737_v36  ;;  %v5641_v17 = vadd.f32 %v6137_v7, %v13193_v49  ;;  %v5635_v6 = vpop.f32.mrb[15].mxu1  ;;  %v6382_v36 = vld [vmem:[%s6530_s18 + $0xe8] sm:$0xff]  ;;  %vm15430_vm8 = vmmov %vm15412_vm0 }
 0x66e   : > { %5768 = vst.msk [vmem:[%s13201_s14 + $0x60] sm:$0xff] %vm15416_vm4, %v5736_v3  ;;  %v5636_v55 = vadd.f32 %v13193_v49, %v5635_v6  ;;  %v6383_v3 = vld [vmem:[%s6530_s18 + $0xe0] sm:$0xff]  ;;  %vm15431_vm4 = vmmov %vm15412_vm0 }
 0x66f   : > { %v5739_v34 = vadd.f32 %v6368_v15, %v5641_v17 }
 0x670   : > { %v5738_v30 = vadd.f32 %v6369_v23, %v5636_v55  ;;  %v6140_v48 = vpop.f32.mrb[16].mxu1 }
 0x671   : > { %5771 = vst.msk [vmem:[%s13201_s14 + $0x78] sm:$0xff] %vm15417_vm15, %v5739_v34  ;;  %v5651_v43 = vadd.f32 %v6140_v48, %v13193_v49  ;;  %v5645_v29 = vpop.f32.mrb[17].mxu1  ;;  %v6384_v34 = vld [vmem:[%s6530_s18 + $0xf8] sm:$0xff]  ;;  %vm15432_vm15 = vmmov %vm15412_vm0 }
 0x672   : > { %5770 = vst.msk [vmem:[%s13201_s14 + $0x70] sm:$0xff] %vm15418_vm6, %v5738_v30  ;;  %v5646_v21 = vadd.f32 %v13193_v49, %v5645_v29  ;;  %v6385_v30 = vld [vmem:[%s6530_s18 + $0xf0] sm:$0xff]  ;;  %vm15433_vm6 = vmmov %vm15412_vm0 }
 0x673   : > { %v5741_v19 = vadd.f32 %v6370_v35, %v5651_v43 }
 0x674   : > { %v5740_v32 = vadd.f32 %v6371_v26, %v5646_v21  ;;  %v6143_v5 = vpop.f32.mrb[18].mxu1 }
 0x675   : > { %5773 = vst.msk [vmem:[%s13201_s14 + $0x88] sm:$0xff] %vm15419_vm5, %v5741_v19  ;;  %v5661_v1 = vadd.f32 %v6143_v5, %v13193_v49  ;;  %v5655_v31 = vpop.f32.mrb[19].mxu1 }
 0x676   : > { %5772 = vst.msk [vmem:[%s13201_s14 + $0x80] sm:$0xff] %vm15420_vm13, %v5740_v32  ;;  %v5656_v0 = vadd.f32 %v13193_v49, %v5655_v31 }
 0x677   : > { %v5743_v57 = vadd.f32 %v6372_v13, %v5661_v1 }
 0x678   : > { %v5742_v9 = vadd.f32 %v6373_v44, %v5656_v0  ;;  %v6146_v51 = vpop.f32.mrb[20].mxu1 }
 0x679   : > { %5775 = vst.msk [vmem:[%s13201_s14 + $0x98] sm:$0xff] %vm15421_vm10, %v5743_v57  ;;  %v5671_v46 = vadd.f32 %v6146_v51, %v13193_v49  ;;  %v5665_v16 = vpop.f32.mrb[21].mxu1 }
 0x67a   : > { %5774 = vst.msk [vmem:[%s13201_s14 + $0x90] sm:$0xff] %vm15422_vm12, %v5742_v9  ;;  %v5666_v40 = vadd.f32 %v13193_v49, %v5665_v16 }
 0x67b   : > { %v5745_v50 = vadd.f32 %v6374_v56, %v5671_v46 }
 0x67c   : > { %v5744_v10 = vadd.f32 %v6375_v41, %v5666_v40  ;;  %v6149_v25 = vpop.f32.mrb[22].mxu1 }
 0x67d   : > { %5777 = vst.msk [vmem:[%s13201_s14 + $0xa8] sm:$0xff] %vm15423_vm11, %v5745_v50  ;;  %v5681_v52 = vadd.f32 %v6149_v25, %v13193_v49  ;;  %v5675_v22 = vpop.f32.mrb[23].mxu1 }
 0x67e   : > { %5776 = vst.msk [vmem:[%s13201_s14 + $0xa0] sm:$0xff] %vm15424_vm14, %v5744_v10  ;;  %v5676_v37 = vadd.f32 %v13193_v49, %v5675_v22 }
 0x67f   : > { %v5747_v47 = vadd.f32 %v6376_v28, %v5681_v52 }
 0x680   : > { %v5746_v63 = vadd.f32 %v6377_v4, %v5676_v37  ;;  %v6152_v39 = vpop.f32.mrb[24].mxu1 }
 0x681   : > { %5779 = vst.msk [vmem:[%s13201_s14 + $0xb8] sm:$0xff] %vm15425_vm7, %v5747_v47  ;;  %v5691_v45 = vadd.f32 %v6152_v39, %v13193_v49  ;;  %v5685_v14 = vpop.f32.mrb[25].mxu1 }
 0x682   : > { %5778 = vst.msk [vmem:[%s13201_s14 + $0xb0] sm:$0xff] %vm15426_vm2, %v5746_v63  ;;  %v5686_v61 = vadd.f32 %v13193_v49, %v5685_v14 }
 0x683   : > { %v5749_v33 = vadd.f32 %v6378_v18, %v5691_v45 }
 0x684   : > { %v5748_v2 = vadd.f32 %v6379_v24, %v5686_v61  ;;  %v6155_v59 = vpop.f32.mrb[26].mxu1 }
 0x685   : > { %5781 = vst.msk [vmem:[%s13201_s14 + $0xc8] sm:$0xff] %vm15427_vm1, %v5749_v33  ;;  %v5701_v27 = vadd.f32 %v6155_v59, %v13193_v49  ;;  %v5695_v54 = vpop.f32.mrb[27].mxu1 }
 0x686   : > { %5780 = vst.msk [vmem:[%s13201_s14 + $0xc0] sm:$0xff] %vm15412_vm0, %v5748_v2  ;;  %v5696_v8 = vadd.f32 %v13193_v49, %v5695_v54 }
 0x687   : > { %v5751_v58 = vadd.f32 %v6380_v20, %v5701_v27 }
 0x688   : > { %v5750_v11 = vadd.f32 %v6381_v53, %v5696_v8  ;;  %v6158_v62 = vpop.f32.mrb[28].mxu1 }
 0x689   : > { %5783 = vst.msk [vmem:[%s13201_s14 + $0xd8] sm:$0xff] %vm15428_vm9, %v5751_v58  ;;  %v5711_v42 = vadd.f32 %v6158_v62, %v13193_v49  ;;  %v5705_v12 = vpop.f32.mrb[29].mxu1 }
 0x68a   : > { %5782 = vst.msk [vmem:[%s13201_s14 + $0xd0] sm:$0xff] %vm15429_vm3, %v5750_v11  ;;  %v5706_v60 = vadd.f32 %v13193_v49, %v5705_v12 }
 0x68b   : > { %v5753_v38 = vadd.f32 %v6382_v36, %v5711_v42 }
 0x68c   : > { %v5752_v7 = vadd.f32 %v6383_v3, %v5706_v60  ;;  %v6161_v17 = vpop.f32.mrb[30].mxu1 }
 0x68d   : > { %5785 = vst.msk [vmem:[%s13201_s14 + $0xe8] sm:$0xff] %vm15430_vm8, %v5753_v38  ;;  %v5721_v6 = vadd.f32 %v6161_v17, %v13193_v49  ;;  %v5715_v55 = vpop.f32.mrb[31].mxu1 }
 0x68e   : > { %5784 = vst.msk [vmem:[%s13201_s14 + $0xe0] sm:$0xff] %vm15431_vm4, %v5752_v7  ;;  %v5716_v15 = vadd.f32 %v13193_v49, %v5715_v55 }
 0x68f   : > { %v5755_v23 = vadd.f32 %v6384_v34, %v5721_v6 }
 0x690   : > { %v5754_v48 = vadd.f32 %v6385_v30, %v5716_v15 }
 0x691   : > { %5787 = vst.msk [vmem:[%s13201_s14 + $0xf8] sm:$0xff] %vm15432_vm15, %v5755_v23 }
 0x692   : > { %5786 = vst.msk [vmem:[%s13201_s14 + $0xf0] sm:$0xff] %vm15433_vm6, %v5754_v48 }
 0x693 PF: > { %s23_s25 = sadd.s32 1, %s6392_s25  }
 0x694   : > { %p20_p4 = scmp.ge.s32.totalorder %s23_s25, 4  }
 0x696   :  { %22 = sbr.rel (!%p20_p4) target bundleno = 1 (0x1), region = 102 }

</bundles_post_ra>
